<compile_context>
chip_gen: v7x
topology: tpu7x:2x2x1
jax: 0.10.0
libtpu: 0.0.40
codegen_flags: <defaults>
</compile_context>

<pallas_src>
import functools

import jax
import jax.numpy as jnp
from jax.experimental import pallas as pl
from jax.experimental.pallas import tpu as pltpu

IN_DIM = 64 * 64 * 3  # 12288
LAYER_DIMS = [
    (IN_DIM, 256),  # 0  encoder   (ReLU)
    (256, 64),      # 1  encoder   (ReLU)
    (64, 32),       # 2  code      (no ReLU)
    (32, 64),       # 3  decoder   (ReLU)
    (64, 256),      # 4  decoder   (ReLU)
    (256, IN_DIM),  # 5  output    (no ReLU)
]


# ----------------------------------------------------------------------------
# Big tiled linear (+bias, +optional ReLU):  y = relu?(x @ W + b)
# ----------------------------------------------------------------------------
def _big_linear_kernel(x_ref, w_ref, b_ref, o_ref, acc_ref, *, apply_relu):
    k = pl.program_id(1)

    @pl.when(k == 0)
    def _():
        acc_ref[...] = jnp.zeros_like(acc_ref)

    # bf16 weight tile is DMA'd at half the bytes; upcast in-register for the
    # f32-accumulated MXU matmul (compute is not the bottleneck at B=2).
    acc_ref[...] += jnp.dot(
        x_ref[...],
        w_ref[...].astype(jnp.float32),
        preferred_element_type=jnp.float32,
    )

    @pl.when(k == pl.num_programs(1) - 1)
    def _():
        r = acc_ref[...] + b_ref[...]
        if apply_relu:
            r = jnp.maximum(r, 0.0)
        o_ref[...] = r.astype(o_ref.dtype)


def big_linear(x, w, b, *, apply_relu, tn, tk):
    """x: (B, K) f32, w: (K, N) bf16/f32, b: (N,) f32 -> (B, N) f32."""
    B, K = x.shape
    Kw, N = w.shape
    assert K == Kw and K % tk == 0 and N % tn == 0
    b2 = b.reshape(1, N)
    grid = (N // tn, K // tk)  # parallel N outer, reduction K innermost

    return pl.pallas_call(
        functools.partial(_big_linear_kernel, apply_relu=apply_relu),
        out_shape=jax.ShapeDtypeStruct((B, N), jnp.float32),
        grid_spec=pltpu.PrefetchScalarGridSpec(
            num_scalar_prefetch=0,
            grid=grid,
            in_specs=[
                pl.BlockSpec((B, tk), lambda j, k: (0, k)),
                pl.BlockSpec((tk, tn), lambda j, k: (k, j)),
                pl.BlockSpec((1, tn), lambda j, k: (0, j)),
            ],
            out_specs=pl.BlockSpec((B, tn), lambda j, k: (0, j)),
            scratch_shapes=[pltpu.VMEM((B, tn), jnp.float32)],
        ),
        compiler_params=pltpu.CompilerParams(
            dimension_semantics=("parallel", "arbitrary"),
        ),
    )(x, w, b2)


# ----------------------------------------------------------------------------
# Fused middle of the network: 256 ->64(ReLU) ->32 ->64(ReLU) ->256(ReLU)
# All four weights (~150 KB) live in VMEM; one grid step, no HBM intermediates.
# ----------------------------------------------------------------------------
def _mid_fused_kernel(x_ref, w1_ref, b1_ref, w2_ref, b2_ref,
                      w3_ref, b3_ref, w4_ref, b4_ref, o_ref):
    h = x_ref[...]
    # 256 -> 64, ReLU
    h = jnp.dot(h, w1_ref[...], preferred_element_type=jnp.float32) + b1_ref[...]
    h = jnp.maximum(h, 0.0)
    # 64 -> 32 (latent code, no ReLU)
    h = jnp.dot(h, w2_ref[...], preferred_element_type=jnp.float32) + b2_ref[...]
    # 32 -> 64, ReLU
    h = jnp.dot(h, w3_ref[...], preferred_element_type=jnp.float32) + b3_ref[...]
    h = jnp.maximum(h, 0.0)
    # 64 -> 256, ReLU
    h = jnp.dot(h, w4_ref[...], preferred_element_type=jnp.float32) + b4_ref[...]
    h = jnp.maximum(h, 0.0)
    o_ref[...] = h.astype(o_ref.dtype)


def mid_fused(x, mid_params):
    """x: (B, 256); mid_params: [(w,b)] for layers 1..4. Returns (B, 256)."""
    B = x.shape[0]
    args = [x]
    in_specs = [pl.BlockSpec(x.shape, lambda i: (0, 0))]
    for w, b in mid_params:
        b2 = b.reshape(1, -1)
        args += [w, b2]
        in_specs += [
            pl.BlockSpec(w.shape, lambda i: (0, 0)),
            pl.BlockSpec(b2.shape, lambda i: (0, 0)),
        ]
    n_out = mid_params[-1][0].shape[1]

    return pl.pallas_call(
        _mid_fused_kernel,
        out_shape=jax.ShapeDtypeStruct((B, n_out), jnp.float32),
        grid_spec=pltpu.PrefetchScalarGridSpec(
            num_scalar_prefetch=0,
            grid=(1,),
            in_specs=in_specs,
            out_specs=pl.BlockSpec((B, n_out), lambda i: (0, 0)),
        ),
        compiler_params=pltpu.CompilerParams(
            dimension_semantics=("arbitrary",),
        ),
    )(*args)


# ----------------------------------------------------------------------------
# Parameters & forward
# ----------------------------------------------------------------------------
def init_params(key):
    """PyTorch-like uniform init. Big weights (layers 0 and 5) in bf16."""
    params = []
    for i, (kin, kout) in enumerate(LAYER_DIMS):
        key, kw, kb = jax.random.split(key, 3)
        bound = 1.0 / jnp.sqrt(float(kin))
        w = jax.random.uniform(kw, (kin, kout), jnp.float32, -bound, bound)
        if i in (0, 5):
            w = w.astype(jnp.bfloat16)  # HBM-bound weights: halve the bytes
        b = jax.random.uniform(kb, (kout,), jnp.float32, -bound, bound)
        params.append((w, b))
    return params


def autoencoder_forward(x, params):
    (w0, b0), l1, l2, l3, l4, (w5, b5) = params
    # layer 0: 12288 -> 256, ReLU.  N split into 2x128 tiles (even megacore
    # split on v7x), K split into 2x6144 (big tiles amortize grid-step cost).
    h = big_linear(x, w0, b0, apply_relu=True, tn=128, tk=6144)
    # layers 1-4 fused in one VMEM-resident kernel.
    h = mid_fused(h, [l1, l2, l3, l4])
    # layer 5: 256 -> 12288, no ReLU.  N split into 2x6144 lane-dense tiles.
    h = big_linear(h, w5, b5, apply_relu=False, tn=6144, tk=256)
    return h


def autoencoder_ref(x, params):
    h = x
    for i, (w, b) in enumerate(params):
        h = jnp.dot(h, w.astype(jnp.float32),
                    precision=jax.lax.Precision.HIGHEST) + b
        if i not in (2, 5):
            h = jnp.maximum(h, 0.0)
    return h


if __name__ == "__main__":
    key = jax.random.PRNGKey(0)
    kx, kp = jax.random.split(key)

    B = 2
    x = jax.random.normal(kx, (B, IN_DIM), jnp.float32)  # flattened 64x64x3
    params = init_params(kp)

    fwd = jax.jit(autoencoder_forward)
    out = fwd(x, params)
    out = jax.block_until_ready(out)

    ref = autoencoder_ref(x, params)
    assert out.shape == (B, IN_DIM), out.shape
    err = float(jnp.max(jnp.abs(out - ref)))
    assert jnp.allclose(out, ref, atol=2e-3, rtol=2e-3), err

    print("KERNEL_OK")
</pallas_src>

<mosaic_0001>
module attributes {stable_mosaic.version = 11 : i64} {
  func.func @_mid_fused_kernel(%arg0: i32, %arg1: memref<2x256xf32, #tpu.memory_space<vmem>>, %arg2: memref<256x64xf32, #tpu.memory_space<vmem>>, %arg3: memref<1x64xf32, #tpu.memory_space<vmem>>, %arg4: memref<64x32xf32, #tpu.memory_space<vmem>>, %arg5: memref<1x32xf32, #tpu.memory_space<vmem>>, %arg6: memref<32x64xf32, #tpu.memory_space<vmem>>, %arg7: memref<1x64xf32, #tpu.memory_space<vmem>>, %arg8: memref<64x256xf32, #tpu.memory_space<vmem>>, %arg9: memref<1x256xf32, #tpu.memory_space<vmem>>, %arg10: memref<2x256xf32, #tpu.memory_space<vmem>>) attributes {dimension_semantics = [#tpu.dimension_semantics<arbitrary>], iteration_bounds = array<i64: 1>, scalar_prefetch = 0 : i64, scratch_operands = 0 : i64, tpu.core_type = #tpu.core_type<tc>, window_params = [{pipeline_mode = #tpu.pipeline_mode<synchronous>, transform_indices = @transform_0, window_bounds = array<i64: 2, 256>}, {pipeline_mode = #tpu.pipeline_mode<synchronous>, transform_indices = @transform_1, window_bounds = array<i64: 256, 64>}, {pipeline_mode = #tpu.pipeline_mode<synchronous>, transform_indices = @transform_2, window_bounds = array<i64: 1, 64>}, {pipeline_mode = #tpu.pipeline_mode<synchronous>, transform_indices = @transform_3, window_bounds = array<i64: 64, 32>}, {pipeline_mode = #tpu.pipeline_mode<synchronous>, transform_indices = @transform_4, window_bounds = array<i64: 1, 32>}, {pipeline_mode = #tpu.pipeline_mode<synchronous>, transform_indices = @transform_5, window_bounds = array<i64: 32, 64>}, {pipeline_mode = #tpu.pipeline_mode<synchronous>, transform_indices = @transform_6, window_bounds = array<i64: 1, 64>}, {pipeline_mode = #tpu.pipeline_mode<synchronous>, transform_indices = @transform_7, window_bounds = array<i64: 64, 256>}, {pipeline_mode = #tpu.pipeline_mode<synchronous>, transform_indices = @transform_8, window_bounds = array<i64: 1, 256>}, {pipeline_mode = #tpu.pipeline_mode<synchronous>, transform_indices = @transform_9, window_bounds = array<i64: 2, 256>}]} {
    %c0 = arith.constant 0 : index
    %c0_0 = arith.constant 0 : index
    %0 = vector.load %arg1[%c0, %c0_0] : memref<2x256xf32, #tpu.memory_space<vmem>>, vector<2x256xf32>
    %c0_1 = arith.constant 0 : index
    %c0_2 = arith.constant 0 : index
    %1 = vector.load %arg2[%c0_1, %c0_2] : memref<256x64xf32, #tpu.memory_space<vmem>>, vector<256x64xf32>
    %cst = arith.constant dense<0.000000e+00> : vector<2x64xf32>
    %2 = tpu.matmul %0, %1, %cst {dimension_numbers = #tpu.dot_dimension_numbers<[1], [0], [0], [1], [0, 0, 1, 1], [], []>} : vector<2x256xf32>, vector<256x64xf32>, vector<2x64xf32> -> vector<2x64xf32>
    %c0_3 = arith.constant 0 : index
    %c0_4 = arith.constant 0 : index
    %3 = vector.load %arg3[%c0_3, %c0_4] : memref<1x64xf32, #tpu.memory_space<vmem>>, vector<1x64xf32>
    %4 = vector.broadcast %3 : vector<1x64xf32> to vector<2x64xf32>
    %5 = arith.addf %2, %4 : vector<2x64xf32>
    %cst_5 = arith.constant 0.000000e+00 : f32
    %6 = vector.broadcast %cst_5 : f32 to vector<2x64xf32>
    %7 = arith.maximumf %5, %6 : vector<2x64xf32>
    %c0_6 = arith.constant 0 : index
    %c0_7 = arith.constant 0 : index
    %8 = vector.load %arg4[%c0_6, %c0_7] : memref<64x32xf32, #tpu.memory_space<vmem>>, vector<64x32xf32>
    %cst_8 = arith.constant dense<0.000000e+00> : vector<2x32xf32>
    %9 = tpu.matmul %7, %8, %cst_8 {dimension_numbers = #tpu.dot_dimension_numbers<[1], [0], [0], [1], [0, 0, 1, 1], [], []>} : vector<2x64xf32>, vector<64x32xf32>, vector<2x32xf32> -> vector<2x32xf32>
    %c0_9 = arith.constant 0 : index
    %c0_10 = arith.constant 0 : index
    %10 = vector.load %arg5[%c0_9, %c0_10] : memref<1x32xf32, #tpu.memory_space<vmem>>, vector<1x32xf32>
    %11 = vector.broadcast %10 : vector<1x32xf32> to vector<2x32xf32>
    %12 = arith.addf %9, %11 : vector<2x32xf32>
    %c0_11 = arith.constant 0 : index
    %c0_12 = arith.constant 0 : index
    %13 = vector.load %arg6[%c0_11, %c0_12] : memref<32x64xf32, #tpu.memory_space<vmem>>, vector<32x64xf32>
    %cst_13 = arith.constant dense<0.000000e+00> : vector<2x64xf32>
    %14 = tpu.matmul %12, %13, %cst_13 {dimension_numbers = #tpu.dot_dimension_numbers<[1], [0], [0], [1], [0, 0, 1, 1], [], []>} : vector<2x32xf32>, vector<32x64xf32>, vector<2x64xf32> -> vector<2x64xf32>
    %c0_14 = arith.constant 0 : index
    %c0_15 = arith.constant 0 : index
    %15 = vector.load %arg7[%c0_14, %c0_15] : memref<1x64xf32, #tpu.memory_space<vmem>>, vector<1x64xf32>
    %16 = vector.broadcast %15 : vector<1x64xf32> to vector<2x64xf32>
    %17 = arith.addf %14, %16 : vector<2x64xf32>
    %cst_16 = arith.constant 0.000000e+00 : f32
    %18 = vector.broadcast %cst_16 : f32 to vector<2x64xf32>
    %19 = arith.maximumf %17, %18 : vector<2x64xf32>
    %c0_17 = arith.constant 0 : index
    %c0_18 = arith.constant 0 : index
    %20 = vector.load %arg8[%c0_17, %c0_18] : memref<64x256xf32, #tpu.memory_space<vmem>>, vector<64x256xf32>
    %cst_19 = arith.constant dense<0.000000e+00> : vector<2x256xf32>
    %21 = tpu.matmul %19, %20, %cst_19 {dimension_numbers = #tpu.dot_dimension_numbers<[1], [0], [0], [1], [0, 0, 1, 1], [], []>} : vector<2x64xf32>, vector<64x256xf32>, vector<2x256xf32> -> vector<2x256xf32>
    %c0_20 = arith.constant 0 : index
    %c0_21 = arith.constant 0 : index
    %22 = vector.load %arg9[%c0_20, %c0_21] : memref<1x256xf32, #tpu.memory_space<vmem>>, vector<1x256xf32>
    %23 = vector.broadcast %22 : vector<1x256xf32> to vector<2x256xf32>
    %24 = arith.addf %21, %23 : vector<2x256xf32>
    %cst_22 = arith.constant 0.000000e+00 : f32
    %25 = vector.broadcast %cst_22 : f32 to vector<2x256xf32>
    %26 = arith.maximumf %24, %25 : vector<2x256xf32>
    %c0_23 = arith.constant 0 : index
    %c0_24 = arith.constant 0 : index
    %27 = vector.load %arg10[%c0_23, %c0_24] : memref<2x256xf32, #tpu.memory_space<vmem>>, vector<2x256xf32>
    tpu.vector_store %arg10[%c0_23, %c0_24], %26 {strides = array<i32>} : memref<2x256xf32, #tpu.memory_space<vmem>>, vector<2x256xf32>,
    return
  }
  func.func @transform_0(%arg0: i32) -> (i32, i32) {
    %c0_i32 = arith.constant 0 : i32
    %c0_i32_0 = arith.constant 0 : i32
    %c0_i32_1 = arith.constant 0 : i32
    return %c0_i32, %c0_i32_0 : i32, i32
  }
  func.func @transform_1(%arg0: i32) -> (i32, i32) {
    %c0_i32 = arith.constant 0 : i32
    %c0_i32_0 = arith.constant 0 : i32
    %c0_i32_1 = arith.constant 0 : i32
    return %c0_i32, %c0_i32_0 : i32, i32
  }
  func.func @transform_2(%arg0: i32) -> (i32, i32) {
    %c0_i32 = arith.constant 0 : i32
    %c0_i32_0 = arith.constant 0 : i32
    %c0_i32_1 = arith.constant 0 : i32
    return %c0_i32, %c0_i32_0 : i32, i32
  }
  func.func @transform_3(%arg0: i32) -> (i32, i32) {
    %c0_i32 = arith.constant 0 : i32
    %c0_i32_0 = arith.constant 0 : i32
    %c0_i32_1 = arith.constant 0 : i32
    return %c0_i32, %c0_i32_0 : i32, i32
  }
  func.func @transform_4(%arg0: i32) -> (i32, i32) {
    %c0_i32 = arith.constant 0 : i32
    %c0_i32_0 = arith.constant 0 : i32
    %c0_i32_1 = arith.constant 0 : i32
    return %c0_i32, %c0_i32_0 : i32, i32
  }
  func.func @transform_5(%arg0: i32) -> (i32, i32) {
    %c0_i32 = arith.constant 0 : i32
    %c0_i32_0 = arith.constant 0 : i32
    %c0_i32_1 = arith.constant 0 : i32
    return %c0_i32, %c0_i32_0 : i32, i32
  }
  func.func @transform_6(%arg0: i32) -> (i32, i32) {
    %c0_i32 = arith.constant 0 : i32
    %c0_i32_0 = arith.constant 0 : i32
    %c0_i32_1 = arith.constant 0 : i32
    return %c0_i32, %c0_i32_0 : i32, i32
  }
  func.func @transform_7(%arg0: i32) -> (i32, i32) {
    %c0_i32 = arith.constant 0 : i32
    %c0_i32_0 = arith.constant 0 : i32
    %c0_i32_1 = arith.constant 0 : i32
    return %c0_i32, %c0_i32_0 : i32, i32
  }
  func.func @transform_8(%arg0: i32) -> (i32, i32) {
    %c0_i32 = arith.constant 0 : i32
    %c0_i32_0 = arith.constant 0 : i32
    %c0_i32_1 = arith.constant 0 : i32
    return %c0_i32, %c0_i32_0 : i32, i32
  }
  func.func @transform_9(%arg0: i32) -> (i32, i32) {
    %c0_i32 = arith.constant 0 : i32
    %c0_i32_0 = arith.constant 0 : i32
    %c0_i32_1 = arith.constant 0 : i32
    return %c0_i32, %c0_i32_0 : i32, i32
  }
}

module attributes {stable_mosaic.version = 11 : i64} {
  func.func @_big_linear_kernel(%arg0: i32, %arg1: i32, %arg2: memref<2x6144xf32, #tpu.memory_space<vmem>>, %arg3: memref<6144x128xbf16, #tpu.memory_space<vmem>>, %arg4: memref<1x128xf32, #tpu.memory_space<vmem>>, %arg5: memref<2x128xf32, #tpu.memory_space<vmem>>, %arg6: memref<2x128xf32, #tpu.memory_space<vmem>>) attributes {dimension_semantics = [#tpu.dimension_semantics<parallel>, #tpu.dimension_semantics<arbitrary>], iteration_bounds = array<i64: 2, 2>, scalar_prefetch = 0 : i64, scratch_operands = 1 : i64, tpu.core_type = #tpu.core_type<tc>, window_params = [{transform_indices = @transform_0, window_bounds = array<i64: 2, 6144>}, {transform_indices = @transform_1, window_bounds = array<i64: 6144, 128>}, {transform_indices = @transform_2, window_bounds = array<i64: 1, 128>}, {transform_indices = @transform_3, window_bounds = array<i64: 2, 128>}]} {
    %c0_i32 = arith.constant 0 : i32
    %0 = arith.cmpi eq, %arg1, %c0_i32 : i32
    %1 = arith.extui %0 : i1 to i32
    %c0_i32_0 = arith.constant 0 : i32
    %2 = arith.cmpi ne, %1, %c0_i32_0 : i32
    scf.if %2 {
      %cst_9 = arith.constant 0.000000e+00 : f32
      %13 = vector.broadcast %cst_9 : f32 to vector<2x128xf32>
      %c0_10 = arith.constant 0 : index
      %c0_11 = arith.constant 0 : index
      %14 = vector.load %arg6[%c0_10, %c0_11] : memref<2x128xf32, #tpu.memory_space<vmem>>, vector<2x128xf32>
      tpu.vector_store %arg6[%c0_10, %c0_11], %13 {strides = array<i32>} : memref<2x128xf32, #tpu.memory_space<vmem>>, vector<2x128xf32>,
    } else {
    }
    %c0 = arith.constant 0 : index
    %c0_1 = arith.constant 0 : index
    %3 = vector.load %arg6[%c0, %c0_1] : memref<2x128xf32, #tpu.memory_space<vmem>>, vector<2x128xf32>
    %c0_2 = arith.constant 0 : index
    %c0_3 = arith.constant 0 : index
    %4 = vector.load %arg2[%c0_2, %c0_3] : memref<2x6144xf32, #tpu.memory_space<vmem>>, vector<2x6144xf32>
    %c0_4 = arith.constant 0 : index
    %c0_5 = arith.constant 0 : index
    %5 = vector.load %arg3[%c0_4, %c0_5] : memref<6144x128xbf16, #tpu.memory_space<vmem>>, vector<6144x128xbf16>
    %6 = arith.extf %5 : vector<6144x128xbf16> to vector<6144x128xf32>
    %cst = arith.constant dense<0.000000e+00> : vector<2x128xf32>
    %7 = tpu.matmul %4, %6, %cst {dimension_numbers = #tpu.dot_dimension_numbers<[1], [0], [0], [1], [0, 0, 1, 1], [], []>} : vector<2x6144xf32>, vector<6144x128xf32>, vector<2x128xf32> -> vector<2x128xf32>
    %8 = arith.addf %3, %7 : vector<2x128xf32>
    %c0_6 = arith.constant 0 : index
    %c0_7 = arith.constant 0 : index
    %9 = vector.load %arg6[%c0_6, %c0_7] : memref<2x128xf32, #tpu.memory_space<vmem>>, vector<2x128xf32>
    tpu.vector_store %arg6[%c0_6, %c0_7], %8 {strides = array<i32>} : memref<2x128xf32, #tpu.memory_space<vmem>>, vector<2x128xf32>,
    %c1_i32 = arith.constant 1 : i32
    %10 = arith.cmpi eq, %arg1, %c1_i32 : i32
    %11 = arith.extui %10 : i1 to i32
    %c0_i32_8 = arith.constant 0 : i32
    %12 = arith.cmpi ne, %11, %c0_i32_8 : i32
    scf.if %12 {
      %c0_9 = arith.constant 0 : index
      %c0_10 = arith.constant 0 : index
      %13 = vector.load %arg6[%c0_9, %c0_10] : memref<2x128xf32, #tpu.memory_space<vmem>>, vector<2x128xf32>
      %c0_11 = arith.constant 0 : index
      %c0_12 = arith.constant 0 : index
      %14 = vector.load %arg4[%c0_11, %c0_12] : memref<1x128xf32, #tpu.memory_space<vmem>>, vector<1x128xf32>
      %15 = vector.broadcast %14 : vector<1x128xf32> to vector<2x128xf32>
      %16 = arith.addf %13, %15 : vector<2x128xf32>
      %cst_13 = arith.constant 0.000000e+00 : f32
      %17 = vector.broadcast %cst_13 : f32 to vector<2x128xf32>
      %18 = arith.maximumf %16, %17 : vector<2x128xf32>
      %c0_14 = arith.constant 0 : index
      %c0_15 = arith.constant 0 : index
      %19 = vector.load %arg5[%c0_14, %c0_15] : memref<2x128xf32, #tpu.memory_space<vmem>>, vector<2x128xf32>
      tpu.vector_store %arg5[%c0_14, %c0_15], %18 {strides = array<i32>} : memref<2x128xf32, #tpu.memory_space<vmem>>, vector<2x128xf32>,
    } else {
    }
    return
  }
  func.func @transform_0(%arg0: i32, %arg1: i32) -> (i32, i32) {
    %c0_i32 = arith.constant 0 : i32
    %c0_i32_0 = arith.constant 0 : i32
    return %c0_i32, %arg1 : i32, i32
  }
  func.func @transform_1(%arg0: i32, %arg1: i32) -> (i32, i32) {
    %c0_i32 = arith.constant 0 : i32
    return %arg1, %arg0 : i32, i32
  }
  func.func @transform_2(%arg0: i32, %arg1: i32) -> (i32, i32) {
    %c0_i32 = arith.constant 0 : i32
    %c0_i32_0 = arith.constant 0 : i32
    return %c0_i32, %arg0 : i32, i32
  }
  func.func @transform_3(%arg0: i32, %arg1: i32) -> (i32, i32) {
    %c0_i32 = arith.constant 0 : i32
    %c0_i32_0 = arith.constant 0 : i32
    return %c0_i32, %arg0 : i32, i32
  }
}

module attributes {stable_mosaic.version = 11 : i64} {
  func.func @_big_linear_kernel(%arg0: i32, %arg1: i32, %arg2: memref<2x256xf32, #tpu.memory_space<vmem>>, %arg3: memref<256x6144xbf16, #tpu.memory_space<vmem>>, %arg4: memref<1x6144xf32, #tpu.memory_space<vmem>>, %arg5: memref<2x6144xf32, #tpu.memory_space<vmem>>, %arg6: memref<2x6144xf32, #tpu.memory_space<vmem>>) attributes {dimension_semantics = [#tpu.dimension_semantics<parallel>, #tpu.dimension_semantics<arbitrary>], iteration_bounds = array<i64: 2, 1>, scalar_prefetch = 0 : i64, scratch_operands = 1 : i64, tpu.core_type = #tpu.core_type<tc>, window_params = [{transform_indices = @transform_0, window_bounds = array<i64: 2, 256>}, {transform_indices = @transform_1, window_bounds = array<i64: 256, 6144>}, {transform_indices = @transform_2, window_bounds = array<i64: 1, 6144>}, {transform_indices = @transform_3, window_bounds = array<i64: 2, 6144>}]} {
    %c0_i32 = arith.constant 0 : i32
    %0 = arith.cmpi eq, %arg1, %c0_i32 : i32
    %1 = arith.extui %0 : i1 to i32
    %c0_i32_0 = arith.constant 0 : i32
    %2 = arith.cmpi ne, %1, %c0_i32_0 : i32
    scf.if %2 {
      %cst_10 = arith.constant 0.000000e+00 : f32
      %13 = vector.broadcast %cst_10 : f32 to vector<2x6144xf32>
      %c0_11 = arith.constant 0 : index
      %c0_12 = arith.constant 0 : index
      %14 = vector.load %arg6[%c0_11, %c0_12] : memref<2x6144xf32, #tpu.memory_space<vmem>>, vector<2x6144xf32>
      tpu.vector_store %arg6[%c0_11, %c0_12], %13 {strides = array<i32>} : memref<2x6144xf32, #tpu.memory_space<vmem>>, vector<2x6144xf32>,
    } else {
    }
    %c0 = arith.constant 0 : index
    %c0_1 = arith.constant 0 : index
    %3 = vector.load %arg6[%c0, %c0_1] : memref<2x6144xf32, #tpu.memory_space<vmem>>, vector<2x6144xf32>
    %c0_2 = arith.constant 0 : index
    %c0_3 = arith.constant 0 : index
    %4 = vector.load %arg2[%c0_2, %c0_3] : memref<2x256xf32, #tpu.memory_space<vmem>>, vector<2x256xf32>
    %c0_4 = arith.constant 0 : index
    %c0_5 = arith.constant 0 : index
    %5 = vector.load %arg3[%c0_4, %c0_5] : memref<256x6144xbf16, #tpu.memory_space<vmem>>, vector<256x6144xbf16>
    %6 = arith.extf %5 : vector<256x6144xbf16> to vector<256x6144xf32>
    %cst = arith.constant dense<0.000000e+00> : vector<2x6144xf32>
    %7 = tpu.matmul %4, %6, %cst {dimension_numbers = #tpu.dot_dimension_numbers<[1], [0], [0], [1], [0, 0, 1, 1], [], []>} : vector<2x256xf32>, vector<256x6144xf32>, vector<2x6144xf32> -> vector<2x6144xf32>
    %8 = arith.addf %3, %7 : vector<2x6144xf32>
    %c0_6 = arith.constant 0 : index
    %c0_7 = arith.constant 0 : index
    %9 = vector.load %arg6[%c0_6, %c0_7] : memref<2x6144xf32, #tpu.memory_space<vmem>>, vector<2x6144xf32>
    tpu.vector_store %arg6[%c0_6, %c0_7], %8 {strides = array<i32>} : memref<2x6144xf32, #tpu.memory_space<vmem>>, vector<2x6144xf32>,
    %c0_i32_8 = arith.constant 0 : i32
    %10 = arith.cmpi eq, %arg1, %c0_i32_8 : i32
    %11 = arith.extui %10 : i1 to i32
    %c0_i32_9 = arith.constant 0 : i32
    %12 = arith.cmpi ne, %11, %c0_i32_9 : i32
    scf.if %12 {
      %c0_10 = arith.constant 0 : index
      %c0_11 = arith.constant 0 : index
      %13 = vector.load %arg6[%c0_10, %c0_11] : memref<2x6144xf32, #tpu.memory_space<vmem>>, vector<2x6144xf32>
      %c0_12 = arith.constant 0 : index
      %c0_13 = arith.constant 0 : index
      %14 = vector.load %arg4[%c0_12, %c0_13] : memref<1x6144xf32, #tpu.memory_space<vmem>>, vector<1x6144xf32>
      %15 = vector.broadcast %14 : vector<1x6144xf32> to vector<2x6144xf32>
      %16 = arith.addf %13, %15 : vector<2x6144xf32>
      %c0_14 = arith.constant 0 : index
      %c0_15 = arith.constant 0 : index
      %17 = vector.load %arg5[%c0_14, %c0_15] : memref<2x6144xf32, #tpu.memory_space<vmem>>, vector<2x6144xf32>
      tpu.vector_store %arg5[%c0_14, %c0_15], %16 {strides = array<i32>} : memref<2x6144xf32, #tpu.memory_space<vmem>>, vector<2x6144xf32>,
    } else {
    }
    return
  }
  func.func @transform_0(%arg0: i32, %arg1: i32) -> (i32, i32) {
    %c0_i32 = arith.constant 0 : i32
    %c0_i32_0 = arith.constant 0 : i32
    return %c0_i32, %arg1 : i32, i32
  }
  func.func @transform_1(%arg0: i32, %arg1: i32) -> (i32, i32) {
    %c0_i32 = arith.constant 0 : i32
    return %arg1, %arg0 : i32, i32
  }
  func.func @transform_2(%arg0: i32, %arg1: i32) -> (i32, i32) {
    %c0_i32 = arith.constant 0 : i32
    %c0_i32_0 = arith.constant 0 : i32
    return %c0_i32, %arg0 : i32, i32
  }
  func.func @transform_3(%arg0: i32, %arg1: i32) -> (i32, i32) {
    %c0_i32 = arith.constant 0 : i32
    %c0_i32_0 = arith.constant 0 : i32
    return %c0_i32, %arg0 : i32, i32
  }
}

</mosaic_0001>

<bundles_post_ra>
// kernel: autoencoder_forward.4
= control target key start
LH: loop header
LB: loop body
LE: loop exit
PB: predicated region body
PF: predicated region fallthrough
CT: control target
= control target key end

     0   :  { %v605_v3 = vmov 0.0|0.0   ;;  %vm606_vm0 = vmmov 0   ;;  %v607_v63 = vmov 0.0   ;;  %vm169_vm1 = vcmask 523264   ;;  %s866_s1 = inlined_call_operand.vmem [shape: f32[256,64], index: 1, kind: input, shape index: {}]   ;;  %s867_s0 = inlined_call_operand.vmem [shape: f32[2,256], index: 0, kind: input, shape index: {}]   ;;  %s868_s3 = inlined_call_operand.vmem [shape: f32[64,32], index: 3, kind: input, shape index: {}]   ;;  %s869_s2 = inlined_call_operand.vmem [shape: f32[1,64], index: 2, kind: input, shape index: {}]   ;;  %s870_s5 = inlined_call_operand.vmem [shape: f32[32,64], index: 5, kind: input, shape index: {}]   ;;  %s871_s7 = inlined_call_operand.vmem [shape: f32[64,256], index: 7, kind: input, shape index: {}]   ;;  %s872_s4 = inlined_call_operand.vmem [shape: f32[1,32], index: 4, kind: input, shape index: {}]   ;;  %s873_s6 = inlined_call_operand.vmem [shape: f32[1,64], index: 6, kind: input, shape index: {}]   ;;  %s874_s8 = inlined_call_operand.vmem [shape: f32[1,256], index: 8, kind: input, shape index: {}]   ;;  %s875_s9 = inlined_call_operand.vmem [shape: f32[2,256], index: 9, kind: output, shape index: {}]  }
   0x1   :  { %v49_v0 = vld [vmem:[%s866_s1 + $0x80] sm:$0xff]  ;;  %v50_v1 = vld [vmem:[%s866_s1 + $0x88] sm:$0xff]  ;;  %568 = vmatprep.subr.bf16.mxu1 %v605_v3  ;;  %v51_v6 = vld [vmem:[%s866_s1 + $0x90] sm:$0xff]  ;;  %522 = vmatprep.mubr.msk.f32.mxu1 %vm606_vm0, %v607_v63  ;;  %vm254_vm2 = vcmask 261120  }
   0x2   :  { %v33_v2 = vld [vmem:[%s866_s1] sm:$0xff]  ;;  %v536_v4 = vpack.c.bf16 %v50_v1, %v49_v0  ;;  %v34_v5 = vld [vmem:[%s866_s1 + $0x8] sm:$0xff]  ;;  %v52_v7 = vld [vmem:[%s866_s1 + $0x98] sm:$0xff] }
   0x3   :  { %v538_v8 = vpack.c.bf16 %v34_v5, %v33_v2  ;;  %v540_v9 = vpack.c.bf16 %v52_v7, %v51_v6  ;;  %v35_v10 = vld [vmem:[%s866_s1 + $0x10] sm:$0xff]  ;;  %v36_v11 = vld [vmem:[%s866_s1 + $0x18] sm:$0xff]  ;;  %v53_v12 = vld [vmem:[%s866_s1 + $0xa0] sm:$0xff] }
   0x4   :  { %537 = vmatprep.subr.bf16.mxu0 %v536_v4  ;;  %v54_v13 = vld [vmem:[%s866_s1 + $0xa8] sm:$0xff]  ;;  %v542_v14 = vpack.c.bf16 %v36_v11, %v35_v10  ;;  %v37_v16 = vld [vmem:[%s866_s1 + $0x20] sm:$0xff]  ;;  %v55_v18 = vld [vmem:[%s866_s1 + $0xb0] sm:$0xff] }
   0x5   :  { %539 = vmatpush3.bf16.msra.mxu0 %v538_v8  ;;  %v544_v15 = vpack.c.bf16 %v54_v13, %v53_v12  ;;  %v38_v17 = vld [vmem:[%s866_s1 + $0x28] sm:$0xff]  ;;  %v56_v19 = vld [vmem:[%s866_s1 + $0xb8] sm:$0xff]  ;;  %v39_v22 = vld [vmem:[%s866_s1 + $0x30] sm:$0xff] }
   0x6   :  { %541 = vmatprep.subr.bf16.mxu0 %v540_v9  ;;  %v546_v20 = vpack.c.bf16 %v38_v17, %v37_v16  ;;  %v548_v21 = vpack.c.bf16 %v56_v19, %v55_v18  ;;  %v40_v23 = vld [vmem:[%s866_s1 + $0x38] sm:$0xff]  ;;  %v57_v24 = vld [vmem:[%s866_s1 + $0xc0] sm:$0xff]  ;;  %v58_v25 = vld [vmem:[%s866_s1 + $0xc8] sm:$0xff] }
   0x7   :  { %v450_v26 = vld.sshfl [vmem:[%s867_s0] sm:$0x33 pattern:$0x76325410]  ;;  %v155_v29 = vld [vmem:[%s868_s3 + $0x8] sm:$0xff]  ;;  %v156_v30 = vld [vmem:[%s868_s3 + $0x10] sm:$0xff]  ;;  %v550_v31 = vpack.c.bf16 %v40_v23, %v39_v22  ;;  %v552_v34 = vpack.c.bf16 %v58_v25, %v57_v24 }
   0x8   :  { %v80_v27 = vcombine.high %v450_v26, %v450_v26  ;;  %v154_v28 = vld [vmem:[%s868_s3] sm:$0xff]  ;;  %v157_v33 = vld [vmem:[%s868_s3 + $0x18] sm:$0xff]  ;;  %v42_v36 = vld [vmem:[%s866_s1 + $0x48] sm:$0xff] }
   0x9   :  { %543 = vmatpush3.bf16.msra.mxu0 %v542_v14  ;;  %v569_v32 = vpack.c.bf16 %v155_v29, %v154_v28  ;;  %v41_v35 = vld [vmem:[%s866_s1 + $0x40] sm:$0xff]  ;;  %v59_v37 = vld [vmem:[%s866_s1 + $0xd0] sm:$0xff]  ;;  %v60_v38 = vld [vmem:[%s866_s1 + $0xd8] sm:$0xff]  ;;  %v572_v39 = vpack.c.bf16 %v157_v33, %v156_v30 }
   0xa   :  { %545 = vmatprep.subr.bf16.mxu0 %v544_v15  ;;  %147 = vmatprep.mubr.f32.mxu0 %v80_v27  ;;  %v554_v40 = vpack.c.bf16 %v42_v36, %v41_v35  ;;  %v556_v41 = vpack.c.bf16 %v60_v38, %v59_v37  ;;  %v43_v42 = vld [vmem:[%s866_s1 + $0x50] sm:$0xff]  ;;  %v44_v43 = vld [vmem:[%s866_s1 + $0x58] sm:$0xff]  ;;  %v61_v44 = vld [vmem:[%s866_s1 + $0xe0] sm:$0xff] }
   0xb   :  { %570 = vmatpush3.bf16.msra.mxu1 %v569_v32  ;;  %v62_v45 = vld [vmem:[%s866_s1 + $0xe8] sm:$0xff]  ;;  %v558_v46 = vpack.c.bf16 %v44_v43, %v43_v42  ;;  %v45_v48 = vld [vmem:[%s866_s1 + $0x60] sm:$0xff]  ;;  %v63_v50 = vld [vmem:[%s866_s1 + $0xf0] sm:$0xff] }
   0xc   :  { %571 = vmatprep.subr.bf16.mxu1 %v605_v3  ;;  %v560_v47 = vpack.c.bf16 %v62_v45, %v61_v44  ;;  %v46_v49 = vld [vmem:[%s866_s1 + $0x68] sm:$0xff]  ;;  %v64_v51 = vld [vmem:[%s866_s1 + $0xf8] sm:$0xff]  ;;  %v47_v54 = vld [vmem:[%s866_s1 + $0x70] sm:$0xff]  ;;  %v347_v45 = vlaneseq }
   0xd   :  { %547 = vmatpush3.bf16.msra.mxu0 %v546_v20  ;;  %v562_v52 = vpack.c.bf16 %v46_v49, %v45_v48  ;;  %v564_v53 = vpack.c.bf16 %v64_v51, %v63_v50  ;;  %v48_v55 = vld [vmem:[%s866_s1 + $0x78] sm:$0xff]  ;;  %v158_v57 = vld [vmem:[%s868_s3 + $0x20] sm:$0xff]  ;;  %v159_v58 = vld [vmem:[%s868_s3 + $0x28] sm:$0xff] }
   0xe   :  { %549 = vmatprep.subr.bf16.mxu0 %v548_v21  ;;  %v566_v56 = vpack.c.bf16 %v48_v55, %v47_v54  ;;  %v575_v59 = vpack.c.bf16 %v159_v58, %v158_v57  ;;  %v160_v60 = vld [vmem:[%s868_s3 + $0x30] sm:$0xff]  ;;  %v161_v61 = vld [vmem:[%s868_s3 + $0x38] sm:$0xff]  ;;  %v449_v1 = vld [vmem:[%s869_s2] ss:$0 sm:$0xff] }
   0xf   :  { %573 = vmatpush3.bf16.msra.mxu1 %v572_v39  ;;  %v578_v62 = vpack.c.bf16 %v161_v61, %v160_v60  ;;  %v243_v5 = vld [vmem:[%s870_s5] sm:$0xff]  ;;  %v244_v6 = vld [vmem:[%s870_s5 + $0x8] sm:$0xff]  ;;  %v245_v10 = vld [vmem:[%s870_s5 + $0x10] sm:$0xff] }
  0x10   :  { %574 = vmatprep.subr.bf16.mxu1 %v605_v3  ;;  %v581_v8 = vpack.c.bf16 %v244_v6, %v243_v5  ;;  %v246_v11 = vld [vmem:[%s870_s5 + $0x18] sm:$0xff]  ;;  %v330_v13 = vld [vmem:[%s871_s7 + $0x8] sm:$0xff]  ;;  %v331_v16 = vld [vmem:[%s871_s7 + $0x10] sm:$0xff] }
  0x11   :  { %551 = vmatpush3.bf16.msra.mxu0 %v550_v31  ;;  %v584_v12 = vpack.c.bf16 %v246_v11, %v245_v10  ;;  %v332_v14 = vld [vmem:[%s871_s7 + $0x18] sm:$0xff]  ;;  %v451_v17 = vld [vmem:[%s872_s4] ss:$0 sm:$0xff]  ;;  %v334_v18 = vld [vmem:[%s871_s7 + $0x28] sm:$0xff] }
  0x12   :  { %553 = vmatprep.subr.bf16.mxu0 %v552_v34  ;;  %v586_v15 = vpack.c.bf16 %v332_v14, %v330_v13  ;;  %v336_v19 = vld [vmem:[%s871_s7 + $0x38] sm:$0xff]  ;;  %v333_v25 = vld [vmem:[%s871_s7 + $0x20] sm:$0xff]  ;;  %v338_v27 = vld [vmem:[%s871_s7 + $0x48] sm:$0xff] }
  0x13   :  { %576 = vmatpush3.bf16.msra.mxu1 %v575_v59  ;;  %v590_v24 = vpack.c.bf16 %v336_v19, %v334_v18  ;;  %v340_v28 = vld [vmem:[%s871_s7 + $0x58] sm:$0xff]  ;;  %v337_v31 = vld [vmem:[%s871_s7 + $0x40] sm:$0xff]  ;;  %v339_v32 = vld [vmem:[%s871_s7 + $0x50] sm:$0xff] }
  0x14   :  { %577 = vmatprep.subr.bf16.mxu1 %v605_v3  ;;  %v594_v30 = vpack.c.bf16 %v340_v28, %v338_v27  ;;  %v596_v33 = vpack.c.bf16 %v339_v32, %v337_v31  ;;  %v342_v34 = vld [vmem:[%s871_s7 + $0x68] sm:$0xff]  ;;  %v344_v35 = vld [vmem:[%s871_s7 + $0x78] sm:$0xff]  ;;  %v341_v37 = vld [vmem:[%s871_s7 + $0x60] sm:$0xff] }
  0x15   :  { %555 = vmatpush3.bf16.msra.mxu0 %v554_v40  ;;  %v598_v36 = vpack.c.bf16 %v344_v35, %v342_v34  ;;  %v343_v38 = vld [vmem:[%s871_s7 + $0x70] sm:$0xff]  ;;  %v453_v40 = vld [vmem:[%s873_s6] ss:$0 sm:$0xff] }
  0x16   :  { %557 = vmatprep.subr.bf16.mxu0 %v556_v41  ;;  %v600_v39 = vpack.c.bf16 %v343_v38, %v341_v37  ;;  %v345_v48 = vld [vmem:[%s874_s8] sm:$0x3] }
  0x17   :  { %579 = vmatpush3.bf16.msra.mxu1 %v578_v62 }
  0x18   :  { %580 = vmatprep.subr.bf16.mxu1 %v605_v3 }
  0x19   :  { %559 = vmatpush3.bf16.msra.mxu0 %v558_v46  ;;  %v348_v46 = vshrl.u32 %v347_v45, 7 }
  0x1a   :  { %561 = vmatprep.subr.bf16.mxu0 %v560_v47 }
  0x1b   :  { %v349_v47 = vsub.s32 0, %v348_v46  ;;  %v353_v49 = vsub.s32 1, %v348_v46 }
  0x1d   :  { %563 = vmatpush3.bf16.msra.mxu0 %v562_v52  ;;  %v350_v50 = vrot.slane %v345_v48, %v349_v47  ;;  %v354_v51 = vrot.slane %v345_v48, %v353_v49 }
  0x1e   :  { %565 = vmatprep.subr.bf16.mxu0 %v564_v53 }
  0x21   :  { %567 = vmatpush3.bf16.msra.mxu0 %v566_v56 }
  0x24   :  { %148 = vmatmul.mubr.f32.vlgmr.msra.gmra.mrb[0].mxu0 %v450_v26  ;;  %v335_v26 = vld [vmem:[%s871_s7 + $0x30] sm:$0xff] }
  0x25   :  { %v592_v29 = vpack.c.bf16 %v335_v26, %v333_v25 }
  0xf7   :  { %v489_v0 = vpop.f32.mrb[0].mxu0 }
  0xf8   :  { %v490_v2 = vpop.f32.mrb[1].mxu0 }
  0xf9   :  { %v491_v4 = vadd.f32 %v490_v2, %v489_v0 }
  0xfb   :  { %v150_v7 = vadd.f32 %v491_v4, %v449_v1 }
  0xfd   :  { %v153_v9 = vmax.f32 %v150_v7, 0.0 }
  0xff   :  { %523 = vmatmul.mubr.msk.f32.vlgmr.msra.gmra.mrb[0].mxu1 %vm169_vm1, %v153_v9 }
 0x100   :  { %582 = vmatpush3.bf16.msra.mxu1 %v581_v8  ;;  %533 = vmatprep.mubr.msk.f32.mxu1 %vm606_vm0, %v607_v63 }
 0x101   :  { %583 = vmatprep.subr.bf16.mxu1 %v605_v3  ;;  %v329_v3 = vld [vmem:[%s871_s7] sm:$0xff] }
 0x102   :  { %v588_v21 = vpack.c.bf16 %v331_v16, %v329_v3 }
 0x104   :  { %585 = vmatpush3.bf16.msra.mxu1 %v584_v12 }
 0x105   :  { %587 = vmatprep.subr.bf16.mxu1 %v586_v15 }
 0x1d2   :  { %v239_v20 = vpop.f32.mrb[0].mxu1 }
 0x1d3   :  { %v240_v22 = vadd.f32 %v451_v17, %v239_v20  ;;  %v524_v23 = vpop.f32.mrb[1].mxu1 }
 0x1d5   :  { %534 = vmatmul.mubr.msk.f32.vlgmr.msra.gmra.mrb[2].mxu1 %vm254_vm2, %v240_v22 }
 0x1d6   :  { %589 = vmatpush1.bf16.msra.mxu1 %v588_v21  ;;  %424 = vmatprep.mubr.f32.mxu1 %v607_v63 }
 0x1d7   :  { %591 = vmatprep.subr.bf16.mxu1 %v590_v24 }
 0x1da   :  { %593 = vmatpush1.bf16.msra.mxu1 %v592_v29 }
 0x1db   :  { %595 = vmatprep.subr.bf16.mxu1 %v594_v30 }
 0x1de   :  { %597 = vmatpush1.bf16.msra.mxu1 %v596_v33 }
 0x1df   :  { %599 = vmatprep.subr.bf16.mxu1 %v598_v36 }
 0x1e2   :  { %601 = vmatpush1.bf16.msra.mxu1 %v600_v39 }
 0x2a8   :  { %v324_v41 = vpop.f32.mrb[2].mxu1 }
 0x2a9   :  { %v325_v42 = vadd.f32 %v453_v40, %v324_v41  ;;  %v535_v43 = vpop.f32.mrb[3].mxu1 }
 0x2ab   :  { %v328_v44 = vmax.f32 %v325_v42, 0.0 }
 0x2ad   :  { %455 = vmatmul.mubr.msk.f32.vlgmr.msra.gmra.mrb[4].mxu1 %vm169_vm1, %v328_v44 }
 0x380   :  { %v426_v52 = vpop.f32.mrb[4].mxu1 }
 0x381   :  { %v427_v53 = vadd.f32 %v426_v52, %v350_v50  ;;  %v428_v54 = vpop.f32.mrb[5].mxu1 }
 0x382   :  { %v429_v55 = vadd.f32 %v428_v54, %v354_v51 }
 0x383   :  { %v431_v56 = vmax.f32 %v427_v53, 0.0 }
 0x384   :  { %v432_v57 = vmax.f32 %v429_v55, 0.0 }
 0x386   :  { %v435_v58 = vcombine.low %v431_v56, %v432_v57 }
 0x388   :  { %456 = vst.sshfl [vmem:[%s875_s9] sm:$0x33 pattern:$0x76325410] %v435_v58 }

// kernel: autoencoder_forward.3
= control target key start
LH: loop header
LB: loop body
LE: loop exit
PB: predicated region body
PF: predicated region fallthrough
CT: control target
= control target key end

     0   :  { %s8765_s0 = inlined_call_operand.hbm [shape: f32[2,12288], index: 0, kind: input, shape index: {}]   ;;  %s8766_s1 = inlined_call_operand.hbm [shape: bf16[12288,256], index: 1, kind: input, shape index: {}]   ;;  %s8767_s2 = inlined_call_operand.hbm [shape: f32[1,256], index: 2, kind: input, shape index: {}]   ;;  %s8768_s3 = inlined_call_operand.vmem [shape: f32[2,256], index: 3, kind: output, shape index: {}]  }
   0x1   :  { %8778 = sst [smem:[#allocation15_spill]] %s8766_s1 }
   0x2   :  { %8779 = sst [smem:[#allocation16_spill]] %s8768_s3 }
   0x3   :  { %8 = vsyncpa [#allocation4], 0 }
   0x4   :  { %10 = vsyncpa [#allocation4 + $0x1], 0 }
   0x5   :  { %11 = vsyncpa [#allocation6], 0 }
   0x6   :  { %13 = vsyncpa [#allocation6 + $0x1], 0  ;;  %s7845_s12 = smov 0   ;;  %s7847_s13 = smov 0  }
   0x7   :  { %s7849_s14 = smov 0   ;;  %s7851_s15 = smov 0  }
   0x8   :  { %s7853_s16 = smov 0   ;;  %s7855_s17 = smov 0  }
   0x9   :  { %s7857_s18 = smov 0   ;;  %s7859_s19 = smov 0  }
   0xa   :  { %s7861_s20 = smov 0   ;;  %s7863_s21 = smov 0  }
   0xb   :  { %s7865_s22 = smov 0   ;;  %s7867_s23 = smov 0  }
   0xc   :  { %s7869_s24 = smov 0   ;;  %s7871_s25 = smov 0  }
   0xd LB: > { %8780 = sst [smem:[#allocation11_spill]] %s7799_s21  ;;  %s28_s26 = sadd.s32 1, %s7807_s23  ;;  %s7815_s25 = sphi %s7871_s25, %s19_s25   ;;  %s7811_s24 = sphi %s7869_s24, %s8827_s24   ;;  %s7807_s23 = sphi %s7867_s23, %s8826_s23   ;;  %s7803_s22 = sphi %s7865_s22, %s8825_s22   ;;  %s7799_s21 = sphi %s7863_s21, %s8824_s21   ;;  %s7795_s20 = sphi %s7861_s20, %s8823_s20   ;;  %s7791_s19 = sphi %s7859_s19, %s8822_s19   ;;  %s7787_s18 = sphi %s7857_s18, %s8821_s18   ;;  %s7783_s17 = sphi %s7855_s17, %s8820_s17   ;;  %s7779_s16 = sphi %s7853_s16, %s8819_s16   ;;  %s7775_s15 = sphi %s7851_s15, %s8818_s15   ;;  %s7771_s14 = sphi %s7849_s14, %s8817_s14   ;;  %s7767_s13 = sphi %s7847_s13, %s8816_s13   ;;  %s7763_s12 = sphi %s7845_s12, %s8815_s12  }
   0xe   : > { %p7917_p0 = scmp.ge.s32.totalorder %s28_s26, 2  ;;  %p8771_p1 = scmp.eq.s32.totalorder %s7815_s25, 0 }
   0xf   : > { %p73_p2 = scmp.ne.s32.totalorder %s7783_s17, %s7779_s16  ;;  %p8770_p5 = scmp.lt.s32.totalorder %s7815_s25, 4 }
  0x10   : > { %s8829_s26 = smov (%p7917_p0, %s28_s26), 0  ;;  %s8769_s30 = smul.u32 1536, %s7807_s23 }
  0x11   : > { %8782 = sst [smem:[#allocation12_spill]] %s8829_s26  ;;  %p75_p3 = por %p73_p2, %p8771_p1 }
  0x12   : > { %s174_s4 = sand.u32 1, %s7815_s25   ;;  %s176_s5 = sand.u32 1, %s7783_s17  }
  0x13   : > { %s7454_s6 = smul.u32 3072, %s176_s5  ;;  %s184_s7 = sadd.s32 %s7811_s24, %s8769_s30 }
  0x14   : > { %s3915_s8 = sshll.u32 %s184_s7, 6  ;;  %p7942_p6 = pnand %p8770_p5, %p75_p3 }
  0x15   : > { %s8784_s1 = sld [smem:[#allocation15_spill]]  ;;  %s178_s5 = scalar_lea.vmem [#allocation5], %s7454_s6 }
  0x16   : > { %s187_s27 = sshll.u32 %s178_s5, 4  ;;  %s7953_s7 = scalar_lea.sflag [#allocation6], %s174_s4  ;;  %s7951_s27 = int_to_ptr.vmem [resolvable:$true] %s187_s27 }
  0x17   : > { %p7605_p8 = pneg %p7942_p6 }
  0x1b   : > { %s7949_s29 = scalar_lea.hbm %s8784_s1, %s3915_s8  ;;  %s7608_s11 = scalar_lea.hbm %s8784_s1, 196608 }
  0x1c   : > { %s7603_s30 = scalar_lea.hbm %s7949_s29, 49152  ;;  %p7609_p11 = scmp.lt.u32.totalorder %s7949_s29, %s8784_s1 }
  0x1d   : > { %p7604_p7 = scmp.ne.s32.totalorder %s7949_s29, %s7603_s30  ;;  %p7610_p12 = scmp.lt.u32.totalorder %s7608_s11, %s7603_s30 }
  0x1e   : > { %p7612_p2 = scmp.lt.u32.totalorder %s7603_s30, %s7949_s29 }
  0x1f   : > { %p7606_p9 = pnand %p7605_p8, %p7604_p7  ;;  %p7611_p13 = por %p7610_p12, %p7609_p11 }
  0x21   : > { %p7607_p10 = pneg %p7606_p9  ;;  %p7613_p3 = por %p7612_p2, %p7611_p13 }
  0x23   : > { %p7614_p5 = pnand %p7613_p3, %p7607_p10 }
  0x25   : > { %7617 = shalt.err (!%p7614_p5)
}
  0x26   : > { %s7618_s4 = scalar_lea.vmem %s7951_s27, 49152  ;;  %s7817_s6 = smov [#allocation5]  }
  0x27   : > { %p7619_p7 = scmp.ne.s32.totalorder %s7951_s27, %s7618_s4  ;;  %s7623_s5 = sshll.u32 %s7817_s6, 4  ;;  %s7624_s5 = int_to_ptr.vmem [resolvable:$false] %s7623_s5 }
  0x28   : > { %s7625_s3 = scalar_lea.vmem %s7624_s5, 98304  ;;  %p7626_p1 = scmp.lt.s32.totalorder %s7951_s27, %s7624_s5 }
  0x29   : > { %p7621_p9 = pnand %p7619_p7, %p7605_p8  ;;  %p7627_p11 = scmp.lt.s32.totalorder %s7625_s3, %s7618_s4 }
  0x2b   : > { %p7622_p4 = pneg %p7621_p9  ;;  %p7628_p12 = por %p7627_p11, %p7626_p1 }
  0x2d   : > { %p7629_p13 = pnand %p7628_p12, %p7622_p4 }
  0x2f   : > { %7632 = shalt.err (!%p7629_p13)
}
  0x30   : > { %s7818_s21 = smov 128   ;;  %s7819_s30 = smov 64  }
  0x31   : > { %s7820_s8 = smov 4   ;;  %p3917_p1 = scmp.ge.s32.totalorder %s7815_s25, 1 }
  0x32   : > { %7469 = dma.hbm_to_vmem [thread:$0]  (!%p7942_p6), %s7949_s29, 49152, %s7951_s27, %s7953_s7, %s7818_s21, %s7819_s30, %s7820_s8  }
  0x33   : > { %p212_p4 = scmp.lt.s32.totalorder %s7815_s25, 5  ;;  %s8772_s11 = sadd.s32 4294967295, %s7815_s25  }
  0x34   : > { %s8786_s4 = sadd.s32 1, %s7811_s24  ;;  %s35_s6 = ssub.s32 %s7807_s23, %s8829_s26 }
  0x35   : > { %p7983_p5 = pnand %p3917_p1, %p212_p4  ;;  %s8831_s4 = smov (!%p7917_p0, %s8786_s4), %s7811_s24 }
  0x36   : > { %s38_s5 = sadd.s32 1, %s7795_s20  ;;  %p33_p8 = scmp.ge.s32.totalorder %s8831_s4, 2 }
  0x37   : > { %s8785_s10 = scalar_select %p7983_p5, 1, 0 }
  0x38   : > { %p36_p6 = scmp.eq.s32.totalorder %s35_s6, 0  ;;  %p45_p10 = scmp.ne.s32.totalorder %s7795_s20, %s7791_s19 }
  0x39   : > { %p51_p2 = scmp.ne.s32.totalorder %s7791_s19, %s7787_s18  ;;  %s8833_s4 = smov (%p33_p8, %s8831_s4), 0 }
  0x3a   : > { %8787 = sst [smem:[#allocation13_spill]] %s8833_s4  ;;  %p8789_p3 = scmp.eq.s32.totalorder %s7815_s25, 0 }
  0x3b   : > { %s8003_s27 = scalar_select %p36_p6, %s7795_s20, %s38_s5  }
  0x3c   : > { %p8007_p7 = por %p8789_p3, %p45_p10  ;;  %p8013_p0 = scmp.eq.s32.totalorder %s8772_s11, 0 }
  0x3d   : > { %8788 = sst [smem:[#allocation14_spill]] %s8003_s27  ;;  %s8019_s18 = ssub.s32 %s7811_s24, %s8833_s4 }
  0x3e   : > { %s155_s9 = sand.u32 1, %s7795_s20   ;;  %p8024_p9 = por %p8013_p0, %p51_p2 }
  0x3f   : > { %s63_s21 = sor.u32 %s8019_s18, %s35_s6  ;;  %p8793_p12 = scmp.ne.s32.totalorder %s7779_s16, %s7775_s15 }
  0x40   : > { %s8792_s3 = scalar_select %p8024_p9, 1, 0 }
  0x41   : > { %p64_p11 = scmp.eq.s32.totalorder %s63_s21, 0  ;;  %p8034_p13 = por %p8793_p12, %p8013_p0 }
  0x42   : > { %s7453_s8 = smul.u32 96, %s155_s9  ;;  %s8795_s5 = sadd.s32 1, %s7783_s17 }
  0x43   : > { %s8794_s30 = scalar_select %p8034_p13, 1, 0 }
  0x44   : > { %s8041_s11 = scalar_select %p64_p11, %s7783_s17, %s8795_s5  }
  0x45   : > { %s8796_s1 = smul.u32 1536, %s7807_s23  ;;  %s159_s6 = scalar_lea.vmem [#allocation3], %s7453_s8 }
  0x46   : > { %s167_s15 = sshll.u32 %s159_s6, 4  ;;  %p8797_p1 = scmp.lt.s32.totalorder %s7815_s25, 4  ;;  %s8058_s15 = int_to_ptr.vmem [resolvable:$true] %s167_s15 }
  0x47   : > { %s8048_s27 = scalar_lea.hbm %s8765_s0, %s8796_s1  ;;  %s156_s5 = scalar_lea.sflag [#allocation4], %s155_s9 }
  0x48   : > { %p8054_p4 = pnand %p8797_p1, %p8007_p7  ;;  %s7633_s26 = scalar_lea.hbm %s8048_s27, 1536 }
  0x49   : > { %p7634_p8 = scmp.ne.s32.totalorder %s8048_s27, %s7633_s26  ;;  %s7638_s28 = scalar_lea.hbm %s8765_s0, 3072 }
  0x4a   : > { %p7635_p6 = pneg %p8054_p4  ;;  %p7639_p3 = scmp.lt.u32.totalorder %s8048_s27, %s8765_s0 }
  0x4b   : > { %p7640_p7 = scmp.lt.u32.totalorder %s7638_s28, %s7633_s26  ;;  %p7642_p12 = scmp.lt.u32.totalorder %s7633_s26, %s8048_s27 }
  0x4c   : > { %p7636_p10 = pnand %p7635_p6, %p7634_p8 }
  0x4d   : > { %p7641_p11 = por %p7640_p7, %p7639_p3 }
  0x4e   : > { %p7637_p2 = pneg %p7636_p10 }
  0x4f   : > { %p7643_p1 = por %p7642_p12, %p7641_p11 }
  0x51   : > { %p7644_p13 = pnand %p7643_p1, %p7637_p2 }
  0x53   : > { %7647 = shalt.err (!%p7644_p13)
}
  0x54   : > { %s7648_s9 = scalar_lea.vmem %s8058_s15, 1536  ;;  %s7821_s1 = smov [#allocation3]  }
  0x55   : > { %p7649_p8 = scmp.ne.s32.totalorder %s8058_s15, %s7648_s9  ;;  %s7653_s4 = sshll.u32 %s7821_s1, 4  ;;  %s7654_s4 = int_to_ptr.vmem [resolvable:$false] %s7653_s4 }
  0x56   : > { %s7655_s8 = scalar_lea.vmem %s7654_s4, 3072  ;;  %p7656_p5 = scmp.lt.s32.totalorder %s8058_s15, %s7654_s4 }
  0x57   : > { %p7651_p10 = pnand %p7649_p8, %p7635_p6  ;;  %p7657_p3 = scmp.lt.s32.totalorder %s7655_s8, %s7648_s9 }
  0x59   : > { %p7652_p9 = pneg %p7651_p10  ;;  %p7658_p7 = por %p7657_p3, %p7656_p5 }
  0x5b   : > { %p7659_p11 = pnand %p7658_p7, %p7652_p9 }
  0x5d   : > { %7662 = shalt.err (!%p7659_p11)
}
  0x5e   : > { %7466 = dma.hbm_to_vmem [thread:$0]  (!%p8054_p4), %s8048_s27, 1536, %s8058_s15, %s156_s5  }
  0x5f   : > { %p90_p5 = scmp.eq.s32.totalorder %s8019_s18, 0  ;;  %s92_s26 = sadd.s32 1, %s7771_s14 }
  0x60   : > { %p99_p9 = scmp.ne.s32.totalorder %s7771_s14, %s7767_s13  ;;  %p105_p13 = scmp.ne.s32.totalorder %s7767_s13, %s7763_s12 }
  0x61   : > { %s8092_s21 = scalar_select %p90_p5, %s7771_s14, %s92_s26  }
  0x62   : > { %p8799_p6 = scmp.eq.s32.totalorder %s7815_s25, 0  ;;  %p8098_p12 = por %p105_p13, %p8013_p0 }
  0x63   : > { %s199_s6 = sand.u32 1, %s7771_s14   ;;  %s3916_s9 = sshll.u32 %s7811_s24, 4 }
  0x64   : > { %p101_p2 = por %p99_p9, %p8799_p6  ;;  %s8107_s8 = scalar_lea.hbm %s8767_s2, %s3916_s9 }
  0x65   : > { %s8800_s28 = scalar_select %p8098_p12, 1, 0 }
  0x66   : > { %s200_s12 = scalar_lea.vmem [#allocation7], %s199_s6  ;;  %p8801_p4 = scmp.lt.s32.totalorder %s7815_s25, 4 }
  0x67   : > { %s207_s27 = sshll.u32 %s200_s12, 4  ;;  %s7663_s18 = scalar_lea.hbm %s8107_s8, 16  ;;  %s208_s27 = int_to_ptr.vmem [resolvable:$true] %s207_s27 }
  0x68   : > { %p8111_p1 = pnand %p8801_p4, %p101_p2  ;;  %p7664_p0 = scmp.ne.s32.totalorder %s8107_s8, %s7663_s18 }
  0x69   : > { %s7668_s26 = scalar_lea.hbm %s8767_s2, 32  ;;  %p7669_p7 = scmp.lt.u32.totalorder %s8107_s8, %s8767_s2 }
  0x6a   : > { %p7665_p8 = pneg %p8111_p1  ;;  %p7670_p11 = scmp.lt.u32.totalorder %s7668_s26, %s7663_s18 }
  0x6b   : > { %p7672_p9 = scmp.lt.u32.totalorder %s7663_s18, %s8107_s8 }
  0x6c   : > { %p7666_p10 = pnand %p7665_p8, %p7664_p0  ;;  %p7671_p5 = por %p7670_p11, %p7669_p7 }
  0x6e   : > { %p7667_p3 = pneg %p7666_p10  ;;  %p7673_p13 = por %p7672_p9, %p7671_p5 }
  0x70   : > { %p7674_p6 = pnand %p7673_p13, %p7667_p3 }
  0x72   : > { %7677 = shalt.err (!%p7674_p6)
}
  0x73   : > { %s7678_s1 = scalar_lea.vmem %s208_s27, 16  ;;  %s7822_s4 = smov [#allocation7]  }
  0x74   : > { %p7679_p2 = scmp.ne.s32.totalorder %s208_s27, %s7678_s1  ;;  %s7683_s12 = sshll.u32 %s7822_s4, 4  ;;  %s7684_s12 = int_to_ptr.vmem [resolvable:$false] %s7683_s12 }
  0x75   : > { %s7685_s15 = scalar_lea.vmem %s7684_s12, 32  ;;  %p7686_p10 = scmp.lt.s32.totalorder %s208_s27, %s7684_s12 }
  0x76   : > { %p7681_p4 = pnand %p7679_p2, %p7665_p8  ;;  %p7687_p12 = scmp.lt.s32.totalorder %s7685_s15, %s7678_s1 }
  0x78   : > { %p7682_p0 = pneg %p7681_p4  ;;  %p7688_p7 = por %p7687_p12, %p7686_p10 }
  0x7a   : > { %p7689_p11 = pnand %p7688_p7, %p7682_p0 }
  0x7c   : > { %7692 = shalt.err (!%p7689_p11)
}
  0x7d   : > { %7472 = dma.hbm_to_vmem [thread:$0]  (!%p8111_p1), %s8107_s8, 16, %s208_s27, %s7953_s7  }
  0x7e   : > { %p8803_p3 = scmp.ne.s32.totalorder %s8785_s10, 0 }
  0x7f   : > { %s218_s18 = sand.u32 (!%p8803_p3), 1, %s7791_s19   ;;  %p8804_p8 = scmp.ne.s32.totalorder (!%p8803_p3), %s8792_s3, 0 }
  0x80   : > { %216 = sbr.rel (%p8803_p3) target bundleno = 780 (0x30c), region = 32  ;;  %s219_s26 = scalar_lea.sflag (!%p8803_p3), [#allocation4], %s218_s18 }
  0x81   : > { %s7455_s5 = smul.u32 (!%p8803_p3), 96, %s218_s18 }
  0x83   : > { %s8140_s6 = scalar_lea.vmem (!%p8803_p3), [#allocation3], %s7455_s5 }
  0x87   : > { %7750 = dma.done.wait (%p8804_p8), %s219_s26, 1536  }
  0x88   : > { %7752 = vsyncadd (%p8804_p8), %s219_s26, 4294965760  ;;  %s8805_s29 = sadd.s32 4294967295, %s7815_s25   ;;  %s229_s8 = sand.u32 1, %s7779_s16  }
  0x89   : > { %s227_s7 = sand.u32 1, %s8805_s29   ;;  %s7456_s10 = smul.u32 3072, %s229_s8 }
  0x8a   : > { %s228_s27 = scalar_lea.sflag [#allocation6], %s227_s7  ;;  %p8806_p12 = scmp.ne.s32.totalorder %s8794_s30, 0 }
  0x8b   : > { %s8149_s9 = scalar_lea.vmem [#allocation5], %s7456_s10 }
  0x8c   : > { %7754 = dma.done.wait (%p8806_p12), %s228_s27, 49152  }
  0x8d   : > { %7756 = vsyncadd (%p8806_p12), %s228_s27, 4294918144  ;;  %s238_s1 = sand.u32 1, %s7767_s13   ;;  %p8807_p1 = scmp.ne.s32.totalorder %s8800_s28, 0 }
  0x8e   : > { %s8156_s3 = scalar_lea.vmem [#allocation7], %s238_s1 }
  0x8f   : > { %7758 = dma.done.wait (%p8807_p1), %s228_s27, 16  }
  0x90   : > { %7760 = vsyncadd (%p8807_p1), %s228_s27, 4294967280  ;;  %p272_p5 = scmp.lt.s32.totalorder %s7803_s22, 1  ;;  %s8808_s18 = sld [smem:[#allocation16_spill]] }
  0x91   : > { %s8809_s5 = sld [smem:[#allocation11_spill]] }
  0x92   : > { %s8835_s22 = smov (!%p272_p5, %s7803_s22), 1 }
  0x93   : > { %s3918_s4 = sshll.u32 %s8835_s22, 1 }
  0x96   : > { %s8167_s30 = scalar_lea.vmem %s8808_s18, %s3918_s4 }
  0x97   : > { %p3919_p9 = scmp.ne.s32.totalorder %s8809_s5, 0 }
  0x98   : > { %v7823_v0 = vmov (!%p3919_p9), 0.0  }
  0x99   : > { %279 = sbr.rel (%p3919_p9) target bundleno = 160 (0xa0), region = 48  ;;  %280 = vst [vmem:[#allocation2] sm:$0x3] (!%p3919_p9), %v7823_v0 }
  0xa0 PF: > { %v5469_v1 = vld [vmem:[%s8149_s9 + $0x40] sm:$0xff]   ;;  %v1846_v4 = vlaneseq  ;;  %v5470_v6 = vld [vmem:[%s8149_s9 + $0x48] sm:$0xff]   ;;  %v7824_v8 = vmov 1983009808   ;;  %v5471_v14 = vld [vmem:[%s8149_s9 + $0x50] sm:$0xff]   ;;  %s8810_s22 = sld [smem:[#allocation11_spill]] }
  0xa1   : > { %v5485_v2 = vld [vmem:[%s8149_s9 + $0xc0] sm:$0xff]   ;;  %6686 = vmatprep.subr.bf16.mxu0 %v5469_v1  ;;  %v5486_v7 = vld [vmem:[%s8149_s9 + $0xc8] sm:$0xff]   ;;  %v1844_v9 = vunpack.c.l.s4 %v7824_v8  ;;  %v5487_v15 = vld [vmem:[%s8149_s9 + $0xd0] sm:$0xff]  }
  0xa2   : > { %v3927_v3 = vld [vmem:[%s8149_s9] sm:$0xff]   ;;  %6718 = vmatprep.subr.bf16.mxu1 %v5485_v2  ;;  %v5462_v10 = vld [vmem:[%s8149_s9 + $0x8] sm:$0xff]   ;;  %v1847_v13 = vshrl.u32 %v1846_v4, 7  ;;  %v5463_v16 = vld [vmem:[%s8149_s9 + $0x10] sm:$0xff]  }
  0xa3   : > { %v5477_v5 = vld [vmem:[%s8149_s9 + $0x80] sm:$0xff]   ;;  %6688 = vmatpush3.bf16.msra.mxu0 %v3927_v3  ;;  %v5478_v11 = vld [vmem:[%s8149_s9 + $0x88] sm:$0xff]   ;;  %v1845_v12 = vunpack.c.0.s8 %v1844_v9  ;;  %v5479_v17 = vld [vmem:[%s8149_s9 + $0x90] sm:$0xff]  }
  0xa4   : > { %6720 = vmatpush3.bf16.msra.mxu1 %v5477_v5  ;;  %6690 = vmatprep.subr.bf16.mxu0 %v5470_v6  ;;  %v5472_v19 = vld [vmem:[%s8149_s9 + $0x58] sm:$0xff]   ;;  %v282_v21 = vld [vmem:[%s8140_s6] sm:$0xff]  ;;  %v5474_v33 = vld [vmem:[%s8149_s9 + $0x68] sm:$0xff]  }
  0xa5   : > { %6722 = vmatprep.subr.bf16.mxu1 %v5486_v7  ;;  %v8182_v18 = vsub.s32 %v1845_v12, %v1847_v13  ;;  %v5488_v20 = vld [vmem:[%s8149_s9 + $0xd8] sm:$0xff]   ;;  %v1842_v25 = vcombine.high %v282_v21, %v282_v21  ;;  %v5473_v26 = vld [vmem:[%s8149_s9 + $0x60] sm:$0xff]   ;;  %v5490_v34 = vld [vmem:[%s8149_s9 + $0xe8] sm:$0xff]  }
  0xa6   : > { %v5464_v22 = vld [vmem:[%s8149_s9 + $0x18] sm:$0xff]   ;;  %v5489_v27 = vld [vmem:[%s8149_s9 + $0xe0] sm:$0xff]   ;;  %v5466_v35 = vld [vmem:[%s8149_s9 + $0x28] sm:$0xff]   ;;  %p3920_p13 = scmp.ne.s32.totalorder %s8810_s22, 1 }
  0xa7   : > { %6692 = vmatpush3.bf16.msra.mxu0 %v5462_v10  ;;  %v5480_v23 = vld [vmem:[%s8149_s9 + $0x98] sm:$0xff]   ;;  %v1849_v24 = vrot.slane %v282_v21, %v8182_v18  ;;  %v1856_v29 = vrot.slane %v1842_v25, %v8182_v18  ;;  %v5465_v30 = vld [vmem:[%s8149_s9 + $0x20] sm:$0xff]   ;;  %v5482_v36 = vld [vmem:[%s8149_s9 + $0xa8] sm:$0xff]  }
  0xa8   : > { %6724 = vmatpush3.bf16.msra.mxu1 %v5478_v11  ;;  %6694 = vmatprep.subr.bf16.mxu0 %v5471_v14  ;;  %v5481_v31 = vld [vmem:[%s8149_s9 + $0xa0] sm:$0xff]   ;;  %v5475_v37 = vld [vmem:[%s8149_s9 + $0x70] sm:$0xff]   ;;  %v283_v39 = vld [vmem:[%s8140_s6 + $0x8] sm:$0xff] }
  0xa9   : > { %6726 = vmatprep.subr.bf16.mxu1 %v5487_v15  ;;  %v1857_v28 = vcombine.high %v1849_v24, %v1849_v24  ;;  %v1858_v32 = vcombine.high %v1856_v29, %v1856_v29  ;;  %v5491_v38 = vld [vmem:[%s8149_s9 + $0xf0] sm:$0xff]   ;;  %v5476_v42 = vld [vmem:[%s8149_s9 + $0x78] sm:$0xff]   ;;  %v1859_v44 = vcombine.high %v283_v39, %v283_v39  ;;  %v5501_v47 = vld [vmem:[%s8149_s9 + $0x140] sm:$0xff]   ;;  %v8211_v49 = vrot.slane %v283_v39, %v8182_v18 }
  0xaa   : > { %v5467_v40 = vld [vmem:[%s8149_s9 + $0x30] sm:$0xff]   ;;  %v5492_v43 = vld [vmem:[%s8149_s9 + $0xf8] sm:$0xff]   ;;  %v5517_v48 = vld [vmem:[%s8149_s9 + $0x1c0] sm:$0xff]  }
  0xab   : > { %6696 = vmatpush3.bf16.msra.mxu0 %v5463_v16  ;;  %2158 = vmatprep.mubr.f32.mxu0 %v1857_v28  ;;  %v5483_v41 = vld [vmem:[%s8149_s9 + $0xb0] sm:$0xff]   ;;  %v5468_v45 = vld [vmem:[%s8149_s9 + $0x38] sm:$0xff]   ;;  %v8214_v50 = vrot.slane %v1859_v44, %v8182_v18  ;;  %v5493_v51 = vld [vmem:[%s8149_s9 + $0x100] sm:$0xff]   ;;  %v1874_v55 = vcombine.high %v8211_v49, %v8211_v49 }
  0xac   : > { %6728 = vmatpush3.bf16.msra.mxu1 %v5479_v17  ;;  %6698 = vmatprep.subr.bf16.mxu0 %v5472_v19  ;;  %v5484_v46 = vld [vmem:[%s8149_s9 + $0xb8] sm:$0xff]   ;;  %v5509_v52 = vld [vmem:[%s8149_s9 + $0x180] sm:$0xff]   ;;  %v5502_v53 = vld [vmem:[%s8149_s9 + $0x148] sm:$0xff]  }
  0xad   : > { %6730 = vmatprep.subr.bf16.mxu1 %v5488_v20  ;;  %2228 = vmatprep.mubr.f32.mxu1 %v1858_v32  ;;  %v5518_v54 = vld [vmem:[%s8149_s9 + $0x1c8] sm:$0xff]   ;;  %v1875_v56 = vcombine.high %v8214_v50, %v8214_v50  ;;  %v5503_v59 = vld [vmem:[%s8149_s9 + $0x150] sm:$0xff]   ;;  %v5504_v63 = vld [vmem:[%s8149_s9 + $0x158] sm:$0xff]  }
  0xae   : > { %v5494_v57 = vld [vmem:[%s8149_s9 + $0x108] sm:$0xff]   ;;  %v5519_v60 = vld [vmem:[%s8149_s9 + $0x1d0] sm:$0xff]   ;;  %v5520_v0 = vld [vmem:[%s8149_s9 + $0x1d8] sm:$0xff]  }
  0xaf   : > { %6700 = vmatpush3.bf16.msra.mxu0 %v5464_v22  ;;  %v5510_v58 = vld [vmem:[%s8149_s9 + $0x188] sm:$0xff]   ;;  %v5495_v61 = vld [vmem:[%s8149_s9 + $0x110] sm:$0xff]   ;;  %v5496_v1 = vld [vmem:[%s8149_s9 + $0x118] sm:$0xff]  }
  0xb0   : > { %6732 = vmatpush3.bf16.msra.mxu1 %v5480_v23  ;;  %6702 = vmatprep.subr.bf16.mxu0 %v5473_v26  ;;  %v5511_v62 = vld [vmem:[%s8149_s9 + $0x190] sm:$0xff]   ;;  %v5512_v2 = vld [vmem:[%s8149_s9 + $0x198] sm:$0xff]   ;;  %v5505_v3 = vld [vmem:[%s8149_s9 + $0x160] sm:$0xff]  }
  0xb1   : > { %6734 = vmatprep.subr.bf16.mxu1 %v5489_v27  ;;  %v5521_v4 = vld [vmem:[%s8149_s9 + $0x1e0] sm:$0xff]   ;;  %v5506_v7 = vld [vmem:[%s8149_s9 + $0x168] sm:$0xff]   ;;  %v5507_v11 = vld [vmem:[%s8149_s9 + $0x170] sm:$0xff]  }
  0xb2   : > { %v5497_v5 = vld [vmem:[%s8149_s9 + $0x120] sm:$0xff]   ;;  %v5522_v8 = vld [vmem:[%s8149_s9 + $0x1e8] sm:$0xff]   ;;  %v5523_v12 = vld [vmem:[%s8149_s9 + $0x1f0] sm:$0xff]  }
  0xb3   : > { %6704 = vmatpush3.bf16.msra.mxu0 %v5465_v30  ;;  %v5513_v6 = vld [vmem:[%s8149_s9 + $0x1a0] sm:$0xff]   ;;  %v5498_v9 = vld [vmem:[%s8149_s9 + $0x128] sm:$0xff]   ;;  %v284_v13 = vld [vmem:[%s8140_s6 + $0x10] sm:$0xff] }
  0xb4   : > { %6736 = vmatpush3.bf16.msra.mxu1 %v5481_v31  ;;  %6706 = vmatprep.subr.bf16.mxu0 %v5474_v33  ;;  %v5514_v10 = vld [vmem:[%s8149_s9 + $0x1a8] sm:$0xff]   ;;  %v5499_v14 = vld [vmem:[%s8149_s9 + $0x130] sm:$0xff]   ;;  %v5508_v16 = vld [vmem:[%s8149_s9 + $0x178] sm:$0xff]   ;;  %v1876_v19 = vcombine.high %v284_v13, %v284_v13 }
  0xb5   : > { %6738 = vmatprep.subr.bf16.mxu1 %v5490_v34  ;;  %v5515_v15 = vld [vmem:[%s8149_s9 + $0x1b0] sm:$0xff]   ;;  %v5524_v17 = vld [vmem:[%s8149_s9 + $0x1f8] sm:$0xff]   ;;  %v5533_v22 = vld [vmem:[%s8149_s9 + $0x240] sm:$0xff]  }
  0xb6   : > { %v5500_v20 = vld [vmem:[%s8149_s9 + $0x138] sm:$0xff]   ;;  %v5549_v23 = vld [vmem:[%s8149_s9 + $0x2c0] sm:$0xff]   ;;  %v8257_v25 = vrot.slane %v1876_v19, %v8182_v18  ;;  %v5534_v28 = vld [vmem:[%s8149_s9 + $0x248] sm:$0xff]  }
  0xb7   : > { %6708 = vmatpush3.bf16.msra.mxu0 %v5466_v35  ;;  %v5516_v21 = vld [vmem:[%s8149_s9 + $0x1b8] sm:$0xff]   ;;  %v5525_v26 = vld [vmem:[%s8149_s9 + $0x200] sm:$0xff]   ;;  %v5526_v32 = vld [vmem:[%s8149_s9 + $0x208] sm:$0xff]  }
  0xb8   : > { %6740 = vmatpush3.bf16.msra.mxu1 %v5482_v36  ;;  %6710 = vmatprep.subr.bf16.mxu0 %v5475_v37  ;;  %v5541_v27 = vld [vmem:[%s8149_s9 + $0x280] sm:$0xff]   ;;  %v1892_v31 = vcombine.high %v8257_v25, %v8257_v25  ;;  %v5542_v33 = vld [vmem:[%s8149_s9 + $0x288] sm:$0xff]   ;;  %v5535_v34 = vld [vmem:[%s8149_s9 + $0x250] sm:$0xff]  }
  0xb9   : > { %6742 = vmatprep.subr.bf16.mxu1 %v5491_v38  ;;  %v5551_v35 = vld [vmem:[%s8149_s9 + $0x2d0] sm:$0xff]   ;;  %v5536_v38 = vld [vmem:[%s8149_s9 + $0x258] sm:$0xff]   ;;  %v5529_v44 = vld [vmem:[%s8149_s9 + $0x220] sm:$0xff]  }
  0xba   : > { %v5527_v36 = vld [vmem:[%s8149_s9 + $0x210] sm:$0xff]   ;;  %v5552_v39 = vld [vmem:[%s8149_s9 + $0x2d8] sm:$0xff]   ;;  %v5561_v19 = vld [vmem:[%s8149_s9 + $0x320] sm:$0xff]  }
  0xbb   : > { %6712 = vmatpush3.bf16.msra.mxu0 %v5467_v40  ;;  %v5543_v37 = vld [vmem:[%s8149_s9 + $0x290] sm:$0xff]   ;;  %v5528_v40 = vld [vmem:[%s8149_s9 + $0x218] sm:$0xff]  }
  0xbc   : > { %6744 = vmatpush3.bf16.msra.mxu1 %v5483_v41  ;;  %6714 = vmatprep.subr.bf16.mxu0 %v5476_v42  ;;  %v5544_v41 = vld [vmem:[%s8149_s9 + $0x298] sm:$0xff]   ;;  %v5537_v42 = vld [vmem:[%s8149_s9 + $0x260] sm:$0xff]  }
  0xbd   : > { %6746 = vmatprep.subr.bf16.mxu1 %v5492_v43  ;;  %v5553_v43 = vld [vmem:[%s8149_s9 + $0x2e0] sm:$0xff]  }
  0xbf   : > { %6716 = vmatpush3.bf16.msra.mxu0 %v5468_v45  ;;  %v5545_v45 = vld [vmem:[%s8149_s9 + $0x2a0] sm:$0xff]  }
  0xc0   : > { %6748 = vmatpush3.bf16.msra.mxu1 %v5484_v46  ;;  %6750 = vmatprep.subr.bf16.mxu0 %v5501_v47  ;;  %v5538_v46 = vld [vmem:[%s8149_s9 + $0x268] sm:$0xff]  }
  0xc1   : > { %6782 = vmatprep.subr.bf16.mxu1 %v5517_v48  ;;  %v5554_v47 = vld [vmem:[%s8149_s9 + $0x2e8] sm:$0xff]  }
  0xc2   : > { %2159 = vmatmul.mubr.f32.vlgmr.msra.gmra.mrb[0].mxu0 %v1849_v24  ;;  %v8254_v24 = vrot.slane %v284_v13, %v8182_v18  ;;  %v5530_v48 = vld [vmem:[%s8149_s9 + $0x228] sm:$0xff]   ;;  %v5584_v13 = vld [vmem:[%s8149_s9 + $0x3d8] sm:$0xff]  }
  0xc3   : > { %2229 = vmatmul.mubr.f32.vlgmr.msra.gmra.mrb[0].mxu1 %v1856_v29  ;;  %6752 = vmatpush3.bf16.msra.mxu0 %v5493_v51  ;;  %v5550_v29 = vld [vmem:[%s8149_s9 + $0x2c8] sm:$0xff]   ;;  %v5555_v51 = vld [vmem:[%s8149_s9 + $0x2f0] sm:$0xff]  }
  0xc4   : > { %6784 = vmatpush3.bf16.msra.mxu1 %v5509_v52  ;;  %6754 = vmatprep.subr.bf16.mxu0 %v5502_v53  ;;  %v1891_v30 = vcombine.high %v8254_v24, %v8254_v24  ;;  %v285_v52 = vld [vmem:[%s8140_s6 + $0x18] sm:$0xff]  ;;  %v5531_v53 = vld [vmem:[%s8149_s9 + $0x230] sm:$0xff]  }
  0xc5   : > { %6786 = vmatprep.subr.bf16.mxu1 %v5518_v54  ;;  %2298 = vmatprep.mubr.f32.mxu0 %v1874_v55  ;;  %v5547_v54 = vld [vmem:[%s8149_s9 + $0x2b0] sm:$0xff]   ;;  %v5540_v55 = vld [vmem:[%s8149_s9 + $0x278] sm:$0xff]  }
  0xc6   : > { %2368 = vmatprep.mubr.f32.mxu1 %v1875_v56  ;;  %v5556_v56 = vld [vmem:[%s8149_s9 + $0x2f8] sm:$0xff]  }
  0xc7   : > { %6756 = vmatpush3.bf16.msra.mxu0 %v5494_v57  ;;  %v1893_v57 = vcombine.high %v285_v52, %v285_v52 }
  0xc8   : > { %6788 = vmatpush3.bf16.msra.mxu1 %v5510_v58  ;;  %6758 = vmatprep.subr.bf16.mxu0 %v5503_v59  ;;  %v5532_v58 = vld [vmem:[%s8149_s9 + $0x238] sm:$0xff]  }
  0xc9   : > { %6790 = vmatprep.subr.bf16.mxu1 %v5519_v60  ;;  %v5548_v59 = vld [vmem:[%s8149_s9 + $0x2b8] sm:$0xff]   ;;  %v5565_v60 = vld [vmem:[%s8149_s9 + $0x340] sm:$0xff]  }
  0xcb   : > { %6760 = vmatpush3.bf16.msra.mxu0 %v5495_v61  ;;  %v5581_v61 = vld [vmem:[%s8149_s9 + $0x3c0] sm:$0xff]  }
  0xcc   : > { %6792 = vmatpush3.bf16.msra.mxu1 %v5511_v62  ;;  %6762 = vmatprep.subr.bf16.mxu0 %v5504_v63  ;;  %v8299_v62 = vrot.slane %v285_v52, %v8182_v18  ;;  %v8302_v63 = vrot.slane %v1893_v57, %v8182_v18  ;;  %v5616_v52 = vld [vmem:[%s8149_s9 + $0x4d8] sm:$0xff]   ;;  %v5593_v57 = vld [vmem:[%s8149_s9 + $0x420] sm:$0xff]  }
  0xcd   : > { %6794 = vmatprep.subr.bf16.mxu1 %v5520_v0  ;;  %v5557_v0 = vld [vmem:[%s8149_s9 + $0x300] sm:$0xff]  }
  0xcf   : > { %6764 = vmatpush3.bf16.msra.mxu0 %v5496_v1  ;;  %v5573_v1 = vld [vmem:[%s8149_s9 + $0x380] sm:$0xff]  }
  0xd0   : > { %6796 = vmatpush3.bf16.msra.mxu1 %v5512_v2  ;;  %6766 = vmatprep.subr.bf16.mxu0 %v5505_v3  ;;  %v5566_v2 = vld [vmem:[%s8149_s9 + $0x348] sm:$0xff]  }
  0xd1   : > { %6798 = vmatprep.subr.bf16.mxu1 %v5521_v4  ;;  %v5582_v3 = vld [vmem:[%s8149_s9 + $0x3c8] sm:$0xff]   ;;  %v1908_v4 = vcombine.high %v8299_v62, %v8299_v62 }
  0xd3   : > { %6768 = vmatpush3.bf16.msra.mxu0 %v5497_v5  ;;  %v1909_v5 = vcombine.high %v8302_v63, %v8302_v63 }
  0xd4   : > { %6800 = vmatpush3.bf16.msra.mxu1 %v5513_v6  ;;  %6770 = vmatprep.subr.bf16.mxu0 %v5506_v7  ;;  %v5558_v6 = vld [vmem:[%s8149_s9 + $0x308] sm:$0xff]  }
  0xd5   : > { %6802 = vmatprep.subr.bf16.mxu1 %v5522_v8  ;;  %v5574_v7 = vld [vmem:[%s8149_s9 + $0x388] sm:$0xff]   ;;  %v5567_v8 = vld [vmem:[%s8149_s9 + $0x350] sm:$0xff]  }
  0xd7   : > { %6772 = vmatpush3.bf16.msra.mxu0 %v5498_v9  ;;  %v5583_v9 = vld [vmem:[%s8149_s9 + $0x3d0] sm:$0xff]  }
  0xd8   : > { %6804 = vmatpush3.bf16.msra.mxu1 %v5514_v10  ;;  %6774 = vmatprep.subr.bf16.mxu0 %v5507_v11  ;;  %v5559_v10 = vld [vmem:[%s8149_s9 + $0x310] sm:$0xff]  }
  0xd9   : > { %6806 = vmatprep.subr.bf16.mxu1 %v5523_v12  ;;  %v5575_v11 = vld [vmem:[%s8149_s9 + $0x390] sm:$0xff]   ;;  %v5568_v12 = vld [vmem:[%s8149_s9 + $0x358] sm:$0xff]  }
  0xdb   : > { %6776 = vmatpush3.bf16.msra.mxu0 %v5499_v14  ;;  %v5560_v14 = vld [vmem:[%s8149_s9 + $0x318] sm:$0xff]  }
  0xdc   : > { %6808 = vmatpush3.bf16.msra.mxu1 %v5515_v15  ;;  %6778 = vmatprep.subr.bf16.mxu0 %v5508_v16  ;;  %v5576_v15 = vld [vmem:[%s8149_s9 + $0x398] sm:$0xff]   ;;  %v5569_v16 = vld [vmem:[%s8149_s9 + $0x360] sm:$0xff]  }
  0xdd   : > { %6810 = vmatprep.subr.bf16.mxu1 %v5524_v17  ;;  %v5585_v17 = vld [vmem:[%s8149_s9 + $0x3e0] sm:$0xff]  }
  0xdf   : > { %6780 = vmatpush3.bf16.msra.mxu0 %v5500_v20  ;;  %v5577_v20 = vld [vmem:[%s8149_s9 + $0x3a0] sm:$0xff]  }
  0xe0   : > { %6812 = vmatpush3.bf16.msra.mxu1 %v5516_v21  ;;  %6814 = vmatprep.subr.bf16.mxu0 %v5533_v22  ;;  %v5570_v21 = vld [vmem:[%s8149_s9 + $0x368] sm:$0xff]  }
  0xe1   : > { %6846 = vmatprep.subr.bf16.mxu1 %v5549_v23  ;;  %v5586_v22 = vld [vmem:[%s8149_s9 + $0x3e8] sm:$0xff]  }
  0xe2   : > { %2299 = vmatmul.mubr.f32.vlgmr.msra.gmra.mrb[2].mxu0 %v8211_v49  ;;  %v5546_v49 = vld [vmem:[%s8149_s9 + $0x2a8] sm:$0xff]  }
  0xe3   : > { %2369 = vmatmul.mubr.f32.vlgmr.msra.gmra.mrb[2].mxu1 %v8214_v50  ;;  %6816 = vmatpush3.bf16.msra.mxu0 %v5525_v26  ;;  %v5539_v50 = vld [vmem:[%s8149_s9 + $0x270] sm:$0xff]   ;;  %v5562_v23 = vld [vmem:[%s8149_s9 + $0x328] sm:$0xff]  }
  0xe4   : > { %6848 = vmatpush3.bf16.msra.mxu1 %v5541_v27  ;;  %6818 = vmatprep.subr.bf16.mxu0 %v5534_v28  ;;  %v5587_v26 = vld [vmem:[%s8149_s9 + $0x3f0] sm:$0xff]   ;;  %v286_v27 = vld [vmem:[%s8140_s6 + $0x20] sm:$0xff] }
  0xe5   : > { %6850 = vmatprep.subr.bf16.mxu1 %v5550_v29  ;;  %2438 = vmatprep.mubr.f32.mxu0 %v1891_v30  ;;  %v5563_v28 = vld [vmem:[%s8149_s9 + $0x330] sm:$0xff]   ;;  %v5572_v30 = vld [vmem:[%s8149_s9 + $0x378] sm:$0xff]  }
  0xe6   : > { %2508 = vmatprep.mubr.f32.mxu1 %v1892_v31  ;;  %v5579_v29 = vld [vmem:[%s8149_s9 + $0x3b0] sm:$0xff]   ;;  %v5588_v31 = vld [vmem:[%s8149_s9 + $0x3f8] sm:$0xff]  }
  0xe7   : > { %6820 = vmatpush3.bf16.msra.mxu0 %v5526_v32  ;;  %v1910_v32 = vcombine.high %v286_v27, %v286_v27 }
  0xe8   : > { %6852 = vmatpush3.bf16.msra.mxu1 %v5542_v33  ;;  %6822 = vmatprep.subr.bf16.mxu0 %v5535_v34  ;;  %v5564_v33 = vld [vmem:[%s8149_s9 + $0x338] sm:$0xff]  }
  0xe9   : > { %6854 = vmatprep.subr.bf16.mxu1 %v5551_v35  ;;  %v5580_v34 = vld [vmem:[%s8149_s9 + $0x3b8] sm:$0xff]   ;;  %v5597_v35 = vld [vmem:[%s8149_s9 + $0x440] sm:$0xff]  }
  0xeb   : > { %6824 = vmatpush3.bf16.msra.mxu0 %v5527_v36  ;;  %v5613_v36 = vld [vmem:[%s8149_s9 + $0x4c0] sm:$0xff]  }
  0xec   : > { %6856 = vmatpush3.bf16.msra.mxu1 %v5543_v37  ;;  %6826 = vmatprep.subr.bf16.mxu0 %v5536_v38  ;;  %v8344_v37 = vrot.slane %v286_v27, %v8182_v18  ;;  %v8347_v38 = vrot.slane %v1910_v32, %v8182_v18  ;;  %v5648_v27 = vld [vmem:[%s8149_s9 + $0x5d8] sm:$0xff]   ;;  %v5625_v32 = vld [vmem:[%s8149_s9 + $0x520] sm:$0xff]  }
  0xed   : > { %6858 = vmatprep.subr.bf16.mxu1 %v5552_v39  ;;  %v5589_v39 = vld [vmem:[%s8149_s9 + $0x400] sm:$0xff]  }
  0xef   : > { %6828 = vmatpush3.bf16.msra.mxu0 %v5528_v40  ;;  %v5605_v40 = vld [vmem:[%s8149_s9 + $0x480] sm:$0xff]  }
  0xf0   : > { %6860 = vmatpush3.bf16.msra.mxu1 %v5544_v41  ;;  %6830 = vmatprep.subr.bf16.mxu0 %v5537_v42  ;;  %v5598_v41 = vld [vmem:[%s8149_s9 + $0x448] sm:$0xff]  }
  0xf1   : > { %6862 = vmatprep.subr.bf16.mxu1 %v5553_v43  ;;  %v5614_v42 = vld [vmem:[%s8149_s9 + $0x4c8] sm:$0xff]   ;;  %v1925_v43 = vcombine.high %v8344_v37, %v8344_v37 }
  0xf3   : > { %6832 = vmatpush3.bf16.msra.mxu0 %v5529_v44  ;;  %v1926_v44 = vcombine.high %v8347_v38, %v8347_v38 }
  0xf4   : > { %6864 = vmatpush3.bf16.msra.mxu1 %v5545_v45  ;;  %6834 = vmatprep.subr.bf16.mxu0 %v5538_v46  ;;  %v5590_v45 = vld [vmem:[%s8149_s9 + $0x408] sm:$0xff]  }
  0xf5   : > { %6866 = vmatprep.subr.bf16.mxu1 %v5554_v47  ;;  %v5606_v46 = vld [vmem:[%s8149_s9 + $0x488] sm:$0xff]   ;;  %v5599_v47 = vld [vmem:[%s8149_s9 + $0x450] sm:$0xff]  }
  0xf7   : > { %6836 = vmatpush3.bf16.msra.mxu0 %v5530_v48  ;;  %v5615_v48 = vld [vmem:[%s8149_s9 + $0x4d0] sm:$0xff]  }
  0xf8   : > { %6868 = vmatpush3.bf16.msra.mxu1 %v5546_v49  ;;  %6838 = vmatprep.subr.bf16.mxu0 %v5539_v50  ;;  %v5591_v49 = vld [vmem:[%s8149_s9 + $0x410] sm:$0xff]  }
  0xf9   : > { %6870 = vmatprep.subr.bf16.mxu1 %v5555_v51  ;;  %v5607_v50 = vld [vmem:[%s8149_s9 + $0x490] sm:$0xff]   ;;  %v5600_v51 = vld [vmem:[%s8149_s9 + $0x458] sm:$0xff]  }
  0xfb   : > { %6840 = vmatpush3.bf16.msra.mxu0 %v5531_v53  ;;  %v5592_v53 = vld [vmem:[%s8149_s9 + $0x418] sm:$0xff]  }
  0xfc   : > { %6872 = vmatpush3.bf16.msra.mxu1 %v5547_v54  ;;  %6842 = vmatprep.subr.bf16.mxu0 %v5540_v55  ;;  %v5608_v54 = vld [vmem:[%s8149_s9 + $0x498] sm:$0xff]   ;;  %v5601_v55 = vld [vmem:[%s8149_s9 + $0x460] sm:$0xff]  }
  0xfd   : > { %6874 = vmatprep.subr.bf16.mxu1 %v5556_v56  ;;  %v5617_v56 = vld [vmem:[%s8149_s9 + $0x4e0] sm:$0xff]  }
  0xff   : > { %6844 = vmatpush3.bf16.msra.mxu0 %v5532_v58  ;;  %v5609_v58 = vld [vmem:[%s8149_s9 + $0x4a0] sm:$0xff]  }
 0x100   : > { %6876 = vmatpush3.bf16.msra.mxu1 %v5548_v59  ;;  %6878 = vmatprep.subr.bf16.mxu0 %v5565_v60  ;;  %v5602_v59 = vld [vmem:[%s8149_s9 + $0x468] sm:$0xff]  }
 0x101   : > { %6910 = vmatprep.subr.bf16.mxu1 %v5581_v61  ;;  %v5618_v60 = vld [vmem:[%s8149_s9 + $0x4e8] sm:$0xff]  }
 0x102   : > { %2439 = vmatmul.mubr.f32.vlgmr.msra.gmra.mrb[4].mxu0 %v8254_v24  ;;  %v5578_v24 = vld [vmem:[%s8149_s9 + $0x3a8] sm:$0xff]  }
 0x103   : > { %2509 = vmatmul.mubr.f32.vlgmr.msra.gmra.mrb[4].mxu1 %v8257_v25  ;;  %6880 = vmatpush3.bf16.msra.mxu0 %v5557_v0  ;;  %v5571_v25 = vld [vmem:[%s8149_s9 + $0x370] sm:$0xff]   ;;  %v5594_v61 = vld [vmem:[%s8149_s9 + $0x428] sm:$0xff]  }
 0x104   : > { %6912 = vmatpush3.bf16.msra.mxu1 %v5573_v1  ;;  %6882 = vmatprep.subr.bf16.mxu0 %v5566_v2  ;;  %v5619_v0 = vld [vmem:[%s8149_s9 + $0x4f0] sm:$0xff]   ;;  %v287_v1 = vld [vmem:[%s8140_s6 + $0x28] sm:$0xff] }
 0x105   : > { %6914 = vmatprep.subr.bf16.mxu1 %v5582_v3  ;;  %2578 = vmatprep.mubr.f32.mxu0 %v1908_v4  ;;  %v5595_v2 = vld [vmem:[%s8149_s9 + $0x430] sm:$0xff]   ;;  %v5604_v4 = vld [vmem:[%s8149_s9 + $0x478] sm:$0xff]  }
 0x106   : > { %2648 = vmatprep.mubr.f32.mxu1 %v1909_v5  ;;  %v5611_v3 = vld [vmem:[%s8149_s9 + $0x4b0] sm:$0xff]   ;;  %v5620_v5 = vld [vmem:[%s8149_s9 + $0x4f8] sm:$0xff]  }
 0x107   : > { %6884 = vmatpush3.bf16.msra.mxu0 %v5558_v6  ;;  %v1927_v6 = vcombine.high %v287_v1, %v287_v1 }
 0x108   : > { %6916 = vmatpush3.bf16.msra.mxu1 %v5574_v7  ;;  %6886 = vmatprep.subr.bf16.mxu0 %v5567_v8  ;;  %v5596_v7 = vld [vmem:[%s8149_s9 + $0x438] sm:$0xff]  }
 0x109   : > { %6918 = vmatprep.subr.bf16.mxu1 %v5583_v9  ;;  %v5612_v8 = vld [vmem:[%s8149_s9 + $0x4b8] sm:$0xff]   ;;  %v5629_v9 = vld [vmem:[%s8149_s9 + $0x540] sm:$0xff]  }
 0x10b   : > { %6888 = vmatpush3.bf16.msra.mxu0 %v5559_v10  ;;  %v5645_v10 = vld [vmem:[%s8149_s9 + $0x5c0] sm:$0xff]  }
 0x10c   : > { %6920 = vmatpush3.bf16.msra.mxu1 %v5575_v11  ;;  %6890 = vmatprep.subr.bf16.mxu0 %v5568_v12  ;;  %v8389_v11 = vrot.slane %v287_v1, %v8182_v18  ;;  %v8392_v12 = vrot.slane %v1927_v6, %v8182_v18  ;;  %v5680_v1 = vld [vmem:[%s8149_s9 + $0x6d8] sm:$0xff]   ;;  %v5657_v6 = vld [vmem:[%s8149_s9 + $0x620] sm:$0xff]  }
 0x10d   : > { %6922 = vmatprep.subr.bf16.mxu1 %v5584_v13  ;;  %v5621_v13 = vld [vmem:[%s8149_s9 + $0x500] sm:$0xff]  }
 0x10f   : > { %6892 = vmatpush3.bf16.msra.mxu0 %v5560_v14  ;;  %v5637_v14 = vld [vmem:[%s8149_s9 + $0x580] sm:$0xff]  }
 0x110   : > { %6924 = vmatpush3.bf16.msra.mxu1 %v5576_v15  ;;  %6894 = vmatprep.subr.bf16.mxu0 %v5569_v16  ;;  %v5630_v15 = vld [vmem:[%s8149_s9 + $0x548] sm:$0xff]  }
 0x111   : > { %6926 = vmatprep.subr.bf16.mxu1 %v5585_v17  ;;  %v5646_v16 = vld [vmem:[%s8149_s9 + $0x5c8] sm:$0xff]   ;;  %v1942_v17 = vcombine.high %v8389_v11, %v8389_v11 }
 0x113   : > { %6896 = vmatpush3.bf16.msra.mxu0 %v5561_v19  ;;  %v1943_v19 = vcombine.high %v8392_v12, %v8392_v12 }
 0x114   : > { %6928 = vmatpush3.bf16.msra.mxu1 %v5577_v20  ;;  %6898 = vmatprep.subr.bf16.mxu0 %v5570_v21  ;;  %v5622_v20 = vld [vmem:[%s8149_s9 + $0x508] sm:$0xff]  }
 0x115   : > { %6930 = vmatprep.subr.bf16.mxu1 %v5586_v22  ;;  %v5638_v21 = vld [vmem:[%s8149_s9 + $0x588] sm:$0xff]   ;;  %v5631_v22 = vld [vmem:[%s8149_s9 + $0x550] sm:$0xff]  }
 0x117   : > { %6900 = vmatpush3.bf16.msra.mxu0 %v5562_v23  ;;  %v5647_v23 = vld [vmem:[%s8149_s9 + $0x5d0] sm:$0xff]  }
 0x118   : > { %6932 = vmatpush3.bf16.msra.mxu1 %v5578_v24  ;;  %6902 = vmatprep.subr.bf16.mxu0 %v5571_v25  ;;  %v5623_v24 = vld [vmem:[%s8149_s9 + $0x510] sm:$0xff]  }
 0x119   : > { %6934 = vmatprep.subr.bf16.mxu1 %v5587_v26  ;;  %v5639_v25 = vld [vmem:[%s8149_s9 + $0x590] sm:$0xff]   ;;  %v5632_v26 = vld [vmem:[%s8149_s9 + $0x558] sm:$0xff]  }
 0x11b   : > { %6904 = vmatpush3.bf16.msra.mxu0 %v5563_v28  ;;  %v5624_v28 = vld [vmem:[%s8149_s9 + $0x518] sm:$0xff]  }
 0x11c   : > { %6936 = vmatpush3.bf16.msra.mxu1 %v5579_v29  ;;  %6906 = vmatprep.subr.bf16.mxu0 %v5572_v30  ;;  %v5640_v29 = vld [vmem:[%s8149_s9 + $0x598] sm:$0xff]   ;;  %v5633_v30 = vld [vmem:[%s8149_s9 + $0x560] sm:$0xff]  }
 0x11d   : > { %6938 = vmatprep.subr.bf16.mxu1 %v5588_v31  ;;  %v5649_v31 = vld [vmem:[%s8149_s9 + $0x5e0] sm:$0xff]  }
 0x11f   : > { %6908 = vmatpush3.bf16.msra.mxu0 %v5564_v33  ;;  %v5641_v33 = vld [vmem:[%s8149_s9 + $0x5a0] sm:$0xff]  }
 0x120   : > { %6940 = vmatpush3.bf16.msra.mxu1 %v5580_v34  ;;  %6942 = vmatprep.subr.bf16.mxu0 %v5597_v35  ;;  %v5634_v34 = vld [vmem:[%s8149_s9 + $0x568] sm:$0xff]  }
 0x121   : > { %6974 = vmatprep.subr.bf16.mxu1 %v5613_v36  ;;  %v5650_v35 = vld [vmem:[%s8149_s9 + $0x5e8] sm:$0xff]  }
 0x122   : > { %2579 = vmatmul.mubr.f32.vlgmr.msra.gmra.mrb[6].mxu0 %v8299_v62  ;;  %v5610_v62 = vld [vmem:[%s8149_s9 + $0x4a8] sm:$0xff]  }
 0x123   : > { %2649 = vmatmul.mubr.f32.vlgmr.msra.gmra.mrb[6].mxu1 %v8302_v63  ;;  %6944 = vmatpush3.bf16.msra.mxu0 %v5589_v39  ;;  %v5603_v63 = vld [vmem:[%s8149_s9 + $0x470] sm:$0xff]   ;;  %v5626_v36 = vld [vmem:[%s8149_s9 + $0x528] sm:$0xff]  }
 0x124   : > { %6976 = vmatpush3.bf16.msra.mxu1 %v5605_v40  ;;  %6946 = vmatprep.subr.bf16.mxu0 %v5598_v41  ;;  %v5651_v39 = vld [vmem:[%s8149_s9 + $0x5f0] sm:$0xff]  }
 0x125   : > { %6978 = vmatprep.subr.bf16.mxu1 %v5614_v42  ;;  %2718 = vmatprep.mubr.f32.mxu0 %v1925_v43  ;;  %v288_v40 = vld [vmem:[%s8140_s6 + $0x30] sm:$0xff]  ;;  %v5636_v43 = vld [vmem:[%s8149_s9 + $0x578] sm:$0xff]  }
 0x126   : > { %2788 = vmatprep.mubr.f32.mxu1 %v1926_v44  ;;  %v5627_v41 = vld [vmem:[%s8149_s9 + $0x530] sm:$0xff]   ;;  %v5652_v44 = vld [vmem:[%s8149_s9 + $0x5f8] sm:$0xff]  }
 0x127   : > { %6948 = vmatpush3.bf16.msra.mxu0 %v5590_v45  ;;  %v5643_v42 = vld [vmem:[%s8149_s9 + $0x5b0] sm:$0xff]   ;;  %v1944_v45 = vcombine.high %v288_v40, %v288_v40 }
 0x128   : > { %6980 = vmatpush3.bf16.msra.mxu1 %v5606_v46  ;;  %6950 = vmatprep.subr.bf16.mxu0 %v5599_v47  ;;  %v5628_v46 = vld [vmem:[%s8149_s9 + $0x538] sm:$0xff]  }
 0x129   : > { %6982 = vmatprep.subr.bf16.mxu1 %v5615_v48  ;;  %v5644_v47 = vld [vmem:[%s8149_s9 + $0x5b8] sm:$0xff]   ;;  %v5661_v48 = vld [vmem:[%s8149_s9 + $0x640] sm:$0xff]  }
 0x12b   : > { %6952 = vmatpush3.bf16.msra.mxu0 %v5591_v49  ;;  %v5677_v49 = vld [vmem:[%s8149_s9 + $0x6c0] sm:$0xff]  }
 0x12c   : > { %6984 = vmatpush3.bf16.msra.mxu1 %v5607_v50  ;;  %6954 = vmatprep.subr.bf16.mxu0 %v5600_v51  ;;  %v8434_v50 = vrot.slane %v288_v40, %v8182_v18  ;;  %v8437_v51 = vrot.slane %v1944_v45, %v8182_v18  ;;  %v5712_v40 = vld [vmem:[%s8149_s9 + $0x7d8] sm:$0xff]   ;;  %v5689_v45 = vld [vmem:[%s8149_s9 + $0x720] sm:$0xff]  }
 0x12d   : > { %6986 = vmatprep.subr.bf16.mxu1 %v5616_v52  ;;  %v5653_v52 = vld [vmem:[%s8149_s9 + $0x600] sm:$0xff]  }
 0x12f   : > { %6956 = vmatpush3.bf16.msra.mxu0 %v5592_v53  ;;  %v5669_v53 = vld [vmem:[%s8149_s9 + $0x680] sm:$0xff]  }
 0x130   : > { %6988 = vmatpush3.bf16.msra.mxu1 %v5608_v54  ;;  %6958 = vmatprep.subr.bf16.mxu0 %v5601_v55  ;;  %v5662_v54 = vld [vmem:[%s8149_s9 + $0x648] sm:$0xff]  }
 0x131   : > { %6990 = vmatprep.subr.bf16.mxu1 %v5617_v56  ;;  %v5678_v55 = vld [vmem:[%s8149_s9 + $0x6c8] sm:$0xff]   ;;  %v1959_v56 = vcombine.high %v8434_v50, %v8434_v50 }
 0x133   : > { %6960 = vmatpush3.bf16.msra.mxu0 %v5593_v57  ;;  %v1960_v57 = vcombine.high %v8437_v51, %v8437_v51 }
 0x134   : > { %6992 = vmatpush3.bf16.msra.mxu1 %v5609_v58  ;;  %6962 = vmatprep.subr.bf16.mxu0 %v5602_v59  ;;  %v5654_v58 = vld [vmem:[%s8149_s9 + $0x608] sm:$0xff]  }
 0x135   : > { %6994 = vmatprep.subr.bf16.mxu1 %v5618_v60  ;;  %v5670_v59 = vld [vmem:[%s8149_s9 + $0x688] sm:$0xff]   ;;  %v5663_v60 = vld [vmem:[%s8149_s9 + $0x650] sm:$0xff]  }
 0x137   : > { %6964 = vmatpush3.bf16.msra.mxu0 %v5594_v61  ;;  %v5679_v61 = vld [vmem:[%s8149_s9 + $0x6d0] sm:$0xff]  }
 0x138   : > { %6996 = vmatpush3.bf16.msra.mxu1 %v5610_v62  ;;  %6966 = vmatprep.subr.bf16.mxu0 %v5603_v63  ;;  %v5655_v62 = vld [vmem:[%s8149_s9 + $0x610] sm:$0xff]  }
 0x139   : > { %6998 = vmatprep.subr.bf16.mxu1 %v5619_v0  ;;  %v5671_v63 = vld [vmem:[%s8149_s9 + $0x690] sm:$0xff]   ;;  %v5664_v0 = vld [vmem:[%s8149_s9 + $0x658] sm:$0xff]  }
 0x13b   : > { %6968 = vmatpush3.bf16.msra.mxu0 %v5595_v2  ;;  %v5656_v2 = vld [vmem:[%s8149_s9 + $0x618] sm:$0xff]  }
 0x13c   : > { %7000 = vmatpush3.bf16.msra.mxu1 %v5611_v3  ;;  %6970 = vmatprep.subr.bf16.mxu0 %v5604_v4  ;;  %v5672_v3 = vld [vmem:[%s8149_s9 + $0x698] sm:$0xff]   ;;  %v5665_v4 = vld [vmem:[%s8149_s9 + $0x660] sm:$0xff]  }
 0x13d   : > { %7002 = vmatprep.subr.bf16.mxu1 %v5620_v5  ;;  %v5681_v5 = vld [vmem:[%s8149_s9 + $0x6e0] sm:$0xff]  }
 0x13f   : > { %6972 = vmatpush3.bf16.msra.mxu0 %v5596_v7  ;;  %v5673_v7 = vld [vmem:[%s8149_s9 + $0x6a0] sm:$0xff]  }
 0x140   : > { %7004 = vmatpush3.bf16.msra.mxu1 %v5612_v8  ;;  %7006 = vmatprep.subr.bf16.mxu0 %v5629_v9  ;;  %v5666_v8 = vld [vmem:[%s8149_s9 + $0x668] sm:$0xff]  }
 0x141   : > { %7038 = vmatprep.subr.bf16.mxu1 %v5645_v10  ;;  %v5682_v9 = vld [vmem:[%s8149_s9 + $0x6e8] sm:$0xff]  }
 0x142   : > { %2719 = vmatmul.mubr.f32.vlgmr.msra.gmra.mrb[8].mxu0 %v8344_v37  ;;  %v5642_v37 = vld [vmem:[%s8149_s9 + $0x5a8] sm:$0xff]  }
 0x143   : > { %2789 = vmatmul.mubr.f32.vlgmr.msra.gmra.mrb[8].mxu1 %v8347_v38  ;;  %7008 = vmatpush3.bf16.msra.mxu0 %v5621_v13  ;;  %v5635_v38 = vld [vmem:[%s8149_s9 + $0x570] sm:$0xff]   ;;  %v5658_v10 = vld [vmem:[%s8149_s9 + $0x628] sm:$0xff]  }
 0x144   : > { %7040 = vmatpush3.bf16.msra.mxu1 %v5637_v14  ;;  %7010 = vmatprep.subr.bf16.mxu0 %v5630_v15  ;;  %v5683_v13 = vld [vmem:[%s8149_s9 + $0x6f0] sm:$0xff]   ;;  %v289_v14 = vld [vmem:[%s8140_s6 + $0x38] sm:$0xff] }
 0x145   : > { %7042 = vmatprep.subr.bf16.mxu1 %v5646_v16  ;;  %2858 = vmatprep.mubr.f32.mxu0 %v1942_v17  ;;  %v5659_v15 = vld [vmem:[%s8149_s9 + $0x630] sm:$0xff]   ;;  %v5668_v17 = vld [vmem:[%s8149_s9 + $0x678] sm:$0xff]  }
 0x146   : > { %2928 = vmatprep.mubr.f32.mxu1 %v1943_v19  ;;  %v5675_v16 = vld [vmem:[%s8149_s9 + $0x6b0] sm:$0xff]   ;;  %v5684_v19 = vld [vmem:[%s8149_s9 + $0x6f8] sm:$0xff]  }
 0x147   : > { %7012 = vmatpush3.bf16.msra.mxu0 %v5622_v20  ;;  %v1961_v20 = vcombine.high %v289_v14, %v289_v14 }
 0x148   : > { %7044 = vmatpush3.bf16.msra.mxu1 %v5638_v21  ;;  %7014 = vmatprep.subr.bf16.mxu0 %v5631_v22  ;;  %v5660_v21 = vld [vmem:[%s8149_s9 + $0x638] sm:$0xff]  }
 0x149   : > { %7046 = vmatprep.subr.bf16.mxu1 %v5647_v23  ;;  %v5676_v22 = vld [vmem:[%s8149_s9 + $0x6b8] sm:$0xff]   ;;  %v5693_v23 = vld [vmem:[%s8149_s9 + $0x740] sm:$0xff]  }
 0x14b   : > { %7016 = vmatpush3.bf16.msra.mxu0 %v5623_v24  ;;  %v5709_v24 = vld [vmem:[%s8149_s9 + $0x7c0] sm:$0xff]  }
 0x14c   : > { %7048 = vmatpush3.bf16.msra.mxu1 %v5639_v25  ;;  %7018 = vmatprep.subr.bf16.mxu0 %v5632_v26  ;;  %v8479_v25 = vrot.slane %v289_v14, %v8182_v18  ;;  %v8482_v26 = vrot.slane %v1961_v20, %v8182_v18  ;;  %v5718_v14 = vld [vmem:[%s8149_s9 + $0x808] sm:$0xff]   ;;  %v5735_v20 = vld [vmem:[%s8149_s9 + $0x890] sm:$0xff]  }
 0x14d   : > { %7050 = vmatprep.subr.bf16.mxu1 %v5648_v27  ;;  %v5685_v27 = vld [vmem:[%s8149_s9 + $0x700] sm:$0xff]  }
 0x14f   : > { %7020 = vmatpush3.bf16.msra.mxu0 %v5624_v28  ;;  %v5701_v28 = vld [vmem:[%s8149_s9 + $0x780] sm:$0xff]  }
 0x150   : > { %7052 = vmatpush3.bf16.msra.mxu1 %v5640_v29  ;;  %7022 = vmatprep.subr.bf16.mxu0 %v5633_v30  ;;  %v5694_v29 = vld [vmem:[%s8149_s9 + $0x748] sm:$0xff]  }
 0x151   : > { %7054 = vmatprep.subr.bf16.mxu1 %v5649_v31  ;;  %v5710_v30 = vld [vmem:[%s8149_s9 + $0x7c8] sm:$0xff]   ;;  %v1976_v31 = vcombine.high %v8479_v25, %v8479_v25 }
 0x153   : > { %7024 = vmatpush3.bf16.msra.mxu0 %v5625_v32  ;;  %v1977_v32 = vcombine.high %v8482_v26, %v8482_v26 }
 0x154   : > { %7056 = vmatpush3.bf16.msra.mxu1 %v5641_v33  ;;  %7026 = vmatprep.subr.bf16.mxu0 %v5634_v34  ;;  %v5686_v33 = vld [vmem:[%s8149_s9 + $0x708] sm:$0xff]  }
 0x155   : > { %7058 = vmatprep.subr.bf16.mxu1 %v5650_v35  ;;  %v5702_v34 = vld [vmem:[%s8149_s9 + $0x788] sm:$0xff]   ;;  %v5695_v35 = vld [vmem:[%s8149_s9 + $0x750] sm:$0xff]  }
 0x157   : > { %7028 = vmatpush3.bf16.msra.mxu0 %v5626_v36  ;;  %v5711_v36 = vld [vmem:[%s8149_s9 + $0x7d0] sm:$0xff]  }
 0x158   : > { %7060 = vmatpush3.bf16.msra.mxu1 %v5642_v37  ;;  %7030 = vmatprep.subr.bf16.mxu0 %v5635_v38  ;;  %v5687_v37 = vld [vmem:[%s8149_s9 + $0x710] sm:$0xff]  }
 0x159   : > { %7062 = vmatprep.subr.bf16.mxu1 %v5651_v39  ;;  %v5703_v38 = vld [vmem:[%s8149_s9 + $0x790] sm:$0xff]   ;;  %v5696_v39 = vld [vmem:[%s8149_s9 + $0x758] sm:$0xff]  }
 0x15b   : > { %7032 = vmatpush3.bf16.msra.mxu0 %v5627_v41  ;;  %v5688_v41 = vld [vmem:[%s8149_s9 + $0x718] sm:$0xff]  }
 0x15c   : > { %7064 = vmatpush3.bf16.msra.mxu1 %v5643_v42  ;;  %7034 = vmatprep.subr.bf16.mxu0 %v5636_v43  ;;  %v5704_v42 = vld [vmem:[%s8149_s9 + $0x798] sm:$0xff]   ;;  %v5697_v43 = vld [vmem:[%s8149_s9 + $0x760] sm:$0xff]  }
 0x15d   : > { %7066 = vmatprep.subr.bf16.mxu1 %v5652_v44  ;;  %v5713_v44 = vld [vmem:[%s8149_s9 + $0x7e0] sm:$0xff]  }
 0x15f   : > { %7036 = vmatpush3.bf16.msra.mxu0 %v5628_v46  ;;  %v5705_v46 = vld [vmem:[%s8149_s9 + $0x7a0] sm:$0xff]  }
 0x160   : > { %7068 = vmatpush3.bf16.msra.mxu1 %v5644_v47  ;;  %7070 = vmatprep.subr.bf16.mxu0 %v5661_v48  ;;  %v5698_v47 = vld [vmem:[%s8149_s9 + $0x768] sm:$0xff]  }
 0x161   : > { %7102 = vmatprep.subr.bf16.mxu1 %v5677_v49  ;;  %v5714_v48 = vld [vmem:[%s8149_s9 + $0x7e8] sm:$0xff]  }
 0x162   : > { %2859 = vmatmul.mubr.f32.vlgmr.msra.gmra.mrb[10].mxu0 %v8389_v11  ;;  %v5674_v11 = vld [vmem:[%s8149_s9 + $0x6a8] sm:$0xff]  }
 0x163   : > { %2929 = vmatmul.mubr.f32.vlgmr.msra.gmra.mrb[10].mxu1 %v8392_v12  ;;  %7072 = vmatpush3.bf16.msra.mxu0 %v5653_v52  ;;  %v5667_v12 = vld [vmem:[%s8149_s9 + $0x670] sm:$0xff]   ;;  %v5690_v49 = vld [vmem:[%s8149_s9 + $0x728] sm:$0xff]  }
 0x164   : > { %7104 = vmatpush3.bf16.msra.mxu1 %v5669_v53  ;;  %7074 = vmatprep.subr.bf16.mxu0 %v5662_v54  ;;  %v5699_v53 = vld [vmem:[%s8149_s9 + $0x770] sm:$0xff]  }
 0x165   : > { %7106 = vmatprep.subr.bf16.mxu1 %v5678_v55  ;;  %2998 = vmatprep.mubr.f32.mxu0 %v1959_v56  ;;  %v5715_v54 = vld [vmem:[%s8149_s9 + $0x7f0] sm:$0xff]  }
 0x166   : > { %3068 = vmatprep.mubr.f32.mxu1 %v1960_v57  ;;  %v290_v57 = vld [vmem:[%s8140_s6 + $0x40] sm:$0xff] }
 0x167   : > { %7076 = vmatpush3.bf16.msra.mxu0 %v5654_v58 }
 0x168   : > { %7108 = vmatpush3.bf16.msra.mxu1 %v5670_v59  ;;  %7078 = vmatprep.subr.bf16.mxu0 %v5663_v60  ;;  %v5691_v60 = vld [vmem:[%s8149_s9 + $0x730] sm:$0xff]  }
 0x169   : > { %7110 = vmatprep.subr.bf16.mxu1 %v5679_v61  ;;  %v5707_v61 = vld [vmem:[%s8149_s9 + $0x7b0] sm:$0xff]  }
 0x16b   : > { %7080 = vmatpush3.bf16.msra.mxu0 %v5655_v62 }
 0x16c   : > { %7112 = vmatpush3.bf16.msra.mxu1 %v5671_v63  ;;  %7082 = vmatprep.subr.bf16.mxu0 %v5664_v0  ;;  %v5700_v63 = vld [vmem:[%s8149_s9 + $0x778] sm:$0xff]  }
 0x16d   : > { %7114 = vmatprep.subr.bf16.mxu1 %v5680_v1  ;;  %v5716_v0 = vld [vmem:[%s8149_s9 + $0x7f8] sm:$0xff]   ;;  %v1978_v1 = vcombine.high %v290_v57, %v290_v57 }
 0x16f   : > { %7084 = vmatpush3.bf16.msra.mxu0 %v5656_v2  ;;  %v5692_v2 = vld [vmem:[%s8149_s9 + $0x738] sm:$0xff]  }
 0x170   : > { %7116 = vmatpush3.bf16.msra.mxu1 %v5672_v3  ;;  %7086 = vmatprep.subr.bf16.mxu0 %v5665_v4  ;;  %v5708_v3 = vld [vmem:[%s8149_s9 + $0x7b8] sm:$0xff]   ;;  %v5725_v4 = vld [vmem:[%s8149_s9 + $0x840] sm:$0xff]  }
 0x171   : > { %7118 = vmatprep.subr.bf16.mxu1 %v5681_v5  ;;  %v5741_v5 = vld [vmem:[%s8149_s9 + $0x8c0] sm:$0xff]  }
 0x173   : > { %7088 = vmatpush3.bf16.msra.mxu0 %v5657_v6  ;;  %v8526_v6 = vrot.slane %v290_v57, %v8182_v18  ;;  %v5758_v57 = vld [vmem:[%s8149_s9 + $0x948] sm:$0xff]  }
 0x174   : > { %7120 = vmatpush3.bf16.msra.mxu1 %v5673_v7  ;;  %7090 = vmatprep.subr.bf16.mxu0 %v5666_v8  ;;  %v8529_v7 = vrot.slane %v1978_v1, %v8182_v18  ;;  %v5717_v8 = vld [vmem:[%s8149_s9 + $0x800] sm:$0xff]   ;;  %v5751_v1 = vld [vmem:[%s8149_s9 + $0x910] sm:$0xff]  }
 0x175   : > { %7122 = vmatprep.subr.bf16.mxu1 %v5682_v9  ;;  %v5733_v9 = vld [vmem:[%s8149_s9 + $0x880] sm:$0xff]  }
 0x177   : > { %7092 = vmatpush3.bf16.msra.mxu0 %v5658_v10  ;;  %v5726_v10 = vld [vmem:[%s8149_s9 + $0x848] sm:$0xff]  }
 0x178   : > { %7124 = vmatpush3.bf16.msra.mxu1 %v5674_v11  ;;  %7094 = vmatprep.subr.bf16.mxu0 %v5667_v12  ;;  %v5742_v11 = vld [vmem:[%s8149_s9 + $0x8c8] sm:$0xff]   ;;  %v1993_v12 = vcombine.high %v8526_v6, %v8526_v6 }
 0x179   : > { %7126 = vmatprep.subr.bf16.mxu1 %v5683_v13  ;;  %v1994_v13 = vcombine.high %v8529_v7, %v8529_v7 }
 0x17b   : > { %7096 = vmatpush3.bf16.msra.mxu0 %v5659_v15  ;;  %v5734_v15 = vld [vmem:[%s8149_s9 + $0x888] sm:$0xff]  }
 0x17c   : > { %7128 = vmatpush3.bf16.msra.mxu1 %v5675_v16  ;;  %7098 = vmatprep.subr.bf16.mxu0 %v5668_v17  ;;  %v5727_v16 = vld [vmem:[%s8149_s9 + $0x850] sm:$0xff]  }
 0x17d   : > { %7130 = vmatprep.subr.bf16.mxu1 %v5684_v19  ;;  %v5743_v17 = vld [vmem:[%s8149_s9 + $0x8d0] sm:$0xff]  }
 0x17e   : > { %v5719_v19 = vld [vmem:[%s8149_s9 + $0x810] sm:$0xff]  }
 0x17f   : > { %7100 = vmatpush3.bf16.msra.mxu0 %v5660_v21  ;;  %v5728_v21 = vld [vmem:[%s8149_s9 + $0x858] sm:$0xff]  }
 0x180   : > { %7132 = vmatpush3.bf16.msra.mxu1 %v5676_v22  ;;  %7134 = vmatprep.subr.bf16.mxu0 %v5693_v23  ;;  %v5744_v22 = vld [vmem:[%s8149_s9 + $0x8d8] sm:$0xff]  }
 0x181   : > { %7166 = vmatprep.subr.bf16.mxu1 %v5709_v24  ;;  %v5720_v23 = vld [vmem:[%s8149_s9 + $0x818] sm:$0xff]  }
 0x182   : > { %2999 = vmatmul.mubr.f32.vlgmr.msra.gmra.mrb[12].mxu0 %v8434_v50  ;;  %v5706_v50 = vld [vmem:[%s8149_s9 + $0x7a8] sm:$0xff]   ;;  %v5736_v24 = vld [vmem:[%s8149_s9 + $0x898] sm:$0xff]  }
 0x183   : > { %3069 = vmatmul.mubr.f32.vlgmr.msra.gmra.mrb[12].mxu1 %v8437_v51  ;;  %7136 = vmatpush3.bf16.msra.mxu0 %v5685_v27  ;;  %v5721_v27 = vld [vmem:[%s8149_s9 + $0x820] sm:$0xff]  }
 0x184   : > { %7168 = vmatpush3.bf16.msra.mxu1 %v5701_v28  ;;  %7138 = vmatprep.subr.bf16.mxu0 %v5694_v29  ;;  %v5737_v28 = vld [vmem:[%s8149_s9 + $0x8a0] sm:$0xff]   ;;  %v5730_v29 = vld [vmem:[%s8149_s9 + $0x868] sm:$0xff]  }
 0x185   : > { %7170 = vmatprep.subr.bf16.mxu1 %v5710_v30  ;;  %3138 = vmatprep.mubr.f32.mxu0 %v1976_v31  ;;  %v5746_v30 = vld [vmem:[%s8149_s9 + $0x8e8] sm:$0xff]  }
 0x186   : > { %3208 = vmatprep.mubr.f32.mxu1 %v1977_v32  ;;  %v5722_v31 = vld [vmem:[%s8149_s9 + $0x828] sm:$0xff]  }
 0x187   : > { %7140 = vmatpush3.bf16.msra.mxu0 %v5686_v33  ;;  %v5738_v32 = vld [vmem:[%s8149_s9 + $0x8a8] sm:$0xff]  }
 0x188   : > { %7172 = vmatpush3.bf16.msra.mxu1 %v5702_v34  ;;  %7142 = vmatprep.subr.bf16.mxu0 %v5695_v35  ;;  %v5731_v35 = vld [vmem:[%s8149_s9 + $0x870] sm:$0xff]  }
 0x189   : > { %7174 = vmatprep.subr.bf16.mxu1 %v5711_v36  ;;  %v5747_v36 = vld [vmem:[%s8149_s9 + $0x8f0] sm:$0xff]  }
 0x18b   : > { %7144 = vmatpush3.bf16.msra.mxu0 %v5687_v37 }
 0x18c   : > { %7176 = vmatpush3.bf16.msra.mxu1 %v5703_v38  ;;  %7146 = vmatprep.subr.bf16.mxu0 %v5696_v39  ;;  %v291_v39 = vld [vmem:[%s8140_s6 + $0x48] sm:$0xff] }
 0x18d   : > { %7178 = vmatprep.subr.bf16.mxu1 %v5712_v40 }
 0x18f   : > { %7148 = vmatpush3.bf16.msra.mxu0 %v5688_v41 }
 0x190   : > { %7180 = vmatpush3.bf16.msra.mxu1 %v5704_v42  ;;  %7150 = vmatprep.subr.bf16.mxu0 %v5697_v43  ;;  %v5723_v42 = vld [vmem:[%s8149_s9 + $0x830] sm:$0xff]  }
 0x191   : > { %7182 = vmatprep.subr.bf16.mxu1 %v5713_v44  ;;  %v5739_v43 = vld [vmem:[%s8149_s9 + $0x8b0] sm:$0xff]  }
 0x193   : > { %7152 = vmatpush3.bf16.msra.mxu0 %v5689_v45  ;;  %v5732_v45 = vld [vmem:[%s8149_s9 + $0x878] sm:$0xff]  }
 0x194   : > { %7184 = vmatpush3.bf16.msra.mxu1 %v5705_v46  ;;  %7154 = vmatprep.subr.bf16.mxu0 %v5698_v47  ;;  %v5748_v46 = vld [vmem:[%s8149_s9 + $0x8f8] sm:$0xff]   ;;  %v1995_v47 = vcombine.high %v291_v39, %v291_v39 }
 0x195   : > { %7186 = vmatprep.subr.bf16.mxu1 %v5714_v48  ;;  %v5877_v51 = vpop.f32.mrb[0].mxu0 }
 0x196   : > { %v5912_v52 = vpop.f32.mrb[0].mxu1  ;;  %v5878_v55 = vpop.f32.mrb[1].mxu0 }
 0x197   : > { %v5913_v56 = vpop.f32.mrb[1].mxu1  ;;  %v5879_v58 = vadd.f32 %v5878_v55, %v5877_v51  ;;  %7156 = vmatpush3.bf16.msra.mxu0 %v5690_v49  ;;  %v5724_v49 = vld [vmem:[%s8149_s9 + $0x838] sm:$0xff]   ;;  %v5757_v51 = vld [vmem:[%s8149_s9 + $0x940] sm:$0xff]  }
 0x198   : > { %v5914_v59 = vadd.f32 %v5913_v56, %v5912_v52  ;;  %7188 = vmatpush3.bf16.msra.mxu1 %v5706_v50  ;;  %7158 = vmatprep.subr.bf16.mxu0 %v5699_v53  ;;  %v5740_v50 = vld [vmem:[%s8149_s9 + $0x8b8] sm:$0xff]   ;;  %v5773_v52 = vld [vmem:[%s8149_s9 + $0x9c0] sm:$0xff]   ;;  %v8574_v53 = vrot.slane %v291_v39, %v8182_v18 }
 0x199   : > { %7190 = vmatprep.subr.bf16.mxu1 %v5715_v54  ;;  %v8577_v54 = vrot.slane %v1995_v47, %v8182_v18  ;;  %v5749_v55 = vld [vmem:[%s8149_s9 + $0x900] sm:$0xff]   ;;  %v5807_v47 = vld [vmem:[%s8149_s9 + $0xad0] sm:$0xff]  }
 0x19a   : > { %v8517_v62 = vadd.f32 %v5914_v59, %v5879_v58  ;;  %v5765_v56 = vld [vmem:[%s8149_s9 + $0x980] sm:$0xff]   ;;  %v5774_v58 = vld [vmem:[%s8149_s9 + $0x9c8] sm:$0xff]   ;;  %v2010_v59 = vcombine.high %v8574_v53, %v8574_v53 }
 0x19b   : > { %7160 = vmatpush3.bf16.msra.mxu0 %v5691_v60  ;;  %v2011_v60 = vcombine.high %v8577_v54, %v8577_v54  ;;  %v5797_v39 = vld [vmem:[%s8149_s9 + $0xa80] sm:$0xff]  }
 0x19c   : > { %7192 = vmatpush3.bf16.msra.mxu1 %v5707_v61  ;;  %7162 = vmatprep.subr.bf16.mxu0 %v5700_v63  ;;  %v5750_v61 = vld [vmem:[%s8149_s9 + $0x908] sm:$0xff]   ;;  %v5759_v63 = vld [vmem:[%s8149_s9 + $0x950] sm:$0xff]  }
 0x19d   : > { %7194 = vmatprep.subr.bf16.mxu1 %v5716_v0  ;;  %v5775_v0 = vld [vmem:[%s8149_s9 + $0x9d0] sm:$0xff]  }
 0x19f   : > { %7164 = vmatpush3.bf16.msra.mxu0 %v5692_v2  ;;  %v5767_v2 = vld [vmem:[%s8149_s9 + $0x990] sm:$0xff]  }
 0x1a0   : > { %7196 = vmatpush3.bf16.msra.mxu1 %v5708_v3  ;;  %7198 = vmatprep.subr.bf16.mxu0 %v5725_v4  ;;  %v5760_v3 = vld [vmem:[%s8149_s9 + $0x958] sm:$0xff]  }
 0x1a1   : > { %7230 = vmatprep.subr.bf16.mxu1 %v5741_v5  ;;  %v5776_v4 = vld [vmem:[%s8149_s9 + $0x9d8] sm:$0xff]  }
 0x1a2   : > { %3139 = vmatmul.mubr.f32.vlgmr.msra.gmra.mrb[14].mxu0 %v8479_v25  ;;  %v5729_v25 = vld [vmem:[%s8149_s9 + $0x860] sm:$0xff]   ;;  %v5752_v5 = vld [vmem:[%s8149_s9 + $0x918] sm:$0xff]  }
 0x1a3   : > { %3209 = vmatmul.mubr.f32.vlgmr.msra.gmra.mrb[14].mxu1 %v8482_v26  ;;  %7200 = vmatpush3.bf16.msra.mxu0 %v5717_v8  ;;  %v5745_v26 = vld [vmem:[%s8149_s9 + $0x8e0] sm:$0xff]  }
 0x1a4   : > { %7232 = vmatpush3.bf16.msra.mxu1 %v5733_v9  ;;  %7202 = vmatprep.subr.bf16.mxu0 %v5726_v10  ;;  %v5777_v8 = vld [vmem:[%s8149_s9 + $0x9e0] sm:$0xff]  }
 0x1a5   : > { %7234 = vmatprep.subr.bf16.mxu1 %v5742_v11  ;;  %3278 = vmatprep.mubr.f32.mxu0 %v1993_v12  ;;  %v5753_v9 = vld [vmem:[%s8149_s9 + $0x920] sm:$0xff]   ;;  %v5762_v11 = vld [vmem:[%s8149_s9 + $0x968] sm:$0xff]  }
 0x1a6   : > { %3348 = vmatprep.mubr.f32.mxu1 %v1994_v13  ;;  %v5769_v10 = vld [vmem:[%s8149_s9 + $0x9a0] sm:$0xff]   ;;  %v5778_v12 = vld [vmem:[%s8149_s9 + $0x9e8] sm:$0xff]  }
 0x1a7   : > { %7204 = vmatpush3.bf16.msra.mxu0 %v5718_v14  ;;  %v5754_v13 = vld [vmem:[%s8149_s9 + $0x928] sm:$0xff]  }
 0x1a8   : > { %7236 = vmatpush3.bf16.msra.mxu1 %v5734_v15  ;;  %7206 = vmatprep.subr.bf16.mxu0 %v5727_v16  ;;  %v5770_v14 = vld [vmem:[%s8149_s9 + $0x9a8] sm:$0xff]  }
 0x1a9   : > { %7238 = vmatprep.subr.bf16.mxu1 %v5743_v17  ;;  %v5763_v17 = vld [vmem:[%s8149_s9 + $0x970] sm:$0xff]  }
 0x1ab   : > { %7208 = vmatpush3.bf16.msra.mxu0 %v5719_v19  ;;  %v5779_v19 = vld [vmem:[%s8149_s9 + $0x9f0] sm:$0xff]  }
 0x1ac   : > { %7240 = vmatpush3.bf16.msra.mxu1 %v5735_v20  ;;  %7210 = vmatprep.subr.bf16.mxu0 %v5728_v21 }
 0x1ad   : > { %7242 = vmatprep.subr.bf16.mxu1 %v5744_v22  ;;  %v292_v22 = vld [vmem:[%s8140_s6 + $0x50] sm:$0xff] }
 0x1af   : > { %7212 = vmatpush3.bf16.msra.mxu0 %v5720_v23 }
 0x1b0   : > { %7244 = vmatpush3.bf16.msra.mxu1 %v5736_v24  ;;  %7214 = vmatprep.subr.bf16.mxu0 %v5729_v25  ;;  %v5755_v25 = vld [vmem:[%s8149_s9 + $0x930] sm:$0xff]  }
 0x1b1   : > { %7246 = vmatprep.subr.bf16.mxu1 %v5745_v26  ;;  %v5771_v26 = vld [vmem:[%s8149_s9 + $0x9b0] sm:$0xff]  }
 0x1b3   : > { %7216 = vmatpush3.bf16.msra.mxu0 %v5721_v27 }
 0x1b4   : > { %7248 = vmatpush3.bf16.msra.mxu1 %v5737_v28  ;;  %7218 = vmatprep.subr.bf16.mxu0 %v5730_v29  ;;  %v5764_v28 = vld [vmem:[%s8149_s9 + $0x978] sm:$0xff]  }
 0x1b5   : > { %7250 = vmatprep.subr.bf16.mxu1 %v5746_v30  ;;  %v5947_v33 = vpop.f32.mrb[2].mxu0  ;;  %v5780_v29 = vld [vmem:[%s8149_s9 + $0x9f8] sm:$0xff]   ;;  %v2012_v30 = vcombine.high %v292_v22, %v292_v22 }
 0x1b6   : > { %v5982_v34 = vpop.f32.mrb[2].mxu1  ;;  %v5948_v37 = vpop.f32.mrb[3].mxu0 }
 0x1b7   : > { %v5983_v38 = vpop.f32.mrb[3].mxu1  ;;  %v5949_v40 = vadd.f32 %v5948_v37, %v5947_v33  ;;  %7220 = vmatpush3.bf16.msra.mxu0 %v5722_v31  ;;  %v5772_v33 = vld [vmem:[%s8149_s9 + $0x9b8] sm:$0xff]   ;;  %v8625_v37 = vrot.slane %v2012_v30, %v8182_v18  ;;  %v5815_v30 = vld [vmem:[%s8149_s9 + $0xb10] sm:$0xff]  }
 0x1b8   : > { %v5984_v41 = vadd.f32 %v5983_v38, %v5982_v34  ;;  %7252 = vmatpush3.bf16.msra.mxu1 %v5738_v32  ;;  %7222 = vmatprep.subr.bf16.mxu0 %v5731_v35  ;;  %v5756_v32 = vld [vmem:[%s8149_s9 + $0x938] sm:$0xff]   ;;  %v5789_v34 = vld [vmem:[%s8149_s9 + $0xa40] sm:$0xff]  }
 0x1b9   : > { %7254 = vmatprep.subr.bf16.mxu1 %v5747_v36  ;;  %v2301_v44 = vadd.f32 %v5949_v40, %v8517_v62  ;;  %v5766_v62 = vld [vmem:[%s8149_s9 + $0x988] sm:$0xff]   ;;  %v5805_v35 = vld [vmem:[%s8149_s9 + $0xac0] sm:$0xff]   ;;  %v8622_v36 = vrot.slane %v292_v22, %v8182_v18 }
 0x1ba   : > { %v5781_v38 = vld [vmem:[%s8149_s9 + $0xa00] sm:$0xff]   ;;  %v5790_v40 = vld [vmem:[%s8149_s9 + $0xa48] sm:$0xff]  }
 0x1bb   : > { %v8567_v48 = vadd.f32 %v5984_v41, %v2301_v44  ;;  %7224 = vmatpush3.bf16.msra.mxu0 %v5723_v42  ;;  %v5806_v41 = vld [vmem:[%s8149_s9 + $0xac8] sm:$0xff]   ;;  %v2027_v42 = vcombine.high %v8622_v36, %v8622_v36  ;;  %v5829_v22 = vld [vmem:[%s8149_s9 + $0xb80] sm:$0xff]  }
 0x1bc   : > { %7256 = vmatpush3.bf16.msra.mxu1 %v5739_v43  ;;  %7226 = vmatprep.subr.bf16.mxu0 %v5732_v45  ;;  %v2028_v43 = vcombine.high %v8625_v37, %v8625_v37  ;;  %v5782_v44 = vld [vmem:[%s8149_s9 + $0xa08] sm:$0xff]  }
 0x1bd   : > { %7258 = vmatprep.subr.bf16.mxu1 %v5748_v46  ;;  %v5798_v45 = vld [vmem:[%s8149_s9 + $0xa88] sm:$0xff]   ;;  %v5791_v46 = vld [vmem:[%s8149_s9 + $0xa50] sm:$0xff]  }
 0x1bf   : > { %7228 = vmatpush3.bf16.msra.mxu0 %v5724_v49  ;;  %v5799_v49 = vld [vmem:[%s8149_s9 + $0xa90] sm:$0xff]  }
 0x1c0   : > { %7260 = vmatpush3.bf16.msra.mxu1 %v5740_v50  ;;  %7262 = vmatprep.subr.bf16.mxu0 %v5757_v51  ;;  %v5792_v50 = vld [vmem:[%s8149_s9 + $0xa58] sm:$0xff]  }
 0x1c1   : > { %7294 = vmatprep.subr.bf16.mxu1 %v5773_v52  ;;  %v5808_v51 = vld [vmem:[%s8149_s9 + $0xad8] sm:$0xff]  }
 0x1c2   : > { %3279 = vmatmul.mubr.f32.vlgmr.msra.gmra.mrb[16].mxu0 %v8526_v6  ;;  %v5768_v6 = vld [vmem:[%s8149_s9 + $0x998] sm:$0xff]  }
 0x1c3   : > { %3349 = vmatmul.mubr.f32.vlgmr.msra.gmra.mrb[16].mxu1 %v8529_v7  ;;  %7264 = vmatpush3.bf16.msra.mxu0 %v5749_v55  ;;  %v5761_v7 = vld [vmem:[%s8149_s9 + $0x960] sm:$0xff]   ;;  %v5784_v52 = vld [vmem:[%s8149_s9 + $0xa18] sm:$0xff]  }
 0x1c4   : > { %7296 = vmatpush3.bf16.msra.mxu1 %v5765_v56  ;;  %7266 = vmatprep.subr.bf16.mxu0 %v5758_v57  ;;  %v5809_v55 = vld [vmem:[%s8149_s9 + $0xae0] sm:$0xff]  }
 0x1c5   : > { %7298 = vmatprep.subr.bf16.mxu1 %v5774_v58  ;;  %3418 = vmatprep.mubr.f32.mxu0 %v2010_v59  ;;  %v5785_v56 = vld [vmem:[%s8149_s9 + $0xa20] sm:$0xff]   ;;  %v5794_v58 = vld [vmem:[%s8149_s9 + $0xa68] sm:$0xff]  }
 0x1c6   : > { %3488 = vmatprep.mubr.f32.mxu1 %v2011_v60  ;;  %v5801_v57 = vld [vmem:[%s8149_s9 + $0xaa0] sm:$0xff]   ;;  %v5810_v59 = vld [vmem:[%s8149_s9 + $0xae8] sm:$0xff]  }
 0x1c7   : > { %7268 = vmatpush3.bf16.msra.mxu0 %v5750_v61  ;;  %v5786_v60 = vld [vmem:[%s8149_s9 + $0xa28] sm:$0xff]  }
 0x1c8   : > { %7300 = vmatpush3.bf16.msra.mxu1 %v5766_v62  ;;  %7270 = vmatprep.subr.bf16.mxu0 %v5759_v63  ;;  %v5802_v61 = vld [vmem:[%s8149_s9 + $0xaa8] sm:$0xff]  }
 0x1c9   : > { %7302 = vmatprep.subr.bf16.mxu1 %v5775_v0  ;;  %v5795_v0 = vld [vmem:[%s8149_s9 + $0xa70] sm:$0xff]  }
 0x1cb   : > { %7272 = vmatpush3.bf16.msra.mxu0 %v5751_v1  ;;  %v5811_v1 = vld [vmem:[%s8149_s9 + $0xaf0] sm:$0xff]  }
 0x1cc   : > { %7304 = vmatpush3.bf16.msra.mxu1 %v5767_v2  ;;  %7274 = vmatprep.subr.bf16.mxu0 %v5760_v3 }
 0x1cd   : > { %7306 = vmatprep.subr.bf16.mxu1 %v5776_v4  ;;  %v293_v4 = vld [vmem:[%s8140_s6 + $0x58] sm:$0xff] }
 0x1cf   : > { %7276 = vmatpush3.bf16.msra.mxu0 %v5752_v5 }
 0x1d0   : > { %7308 = vmatpush3.bf16.msra.mxu1 %v5768_v6  ;;  %7278 = vmatprep.subr.bf16.mxu0 %v5761_v7  ;;  %v5787_v7 = vld [vmem:[%s8149_s9 + $0xa30] sm:$0xff]  }
 0x1d1   : > { %7310 = vmatprep.subr.bf16.mxu1 %v5777_v8  ;;  %v5803_v8 = vld [vmem:[%s8149_s9 + $0xab0] sm:$0xff]  }
 0x1d3   : > { %7280 = vmatpush3.bf16.msra.mxu0 %v5753_v9 }
 0x1d4   : > { %7312 = vmatpush3.bf16.msra.mxu1 %v5769_v10  ;;  %7282 = vmatprep.subr.bf16.mxu0 %v5762_v11  ;;  %v5796_v10 = vld [vmem:[%s8149_s9 + $0xa78] sm:$0xff]  }
 0x1d5   : > { %7314 = vmatprep.subr.bf16.mxu1 %v5778_v12  ;;  %v6017_v15 = vpop.f32.mrb[4].mxu0  ;;  %v5812_v11 = vld [vmem:[%s8149_s9 + $0xaf8] sm:$0xff]   ;;  %v2029_v12 = vcombine.high %v293_v4, %v293_v4 }
 0x1d6   : > { %v6052_v16 = vpop.f32.mrb[4].mxu1  ;;  %v6018_v20 = vpop.f32.mrb[5].mxu0 }
 0x1d7   : > { %v6053_v21 = vpop.f32.mrb[5].mxu1  ;;  %v6019_v23 = vadd.f32 %v6018_v20, %v6017_v15  ;;  %7284 = vmatpush3.bf16.msra.mxu0 %v5754_v13  ;;  %v5804_v15 = vld [vmem:[%s8149_s9 + $0xab8] sm:$0xff]   ;;  %v8673_v20 = vrot.slane %v2029_v12, %v8182_v18 }
 0x1d8   : > { %v6054_v24 = vadd.f32 %v6053_v21, %v6052_v16  ;;  %7316 = vmatpush3.bf16.msra.mxu1 %v5770_v14  ;;  %7286 = vmatprep.subr.bf16.mxu0 %v5763_v17  ;;  %v5788_v14 = vld [vmem:[%s8149_s9 + $0xa38] sm:$0xff]   ;;  %v5821_v16 = vld [vmem:[%s8149_s9 + $0xb40] sm:$0xff]  }
 0x1d9   : > { %7318 = vmatprep.subr.bf16.mxu1 %v5779_v19  ;;  %v2441_v27 = vadd.f32 %v6019_v23, %v8567_v48  ;;  %v5783_v48 = vld [vmem:[%s8149_s9 + $0xa10] sm:$0xff]   ;;  %v5837_v17 = vld [vmem:[%s8149_s9 + $0xbc0] sm:$0xff]   ;;  %v8670_v19 = vrot.slane %v293_v4, %v8182_v18  ;;  %v5822_v23 = vld [vmem:[%s8149_s9 + $0xb48] sm:$0xff]  }
 0x1da   : > { %v5813_v21 = vld [vmem:[%s8149_s9 + $0xb00] sm:$0xff]   ;;  %v5814_v18 = vld [vmem:[%s8149_s9 + $0xb08] sm:$0xff]  }
 0x1db   : > { %v8615_v31 = vadd.f32 %v6054_v24, %v2441_v27  ;;  %7288 = vmatpush3.bf16.msra.mxu0 %v5755_v25  ;;  %v5838_v24 = vld [vmem:[%s8149_s9 + $0xbc8] sm:$0xff]   ;;  %v2044_v25 = vcombine.high %v8670_v19, %v8670_v19 }
 0x1dc   : > { %7320 = vmatpush3.bf16.msra.mxu1 %v5771_v26  ;;  %7290 = vmatprep.subr.bf16.mxu0 %v5764_v28  ;;  %v2045_v26 = vcombine.high %v8673_v20, %v8673_v20  ;;  %v5830_v27 = vld [vmem:[%s8149_s9 + $0xb88] sm:$0xff]   ;;  %v5823_v28 = vld [vmem:[%s8149_s9 + $0xb50] sm:$0xff]  }
 0x1dd   : > { %7322 = vmatprep.subr.bf16.mxu1 %v5780_v29  ;;  %v5839_v29 = vld [vmem:[%s8149_s9 + $0xbd0] sm:$0xff]  }
 0x1df   : > { %7292 = vmatpush3.bf16.msra.mxu0 %v5756_v32  ;;  %v5824_v32 = vld [vmem:[%s8149_s9 + $0xb58] sm:$0xff]  }
 0x1e0   : > { %7324 = vmatpush3.bf16.msra.mxu1 %v5772_v33  ;;  %7326 = vmatprep.subr.bf16.mxu0 %v5789_v34  ;;  %v5840_v33 = vld [vmem:[%s8149_s9 + $0xbd8] sm:$0xff]  }
 0x1e1   : > { %7358 = vmatprep.subr.bf16.mxu1 %v5805_v35  ;;  %v5816_v34 = vld [vmem:[%s8149_s9 + $0xb18] sm:$0xff]  }
 0x1e2   : > { %3419 = vmatmul.mubr.f32.vlgmr.msra.gmra.mrb[18].mxu0 %v8574_v53  ;;  %v5800_v53 = vld [vmem:[%s8149_s9 + $0xa98] sm:$0xff]  }
 0x1e3   : > { %3489 = vmatmul.mubr.f32.vlgmr.msra.gmra.mrb[18].mxu1 %v8577_v54  ;;  %7328 = vmatpush3.bf16.msra.mxu0 %v5781_v38  ;;  %v5793_v54 = vld [vmem:[%s8149_s9 + $0xa60] sm:$0xff]   ;;  %v5832_v35 = vld [vmem:[%s8149_s9 + $0xb98] sm:$0xff]  }
 0x1e4   : > { %7360 = vmatpush3.bf16.msra.mxu1 %v5797_v39  ;;  %7330 = vmatprep.subr.bf16.mxu0 %v5790_v40  ;;  %v5817_v38 = vld [vmem:[%s8149_s9 + $0xb20] sm:$0xff]   ;;  %v5826_v40 = vld [vmem:[%s8149_s9 + $0xb68] sm:$0xff]  }
 0x1e5   : > { %7362 = vmatprep.subr.bf16.mxu1 %v5806_v41  ;;  %3558 = vmatprep.mubr.f32.mxu0 %v2027_v42  ;;  %v5833_v39 = vld [vmem:[%s8149_s9 + $0xba0] sm:$0xff]   ;;  %v5842_v41 = vld [vmem:[%s8149_s9 + $0xbe8] sm:$0xff]  }
 0x1e6   : > { %3628 = vmatprep.mubr.f32.mxu1 %v2028_v43  ;;  %v5818_v42 = vld [vmem:[%s8149_s9 + $0xb28] sm:$0xff]  }
 0x1e7   : > { %7332 = vmatpush3.bf16.msra.mxu0 %v5782_v44  ;;  %v5834_v43 = vld [vmem:[%s8149_s9 + $0xba8] sm:$0xff]  }
 0x1e8   : > { %7364 = vmatpush3.bf16.msra.mxu1 %v5798_v45  ;;  %7334 = vmatprep.subr.bf16.mxu0 %v5791_v46  ;;  %v5827_v46 = vld [vmem:[%s8149_s9 + $0xb70] sm:$0xff]  }
 0x1e9   : > { %7366 = vmatprep.subr.bf16.mxu1 %v5807_v47  ;;  %v5843_v47 = vld [vmem:[%s8149_s9 + $0xbf0] sm:$0xff]  }
 0x1eb   : > { %7336 = vmatpush3.bf16.msra.mxu0 %v5783_v48 }
 0x1ec   : > { %7368 = vmatpush3.bf16.msra.mxu1 %v5799_v49  ;;  %7338 = vmatprep.subr.bf16.mxu0 %v5792_v50 }
 0x1ed   : > { %7370 = vmatprep.subr.bf16.mxu1 %v5808_v51 }
 0x1ef   : > { %7340 = vmatpush3.bf16.msra.mxu0 %v5784_v52  ;;  %v5819_v52 = vld [vmem:[%s8149_s9 + $0xb30] sm:$0xff]  }
 0x1f0   : > { %7372 = vmatpush3.bf16.msra.mxu1 %v5800_v53  ;;  %7342 = vmatprep.subr.bf16.mxu0 %v5793_v54  ;;  %v5835_v53 = vld [vmem:[%s8149_s9 + $0xbb0] sm:$0xff]  }
 0x1f1   : > { %7374 = vmatprep.subr.bf16.mxu1 %v5809_v55  ;;  %v5828_v55 = vld [vmem:[%s8149_s9 + $0xb78] sm:$0xff]  }
 0x1f3   : > { %7344 = vmatpush3.bf16.msra.mxu0 %v5785_v56  ;;  %v5844_v56 = vld [vmem:[%s8149_s9 + $0xbf8] sm:$0xff]  }
 0x1f4   : > { %7376 = vmatpush3.bf16.msra.mxu1 %v5801_v57  ;;  %7346 = vmatprep.subr.bf16.mxu0 %v5794_v58  ;;  %v5820_v58 = vld [vmem:[%s8149_s9 + $0xb38] sm:$0xff]  }
 0x1f5   : > { %7378 = vmatprep.subr.bf16.mxu1 %v5810_v59  ;;  %v6087_v62 = vpop.f32.mrb[6].mxu0  ;;  %v5836_v59 = vld [vmem:[%s8149_s9 + $0xbb8] sm:$0xff]  }
 0x1f6   : > { %v6122_v63 = vpop.f32.mrb[6].mxu1  ;;  %v6088_v2 = vpop.f32.mrb[7].mxu0 }
 0x1f7   : > { %v6123_v3 = vpop.f32.mrb[7].mxu1  ;;  %v6089_v5 = vadd.f32 %v6088_v2, %v6087_v62  ;;  %7348 = vmatpush3.bf16.msra.mxu0 %v5786_v60 }
 0x1f8   : > { %v6124_v6 = vadd.f32 %v6123_v3, %v6122_v63  ;;  %7380 = vmatpush3.bf16.msra.mxu1 %v5802_v61  ;;  %7350 = vmatprep.subr.bf16.mxu0 %v5795_v0 }
 0x1f9   : > { %7382 = vmatprep.subr.bf16.mxu1 %v5811_v1  ;;  %v2581_v9 = vadd.f32 %v6089_v5, %v8615_v31  ;;  %v5831_v31 = vld [vmem:[%s8149_s9 + $0xb90] sm:$0xff]  }
 0x1fb   : > { %v8663_v13 = vadd.f32 %v6124_v6, %v2581_v9  ;;  %7352 = vmatpush3.bf16.msra.mxu0 %v5787_v7 }
 0x1fc   : > { %7384 = vmatpush3.bf16.msra.mxu1 %v5803_v8  ;;  %7354 = vmatprep.subr.bf16.mxu0 %v5796_v10 }
 0x1fd   : > { %7386 = vmatprep.subr.bf16.mxu1 %v5812_v11 }
 0x1ff   : > { %7356 = vmatpush3.bf16.msra.mxu0 %v5788_v14 }
 0x200   : > { %7388 = vmatpush3.bf16.msra.mxu1 %v5804_v15  ;;  %7390 = vmatprep.subr.bf16.mxu0 %v5821_v16 }
 0x201   : > { %7422 = vmatprep.subr.bf16.mxu1 %v5837_v17 }
 0x202   : > { %3559 = vmatmul.mubr.f32.vlgmr.msra.gmra.mrb[20].mxu0 %v8622_v36  ;;  %v5825_v36 = vld [vmem:[%s8149_s9 + $0xb60] sm:$0xff]  }
 0x203   : > { %3629 = vmatmul.mubr.f32.vlgmr.msra.gmra.mrb[20].mxu1 %v8625_v37  ;;  %7392 = vmatpush3.bf16.msra.mxu0 %v5813_v21  ;;  %v5841_v37 = vld [vmem:[%s8149_s9 + $0xbe0] sm:$0xff]  }
 0x204   : > { %7424 = vmatpush3.bf16.msra.mxu1 %v5829_v22  ;;  %7394 = vmatprep.subr.bf16.mxu0 %v5822_v23 }
 0x205   : > { %7426 = vmatprep.subr.bf16.mxu1 %v5838_v24  ;;  %3698 = vmatprep.mubr.f32.mxu0 %v2044_v25 }
 0x206   : > { %3768 = vmatprep.mubr.f32.mxu1 %v2045_v26 }
 0x207   : > { %7396 = vmatpush3.bf16.msra.mxu0 %v5814_v18 }
 0x208   : > { %7428 = vmatpush3.bf16.msra.mxu1 %v5830_v27  ;;  %7398 = vmatprep.subr.bf16.mxu0 %v5823_v28 }
 0x209   : > { %7430 = vmatprep.subr.bf16.mxu1 %v5839_v29 }
 0x20b   : > { %7400 = vmatpush3.bf16.msra.mxu0 %v5815_v30 }
 0x20c   : > { %7432 = vmatpush3.bf16.msra.mxu1 %v5831_v31  ;;  %7402 = vmatprep.subr.bf16.mxu0 %v5824_v32 }
 0x20d   : > { %7434 = vmatprep.subr.bf16.mxu1 %v5840_v33 }
 0x20f   : > { %7404 = vmatpush3.bf16.msra.mxu0 %v5816_v34 }
 0x210   : > { %7436 = vmatpush3.bf16.msra.mxu1 %v5832_v35  ;;  %7406 = vmatprep.subr.bf16.mxu0 %v5825_v36 }
 0x211   : > { %7438 = vmatprep.subr.bf16.mxu1 %v5841_v37 }
 0x213   : > { %7408 = vmatpush3.bf16.msra.mxu0 %v5817_v38 }
 0x214   : > { %7440 = vmatpush3.bf16.msra.mxu1 %v5833_v39  ;;  %7410 = vmatprep.subr.bf16.mxu0 %v5826_v40 }
 0x215   : > { %7442 = vmatprep.subr.bf16.mxu1 %v5842_v41  ;;  %v6157_v44 = vpop.f32.mrb[8].mxu0 }
 0x216   : > { %v6192_v45 = vpop.f32.mrb[8].mxu1  ;;  %v6158_v48 = vpop.f32.mrb[9].mxu0 }
 0x217   : > { %v6193_v49 = vpop.f32.mrb[9].mxu1  ;;  %v6159_v50 = vadd.f32 %v6158_v48, %v6157_v44  ;;  %7412 = vmatpush3.bf16.msra.mxu0 %v5818_v42 }
 0x218   : > { %v6194_v51 = vadd.f32 %v6193_v49, %v6192_v45  ;;  %7444 = vmatpush3.bf16.msra.mxu1 %v5834_v43  ;;  %7414 = vmatprep.subr.bf16.mxu0 %v5827_v46 }
 0x219   : > { %7446 = vmatprep.subr.bf16.mxu1 %v5843_v47  ;;  %v2721_v54 = vadd.f32 %v6159_v50, %v8663_v13 }
 0x21b   : > { %v2791_v57 = vadd.f32 %v6194_v51, %v2721_v54  ;;  %7416 = vmatpush3.bf16.msra.mxu0 %v5819_v52  ;;  %v281_v51 = vld [vmem:[#allocation2] sm:$0x3] }
 0x21c   : > { %7448 = vmatpush3.bf16.msra.mxu1 %v5835_v53  ;;  %7418 = vmatprep.subr.bf16.mxu0 %v5828_v55  ;;  %v3921_v55 = vld [vmem:[%s8156_s3] ss:$0 sm:$0xff] (!%p3920_p13) }
 0x21d   : > { %7450 = vmatprep.subr.bf16.mxu1 %v5844_v56 }
 0x21f   : > { %7420 = vmatpush3.bf16.msra.mxu0 %v5820_v58 }
 0x220   : > { %7452 = vmatpush3.bf16.msra.mxu1 %v5836_v59 }
 0x222   : > { %3699 = vmatmul.mubr.f32.vlgmr.msra.gmra.mrb[22].mxu0 %v8670_v19 }
 0x223   : > { %3769 = vmatmul.mubr.f32.vlgmr.msra.gmra.mrb[22].mxu1 %v8673_v20 }
 0x235   : > { %v6227_v60 = vpop.f32.mrb[10].mxu0 }
 0x236   : > { %v6262_v61 = vpop.f32.mrb[10].mxu1  ;;  %v6228_v62 = vpop.f32.mrb[11].mxu0 }
 0x237   : > { %v6263_v63 = vpop.f32.mrb[11].mxu1  ;;  %v6229_v0 = vadd.f32 %v6228_v62, %v6227_v60 }
 0x238   : > { %v6264_v1 = vadd.f32 %v6263_v63, %v6262_v61 }
 0x239   : > { %v2861_v2 = vadd.f32 %v6229_v0, %v2791_v57 }
 0x23b   : > { %v2931_v3 = vadd.f32 %v6264_v1, %v2861_v2 }
 0x255   : > { %v6297_v4 = vpop.f32.mrb[12].mxu0 }
 0x256   : > { %v6332_v5 = vpop.f32.mrb[12].mxu1  ;;  %v6298_v6 = vpop.f32.mrb[13].mxu0 }
 0x257   : > { %v6333_v7 = vpop.f32.mrb[13].mxu1  ;;  %v6299_v8 = vadd.f32 %v6298_v6, %v6297_v4 }
 0x258   : > { %v6334_v9 = vadd.f32 %v6333_v7, %v6332_v5 }
 0x259   : > { %v3001_v10 = vadd.f32 %v6299_v8, %v2931_v3 }
 0x25b   : > { %v3071_v11 = vadd.f32 %v6334_v9, %v3001_v10 }
 0x275   : > { %v6367_v12 = vpop.f32.mrb[14].mxu0 }
 0x276   : > { %v6402_v13 = vpop.f32.mrb[14].mxu1  ;;  %v6368_v14 = vpop.f32.mrb[15].mxu0 }
 0x277   : > { %v6403_v15 = vpop.f32.mrb[15].mxu1  ;;  %v6369_v16 = vadd.f32 %v6368_v14, %v6367_v12 }
 0x278   : > { %v6404_v17 = vadd.f32 %v6403_v15, %v6402_v13 }
 0x279   : > { %v3141_v19 = vadd.f32 %v6369_v16, %v3071_v11 }
 0x27b   : > { %v3211_v20 = vadd.f32 %v6404_v17, %v3141_v19 }
 0x295   : > { %v6437_v21 = vpop.f32.mrb[16].mxu0 }
 0x296   : > { %v6472_v22 = vpop.f32.mrb[16].mxu1  ;;  %v6438_v23 = vpop.f32.mrb[17].mxu0 }
 0x297   : > { %v6473_v24 = vpop.f32.mrb[17].mxu1  ;;  %v6439_v25 = vadd.f32 %v6438_v23, %v6437_v21 }
 0x298   : > { %v6474_v26 = vadd.f32 %v6473_v24, %v6472_v22 }
 0x299   : > { %v3281_v18 = vadd.f32 %v6439_v25, %v3211_v20 }
 0x29b   : > { %v3351_v27 = vadd.f32 %v6474_v26, %v3281_v18 }
 0x2b5   : > { %v6507_v28 = vpop.f32.mrb[18].mxu0 }
 0x2b6   : > { %v6542_v29 = vpop.f32.mrb[18].mxu1  ;;  %v6508_v30 = vpop.f32.mrb[19].mxu0 }
 0x2b7   : > { %v6543_v31 = vpop.f32.mrb[19].mxu1  ;;  %v6509_v32 = vadd.f32 %v6508_v30, %v6507_v28 }
 0x2b8   : > { %v6544_v33 = vadd.f32 %v6543_v31, %v6542_v29 }
 0x2b9   : > { %v3421_v34 = vadd.f32 %v6509_v32, %v3351_v27 }
 0x2bb   : > { %v3491_v35 = vadd.f32 %v6544_v33, %v3421_v34 }
 0x2d5   : > { %v6577_v36 = vpop.f32.mrb[20].mxu0 }
 0x2d6   : > { %v6612_v37 = vpop.f32.mrb[20].mxu1  ;;  %v6578_v38 = vpop.f32.mrb[21].mxu0 }
 0x2d7   : > { %v6613_v39 = vpop.f32.mrb[21].mxu1  ;;  %v6579_v40 = vadd.f32 %v6578_v38, %v6577_v36 }
 0x2d8   : > { %v6614_v41 = vadd.f32 %v6613_v39, %v6612_v37 }
 0x2d9   : > { %v3561_v42 = vadd.f32 %v6579_v40, %v3491_v35 }
 0x2db   : > { %v3631_v43 = vadd.f32 %v6614_v41, %v3561_v42 }
 0x2f5   : > { %v6647_v44 = vpop.f32.mrb[22].mxu0 }
 0x2f6   : > { %v6682_v45 = vpop.f32.mrb[22].mxu1  ;;  %v6648_v46 = vpop.f32.mrb[23].mxu0 }
 0x2f7   : > { %v6683_v47 = vpop.f32.mrb[23].mxu1  ;;  %v6649_v48 = vadd.f32 %v6648_v46, %v6647_v44 }
 0x2f8   : > { %v6684_v49 = vadd.f32 %v6683_v47, %v6682_v45 }
 0x2f9   : > { %v3701_v50 = vadd.f32 %v6649_v48, %v3631_v43  ;;  %3779 = sbr.rel (%p3920_p13) target bundleno = 780 (0x30c), region = 52 }
 0x2fb   : > { %v3771_v52 = vadd.f32 %v6684_v49, %v3701_v50 }
 0x2fd   : > { %v3774_v53 = vadd.f32 %v3771_v52, %v281_v51 }
 0x2ff   : > { %3775 = vst [vmem:[#allocation2] sm:$0x3] %v3774_v53 }
 0x306   : > { %v3780_v54 = vld [vmem:[#allocation2] sm:$0x3] }
 0x307   : > { %v3788_v56 = vadd.f32 %v3921_v55, %v3780_v54 }
 0x309   : > { %v3789_v57 = vmax.f32 %v3788_v56, 0.0 }
 0x30b   : > { %3790 = vst [vmem:[%s8167_s30] sm:$0x3] %v3789_v57 }
 0x30c PF: > { %s19_s25 = sadd.s32 1, %s7815_s25   ;;  %s8812_s26 = sld [smem:[#allocation14_spill]] }
 0x30d   : > { %p8718_p6 = scmp.ge.s32.totalorder %s19_s25, 6   ;;  %s8813_s6 = sld [smem:[#allocation12_spill]] }
 0x30e   : > { %s8814_s29 = sld [smem:[#allocation13_spill]]  ;;  %s8815_s12 = smov %s7767_s13 }
 0x30f   : > { %s8816_s13 = smov %s7771_s14  ;;  %s8817_s14 = smov %s8092_s21 }
 0x310   : > { %s8818_s15 = smov %s7779_s16  ;;  %s8819_s16 = smov %s7783_s17 }
 0x311   : > { %s8820_s17 = smov %s8041_s11  ;;  %s8821_s18 = smov %s7791_s19 }
 0x312   : > { %s8822_s19 = smov %s7795_s20  ;;  %s8823_s20 = smov %s8812_s26 }
 0x313   : > { %s8824_s21 = smov %s7807_s23  ;;  %s8825_s22 = smov %s7811_s24 }
 0x314   : > { %s8826_s23 = smov %s8813_s6  ;;  %s8827_s24 = smov %s8814_s29 }
 0x315   :  { %18 = sbr.rel (!%p8718_p6) target bundleno = 13 (0xd), region = 104 }
 0x31c   :  { %3810 = vsyncpa [#allocation4], 1 }
 0x31d   :  { %3812 = vsyncpa [#allocation4 + $0x1], 1 }
 0x31e   :  { %3813 = vsyncpa [#allocation6], 1 }
 0x31f   :  { %3815 = vsyncpa [#allocation6 + $0x1], 1 }

// kernel: autoencoder_forward.5
= control target key start
LH: loop header
LB: loop body
LE: loop exit
PB: predicated region body
PF: predicated region fallthrough
CT: control target
= control target key end

     0   :  { %8 = vsyncpa [#allocation5], 0  ;;  %s11879_s0 = inlined_call_operand.vmem [shape: f32[2,256], index: 0, kind: input, shape index: {}]   ;;  %s11880_s1 = inlined_call_operand.vmem [shape: bf16[256,12288], index: 1, kind: input, shape index: {}]   ;;  %s11881_s2 = inlined_call_operand.vmem [shape: f32[1,12288], index: 2, kind: input, shape index: {}]   ;;  %s11882_s3 = inlined_call_operand.hbm [shape: f32[2,12288], index: 3, kind: output, shape index: {}]  }
   0x1   :  { %10 = vsyncpa [#allocation5 + $0x1], 0  ;;  %s9176_s12 = smov 0   ;;  %s9178_s13 = smov 0  }
   0x2   :  { %s9180_s14 = smov 0   ;;  %s9182_s15 = smov 0  }
   0x3   :  { %s9184_s16 = smov 0   ;;  %s9186_s17 = smov 0  }
   0x4 LB: > { %s6694_s18 = sadd.s32 4294967295, %s9152_s17   ;;  %s6695_s19 = sadd.s32 4294967294, %s9152_s17   ;;  %s9152_s17 = sphi %s9186_s17, %s16_s17   ;;  %s9148_s16 = sphi %s9184_s16, %s11890_s16   ;;  %s9144_s15 = sphi %s9182_s15, %s11889_s15   ;;  %s9140_s14 = sphi %s9180_s14, %s11888_s14   ;;  %s9136_s13 = sphi %s9178_s13, %s11887_s13   ;;  %s9132_s12 = sphi %s9176_s12, %s11886_s12  }
   0x5   : > { %s28_s20 = sadd.s32 1, %s9148_s16  ;;  %s63_s21 = sadd.s32 1, %s9140_s14 }
   0x6   : > { %p30_p0 = scmp.ge.s32.totalorder %s28_s20, 2  ;;  %p70_p1 = scmp.ne.s32.totalorder %s9140_s14, %s9136_s13 }
   0x7   : > { %p71_p2 = scmp.eq.s32.totalorder %s9152_s17, 0  ;;  %p126_p3 = scmp.eq.s32.totalorder %s6694_s18, 1 }
   0x8   : > { %s11892_s20 = smov (%p30_p0, %s28_s20), 0  ;;  %p131_p6 = scmp.ne.s32.totalorder %s9136_s13, %s9132_s12 }
   0x9   : > { %p72_p4 = por %p71_p2, %p70_p1  ;;  %p9215_p5 = por %p126_p3, %p70_p1 }
   0xa   : > { %s59_s23 = ssub.s32 %s9148_s16, %s11892_s20  ;;  %p132_p8 = scmp.eq.s32.totalorder %s6695_s19, 1 }
   0xb   : > { %p61_p7 = scmp.eq.s32.totalorder %s59_s23, 0  ;;  %p6698_p10 = scmp.ge.s32.totalorder %s9152_s17, 2 }
   0xc   : > { %p9226_p9 = por %p132_p8, %p131_p6 }
   0xd   : > { %s9224_s24 = scalar_select %p61_p7, %s9140_s14, %s63_s21  }
   0xe   : > { %157 = sbr.rel (%p6698_p10) target bundleno = 410 (0x19a), region = 20 }
  0x15   : > { %160 = sbr.rel (!%p72_p4) target bundleno = 410 (0x19a), region = 24  ;;  %s162_s26 = sand.u32 (%p72_p4), 1, %s9140_s14  }
  0x16   : > { %s6705_s27 = smul.u32 (%p72_p4), 192, %s9148_s16 }
  0x17   : > { %s9011_s28 = smul.u32 (%p72_p4), 6144, %s162_s26 }
  0x18   : > { %s9238_s4 = scalar_lea.vmem (%p72_p4), %s11880_s1, %s6705_s27 }
  0x19   : > { %v183_v0 = vld [vmem:[%s9238_s4] sm:$0xff] (%p72_p4)  ;;  %v185_v1 = vld [vmem:[%s9238_s4 + $0x8] sm:$0xff] (%p72_p4)  ;;  %v187_v2 = vld [vmem:[%s9238_s4 + $0x10] sm:$0xff] (%p72_p4)  ;;  %s9243_s5 = scalar_lea.vmem (%p72_p4), [#allocation3], %s9011_s28 }
  0x1a   : > { %184 = vst [vmem:[%s9243_s5] sm:$0xff] (%p72_p4), %v183_v0  ;;  %186 = vst [vmem:[%s9243_s5 + $0x8] sm:$0xff] (%p72_p4), %v185_v1  ;;  %v189_v3 = vld [vmem:[%s9238_s4 + $0x18] sm:$0xff] (%p72_p4)  ;;  %v191_v4 = vld [vmem:[%s9238_s4 + $0x20] sm:$0xff] (%p72_p4) }
  0x1b   : > { %188 = vst [vmem:[%s9243_s5 + $0x10] sm:$0xff] (%p72_p4), %v187_v2  ;;  %v193_v5 = vld [vmem:[%s9238_s4 + $0x28] sm:$0xff] (%p72_p4)  ;;  %190 = vst [vmem:[%s9243_s5 + $0x18] sm:$0xff] (%p72_p4), %v189_v3  ;;  %v195_v6 = vld [vmem:[%s9238_s4 + $0x30] sm:$0xff] (%p72_p4) }
  0x1c   : > { %192 = vst [vmem:[%s9243_s5 + $0x20] sm:$0xff] %v191_v4  ;;  %194 = vst [vmem:[%s9243_s5 + $0x28] sm:$0xff] %v193_v5  ;;  %v197_v7 = vld [vmem:[%s9238_s4 + $0x38] sm:$0xff]  ;;  %v199_v8 = vld [vmem:[%s9238_s4 + $0x40] sm:$0xff] }
  0x1d   : > { %196 = vst [vmem:[%s9243_s5 + $0x30] sm:$0xff] %v195_v6  ;;  %198 = vst [vmem:[%s9243_s5 + $0x38] sm:$0xff] %v197_v7  ;;  %v201_v9 = vld [vmem:[%s9238_s4 + $0x48] sm:$0xff]  ;;  %v203_v10 = vld [vmem:[%s9238_s4 + $0x50] sm:$0xff] }
  0x1e   : > { %200 = vst [vmem:[%s9243_s5 + $0x40] sm:$0xff] %v199_v8  ;;  %v205_v11 = vld [vmem:[%s9238_s4 + $0x58] sm:$0xff]  ;;  %202 = vst [vmem:[%s9243_s5 + $0x48] sm:$0xff] %v201_v9  ;;  %v207_v12 = vld [vmem:[%s9238_s4 + $0x60] sm:$0xff] }
  0x1f   : > { %204 = vst [vmem:[%s9243_s5 + $0x50] sm:$0xff] %v203_v10  ;;  %206 = vst [vmem:[%s9243_s5 + $0x58] sm:$0xff] %v205_v11  ;;  %v209_v13 = vld [vmem:[%s9238_s4 + $0x68] sm:$0xff]  ;;  %v211_v14 = vld [vmem:[%s9238_s4 + $0x70] sm:$0xff] }
  0x20   : > { %208 = vst [vmem:[%s9243_s5 + $0x60] sm:$0xff] %v207_v12  ;;  %210 = vst [vmem:[%s9243_s5 + $0x68] sm:$0xff] %v209_v13  ;;  %v213_v15 = vld [vmem:[%s9238_s4 + $0x78] sm:$0xff]  ;;  %v215_v16 = vld [vmem:[%s9238_s4 + $0x80] sm:$0xff] }
  0x21   : > { %212 = vst [vmem:[%s9243_s5 + $0x70] sm:$0xff] %v211_v14  ;;  %v217_v17 = vld [vmem:[%s9238_s4 + $0x88] sm:$0xff]  ;;  %214 = vst [vmem:[%s9243_s5 + $0x78] sm:$0xff] %v213_v15  ;;  %v219_v18 = vld [vmem:[%s9238_s4 + $0x90] sm:$0xff] }
  0x22   : > { %216 = vst [vmem:[%s9243_s5 + $0x80] sm:$0xff] %v215_v16  ;;  %218 = vst [vmem:[%s9243_s5 + $0x88] sm:$0xff] %v217_v17  ;;  %v221_v19 = vld [vmem:[%s9238_s4 + $0x98] sm:$0xff]  ;;  %v223_v20 = vld [vmem:[%s9238_s4 + $0xa0] sm:$0xff] }
  0x23   : > { %220 = vst [vmem:[%s9243_s5 + $0x90] sm:$0xff] %v219_v18  ;;  %222 = vst [vmem:[%s9243_s5 + $0x98] sm:$0xff] %v221_v19  ;;  %v225_v21 = vld [vmem:[%s9238_s4 + $0xa8] sm:$0xff]  ;;  %v227_v22 = vld [vmem:[%s9238_s4 + $0xb0] sm:$0xff] }
  0x24   : > { %224 = vst [vmem:[%s9243_s5 + $0xa0] sm:$0xff] %v223_v20  ;;  %v229_v23 = vld [vmem:[%s9238_s4 + $0xb8] sm:$0xff]  ;;  %226 = vst [vmem:[%s9243_s5 + $0xa8] sm:$0xff] %v225_v21  ;;  %v231_v24 = vld [vmem:[%s9238_s4 + $0x180] sm:$0xff] }
  0x25   : > { %228 = vst [vmem:[%s9243_s5 + $0xb0] sm:$0xff] %v227_v22  ;;  %230 = vst [vmem:[%s9243_s5 + $0xb8] sm:$0xff] %v229_v23  ;;  %v233_v25 = vld [vmem:[%s9238_s4 + $0x188] sm:$0xff]  ;;  %v235_v26 = vld [vmem:[%s9238_s4 + $0x190] sm:$0xff] }
  0x26   : > { %232 = vst [vmem:[%s9243_s5 + $0xc0] sm:$0xff] %v231_v24  ;;  %234 = vst [vmem:[%s9243_s5 + $0xc8] sm:$0xff] %v233_v25  ;;  %v237_v27 = vld [vmem:[%s9238_s4 + $0x198] sm:$0xff]  ;;  %v239_v28 = vld [vmem:[%s9238_s4 + $0x1a0] sm:$0xff] }
  0x27   : > { %236 = vst [vmem:[%s9243_s5 + $0xd0] sm:$0xff] %v235_v26  ;;  %v241_v29 = vld [vmem:[%s9238_s4 + $0x1a8] sm:$0xff]  ;;  %238 = vst [vmem:[%s9243_s5 + $0xd8] sm:$0xff] %v237_v27  ;;  %v243_v30 = vld [vmem:[%s9238_s4 + $0x1b0] sm:$0xff] }
  0x28   : > { %240 = vst [vmem:[%s9243_s5 + $0xe0] sm:$0xff] %v239_v28  ;;  %242 = vst [vmem:[%s9243_s5 + $0xe8] sm:$0xff] %v241_v29  ;;  %v245_v31 = vld [vmem:[%s9238_s4 + $0x1b8] sm:$0xff]  ;;  %v247_v32 = vld [vmem:[%s9238_s4 + $0x1c0] sm:$0xff] }
  0x29   : > { %244 = vst [vmem:[%s9243_s5 + $0xf0] sm:$0xff] %v243_v30  ;;  %246 = vst [vmem:[%s9243_s5 + $0xf8] sm:$0xff] %v245_v31  ;;  %v249_v33 = vld [vmem:[%s9238_s4 + $0x1c8] sm:$0xff]  ;;  %v251_v34 = vld [vmem:[%s9238_s4 + $0x1d0] sm:$0xff] }
  0x2a   : > { %248 = vst [vmem:[%s9243_s5 + $0x100] sm:$0xff] %v247_v32  ;;  %v253_v35 = vld [vmem:[%s9238_s4 + $0x1d8] sm:$0xff]  ;;  %250 = vst [vmem:[%s9243_s5 + $0x108] sm:$0xff] %v249_v33  ;;  %v255_v36 = vld [vmem:[%s9238_s4 + $0x1e0] sm:$0xff] }
  0x2b   : > { %252 = vst [vmem:[%s9243_s5 + $0x110] sm:$0xff] %v251_v34  ;;  %254 = vst [vmem:[%s9243_s5 + $0x118] sm:$0xff] %v253_v35  ;;  %v257_v37 = vld [vmem:[%s9238_s4 + $0x1e8] sm:$0xff]  ;;  %v259_v38 = vld [vmem:[%s9238_s4 + $0x1f0] sm:$0xff] }
  0x2c   : > { %256 = vst [vmem:[%s9243_s5 + $0x120] sm:$0xff] %v255_v36  ;;  %258 = vst [vmem:[%s9243_s5 + $0x128] sm:$0xff] %v257_v37  ;;  %v261_v39 = vld [vmem:[%s9238_s4 + $0x1f8] sm:$0xff]  ;;  %v263_v40 = vld [vmem:[%s9238_s4 + $0x200] sm:$0xff] }
  0x2d   : > { %260 = vst [vmem:[%s9243_s5 + $0x130] sm:$0xff] %v259_v38  ;;  %v265_v41 = vld [vmem:[%s9238_s4 + $0x208] sm:$0xff]  ;;  %262 = vst [vmem:[%s9243_s5 + $0x138] sm:$0xff] %v261_v39  ;;  %v267_v42 = vld [vmem:[%s9238_s4 + $0x210] sm:$0xff] }
  0x2e   : > { %264 = vst [vmem:[%s9243_s5 + $0x140] sm:$0xff] %v263_v40  ;;  %266 = vst [vmem:[%s9243_s5 + $0x148] sm:$0xff] %v265_v41  ;;  %v269_v43 = vld [vmem:[%s9238_s4 + $0x218] sm:$0xff]  ;;  %v271_v44 = vld [vmem:[%s9238_s4 + $0x220] sm:$0xff] }
  0x2f   : > { %268 = vst [vmem:[%s9243_s5 + $0x150] sm:$0xff] %v267_v42  ;;  %270 = vst [vmem:[%s9243_s5 + $0x158] sm:$0xff] %v269_v43  ;;  %v273_v45 = vld [vmem:[%s9238_s4 + $0x228] sm:$0xff]  ;;  %v275_v46 = vld [vmem:[%s9238_s4 + $0x230] sm:$0xff] }
  0x30   : > { %272 = vst [vmem:[%s9243_s5 + $0x160] sm:$0xff] %v271_v44  ;;  %v277_v47 = vld [vmem:[%s9238_s4 + $0x238] sm:$0xff]  ;;  %274 = vst [vmem:[%s9243_s5 + $0x168] sm:$0xff] %v273_v45  ;;  %v279_v48 = vld [vmem:[%s9238_s4 + $0x300] sm:$0xff] }
  0x31   : > { %276 = vst [vmem:[%s9243_s5 + $0x170] sm:$0xff] %v275_v46  ;;  %278 = vst [vmem:[%s9243_s5 + $0x178] sm:$0xff] %v277_v47  ;;  %v281_v49 = vld [vmem:[%s9238_s4 + $0x308] sm:$0xff]  ;;  %v283_v50 = vld [vmem:[%s9238_s4 + $0x310] sm:$0xff] }
  0x32   : > { %280 = vst [vmem:[%s9243_s5 + $0x180] sm:$0xff] %v279_v48  ;;  %282 = vst [vmem:[%s9243_s5 + $0x188] sm:$0xff] %v281_v49  ;;  %v285_v51 = vld [vmem:[%s9238_s4 + $0x318] sm:$0xff]  ;;  %v287_v52 = vld [vmem:[%s9238_s4 + $0x320] sm:$0xff] }
  0x33   : > { %284 = vst [vmem:[%s9243_s5 + $0x190] sm:$0xff] %v283_v50  ;;  %v289_v53 = vld [vmem:[%s9238_s4 + $0x328] sm:$0xff]  ;;  %286 = vst [vmem:[%s9243_s5 + $0x198] sm:$0xff] %v285_v51  ;;  %v291_v54 = vld [vmem:[%s9238_s4 + $0x330] sm:$0xff] }
  0x34   : > { %288 = vst [vmem:[%s9243_s5 + $0x1a0] sm:$0xff] %v287_v52  ;;  %290 = vst [vmem:[%s9243_s5 + $0x1a8] sm:$0xff] %v289_v53  ;;  %v293_v55 = vld [vmem:[%s9238_s4 + $0x338] sm:$0xff]  ;;  %v295_v56 = vld [vmem:[%s9238_s4 + $0x340] sm:$0xff] }
  0x35   : > { %292 = vst [vmem:[%s9243_s5 + $0x1b0] sm:$0xff] %v291_v54  ;;  %294 = vst [vmem:[%s9243_s5 + $0x1b8] sm:$0xff] %v293_v55  ;;  %v297_v57 = vld [vmem:[%s9238_s4 + $0x348] sm:$0xff]  ;;  %v299_v58 = vld [vmem:[%s9238_s4 + $0x350] sm:$0xff] }
  0x36   : > { %296 = vst [vmem:[%s9243_s5 + $0x1c0] sm:$0xff] %v295_v56  ;;  %v301_v59 = vld [vmem:[%s9238_s4 + $0x358] sm:$0xff]  ;;  %298 = vst [vmem:[%s9243_s5 + $0x1c8] sm:$0xff] %v297_v57  ;;  %v303_v60 = vld [vmem:[%s9238_s4 + $0x360] sm:$0xff] }
  0x37   : > { %300 = vst [vmem:[%s9243_s5 + $0x1d0] sm:$0xff] %v299_v58  ;;  %302 = vst [vmem:[%s9243_s5 + $0x1d8] sm:$0xff] %v301_v59  ;;  %v305_v61 = vld [vmem:[%s9238_s4 + $0x368] sm:$0xff]  ;;  %v307_v62 = vld [vmem:[%s9238_s4 + $0x370] sm:$0xff] }
  0x38   : > { %304 = vst [vmem:[%s9243_s5 + $0x1e0] sm:$0xff] %v303_v60  ;;  %306 = vst [vmem:[%s9243_s5 + $0x1e8] sm:$0xff] %v305_v61  ;;  %v309_v63 = vld [vmem:[%s9238_s4 + $0x378] sm:$0xff]  ;;  %v311_v0 = vld [vmem:[%s9238_s4 + $0x380] sm:$0xff] }
  0x39   : > { %308 = vst [vmem:[%s9243_s5 + $0x1f0] sm:$0xff] %v307_v62  ;;  %v313_v1 = vld [vmem:[%s9238_s4 + $0x388] sm:$0xff]  ;;  %310 = vst [vmem:[%s9243_s5 + $0x1f8] sm:$0xff] %v309_v63  ;;  %v315_v2 = vld [vmem:[%s9238_s4 + $0x390] sm:$0xff] }
  0x3a   : > { %312 = vst [vmem:[%s9243_s5 + $0x200] sm:$0xff] %v311_v0  ;;  %314 = vst [vmem:[%s9243_s5 + $0x208] sm:$0xff] %v313_v1  ;;  %v317_v3 = vld [vmem:[%s9238_s4 + $0x398] sm:$0xff]  ;;  %v319_v4 = vld [vmem:[%s9238_s4 + $0x3a0] sm:$0xff] }
  0x3b   : > { %316 = vst [vmem:[%s9243_s5 + $0x210] sm:$0xff] %v315_v2  ;;  %318 = vst [vmem:[%s9243_s5 + $0x218] sm:$0xff] %v317_v3  ;;  %v321_v5 = vld [vmem:[%s9238_s4 + $0x3a8] sm:$0xff]  ;;  %v323_v6 = vld [vmem:[%s9238_s4 + $0x3b0] sm:$0xff] }
  0x3c   : > { %320 = vst [vmem:[%s9243_s5 + $0x220] sm:$0xff] %v319_v4  ;;  %v325_v7 = vld [vmem:[%s9238_s4 + $0x3b8] sm:$0xff]  ;;  %322 = vst [vmem:[%s9243_s5 + $0x228] sm:$0xff] %v321_v5  ;;  %v327_v8 = vld [vmem:[%s9238_s4 + $0x480] sm:$0xff] }
  0x3d   : > { %324 = vst [vmem:[%s9243_s5 + $0x230] sm:$0xff] %v323_v6  ;;  %326 = vst [vmem:[%s9243_s5 + $0x238] sm:$0xff] %v325_v7  ;;  %v329_v9 = vld [vmem:[%s9238_s4 + $0x488] sm:$0xff]  ;;  %v331_v10 = vld [vmem:[%s9238_s4 + $0x490] sm:$0xff] }
  0x3e   : > { %328 = vst [vmem:[%s9243_s5 + $0x240] sm:$0xff] %v327_v8  ;;  %330 = vst [vmem:[%s9243_s5 + $0x248] sm:$0xff] %v329_v9  ;;  %v333_v11 = vld [vmem:[%s9238_s4 + $0x498] sm:$0xff]  ;;  %v335_v12 = vld [vmem:[%s9238_s4 + $0x4a0] sm:$0xff] }
  0x3f   : > { %332 = vst [vmem:[%s9243_s5 + $0x250] sm:$0xff] %v331_v10  ;;  %v337_v13 = vld [vmem:[%s9238_s4 + $0x4a8] sm:$0xff]  ;;  %334 = vst [vmem:[%s9243_s5 + $0x258] sm:$0xff] %v333_v11  ;;  %v339_v14 = vld [vmem:[%s9238_s4 + $0x4b0] sm:$0xff] }
  0x40   : > { %336 = vst [vmem:[%s9243_s5 + $0x260] sm:$0xff] %v335_v12  ;;  %338 = vst [vmem:[%s9243_s5 + $0x268] sm:$0xff] %v337_v13  ;;  %v341_v15 = vld [vmem:[%s9238_s4 + $0x4b8] sm:$0xff]  ;;  %v343_v16 = vld [vmem:[%s9238_s4 + $0x4c0] sm:$0xff] }
  0x41   : > { %340 = vst [vmem:[%s9243_s5 + $0x270] sm:$0xff] %v339_v14  ;;  %342 = vst [vmem:[%s9243_s5 + $0x278] sm:$0xff] %v341_v15  ;;  %v345_v17 = vld [vmem:[%s9238_s4 + $0x4c8] sm:$0xff]  ;;  %v347_v18 = vld [vmem:[%s9238_s4 + $0x4d0] sm:$0xff] }
  0x42   : > { %344 = vst [vmem:[%s9243_s5 + $0x280] sm:$0xff] %v343_v16  ;;  %v349_v19 = vld [vmem:[%s9238_s4 + $0x4d8] sm:$0xff]  ;;  %346 = vst [vmem:[%s9243_s5 + $0x288] sm:$0xff] %v345_v17  ;;  %v351_v20 = vld [vmem:[%s9238_s4 + $0x4e0] sm:$0xff] }
  0x43   : > { %348 = vst [vmem:[%s9243_s5 + $0x290] sm:$0xff] %v347_v18  ;;  %350 = vst [vmem:[%s9243_s5 + $0x298] sm:$0xff] %v349_v19  ;;  %v353_v21 = vld [vmem:[%s9238_s4 + $0x4e8] sm:$0xff]  ;;  %v355_v22 = vld [vmem:[%s9238_s4 + $0x4f0] sm:$0xff] }
  0x44   : > { %352 = vst [vmem:[%s9243_s5 + $0x2a0] sm:$0xff] %v351_v20  ;;  %354 = vst [vmem:[%s9243_s5 + $0x2a8] sm:$0xff] %v353_v21  ;;  %v357_v23 = vld [vmem:[%s9238_s4 + $0x4f8] sm:$0xff]  ;;  %v359_v24 = vld [vmem:[%s9238_s4 + $0x500] sm:$0xff] }
  0x45   : > { %356 = vst [vmem:[%s9243_s5 + $0x2b0] sm:$0xff] %v355_v22  ;;  %v361_v25 = vld [vmem:[%s9238_s4 + $0x508] sm:$0xff]  ;;  %358 = vst [vmem:[%s9243_s5 + $0x2b8] sm:$0xff] %v357_v23  ;;  %v363_v26 = vld [vmem:[%s9238_s4 + $0x510] sm:$0xff] }
  0x46   : > { %360 = vst [vmem:[%s9243_s5 + $0x2c0] sm:$0xff] %v359_v24  ;;  %362 = vst [vmem:[%s9243_s5 + $0x2c8] sm:$0xff] %v361_v25  ;;  %v365_v27 = vld [vmem:[%s9238_s4 + $0x518] sm:$0xff]  ;;  %v367_v28 = vld [vmem:[%s9238_s4 + $0x520] sm:$0xff] }
  0x47   : > { %364 = vst [vmem:[%s9243_s5 + $0x2d0] sm:$0xff] %v363_v26  ;;  %366 = vst [vmem:[%s9243_s5 + $0x2d8] sm:$0xff] %v365_v27  ;;  %v369_v29 = vld [vmem:[%s9238_s4 + $0x528] sm:$0xff]  ;;  %v371_v30 = vld [vmem:[%s9238_s4 + $0x530] sm:$0xff] }
  0x48   : > { %368 = vst [vmem:[%s9243_s5 + $0x2e0] sm:$0xff] %v367_v28  ;;  %v373_v31 = vld [vmem:[%s9238_s4 + $0x538] sm:$0xff]  ;;  %370 = vst [vmem:[%s9243_s5 + $0x2e8] sm:$0xff] %v369_v29  ;;  %v375_v32 = vld [vmem:[%s9238_s4 + $0x600] sm:$0xff] }
  0x49   : > { %372 = vst [vmem:[%s9243_s5 + $0x2f0] sm:$0xff] %v371_v30  ;;  %374 = vst [vmem:[%s9243_s5 + $0x2f8] sm:$0xff] %v373_v31  ;;  %v377_v33 = vld [vmem:[%s9238_s4 + $0x608] sm:$0xff]  ;;  %v379_v34 = vld [vmem:[%s9238_s4 + $0x610] sm:$0xff] }
  0x4a   : > { %376 = vst [vmem:[%s9243_s5 + $0x300] sm:$0xff] %v375_v32  ;;  %378 = vst [vmem:[%s9243_s5 + $0x308] sm:$0xff] %v377_v33  ;;  %v381_v35 = vld [vmem:[%s9238_s4 + $0x618] sm:$0xff]  ;;  %v383_v36 = vld [vmem:[%s9238_s4 + $0x620] sm:$0xff] }
  0x4b   : > { %380 = vst [vmem:[%s9243_s5 + $0x310] sm:$0xff] %v379_v34  ;;  %v385_v37 = vld [vmem:[%s9238_s4 + $0x628] sm:$0xff]  ;;  %382 = vst [vmem:[%s9243_s5 + $0x318] sm:$0xff] %v381_v35  ;;  %v387_v38 = vld [vmem:[%s9238_s4 + $0x630] sm:$0xff] }
  0x4c   : > { %384 = vst [vmem:[%s9243_s5 + $0x320] sm:$0xff] %v383_v36  ;;  %386 = vst [vmem:[%s9243_s5 + $0x328] sm:$0xff] %v385_v37  ;;  %v389_v39 = vld [vmem:[%s9238_s4 + $0x638] sm:$0xff]  ;;  %v391_v40 = vld [vmem:[%s9238_s4 + $0x640] sm:$0xff] }
  0x4d   : > { %388 = vst [vmem:[%s9243_s5 + $0x330] sm:$0xff] %v387_v38  ;;  %390 = vst [vmem:[%s9243_s5 + $0x338] sm:$0xff] %v389_v39  ;;  %v393_v41 = vld [vmem:[%s9238_s4 + $0x648] sm:$0xff]  ;;  %v395_v42 = vld [vmem:[%s9238_s4 + $0x650] sm:$0xff] }
  0x4e   : > { %392 = vst [vmem:[%s9243_s5 + $0x340] sm:$0xff] %v391_v40  ;;  %v397_v43 = vld [vmem:[%s9238_s4 + $0x658] sm:$0xff]  ;;  %394 = vst [vmem:[%s9243_s5 + $0x348] sm:$0xff] %v393_v41  ;;  %v399_v44 = vld [vmem:[%s9238_s4 + $0x660] sm:$0xff] }
  0x4f   : > { %396 = vst [vmem:[%s9243_s5 + $0x350] sm:$0xff] %v395_v42  ;;  %398 = vst [vmem:[%s9243_s5 + $0x358] sm:$0xff] %v397_v43  ;;  %v401_v45 = vld [vmem:[%s9238_s4 + $0x668] sm:$0xff]  ;;  %v403_v46 = vld [vmem:[%s9238_s4 + $0x670] sm:$0xff] }
  0x50   : > { %400 = vst [vmem:[%s9243_s5 + $0x360] sm:$0xff] %v399_v44  ;;  %402 = vst [vmem:[%s9243_s5 + $0x368] sm:$0xff] %v401_v45  ;;  %v405_v47 = vld [vmem:[%s9238_s4 + $0x678] sm:$0xff]  ;;  %v407_v48 = vld [vmem:[%s9238_s4 + $0x680] sm:$0xff] }
  0x51   : > { %404 = vst [vmem:[%s9243_s5 + $0x370] sm:$0xff] %v403_v46  ;;  %v409_v49 = vld [vmem:[%s9238_s4 + $0x688] sm:$0xff]  ;;  %406 = vst [vmem:[%s9243_s5 + $0x378] sm:$0xff] %v405_v47  ;;  %v411_v50 = vld [vmem:[%s9238_s4 + $0x690] sm:$0xff] }
  0x52   : > { %408 = vst [vmem:[%s9243_s5 + $0x380] sm:$0xff] %v407_v48  ;;  %410 = vst [vmem:[%s9243_s5 + $0x388] sm:$0xff] %v409_v49  ;;  %v413_v51 = vld [vmem:[%s9238_s4 + $0x698] sm:$0xff]  ;;  %v415_v52 = vld [vmem:[%s9238_s4 + $0x6a0] sm:$0xff] }
  0x53   : > { %412 = vst [vmem:[%s9243_s5 + $0x390] sm:$0xff] %v411_v50  ;;  %414 = vst [vmem:[%s9243_s5 + $0x398] sm:$0xff] %v413_v51  ;;  %v417_v53 = vld [vmem:[%s9238_s4 + $0x6a8] sm:$0xff]  ;;  %v419_v54 = vld [vmem:[%s9238_s4 + $0x6b0] sm:$0xff] }
  0x54   : > { %416 = vst [vmem:[%s9243_s5 + $0x3a0] sm:$0xff] %v415_v52  ;;  %v421_v55 = vld [vmem:[%s9238_s4 + $0x6b8] sm:$0xff]  ;;  %418 = vst [vmem:[%s9243_s5 + $0x3a8] sm:$0xff] %v417_v53  ;;  %v423_v56 = vld [vmem:[%s9238_s4 + $0x780] sm:$0xff] }
  0x55   : > { %420 = vst [vmem:[%s9243_s5 + $0x3b0] sm:$0xff] %v419_v54  ;;  %422 = vst [vmem:[%s9243_s5 + $0x3b8] sm:$0xff] %v421_v55  ;;  %v425_v57 = vld [vmem:[%s9238_s4 + $0x788] sm:$0xff]  ;;  %v427_v58 = vld [vmem:[%s9238_s4 + $0x790] sm:$0xff] }
  0x56   : > { %424 = vst [vmem:[%s9243_s5 + $0x3c0] sm:$0xff] %v423_v56  ;;  %426 = vst [vmem:[%s9243_s5 + $0x3c8] sm:$0xff] %v425_v57  ;;  %v429_v59 = vld [vmem:[%s9238_s4 + $0x798] sm:$0xff]  ;;  %v431_v60 = vld [vmem:[%s9238_s4 + $0x7a0] sm:$0xff] }
  0x57   : > { %428 = vst [vmem:[%s9243_s5 + $0x3d0] sm:$0xff] %v427_v58  ;;  %v433_v61 = vld [vmem:[%s9238_s4 + $0x7a8] sm:$0xff]  ;;  %430 = vst [vmem:[%s9243_s5 + $0x3d8] sm:$0xff] %v429_v59  ;;  %v435_v62 = vld [vmem:[%s9238_s4 + $0x7b0] sm:$0xff] }
  0x58   : > { %432 = vst [vmem:[%s9243_s5 + $0x3e0] sm:$0xff] %v431_v60  ;;  %434 = vst [vmem:[%s9243_s5 + $0x3e8] sm:$0xff] %v433_v61  ;;  %v437_v63 = vld [vmem:[%s9238_s4 + $0x7b8] sm:$0xff]  ;;  %v439_v0 = vld [vmem:[%s9238_s4 + $0x7c0] sm:$0xff] }
  0x59   : > { %436 = vst [vmem:[%s9243_s5 + $0x3f0] sm:$0xff] %v435_v62  ;;  %438 = vst [vmem:[%s9243_s5 + $0x3f8] sm:$0xff] %v437_v63  ;;  %v441_v1 = vld [vmem:[%s9238_s4 + $0x7c8] sm:$0xff]  ;;  %v443_v2 = vld [vmem:[%s9238_s4 + $0x7d0] sm:$0xff] }
  0x5a   : > { %440 = vst [vmem:[%s9243_s5 + $0x400] sm:$0xff] %v439_v0  ;;  %v445_v3 = vld [vmem:[%s9238_s4 + $0x7d8] sm:$0xff]  ;;  %442 = vst [vmem:[%s9243_s5 + $0x408] sm:$0xff] %v441_v1  ;;  %v447_v4 = vld [vmem:[%s9238_s4 + $0x7e0] sm:$0xff] }
  0x5b   : > { %444 = vst [vmem:[%s9243_s5 + $0x410] sm:$0xff] %v443_v2  ;;  %446 = vst [vmem:[%s9243_s5 + $0x418] sm:$0xff] %v445_v3  ;;  %v449_v5 = vld [vmem:[%s9238_s4 + $0x7e8] sm:$0xff]  ;;  %v451_v6 = vld [vmem:[%s9238_s4 + $0x7f0] sm:$0xff] }
  0x5c   : > { %448 = vst [vmem:[%s9243_s5 + $0x420] sm:$0xff] %v447_v4  ;;  %450 = vst [vmem:[%s9243_s5 + $0x428] sm:$0xff] %v449_v5  ;;  %v453_v7 = vld [vmem:[%s9238_s4 + $0x7f8] sm:$0xff]  ;;  %v455_v8 = vld [vmem:[%s9238_s4 + $0x800] sm:$0xff] }
  0x5d   : > { %452 = vst [vmem:[%s9243_s5 + $0x430] sm:$0xff] %v451_v6  ;;  %v457_v9 = vld [vmem:[%s9238_s4 + $0x808] sm:$0xff]  ;;  %454 = vst [vmem:[%s9243_s5 + $0x438] sm:$0xff] %v453_v7  ;;  %v459_v10 = vld [vmem:[%s9238_s4 + $0x810] sm:$0xff] }
  0x5e   : > { %456 = vst [vmem:[%s9243_s5 + $0x440] sm:$0xff] %v455_v8  ;;  %458 = vst [vmem:[%s9243_s5 + $0x448] sm:$0xff] %v457_v9  ;;  %v461_v11 = vld [vmem:[%s9238_s4 + $0x818] sm:$0xff]  ;;  %v463_v12 = vld [vmem:[%s9238_s4 + $0x820] sm:$0xff] }
  0x5f   : > { %460 = vst [vmem:[%s9243_s5 + $0x450] sm:$0xff] %v459_v10  ;;  %462 = vst [vmem:[%s9243_s5 + $0x458] sm:$0xff] %v461_v11  ;;  %v465_v13 = vld [vmem:[%s9238_s4 + $0x828] sm:$0xff]  ;;  %v467_v14 = vld [vmem:[%s9238_s4 + $0x830] sm:$0xff] }
  0x60   : > { %464 = vst [vmem:[%s9243_s5 + $0x460] sm:$0xff] %v463_v12  ;;  %v469_v15 = vld [vmem:[%s9238_s4 + $0x838] sm:$0xff]  ;;  %466 = vst [vmem:[%s9243_s5 + $0x468] sm:$0xff] %v465_v13  ;;  %v471_v16 = vld [vmem:[%s9238_s4 + $0x900] sm:$0xff] }
  0x61   : > { %468 = vst [vmem:[%s9243_s5 + $0x470] sm:$0xff] %v467_v14  ;;  %470 = vst [vmem:[%s9243_s5 + $0x478] sm:$0xff] %v469_v15  ;;  %v473_v17 = vld [vmem:[%s9238_s4 + $0x908] sm:$0xff]  ;;  %v475_v18 = vld [vmem:[%s9238_s4 + $0x910] sm:$0xff] }
  0x62   : > { %472 = vst [vmem:[%s9243_s5 + $0x480] sm:$0xff] %v471_v16  ;;  %474 = vst [vmem:[%s9243_s5 + $0x488] sm:$0xff] %v473_v17  ;;  %v477_v19 = vld [vmem:[%s9238_s4 + $0x918] sm:$0xff]  ;;  %v479_v20 = vld [vmem:[%s9238_s4 + $0x920] sm:$0xff] }
  0x63   : > { %476 = vst [vmem:[%s9243_s5 + $0x490] sm:$0xff] %v475_v18  ;;  %v481_v21 = vld [vmem:[%s9238_s4 + $0x928] sm:$0xff]  ;;  %478 = vst [vmem:[%s9243_s5 + $0x498] sm:$0xff] %v477_v19  ;;  %v483_v22 = vld [vmem:[%s9238_s4 + $0x930] sm:$0xff] }
  0x64   : > { %480 = vst [vmem:[%s9243_s5 + $0x4a0] sm:$0xff] %v479_v20  ;;  %482 = vst [vmem:[%s9243_s5 + $0x4a8] sm:$0xff] %v481_v21  ;;  %v485_v23 = vld [vmem:[%s9238_s4 + $0x938] sm:$0xff]  ;;  %v487_v24 = vld [vmem:[%s9238_s4 + $0x940] sm:$0xff] }
  0x65   : > { %484 = vst [vmem:[%s9243_s5 + $0x4b0] sm:$0xff] %v483_v22  ;;  %486 = vst [vmem:[%s9243_s5 + $0x4b8] sm:$0xff] %v485_v23  ;;  %v489_v25 = vld [vmem:[%s9238_s4 + $0x948] sm:$0xff]  ;;  %v491_v26 = vld [vmem:[%s9238_s4 + $0x950] sm:$0xff] }
  0x66   : > { %488 = vst [vmem:[%s9243_s5 + $0x4c0] sm:$0xff] %v487_v24  ;;  %v493_v27 = vld [vmem:[%s9238_s4 + $0x958] sm:$0xff]  ;;  %490 = vst [vmem:[%s9243_s5 + $0x4c8] sm:$0xff] %v489_v25  ;;  %v495_v28 = vld [vmem:[%s9238_s4 + $0x960] sm:$0xff] }
  0x67   : > { %492 = vst [vmem:[%s9243_s5 + $0x4d0] sm:$0xff] %v491_v26  ;;  %494 = vst [vmem:[%s9243_s5 + $0x4d8] sm:$0xff] %v493_v27  ;;  %v497_v29 = vld [vmem:[%s9238_s4 + $0x968] sm:$0xff]  ;;  %v499_v30 = vld [vmem:[%s9238_s4 + $0x970] sm:$0xff] }
  0x68   : > { %496 = vst [vmem:[%s9243_s5 + $0x4e0] sm:$0xff] %v495_v28  ;;  %498 = vst [vmem:[%s9243_s5 + $0x4e8] sm:$0xff] %v497_v29  ;;  %v501_v31 = vld [vmem:[%s9238_s4 + $0x978] sm:$0xff]  ;;  %v503_v32 = vld [vmem:[%s9238_s4 + $0x980] sm:$0xff] }
  0x69   : > { %500 = vst [vmem:[%s9243_s5 + $0x4f0] sm:$0xff] %v499_v30  ;;  %v505_v33 = vld [vmem:[%s9238_s4 + $0x988] sm:$0xff]  ;;  %502 = vst [vmem:[%s9243_s5 + $0x4f8] sm:$0xff] %v501_v31  ;;  %v507_v34 = vld [vmem:[%s9238_s4 + $0x990] sm:$0xff] }
  0x6a   : > { %504 = vst [vmem:[%s9243_s5 + $0x500] sm:$0xff] %v503_v32  ;;  %506 = vst [vmem:[%s9243_s5 + $0x508] sm:$0xff] %v505_v33  ;;  %v509_v35 = vld [vmem:[%s9238_s4 + $0x998] sm:$0xff]  ;;  %v511_v36 = vld [vmem:[%s9238_s4 + $0x9a0] sm:$0xff] }
  0x6b   : > { %508 = vst [vmem:[%s9243_s5 + $0x510] sm:$0xff] %v507_v34  ;;  %510 = vst [vmem:[%s9243_s5 + $0x518] sm:$0xff] %v509_v35  ;;  %v513_v37 = vld [vmem:[%s9238_s4 + $0x9a8] sm:$0xff]  ;;  %v515_v38 = vld [vmem:[%s9238_s4 + $0x9b0] sm:$0xff] }
  0x6c   : > { %512 = vst [vmem:[%s9243_s5 + $0x520] sm:$0xff] %v511_v36  ;;  %v517_v39 = vld [vmem:[%s9238_s4 + $0x9b8] sm:$0xff]  ;;  %514 = vst [vmem:[%s9243_s5 + $0x528] sm:$0xff] %v513_v37  ;;  %v519_v40 = vld [vmem:[%s9238_s4 + $0xa80] sm:$0xff] }
  0x6d   : > { %516 = vst [vmem:[%s9243_s5 + $0x530] sm:$0xff] %v515_v38  ;;  %518 = vst [vmem:[%s9243_s5 + $0x538] sm:$0xff] %v517_v39  ;;  %v521_v41 = vld [vmem:[%s9238_s4 + $0xa88] sm:$0xff]  ;;  %v523_v42 = vld [vmem:[%s9238_s4 + $0xa90] sm:$0xff] }
  0x6e   : > { %520 = vst [vmem:[%s9243_s5 + $0x540] sm:$0xff] %v519_v40  ;;  %522 = vst [vmem:[%s9243_s5 + $0x548] sm:$0xff] %v521_v41  ;;  %v525_v43 = vld [vmem:[%s9238_s4 + $0xa98] sm:$0xff]  ;;  %v527_v44 = vld [vmem:[%s9238_s4 + $0xaa0] sm:$0xff] }
  0x6f   : > { %524 = vst [vmem:[%s9243_s5 + $0x550] sm:$0xff] %v523_v42  ;;  %v529_v45 = vld [vmem:[%s9238_s4 + $0xaa8] sm:$0xff]  ;;  %526 = vst [vmem:[%s9243_s5 + $0x558] sm:$0xff] %v525_v43  ;;  %v531_v46 = vld [vmem:[%s9238_s4 + $0xab0] sm:$0xff] }
  0x70   : > { %528 = vst [vmem:[%s9243_s5 + $0x560] sm:$0xff] %v527_v44  ;;  %530 = vst [vmem:[%s9243_s5 + $0x568] sm:$0xff] %v529_v45  ;;  %v533_v47 = vld [vmem:[%s9238_s4 + $0xab8] sm:$0xff]  ;;  %v535_v48 = vld [vmem:[%s9238_s4 + $0xac0] sm:$0xff] }
  0x71   : > { %532 = vst [vmem:[%s9243_s5 + $0x570] sm:$0xff] %v531_v46  ;;  %534 = vst [vmem:[%s9243_s5 + $0x578] sm:$0xff] %v533_v47  ;;  %v537_v49 = vld [vmem:[%s9238_s4 + $0xac8] sm:$0xff]  ;;  %v539_v50 = vld [vmem:[%s9238_s4 + $0xad0] sm:$0xff] }
  0x72   : > { %536 = vst [vmem:[%s9243_s5 + $0x580] sm:$0xff] %v535_v48  ;;  %v541_v51 = vld [vmem:[%s9238_s4 + $0xad8] sm:$0xff]  ;;  %538 = vst [vmem:[%s9243_s5 + $0x588] sm:$0xff] %v537_v49  ;;  %v543_v52 = vld [vmem:[%s9238_s4 + $0xae0] sm:$0xff] }
  0x73   : > { %540 = vst [vmem:[%s9243_s5 + $0x590] sm:$0xff] %v539_v50  ;;  %542 = vst [vmem:[%s9243_s5 + $0x598] sm:$0xff] %v541_v51  ;;  %v545_v53 = vld [vmem:[%s9238_s4 + $0xae8] sm:$0xff]  ;;  %v547_v54 = vld [vmem:[%s9238_s4 + $0xaf0] sm:$0xff] }
  0x74   : > { %544 = vst [vmem:[%s9243_s5 + $0x5a0] sm:$0xff] %v543_v52  ;;  %546 = vst [vmem:[%s9243_s5 + $0x5a8] sm:$0xff] %v545_v53  ;;  %v549_v55 = vld [vmem:[%s9238_s4 + $0xaf8] sm:$0xff]  ;;  %v551_v56 = vld [vmem:[%s9238_s4 + $0xb00] sm:$0xff] }
  0x75   : > { %548 = vst [vmem:[%s9243_s5 + $0x5b0] sm:$0xff] %v547_v54  ;;  %v553_v57 = vld [vmem:[%s9238_s4 + $0xb08] sm:$0xff]  ;;  %550 = vst [vmem:[%s9243_s5 + $0x5b8] sm:$0xff] %v549_v55  ;;  %v555_v58 = vld [vmem:[%s9238_s4 + $0xb10] sm:$0xff] }
  0x76   : > { %552 = vst [vmem:[%s9243_s5 + $0x5c0] sm:$0xff] %v551_v56  ;;  %554 = vst [vmem:[%s9243_s5 + $0x5c8] sm:$0xff] %v553_v57  ;;  %v557_v59 = vld [vmem:[%s9238_s4 + $0xb18] sm:$0xff]  ;;  %v559_v60 = vld [vmem:[%s9238_s4 + $0xb20] sm:$0xff] }
  0x77   : > { %556 = vst [vmem:[%s9243_s5 + $0x5d0] sm:$0xff] %v555_v58  ;;  %558 = vst [vmem:[%s9243_s5 + $0x5d8] sm:$0xff] %v557_v59  ;;  %v561_v61 = vld [vmem:[%s9238_s4 + $0xb28] sm:$0xff]  ;;  %v563_v62 = vld [vmem:[%s9238_s4 + $0xb30] sm:$0xff] }
  0x78   : > { %560 = vst [vmem:[%s9243_s5 + $0x5e0] sm:$0xff] %v559_v60  ;;  %v565_v63 = vld [vmem:[%s9238_s4 + $0xb38] sm:$0xff]  ;;  %562 = vst [vmem:[%s9243_s5 + $0x5e8] sm:$0xff] %v561_v61  ;;  %v567_v0 = vld [vmem:[%s9238_s4 + $0xc00] sm:$0xff] }
  0x79   : > { %564 = vst [vmem:[%s9243_s5 + $0x5f0] sm:$0xff] %v563_v62  ;;  %566 = vst [vmem:[%s9243_s5 + $0x5f8] sm:$0xff] %v565_v63  ;;  %v569_v1 = vld [vmem:[%s9238_s4 + $0xc08] sm:$0xff]  ;;  %v571_v2 = vld [vmem:[%s9238_s4 + $0xc10] sm:$0xff] }
  0x7a   : > { %568 = vst [vmem:[%s9243_s5 + $0x600] sm:$0xff] %v567_v0  ;;  %570 = vst [vmem:[%s9243_s5 + $0x608] sm:$0xff] %v569_v1  ;;  %v573_v3 = vld [vmem:[%s9238_s4 + $0xc18] sm:$0xff]  ;;  %v575_v4 = vld [vmem:[%s9238_s4 + $0xc20] sm:$0xff] }
  0x7b   : > { %572 = vst [vmem:[%s9243_s5 + $0x610] sm:$0xff] %v571_v2  ;;  %v577_v5 = vld [vmem:[%s9238_s4 + $0xc28] sm:$0xff]  ;;  %574 = vst [vmem:[%s9243_s5 + $0x618] sm:$0xff] %v573_v3  ;;  %v579_v6 = vld [vmem:[%s9238_s4 + $0xc30] sm:$0xff] }
  0x7c   : > { %576 = vst [vmem:[%s9243_s5 + $0x620] sm:$0xff] %v575_v4  ;;  %578 = vst [vmem:[%s9243_s5 + $0x628] sm:$0xff] %v577_v5  ;;  %v581_v7 = vld [vmem:[%s9238_s4 + $0xc38] sm:$0xff]  ;;  %v583_v8 = vld [vmem:[%s9238_s4 + $0xc40] sm:$0xff] }
  0x7d   : > { %580 = vst [vmem:[%s9243_s5 + $0x630] sm:$0xff] %v579_v6  ;;  %582 = vst [vmem:[%s9243_s5 + $0x638] sm:$0xff] %v581_v7  ;;  %v585_v9 = vld [vmem:[%s9238_s4 + $0xc48] sm:$0xff]  ;;  %v587_v10 = vld [vmem:[%s9238_s4 + $0xc50] sm:$0xff] }
  0x7e   : > { %584 = vst [vmem:[%s9243_s5 + $0x640] sm:$0xff] %v583_v8  ;;  %v589_v11 = vld [vmem:[%s9238_s4 + $0xc58] sm:$0xff]  ;;  %586 = vst [vmem:[%s9243_s5 + $0x648] sm:$0xff] %v585_v9  ;;  %v591_v12 = vld [vmem:[%s9238_s4 + $0xc60] sm:$0xff] }
  0x7f   : > { %588 = vst [vmem:[%s9243_s5 + $0x650] sm:$0xff] %v587_v10  ;;  %590 = vst [vmem:[%s9243_s5 + $0x658] sm:$0xff] %v589_v11  ;;  %v593_v13 = vld [vmem:[%s9238_s4 + $0xc68] sm:$0xff]  ;;  %v595_v14 = vld [vmem:[%s9238_s4 + $0xc70] sm:$0xff] }
  0x80   : > { %592 = vst [vmem:[%s9243_s5 + $0x660] sm:$0xff] %v591_v12  ;;  %594 = vst [vmem:[%s9243_s5 + $0x668] sm:$0xff] %v593_v13  ;;  %v597_v15 = vld [vmem:[%s9238_s4 + $0xc78] sm:$0xff]  ;;  %v599_v16 = vld [vmem:[%s9238_s4 + $0xc80] sm:$0xff] }
  0x81   : > { %596 = vst [vmem:[%s9243_s5 + $0x670] sm:$0xff] %v595_v14  ;;  %v601_v17 = vld [vmem:[%s9238_s4 + $0xc88] sm:$0xff]  ;;  %598 = vst [vmem:[%s9243_s5 + $0x678] sm:$0xff] %v597_v15  ;;  %v603_v18 = vld [vmem:[%s9238_s4 + $0xc90] sm:$0xff] }
  0x82   : > { %600 = vst [vmem:[%s9243_s5 + $0x680] sm:$0xff] %v599_v16  ;;  %602 = vst [vmem:[%s9243_s5 + $0x688] sm:$0xff] %v601_v17  ;;  %v605_v19 = vld [vmem:[%s9238_s4 + $0xc98] sm:$0xff]  ;;  %v607_v20 = vld [vmem:[%s9238_s4 + $0xca0] sm:$0xff] }
  0x83   : > { %604 = vst [vmem:[%s9243_s5 + $0x690] sm:$0xff] %v603_v18  ;;  %606 = vst [vmem:[%s9243_s5 + $0x698] sm:$0xff] %v605_v19  ;;  %v609_v21 = vld [vmem:[%s9238_s4 + $0xca8] sm:$0xff]  ;;  %v611_v22 = vld [vmem:[%s9238_s4 + $0xcb0] sm:$0xff] }
  0x84   : > { %608 = vst [vmem:[%s9243_s5 + $0x6a0] sm:$0xff] %v607_v20  ;;  %v613_v23 = vld [vmem:[%s9238_s4 + $0xcb8] sm:$0xff]  ;;  %610 = vst [vmem:[%s9243_s5 + $0x6a8] sm:$0xff] %v609_v21  ;;  %v615_v24 = vld [vmem:[%s9238_s4 + $0xd80] sm:$0xff] }
  0x85   : > { %612 = vst [vmem:[%s9243_s5 + $0x6b0] sm:$0xff] %v611_v22  ;;  %614 = vst [vmem:[%s9243_s5 + $0x6b8] sm:$0xff] %v613_v23  ;;  %v617_v25 = vld [vmem:[%s9238_s4 + $0xd88] sm:$0xff]  ;;  %v619_v26 = vld [vmem:[%s9238_s4 + $0xd90] sm:$0xff] }
  0x86   : > { %616 = vst [vmem:[%s9243_s5 + $0x6c0] sm:$0xff] %v615_v24  ;;  %618 = vst [vmem:[%s9243_s5 + $0x6c8] sm:$0xff] %v617_v25  ;;  %v621_v27 = vld [vmem:[%s9238_s4 + $0xd98] sm:$0xff]  ;;  %v623_v28 = vld [vmem:[%s9238_s4 + $0xda0] sm:$0xff] }
  0x87   : > { %620 = vst [vmem:[%s9243_s5 + $0x6d0] sm:$0xff] %v619_v26  ;;  %v625_v29 = vld [vmem:[%s9238_s4 + $0xda8] sm:$0xff]  ;;  %622 = vst [vmem:[%s9243_s5 + $0x6d8] sm:$0xff] %v621_v27  ;;  %v627_v30 = vld [vmem:[%s9238_s4 + $0xdb0] sm:$0xff] }
  0x88   : > { %624 = vst [vmem:[%s9243_s5 + $0x6e0] sm:$0xff] %v623_v28  ;;  %626 = vst [vmem:[%s9243_s5 + $0x6e8] sm:$0xff] %v625_v29  ;;  %v629_v31 = vld [vmem:[%s9238_s4 + $0xdb8] sm:$0xff]  ;;  %v631_v32 = vld [vmem:[%s9238_s4 + $0xdc0] sm:$0xff] }
  0x89   : > { %628 = vst [vmem:[%s9243_s5 + $0x6f0] sm:$0xff] %v627_v30  ;;  %630 = vst [vmem:[%s9243_s5 + $0x6f8] sm:$0xff] %v629_v31  ;;  %v633_v33 = vld [vmem:[%s9238_s4 + $0xdc8] sm:$0xff]  ;;  %v635_v34 = vld [vmem:[%s9238_s4 + $0xdd0] sm:$0xff] }
  0x8a   : > { %632 = vst [vmem:[%s9243_s5 + $0x700] sm:$0xff] %v631_v32  ;;  %v637_v35 = vld [vmem:[%s9238_s4 + $0xdd8] sm:$0xff]  ;;  %634 = vst [vmem:[%s9243_s5 + $0x708] sm:$0xff] %v633_v33  ;;  %v639_v36 = vld [vmem:[%s9238_s4 + $0xde0] sm:$0xff] }
  0x8b   : > { %636 = vst [vmem:[%s9243_s5 + $0x710] sm:$0xff] %v635_v34  ;;  %638 = vst [vmem:[%s9243_s5 + $0x718] sm:$0xff] %v637_v35  ;;  %v641_v37 = vld [vmem:[%s9238_s4 + $0xde8] sm:$0xff]  ;;  %v643_v38 = vld [vmem:[%s9238_s4 + $0xdf0] sm:$0xff] }
  0x8c   : > { %640 = vst [vmem:[%s9243_s5 + $0x720] sm:$0xff] %v639_v36  ;;  %642 = vst [vmem:[%s9243_s5 + $0x728] sm:$0xff] %v641_v37  ;;  %v645_v39 = vld [vmem:[%s9238_s4 + $0xdf8] sm:$0xff]  ;;  %v647_v40 = vld [vmem:[%s9238_s4 + $0xe00] sm:$0xff] }
  0x8d   : > { %644 = vst [vmem:[%s9243_s5 + $0x730] sm:$0xff] %v643_v38  ;;  %v649_v41 = vld [vmem:[%s9238_s4 + $0xe08] sm:$0xff]  ;;  %646 = vst [vmem:[%s9243_s5 + $0x738] sm:$0xff] %v645_v39  ;;  %v651_v42 = vld [vmem:[%s9238_s4 + $0xe10] sm:$0xff] }
  0x8e   : > { %648 = vst [vmem:[%s9243_s5 + $0x740] sm:$0xff] %v647_v40  ;;  %650 = vst [vmem:[%s9243_s5 + $0x748] sm:$0xff] %v649_v41  ;;  %v653_v43 = vld [vmem:[%s9238_s4 + $0xe18] sm:$0xff]  ;;  %v655_v44 = vld [vmem:[%s9238_s4 + $0xe20] sm:$0xff] }
  0x8f   : > { %652 = vst [vmem:[%s9243_s5 + $0x750] sm:$0xff] %v651_v42  ;;  %654 = vst [vmem:[%s9243_s5 + $0x758] sm:$0xff] %v653_v43  ;;  %v657_v45 = vld [vmem:[%s9238_s4 + $0xe28] sm:$0xff]  ;;  %v659_v46 = vld [vmem:[%s9238_s4 + $0xe30] sm:$0xff] }
  0x90   : > { %656 = vst [vmem:[%s9243_s5 + $0x760] sm:$0xff] %v655_v44  ;;  %v661_v47 = vld [vmem:[%s9238_s4 + $0xe38] sm:$0xff]  ;;  %658 = vst [vmem:[%s9243_s5 + $0x768] sm:$0xff] %v657_v45  ;;  %v663_v48 = vld [vmem:[%s9238_s4 + $0xf00] sm:$0xff] }
  0x91   : > { %660 = vst [vmem:[%s9243_s5 + $0x770] sm:$0xff] %v659_v46  ;;  %662 = vst [vmem:[%s9243_s5 + $0x778] sm:$0xff] %v661_v47  ;;  %v665_v49 = vld [vmem:[%s9238_s4 + $0xf08] sm:$0xff]  ;;  %v667_v50 = vld [vmem:[%s9238_s4 + $0xf10] sm:$0xff] }
  0x92   : > { %664 = vst [vmem:[%s9243_s5 + $0x780] sm:$0xff] %v663_v48  ;;  %666 = vst [vmem:[%s9243_s5 + $0x788] sm:$0xff] %v665_v49  ;;  %v669_v51 = vld [vmem:[%s9238_s4 + $0xf18] sm:$0xff]  ;;  %v671_v52 = vld [vmem:[%s9238_s4 + $0xf20] sm:$0xff] }
  0x93   : > { %668 = vst [vmem:[%s9243_s5 + $0x790] sm:$0xff] %v667_v50  ;;  %v673_v53 = vld [vmem:[%s9238_s4 + $0xf28] sm:$0xff]  ;;  %670 = vst [vmem:[%s9243_s5 + $0x798] sm:$0xff] %v669_v51  ;;  %v675_v54 = vld [vmem:[%s9238_s4 + $0xf30] sm:$0xff] }
  0x94   : > { %672 = vst [vmem:[%s9243_s5 + $0x7a0] sm:$0xff] %v671_v52  ;;  %674 = vst [vmem:[%s9243_s5 + $0x7a8] sm:$0xff] %v673_v53  ;;  %v677_v55 = vld [vmem:[%s9238_s4 + $0xf38] sm:$0xff]  ;;  %v679_v56 = vld [vmem:[%s9238_s4 + $0xf40] sm:$0xff] }
  0x95   : > { %676 = vst [vmem:[%s9243_s5 + $0x7b0] sm:$0xff] %v675_v54  ;;  %678 = vst [vmem:[%s9243_s5 + $0x7b8] sm:$0xff] %v677_v55  ;;  %v681_v57 = vld [vmem:[%s9238_s4 + $0xf48] sm:$0xff]  ;;  %v683_v58 = vld [vmem:[%s9238_s4 + $0xf50] sm:$0xff] }
  0x96   : > { %680 = vst [vmem:[%s9243_s5 + $0x7c0] sm:$0xff] %v679_v56  ;;  %v685_v59 = vld [vmem:[%s9238_s4 + $0xf58] sm:$0xff]  ;;  %682 = vst [vmem:[%s9243_s5 + $0x7c8] sm:$0xff] %v681_v57  ;;  %v687_v60 = vld [vmem:[%s9238_s4 + $0xf60] sm:$0xff] }
  0x97   : > { %684 = vst [vmem:[%s9243_s5 + $0x7d0] sm:$0xff] %v683_v58  ;;  %686 = vst [vmem:[%s9243_s5 + $0x7d8] sm:$0xff] %v685_v59  ;;  %v689_v61 = vld [vmem:[%s9238_s4 + $0xf68] sm:$0xff]  ;;  %v691_v62 = vld [vmem:[%s9238_s4 + $0xf70] sm:$0xff] }
  0x98   : > { %688 = vst [vmem:[%s9243_s5 + $0x7e0] sm:$0xff] %v687_v60  ;;  %690 = vst [vmem:[%s9243_s5 + $0x7e8] sm:$0xff] %v689_v61  ;;  %v693_v63 = vld [vmem:[%s9238_s4 + $0xf78] sm:$0xff]  ;;  %v695_v0 = vld [vmem:[%s9238_s4 + $0xf80] sm:$0xff] }
  0x99   : > { %692 = vst [vmem:[%s9243_s5 + $0x7f0] sm:$0xff] %v691_v62  ;;  %v697_v1 = vld [vmem:[%s9238_s4 + $0xf88] sm:$0xff]  ;;  %694 = vst [vmem:[%s9243_s5 + $0x7f8] sm:$0xff] %v693_v63  ;;  %v699_v2 = vld [vmem:[%s9238_s4 + $0xf90] sm:$0xff] }
  0x9a   : > { %696 = vst [vmem:[%s9243_s5 + $0x800] sm:$0xff] %v695_v0  ;;  %698 = vst [vmem:[%s9243_s5 + $0x808] sm:$0xff] %v697_v1  ;;  %v701_v3 = vld [vmem:[%s9238_s4 + $0xf98] sm:$0xff]  ;;  %v703_v4 = vld [vmem:[%s9238_s4 + $0xfa0] sm:$0xff] }
  0x9b   : > { %700 = vst [vmem:[%s9243_s5 + $0x810] sm:$0xff] %v699_v2  ;;  %702 = vst [vmem:[%s9243_s5 + $0x818] sm:$0xff] %v701_v3  ;;  %v705_v5 = vld [vmem:[%s9238_s4 + $0xfa8] sm:$0xff]  ;;  %v707_v6 = vld [vmem:[%s9238_s4 + $0xfb0] sm:$0xff] }
  0x9c   : > { %704 = vst [vmem:[%s9243_s5 + $0x820] sm:$0xff] %v703_v4  ;;  %v709_v7 = vld [vmem:[%s9238_s4 + $0xfb8] sm:$0xff]  ;;  %706 = vst [vmem:[%s9243_s5 + $0x828] sm:$0xff] %v705_v5  ;;  %v711_v8 = vld [vmem:[%s9238_s4 + $0x1080] sm:$0xff] }
  0x9d   : > { %708 = vst [vmem:[%s9243_s5 + $0x830] sm:$0xff] %v707_v6  ;;  %710 = vst [vmem:[%s9243_s5 + $0x838] sm:$0xff] %v709_v7  ;;  %v713_v9 = vld [vmem:[%s9238_s4 + $0x1088] sm:$0xff]  ;;  %v715_v10 = vld [vmem:[%s9238_s4 + $0x1090] sm:$0xff] }
  0x9e   : > { %712 = vst [vmem:[%s9243_s5 + $0x840] sm:$0xff] %v711_v8  ;;  %714 = vst [vmem:[%s9243_s5 + $0x848] sm:$0xff] %v713_v9  ;;  %v717_v11 = vld [vmem:[%s9238_s4 + $0x1098] sm:$0xff]  ;;  %v719_v12 = vld [vmem:[%s9238_s4 + $0x10a0] sm:$0xff] }
  0x9f   : > { %716 = vst [vmem:[%s9243_s5 + $0x850] sm:$0xff] %v715_v10  ;;  %v721_v13 = vld [vmem:[%s9238_s4 + $0x10a8] sm:$0xff]  ;;  %718 = vst [vmem:[%s9243_s5 + $0x858] sm:$0xff] %v717_v11  ;;  %v723_v14 = vld [vmem:[%s9238_s4 + $0x10b0] sm:$0xff] }
  0xa0   : > { %720 = vst [vmem:[%s9243_s5 + $0x860] sm:$0xff] %v719_v12  ;;  %722 = vst [vmem:[%s9243_s5 + $0x868] sm:$0xff] %v721_v13  ;;  %v725_v15 = vld [vmem:[%s9238_s4 + $0x10b8] sm:$0xff]  ;;  %v727_v16 = vld [vmem:[%s9238_s4 + $0x10c0] sm:$0xff] }
  0xa1   : > { %724 = vst [vmem:[%s9243_s5 + $0x870] sm:$0xff] %v723_v14  ;;  %726 = vst [vmem:[%s9243_s5 + $0x878] sm:$0xff] %v725_v15  ;;  %v729_v17 = vld [vmem:[%s9238_s4 + $0x10c8] sm:$0xff]  ;;  %v731_v18 = vld [vmem:[%s9238_s4 + $0x10d0] sm:$0xff] }
  0xa2   : > { %728 = vst [vmem:[%s9243_s5 + $0x880] sm:$0xff] %v727_v16  ;;  %v733_v19 = vld [vmem:[%s9238_s4 + $0x10d8] sm:$0xff]  ;;  %730 = vst [vmem:[%s9243_s5 + $0x888] sm:$0xff] %v729_v17  ;;  %v735_v20 = vld [vmem:[%s9238_s4 + $0x10e0] sm:$0xff] }
  0xa3   : > { %732 = vst [vmem:[%s9243_s5 + $0x890] sm:$0xff] %v731_v18  ;;  %734 = vst [vmem:[%s9243_s5 + $0x898] sm:$0xff] %v733_v19  ;;  %v737_v21 = vld [vmem:[%s9238_s4 + $0x10e8] sm:$0xff]  ;;  %v739_v22 = vld [vmem:[%s9238_s4 + $0x10f0] sm:$0xff] }
  0xa4   : > { %736 = vst [vmem:[%s9243_s5 + $0x8a0] sm:$0xff] %v735_v20  ;;  %738 = vst [vmem:[%s9243_s5 + $0x8a8] sm:$0xff] %v737_v21  ;;  %v741_v23 = vld [vmem:[%s9238_s4 + $0x10f8] sm:$0xff]  ;;  %v743_v24 = vld [vmem:[%s9238_s4 + $0x1100] sm:$0xff] }
  0xa5   : > { %740 = vst [vmem:[%s9243_s5 + $0x8b0] sm:$0xff] %v739_v22  ;;  %v745_v25 = vld [vmem:[%s9238_s4 + $0x1108] sm:$0xff]  ;;  %742 = vst [vmem:[%s9243_s5 + $0x8b8] sm:$0xff] %v741_v23  ;;  %v747_v26 = vld [vmem:[%s9238_s4 + $0x1110] sm:$0xff] }
  0xa6   : > { %744 = vst [vmem:[%s9243_s5 + $0x8c0] sm:$0xff] %v743_v24  ;;  %746 = vst [vmem:[%s9243_s5 + $0x8c8] sm:$0xff] %v745_v25  ;;  %v749_v27 = vld [vmem:[%s9238_s4 + $0x1118] sm:$0xff]  ;;  %v751_v28 = vld [vmem:[%s9238_s4 + $0x1120] sm:$0xff] }
  0xa7   : > { %748 = vst [vmem:[%s9243_s5 + $0x8d0] sm:$0xff] %v747_v26  ;;  %750 = vst [vmem:[%s9243_s5 + $0x8d8] sm:$0xff] %v749_v27  ;;  %v753_v29 = vld [vmem:[%s9238_s4 + $0x1128] sm:$0xff]  ;;  %v755_v30 = vld [vmem:[%s9238_s4 + $0x1130] sm:$0xff] }
  0xa8   : > { %752 = vst [vmem:[%s9243_s5 + $0x8e0] sm:$0xff] %v751_v28  ;;  %v757_v31 = vld [vmem:[%s9238_s4 + $0x1138] sm:$0xff]  ;;  %754 = vst [vmem:[%s9243_s5 + $0x8e8] sm:$0xff] %v753_v29  ;;  %v759_v32 = vld [vmem:[%s9238_s4 + $0x1200] sm:$0xff] }
  0xa9   : > { %756 = vst [vmem:[%s9243_s5 + $0x8f0] sm:$0xff] %v755_v30  ;;  %758 = vst [vmem:[%s9243_s5 + $0x8f8] sm:$0xff] %v757_v31  ;;  %v761_v33 = vld [vmem:[%s9238_s4 + $0x1208] sm:$0xff]  ;;  %v763_v34 = vld [vmem:[%s9238_s4 + $0x1210] sm:$0xff] }
  0xaa   : > { %760 = vst [vmem:[%s9243_s5 + $0x900] sm:$0xff] %v759_v32  ;;  %762 = vst [vmem:[%s9243_s5 + $0x908] sm:$0xff] %v761_v33  ;;  %v765_v35 = vld [vmem:[%s9238_s4 + $0x1218] sm:$0xff]  ;;  %v767_v36 = vld [vmem:[%s9238_s4 + $0x1220] sm:$0xff] }
  0xab   : > { %764 = vst [vmem:[%s9243_s5 + $0x910] sm:$0xff] %v763_v34  ;;  %v769_v37 = vld [vmem:[%s9238_s4 + $0x1228] sm:$0xff]  ;;  %766 = vst [vmem:[%s9243_s5 + $0x918] sm:$0xff] %v765_v35  ;;  %v771_v38 = vld [vmem:[%s9238_s4 + $0x1230] sm:$0xff] }
  0xac   : > { %768 = vst [vmem:[%s9243_s5 + $0x920] sm:$0xff] %v767_v36  ;;  %770 = vst [vmem:[%s9243_s5 + $0x928] sm:$0xff] %v769_v37  ;;  %v773_v39 = vld [vmem:[%s9238_s4 + $0x1238] sm:$0xff]  ;;  %v775_v40 = vld [vmem:[%s9238_s4 + $0x1240] sm:$0xff] }
  0xad   : > { %772 = vst [vmem:[%s9243_s5 + $0x930] sm:$0xff] %v771_v38  ;;  %774 = vst [vmem:[%s9243_s5 + $0x938] sm:$0xff] %v773_v39  ;;  %v777_v41 = vld [vmem:[%s9238_s4 + $0x1248] sm:$0xff]  ;;  %v779_v42 = vld [vmem:[%s9238_s4 + $0x1250] sm:$0xff] }
  0xae   : > { %776 = vst [vmem:[%s9243_s5 + $0x940] sm:$0xff] %v775_v40  ;;  %v781_v43 = vld [vmem:[%s9238_s4 + $0x1258] sm:$0xff]  ;;  %778 = vst [vmem:[%s9243_s5 + $0x948] sm:$0xff] %v777_v41  ;;  %v783_v44 = vld [vmem:[%s9238_s4 + $0x1260] sm:$0xff] }
  0xaf   : > { %780 = vst [vmem:[%s9243_s5 + $0x950] sm:$0xff] %v779_v42  ;;  %782 = vst [vmem:[%s9243_s5 + $0x958] sm:$0xff] %v781_v43  ;;  %v785_v45 = vld [vmem:[%s9238_s4 + $0x1268] sm:$0xff]  ;;  %v787_v46 = vld [vmem:[%s9238_s4 + $0x1270] sm:$0xff] }
  0xb0   : > { %784 = vst [vmem:[%s9243_s5 + $0x960] sm:$0xff] %v783_v44  ;;  %786 = vst [vmem:[%s9243_s5 + $0x968] sm:$0xff] %v785_v45  ;;  %v789_v47 = vld [vmem:[%s9238_s4 + $0x1278] sm:$0xff]  ;;  %v791_v48 = vld [vmem:[%s9238_s4 + $0x1280] sm:$0xff] }
  0xb1   : > { %788 = vst [vmem:[%s9243_s5 + $0x970] sm:$0xff] %v787_v46  ;;  %v793_v49 = vld [vmem:[%s9238_s4 + $0x1288] sm:$0xff]  ;;  %790 = vst [vmem:[%s9243_s5 + $0x978] sm:$0xff] %v789_v47  ;;  %v795_v50 = vld [vmem:[%s9238_s4 + $0x1290] sm:$0xff] }
  0xb2   : > { %792 = vst [vmem:[%s9243_s5 + $0x980] sm:$0xff] %v791_v48  ;;  %794 = vst [vmem:[%s9243_s5 + $0x988] sm:$0xff] %v793_v49  ;;  %v797_v51 = vld [vmem:[%s9238_s4 + $0x1298] sm:$0xff]  ;;  %v799_v52 = vld [vmem:[%s9238_s4 + $0x12a0] sm:$0xff] }
  0xb3   : > { %796 = vst [vmem:[%s9243_s5 + $0x990] sm:$0xff] %v795_v50  ;;  %798 = vst [vmem:[%s9243_s5 + $0x998] sm:$0xff] %v797_v51  ;;  %v801_v53 = vld [vmem:[%s9238_s4 + $0x12a8] sm:$0xff]  ;;  %v803_v54 = vld [vmem:[%s9238_s4 + $0x12b0] sm:$0xff] }
  0xb4   : > { %800 = vst [vmem:[%s9243_s5 + $0x9a0] sm:$0xff] %v799_v52  ;;  %v805_v55 = vld [vmem:[%s9238_s4 + $0x12b8] sm:$0xff]  ;;  %802 = vst [vmem:[%s9243_s5 + $0x9a8] sm:$0xff] %v801_v53  ;;  %v807_v56 = vld [vmem:[%s9238_s4 + $0x1380] sm:$0xff] }
  0xb5   : > { %804 = vst [vmem:[%s9243_s5 + $0x9b0] sm:$0xff] %v803_v54  ;;  %806 = vst [vmem:[%s9243_s5 + $0x9b8] sm:$0xff] %v805_v55  ;;  %v809_v57 = vld [vmem:[%s9238_s4 + $0x1388] sm:$0xff]  ;;  %v811_v58 = vld [vmem:[%s9238_s4 + $0x1390] sm:$0xff] }
  0xb6   : > { %808 = vst [vmem:[%s9243_s5 + $0x9c0] sm:$0xff] %v807_v56  ;;  %810 = vst [vmem:[%s9243_s5 + $0x9c8] sm:$0xff] %v809_v57  ;;  %v813_v59 = vld [vmem:[%s9238_s4 + $0x1398] sm:$0xff]  ;;  %v815_v60 = vld [vmem:[%s9238_s4 + $0x13a0] sm:$0xff] }
  0xb7   : > { %812 = vst [vmem:[%s9243_s5 + $0x9d0] sm:$0xff] %v811_v58  ;;  %v817_v61 = vld [vmem:[%s9238_s4 + $0x13a8] sm:$0xff]  ;;  %814 = vst [vmem:[%s9243_s5 + $0x9d8] sm:$0xff] %v813_v59  ;;  %v819_v62 = vld [vmem:[%s9238_s4 + $0x13b0] sm:$0xff] }
  0xb8   : > { %816 = vst [vmem:[%s9243_s5 + $0x9e0] sm:$0xff] %v815_v60  ;;  %818 = vst [vmem:[%s9243_s5 + $0x9e8] sm:$0xff] %v817_v61  ;;  %v821_v63 = vld [vmem:[%s9238_s4 + $0x13b8] sm:$0xff]  ;;  %v823_v0 = vld [vmem:[%s9238_s4 + $0x13c0] sm:$0xff] }
  0xb9   : > { %820 = vst [vmem:[%s9243_s5 + $0x9f0] sm:$0xff] %v819_v62  ;;  %822 = vst [vmem:[%s9243_s5 + $0x9f8] sm:$0xff] %v821_v63  ;;  %v825_v1 = vld [vmem:[%s9238_s4 + $0x13c8] sm:$0xff]  ;;  %v827_v2 = vld [vmem:[%s9238_s4 + $0x13d0] sm:$0xff] }
  0xba   : > { %824 = vst [vmem:[%s9243_s5 + $0xa00] sm:$0xff] %v823_v0  ;;  %v829_v3 = vld [vmem:[%s9238_s4 + $0x13d8] sm:$0xff]  ;;  %826 = vst [vmem:[%s9243_s5 + $0xa08] sm:$0xff] %v825_v1  ;;  %v831_v4 = vld [vmem:[%s9238_s4 + $0x13e0] sm:$0xff] }
  0xbb   : > { %828 = vst [vmem:[%s9243_s5 + $0xa10] sm:$0xff] %v827_v2  ;;  %830 = vst [vmem:[%s9243_s5 + $0xa18] sm:$0xff] %v829_v3  ;;  %v833_v5 = vld [vmem:[%s9238_s4 + $0x13e8] sm:$0xff]  ;;  %v835_v6 = vld [vmem:[%s9238_s4 + $0x13f0] sm:$0xff] }
  0xbc   : > { %832 = vst [vmem:[%s9243_s5 + $0xa20] sm:$0xff] %v831_v4  ;;  %834 = vst [vmem:[%s9243_s5 + $0xa28] sm:$0xff] %v833_v5  ;;  %v837_v7 = vld [vmem:[%s9238_s4 + $0x13f8] sm:$0xff]  ;;  %v839_v8 = vld [vmem:[%s9238_s4 + $0x1400] sm:$0xff] }
  0xbd   : > { %836 = vst [vmem:[%s9243_s5 + $0xa30] sm:$0xff] %v835_v6  ;;  %v841_v9 = vld [vmem:[%s9238_s4 + $0x1408] sm:$0xff]  ;;  %838 = vst [vmem:[%s9243_s5 + $0xa38] sm:$0xff] %v837_v7  ;;  %v843_v10 = vld [vmem:[%s9238_s4 + $0x1410] sm:$0xff] }
  0xbe   : > { %840 = vst [vmem:[%s9243_s5 + $0xa40] sm:$0xff] %v839_v8  ;;  %842 = vst [vmem:[%s9243_s5 + $0xa48] sm:$0xff] %v841_v9  ;;  %v845_v11 = vld [vmem:[%s9238_s4 + $0x1418] sm:$0xff]  ;;  %v847_v12 = vld [vmem:[%s9238_s4 + $0x1420] sm:$0xff] }
  0xbf   : > { %844 = vst [vmem:[%s9243_s5 + $0xa50] sm:$0xff] %v843_v10  ;;  %846 = vst [vmem:[%s9243_s5 + $0xa58] sm:$0xff] %v845_v11  ;;  %v849_v13 = vld [vmem:[%s9238_s4 + $0x1428] sm:$0xff]  ;;  %v851_v14 = vld [vmem:[%s9238_s4 + $0x1430] sm:$0xff] }
  0xc0   : > { %848 = vst [vmem:[%s9243_s5 + $0xa60] sm:$0xff] %v847_v12  ;;  %v853_v15 = vld [vmem:[%s9238_s4 + $0x1438] sm:$0xff]  ;;  %850 = vst [vmem:[%s9243_s5 + $0xa68] sm:$0xff] %v849_v13  ;;  %v855_v16 = vld [vmem:[%s9238_s4 + $0x1500] sm:$0xff] }
  0xc1   : > { %852 = vst [vmem:[%s9243_s5 + $0xa70] sm:$0xff] %v851_v14  ;;  %854 = vst [vmem:[%s9243_s5 + $0xa78] sm:$0xff] %v853_v15  ;;  %v857_v17 = vld [vmem:[%s9238_s4 + $0x1508] sm:$0xff]  ;;  %v859_v18 = vld [vmem:[%s9238_s4 + $0x1510] sm:$0xff] }
  0xc2   : > { %856 = vst [vmem:[%s9243_s5 + $0xa80] sm:$0xff] %v855_v16  ;;  %858 = vst [vmem:[%s9243_s5 + $0xa88] sm:$0xff] %v857_v17  ;;  %v861_v19 = vld [vmem:[%s9238_s4 + $0x1518] sm:$0xff]  ;;  %v863_v20 = vld [vmem:[%s9238_s4 + $0x1520] sm:$0xff] }
  0xc3   : > { %860 = vst [vmem:[%s9243_s5 + $0xa90] sm:$0xff] %v859_v18  ;;  %v865_v21 = vld [vmem:[%s9238_s4 + $0x1528] sm:$0xff]  ;;  %862 = vst [vmem:[%s9243_s5 + $0xa98] sm:$0xff] %v861_v19  ;;  %v867_v22 = vld [vmem:[%s9238_s4 + $0x1530] sm:$0xff] }
  0xc4   : > { %864 = vst [vmem:[%s9243_s5 + $0xaa0] sm:$0xff] %v863_v20  ;;  %866 = vst [vmem:[%s9243_s5 + $0xaa8] sm:$0xff] %v865_v21  ;;  %v869_v23 = vld [vmem:[%s9238_s4 + $0x1538] sm:$0xff]  ;;  %v871_v24 = vld [vmem:[%s9238_s4 + $0x1540] sm:$0xff] }
  0xc5   : > { %868 = vst [vmem:[%s9243_s5 + $0xab0] sm:$0xff] %v867_v22  ;;  %870 = vst [vmem:[%s9243_s5 + $0xab8] sm:$0xff] %v869_v23  ;;  %v873_v25 = vld [vmem:[%s9238_s4 + $0x1548] sm:$0xff]  ;;  %v875_v26 = vld [vmem:[%s9238_s4 + $0x1550] sm:$0xff] }
  0xc6   : > { %872 = vst [vmem:[%s9243_s5 + $0xac0] sm:$0xff] %v871_v24  ;;  %v877_v27 = vld [vmem:[%s9238_s4 + $0x1558] sm:$0xff]  ;;  %874 = vst [vmem:[%s9243_s5 + $0xac8] sm:$0xff] %v873_v25  ;;  %v879_v28 = vld [vmem:[%s9238_s4 + $0x1560] sm:$0xff] }
  0xc7   : > { %876 = vst [vmem:[%s9243_s5 + $0xad0] sm:$0xff] %v875_v26  ;;  %878 = vst [vmem:[%s9243_s5 + $0xad8] sm:$0xff] %v877_v27  ;;  %v881_v29 = vld [vmem:[%s9238_s4 + $0x1568] sm:$0xff]  ;;  %v883_v30 = vld [vmem:[%s9238_s4 + $0x1570] sm:$0xff] }
  0xc8   : > { %880 = vst [vmem:[%s9243_s5 + $0xae0] sm:$0xff] %v879_v28  ;;  %882 = vst [vmem:[%s9243_s5 + $0xae8] sm:$0xff] %v881_v29  ;;  %v885_v31 = vld [vmem:[%s9238_s4 + $0x1578] sm:$0xff]  ;;  %v887_v32 = vld [vmem:[%s9238_s4 + $0x1580] sm:$0xff] }
  0xc9   : > { %884 = vst [vmem:[%s9243_s5 + $0xaf0] sm:$0xff] %v883_v30  ;;  %v889_v33 = vld [vmem:[%s9238_s4 + $0x1588] sm:$0xff]  ;;  %886 = vst [vmem:[%s9243_s5 + $0xaf8] sm:$0xff] %v885_v31  ;;  %v891_v34 = vld [vmem:[%s9238_s4 + $0x1590] sm:$0xff] }
  0xca   : > { %888 = vst [vmem:[%s9243_s5 + $0xb00] sm:$0xff] %v887_v32  ;;  %890 = vst [vmem:[%s9243_s5 + $0xb08] sm:$0xff] %v889_v33  ;;  %v893_v35 = vld [vmem:[%s9238_s4 + $0x1598] sm:$0xff]  ;;  %v895_v36 = vld [vmem:[%s9238_s4 + $0x15a0] sm:$0xff] }
  0xcb   : > { %892 = vst [vmem:[%s9243_s5 + $0xb10] sm:$0xff] %v891_v34  ;;  %894 = vst [vmem:[%s9243_s5 + $0xb18] sm:$0xff] %v893_v35  ;;  %v897_v37 = vld [vmem:[%s9238_s4 + $0x15a8] sm:$0xff]  ;;  %v899_v38 = vld [vmem:[%s9238_s4 + $0x15b0] sm:$0xff] }
  0xcc   : > { %896 = vst [vmem:[%s9243_s5 + $0xb20] sm:$0xff] %v895_v36  ;;  %v901_v39 = vld [vmem:[%s9238_s4 + $0x15b8] sm:$0xff]  ;;  %898 = vst [vmem:[%s9243_s5 + $0xb28] sm:$0xff] %v897_v37  ;;  %v903_v40 = vld [vmem:[%s9238_s4 + $0x1680] sm:$0xff] }
  0xcd   : > { %900 = vst [vmem:[%s9243_s5 + $0xb30] sm:$0xff] %v899_v38  ;;  %902 = vst [vmem:[%s9243_s5 + $0xb38] sm:$0xff] %v901_v39  ;;  %v905_v41 = vld [vmem:[%s9238_s4 + $0x1688] sm:$0xff]  ;;  %v907_v42 = vld [vmem:[%s9238_s4 + $0x1690] sm:$0xff] }
  0xce   : > { %904 = vst [vmem:[%s9243_s5 + $0xb40] sm:$0xff] %v903_v40  ;;  %906 = vst [vmem:[%s9243_s5 + $0xb48] sm:$0xff] %v905_v41  ;;  %v909_v43 = vld [vmem:[%s9238_s4 + $0x1698] sm:$0xff]  ;;  %v911_v44 = vld [vmem:[%s9238_s4 + $0x16a0] sm:$0xff] }
  0xcf   : > { %908 = vst [vmem:[%s9243_s5 + $0xb50] sm:$0xff] %v907_v42  ;;  %v913_v45 = vld [vmem:[%s9238_s4 + $0x16a8] sm:$0xff]  ;;  %910 = vst [vmem:[%s9243_s5 + $0xb58] sm:$0xff] %v909_v43  ;;  %v915_v46 = vld [vmem:[%s9238_s4 + $0x16b0] sm:$0xff] }
  0xd0   : > { %912 = vst [vmem:[%s9243_s5 + $0xb60] sm:$0xff] %v911_v44  ;;  %914 = vst [vmem:[%s9243_s5 + $0xb68] sm:$0xff] %v913_v45  ;;  %v917_v47 = vld [vmem:[%s9238_s4 + $0x16b8] sm:$0xff]  ;;  %v919_v48 = vld [vmem:[%s9238_s4 + $0x16c0] sm:$0xff] }
  0xd1   : > { %916 = vst [vmem:[%s9243_s5 + $0xb70] sm:$0xff] %v915_v46  ;;  %918 = vst [vmem:[%s9243_s5 + $0xb78] sm:$0xff] %v917_v47  ;;  %v921_v49 = vld [vmem:[%s9238_s4 + $0x16c8] sm:$0xff]  ;;  %v923_v50 = vld [vmem:[%s9238_s4 + $0x16d0] sm:$0xff] }
  0xd2   : > { %920 = vst [vmem:[%s9243_s5 + $0xb80] sm:$0xff] %v919_v48  ;;  %v925_v51 = vld [vmem:[%s9238_s4 + $0x16d8] sm:$0xff]  ;;  %922 = vst [vmem:[%s9243_s5 + $0xb88] sm:$0xff] %v921_v49  ;;  %v927_v52 = vld [vmem:[%s9238_s4 + $0x16e0] sm:$0xff] }
  0xd3   : > { %924 = vst [vmem:[%s9243_s5 + $0xb90] sm:$0xff] %v923_v50  ;;  %926 = vst [vmem:[%s9243_s5 + $0xb98] sm:$0xff] %v925_v51  ;;  %v929_v53 = vld [vmem:[%s9238_s4 + $0x16e8] sm:$0xff]  ;;  %v931_v54 = vld [vmem:[%s9238_s4 + $0x16f0] sm:$0xff] }
  0xd4   : > { %928 = vst [vmem:[%s9243_s5 + $0xba0] sm:$0xff] %v927_v52  ;;  %930 = vst [vmem:[%s9243_s5 + $0xba8] sm:$0xff] %v929_v53  ;;  %v933_v55 = vld [vmem:[%s9238_s4 + $0x16f8] sm:$0xff]  ;;  %v935_v56 = vld [vmem:[%s9238_s4 + $0x1700] sm:$0xff] }
  0xd5   : > { %932 = vst [vmem:[%s9243_s5 + $0xbb0] sm:$0xff] %v931_v54  ;;  %v937_v57 = vld [vmem:[%s9238_s4 + $0x1708] sm:$0xff]  ;;  %934 = vst [vmem:[%s9243_s5 + $0xbb8] sm:$0xff] %v933_v55  ;;  %v939_v58 = vld [vmem:[%s9238_s4 + $0x1710] sm:$0xff] }
  0xd6   : > { %936 = vst [vmem:[%s9243_s5 + $0xbc0] sm:$0xff] %v935_v56  ;;  %938 = vst [vmem:[%s9243_s5 + $0xbc8] sm:$0xff] %v937_v57  ;;  %v941_v59 = vld [vmem:[%s9238_s4 + $0x1718] sm:$0xff]  ;;  %v943_v60 = vld [vmem:[%s9238_s4 + $0x1720] sm:$0xff] }
  0xd7   : > { %940 = vst [vmem:[%s9243_s5 + $0xbd0] sm:$0xff] %v939_v58  ;;  %942 = vst [vmem:[%s9243_s5 + $0xbd8] sm:$0xff] %v941_v59  ;;  %v945_v61 = vld [vmem:[%s9238_s4 + $0x1728] sm:$0xff]  ;;  %v947_v62 = vld [vmem:[%s9238_s4 + $0x1730] sm:$0xff] }
  0xd8   : > { %944 = vst [vmem:[%s9243_s5 + $0xbe0] sm:$0xff] %v943_v60  ;;  %v949_v63 = vld [vmem:[%s9238_s4 + $0x1738] sm:$0xff]  ;;  %946 = vst [vmem:[%s9243_s5 + $0xbe8] sm:$0xff] %v945_v61  ;;  %v951_v0 = vld [vmem:[%s9238_s4 + $0x1800] sm:$0xff] }
  0xd9   : > { %948 = vst [vmem:[%s9243_s5 + $0xbf0] sm:$0xff] %v947_v62  ;;  %950 = vst [vmem:[%s9243_s5 + $0xbf8] sm:$0xff] %v949_v63  ;;  %v953_v1 = vld [vmem:[%s9238_s4 + $0x1808] sm:$0xff]  ;;  %v955_v2 = vld [vmem:[%s9238_s4 + $0x1810] sm:$0xff] }
  0xda   : > { %952 = vst [vmem:[%s9243_s5 + $0xc00] sm:$0xff] %v951_v0  ;;  %954 = vst [vmem:[%s9243_s5 + $0xc08] sm:$0xff] %v953_v1  ;;  %v957_v3 = vld [vmem:[%s9238_s4 + $0x1818] sm:$0xff]  ;;  %v959_v4 = vld [vmem:[%s9238_s4 + $0x1820] sm:$0xff] }
  0xdb   : > { %956 = vst [vmem:[%s9243_s5 + $0xc10] sm:$0xff] %v955_v2  ;;  %v961_v5 = vld [vmem:[%s9238_s4 + $0x1828] sm:$0xff]  ;;  %958 = vst [vmem:[%s9243_s5 + $0xc18] sm:$0xff] %v957_v3  ;;  %v963_v6 = vld [vmem:[%s9238_s4 + $0x1830] sm:$0xff] }
  0xdc   : > { %960 = vst [vmem:[%s9243_s5 + $0xc20] sm:$0xff] %v959_v4  ;;  %962 = vst [vmem:[%s9243_s5 + $0xc28] sm:$0xff] %v961_v5  ;;  %v965_v7 = vld [vmem:[%s9238_s4 + $0x1838] sm:$0xff]  ;;  %v967_v8 = vld [vmem:[%s9238_s4 + $0x1840] sm:$0xff] }
  0xdd   : > { %964 = vst [vmem:[%s9243_s5 + $0xc30] sm:$0xff] %v963_v6  ;;  %966 = vst [vmem:[%s9243_s5 + $0xc38] sm:$0xff] %v965_v7  ;;  %v969_v9 = vld [vmem:[%s9238_s4 + $0x1848] sm:$0xff]  ;;  %v971_v10 = vld [vmem:[%s9238_s4 + $0x1850] sm:$0xff] }
  0xde   : > { %968 = vst [vmem:[%s9243_s5 + $0xc40] sm:$0xff] %v967_v8  ;;  %v973_v11 = vld [vmem:[%s9238_s4 + $0x1858] sm:$0xff]  ;;  %970 = vst [vmem:[%s9243_s5 + $0xc48] sm:$0xff] %v969_v9  ;;  %v975_v12 = vld [vmem:[%s9238_s4 + $0x1860] sm:$0xff] }
  0xdf   : > { %972 = vst [vmem:[%s9243_s5 + $0xc50] sm:$0xff] %v971_v10  ;;  %974 = vst [vmem:[%s9243_s5 + $0xc58] sm:$0xff] %v973_v11  ;;  %v977_v13 = vld [vmem:[%s9238_s4 + $0x1868] sm:$0xff]  ;;  %v979_v14 = vld [vmem:[%s9238_s4 + $0x1870] sm:$0xff] }
  0xe0   : > { %976 = vst [vmem:[%s9243_s5 + $0xc60] sm:$0xff] %v975_v12  ;;  %978 = vst [vmem:[%s9243_s5 + $0xc68] sm:$0xff] %v977_v13  ;;  %v981_v15 = vld [vmem:[%s9238_s4 + $0x1878] sm:$0xff]  ;;  %v983_v16 = vld [vmem:[%s9238_s4 + $0x1880] sm:$0xff] }
  0xe1   : > { %980 = vst [vmem:[%s9243_s5 + $0xc70] sm:$0xff] %v979_v14  ;;  %v985_v17 = vld [vmem:[%s9238_s4 + $0x1888] sm:$0xff]  ;;  %982 = vst [vmem:[%s9243_s5 + $0xc78] sm:$0xff] %v981_v15  ;;  %v987_v18 = vld [vmem:[%s9238_s4 + $0x1890] sm:$0xff] }
  0xe2   : > { %984 = vst [vmem:[%s9243_s5 + $0xc80] sm:$0xff] %v983_v16  ;;  %986 = vst [vmem:[%s9243_s5 + $0xc88] sm:$0xff] %v985_v17  ;;  %v989_v19 = vld [vmem:[%s9238_s4 + $0x1898] sm:$0xff]  ;;  %v991_v20 = vld [vmem:[%s9238_s4 + $0x18a0] sm:$0xff] }
  0xe3   : > { %988 = vst [vmem:[%s9243_s5 + $0xc90] sm:$0xff] %v987_v18  ;;  %990 = vst [vmem:[%s9243_s5 + $0xc98] sm:$0xff] %v989_v19  ;;  %v993_v21 = vld [vmem:[%s9238_s4 + $0x18a8] sm:$0xff]  ;;  %v995_v22 = vld [vmem:[%s9238_s4 + $0x18b0] sm:$0xff] }
  0xe4   : > { %992 = vst [vmem:[%s9243_s5 + $0xca0] sm:$0xff] %v991_v20  ;;  %v997_v23 = vld [vmem:[%s9238_s4 + $0x18b8] sm:$0xff]  ;;  %994 = vst [vmem:[%s9243_s5 + $0xca8] sm:$0xff] %v993_v21  ;;  %v999_v24 = vld [vmem:[%s9238_s4 + $0x1980] sm:$0xff] }
  0xe5   : > { %996 = vst [vmem:[%s9243_s5 + $0xcb0] sm:$0xff] %v995_v22  ;;  %998 = vst [vmem:[%s9243_s5 + $0xcb8] sm:$0xff] %v997_v23  ;;  %v1001_v25 = vld [vmem:[%s9238_s4 + $0x1988] sm:$0xff]  ;;  %v1003_v26 = vld [vmem:[%s9238_s4 + $0x1990] sm:$0xff] }
  0xe6   : > { %1000 = vst [vmem:[%s9243_s5 + $0xcc0] sm:$0xff] %v999_v24  ;;  %1002 = vst [vmem:[%s9243_s5 + $0xcc8] sm:$0xff] %v1001_v25  ;;  %v1005_v27 = vld [vmem:[%s9238_s4 + $0x1998] sm:$0xff]  ;;  %v1007_v28 = vld [vmem:[%s9238_s4 + $0x19a0] sm:$0xff] }
  0xe7   : > { %1004 = vst [vmem:[%s9243_s5 + $0xcd0] sm:$0xff] %v1003_v26  ;;  %v1009_v29 = vld [vmem:[%s9238_s4 + $0x19a8] sm:$0xff]  ;;  %1006 = vst [vmem:[%s9243_s5 + $0xcd8] sm:$0xff] %v1005_v27  ;;  %v1011_v30 = vld [vmem:[%s9238_s4 + $0x19b0] sm:$0xff] }
  0xe8   : > { %1008 = vst [vmem:[%s9243_s5 + $0xce0] sm:$0xff] %v1007_v28  ;;  %1010 = vst [vmem:[%s9243_s5 + $0xce8] sm:$0xff] %v1009_v29  ;;  %v1013_v31 = vld [vmem:[%s9238_s4 + $0x19b8] sm:$0xff]  ;;  %v1015_v32 = vld [vmem:[%s9238_s4 + $0x19c0] sm:$0xff] }
  0xe9   : > { %1012 = vst [vmem:[%s9243_s5 + $0xcf0] sm:$0xff] %v1011_v30  ;;  %1014 = vst [vmem:[%s9243_s5 + $0xcf8] sm:$0xff] %v1013_v31  ;;  %v1017_v33 = vld [vmem:[%s9238_s4 + $0x19c8] sm:$0xff]  ;;  %v1019_v34 = vld [vmem:[%s9238_s4 + $0x19d0] sm:$0xff] }
  0xea   : > { %1016 = vst [vmem:[%s9243_s5 + $0xd00] sm:$0xff] %v1015_v32  ;;  %v1021_v35 = vld [vmem:[%s9238_s4 + $0x19d8] sm:$0xff]  ;;  %1018 = vst [vmem:[%s9243_s5 + $0xd08] sm:$0xff] %v1017_v33  ;;  %v1023_v36 = vld [vmem:[%s9238_s4 + $0x19e0] sm:$0xff] }
  0xeb   : > { %1020 = vst [vmem:[%s9243_s5 + $0xd10] sm:$0xff] %v1019_v34  ;;  %1022 = vst [vmem:[%s9243_s5 + $0xd18] sm:$0xff] %v1021_v35  ;;  %v1025_v37 = vld [vmem:[%s9238_s4 + $0x19e8] sm:$0xff]  ;;  %v1027_v38 = vld [vmem:[%s9238_s4 + $0x19f0] sm:$0xff] }
  0xec   : > { %1024 = vst [vmem:[%s9243_s5 + $0xd20] sm:$0xff] %v1023_v36  ;;  %1026 = vst [vmem:[%s9243_s5 + $0xd28] sm:$0xff] %v1025_v37  ;;  %v1029_v39 = vld [vmem:[%s9238_s4 + $0x19f8] sm:$0xff]  ;;  %v1031_v40 = vld [vmem:[%s9238_s4 + $0x1a00] sm:$0xff] }
  0xed   : > { %1028 = vst [vmem:[%s9243_s5 + $0xd30] sm:$0xff] %v1027_v38  ;;  %v1033_v41 = vld [vmem:[%s9238_s4 + $0x1a08] sm:$0xff]  ;;  %1030 = vst [vmem:[%s9243_s5 + $0xd38] sm:$0xff] %v1029_v39  ;;  %v1035_v42 = vld [vmem:[%s9238_s4 + $0x1a10] sm:$0xff] }
  0xee   : > { %1032 = vst [vmem:[%s9243_s5 + $0xd40] sm:$0xff] %v1031_v40  ;;  %1034 = vst [vmem:[%s9243_s5 + $0xd48] sm:$0xff] %v1033_v41  ;;  %v1037_v43 = vld [vmem:[%s9238_s4 + $0x1a18] sm:$0xff]  ;;  %v1039_v44 = vld [vmem:[%s9238_s4 + $0x1a20] sm:$0xff] }
  0xef   : > { %1036 = vst [vmem:[%s9243_s5 + $0xd50] sm:$0xff] %v1035_v42  ;;  %1038 = vst [vmem:[%s9243_s5 + $0xd58] sm:$0xff] %v1037_v43  ;;  %v1041_v45 = vld [vmem:[%s9238_s4 + $0x1a28] sm:$0xff]  ;;  %v1043_v46 = vld [vmem:[%s9238_s4 + $0x1a30] sm:$0xff] }
  0xf0   : > { %1040 = vst [vmem:[%s9243_s5 + $0xd60] sm:$0xff] %v1039_v44  ;;  %v1045_v47 = vld [vmem:[%s9238_s4 + $0x1a38] sm:$0xff]  ;;  %1042 = vst [vmem:[%s9243_s5 + $0xd68] sm:$0xff] %v1041_v45  ;;  %v1047_v48 = vld [vmem:[%s9238_s4 + $0x1b00] sm:$0xff] }
  0xf1   : > { %1044 = vst [vmem:[%s9243_s5 + $0xd70] sm:$0xff] %v1043_v46  ;;  %1046 = vst [vmem:[%s9243_s5 + $0xd78] sm:$0xff] %v1045_v47  ;;  %v1049_v49 = vld [vmem:[%s9238_s4 + $0x1b08] sm:$0xff]  ;;  %v1051_v50 = vld [vmem:[%s9238_s4 + $0x1b10] sm:$0xff] }
  0xf2   : > { %1048 = vst [vmem:[%s9243_s5 + $0xd80] sm:$0xff] %v1047_v48  ;;  %1050 = vst [vmem:[%s9243_s5 + $0xd88] sm:$0xff] %v1049_v49  ;;  %v1053_v51 = vld [vmem:[%s9238_s4 + $0x1b18] sm:$0xff]  ;;  %v1055_v52 = vld [vmem:[%s9238_s4 + $0x1b20] sm:$0xff] }
  0xf3   : > { %1052 = vst [vmem:[%s9243_s5 + $0xd90] sm:$0xff] %v1051_v50  ;;  %v1057_v53 = vld [vmem:[%s9238_s4 + $0x1b28] sm:$0xff]  ;;  %1054 = vst [vmem:[%s9243_s5 + $0xd98] sm:$0xff] %v1053_v51  ;;  %v1059_v54 = vld [vmem:[%s9238_s4 + $0x1b30] sm:$0xff] }
  0xf4   : > { %1056 = vst [vmem:[%s9243_s5 + $0xda0] sm:$0xff] %v1055_v52  ;;  %1058 = vst [vmem:[%s9243_s5 + $0xda8] sm:$0xff] %v1057_v53  ;;  %v1061_v55 = vld [vmem:[%s9238_s4 + $0x1b38] sm:$0xff]  ;;  %v1063_v56 = vld [vmem:[%s9238_s4 + $0x1b40] sm:$0xff] }
  0xf5   : > { %1060 = vst [vmem:[%s9243_s5 + $0xdb0] sm:$0xff] %v1059_v54  ;;  %1062 = vst [vmem:[%s9243_s5 + $0xdb8] sm:$0xff] %v1061_v55  ;;  %v1065_v57 = vld [vmem:[%s9238_s4 + $0x1b48] sm:$0xff]  ;;  %v1067_v58 = vld [vmem:[%s9238_s4 + $0x1b50] sm:$0xff] }
  0xf6   : > { %1064 = vst [vmem:[%s9243_s5 + $0xdc0] sm:$0xff] %v1063_v56  ;;  %v1069_v59 = vld [vmem:[%s9238_s4 + $0x1b58] sm:$0xff]  ;;  %1066 = vst [vmem:[%s9243_s5 + $0xdc8] sm:$0xff] %v1065_v57  ;;  %v1071_v60 = vld [vmem:[%s9238_s4 + $0x1b60] sm:$0xff] }
  0xf7   : > { %1068 = vst [vmem:[%s9243_s5 + $0xdd0] sm:$0xff] %v1067_v58  ;;  %1070 = vst [vmem:[%s9243_s5 + $0xdd8] sm:$0xff] %v1069_v59  ;;  %v1073_v61 = vld [vmem:[%s9238_s4 + $0x1b68] sm:$0xff]  ;;  %v1075_v62 = vld [vmem:[%s9238_s4 + $0x1b70] sm:$0xff] }
  0xf8   : > { %1072 = vst [vmem:[%s9243_s5 + $0xde0] sm:$0xff] %v1071_v60  ;;  %1074 = vst [vmem:[%s9243_s5 + $0xde8] sm:$0xff] %v1073_v61  ;;  %v1077_v63 = vld [vmem:[%s9238_s4 + $0x1b78] sm:$0xff]  ;;  %v1079_v0 = vld [vmem:[%s9238_s4 + $0x1b80] sm:$0xff] }
  0xf9   : > { %1076 = vst [vmem:[%s9243_s5 + $0xdf0] sm:$0xff] %v1075_v62  ;;  %v1081_v1 = vld [vmem:[%s9238_s4 + $0x1b88] sm:$0xff]  ;;  %1078 = vst [vmem:[%s9243_s5 + $0xdf8] sm:$0xff] %v1077_v63  ;;  %v1083_v2 = vld [vmem:[%s9238_s4 + $0x1b90] sm:$0xff] }
  0xfa   : > { %1080 = vst [vmem:[%s9243_s5 + $0xe00] sm:$0xff] %v1079_v0  ;;  %1082 = vst [vmem:[%s9243_s5 + $0xe08] sm:$0xff] %v1081_v1  ;;  %v1085_v3 = vld [vmem:[%s9238_s4 + $0x1b98] sm:$0xff]  ;;  %v1087_v4 = vld [vmem:[%s9238_s4 + $0x1ba0] sm:$0xff] }
  0xfb   : > { %1084 = vst [vmem:[%s9243_s5 + $0xe10] sm:$0xff] %v1083_v2  ;;  %1086 = vst [vmem:[%s9243_s5 + $0xe18] sm:$0xff] %v1085_v3  ;;  %v1089_v5 = vld [vmem:[%s9238_s4 + $0x1ba8] sm:$0xff]  ;;  %v1091_v6 = vld [vmem:[%s9238_s4 + $0x1bb0] sm:$0xff] }
  0xfc   : > { %1088 = vst [vmem:[%s9243_s5 + $0xe20] sm:$0xff] %v1087_v4  ;;  %v1093_v7 = vld [vmem:[%s9238_s4 + $0x1bb8] sm:$0xff]  ;;  %1090 = vst [vmem:[%s9243_s5 + $0xe28] sm:$0xff] %v1089_v5  ;;  %v1095_v8 = vld [vmem:[%s9238_s4 + $0x1c80] sm:$0xff] }
  0xfd   : > { %1092 = vst [vmem:[%s9243_s5 + $0xe30] sm:$0xff] %v1091_v6  ;;  %1094 = vst [vmem:[%s9243_s5 + $0xe38] sm:$0xff] %v1093_v7  ;;  %v1097_v9 = vld [vmem:[%s9238_s4 + $0x1c88] sm:$0xff]  ;;  %v1099_v10 = vld [vmem:[%s9238_s4 + $0x1c90] sm:$0xff] }
  0xfe   : > { %1096 = vst [vmem:[%s9243_s5 + $0xe40] sm:$0xff] %v1095_v8  ;;  %1098 = vst [vmem:[%s9243_s5 + $0xe48] sm:$0xff] %v1097_v9  ;;  %v1101_v11 = vld [vmem:[%s9238_s4 + $0x1c98] sm:$0xff]  ;;  %v1103_v12 = vld [vmem:[%s9238_s4 + $0x1ca0] sm:$0xff] }
  0xff   : > { %1100 = vst [vmem:[%s9243_s5 + $0xe50] sm:$0xff] %v1099_v10  ;;  %v1105_v13 = vld [vmem:[%s9238_s4 + $0x1ca8] sm:$0xff]  ;;  %1102 = vst [vmem:[%s9243_s5 + $0xe58] sm:$0xff] %v1101_v11  ;;  %v1107_v14 = vld [vmem:[%s9238_s4 + $0x1cb0] sm:$0xff] }
 0x100   : > { %1104 = vst [vmem:[%s9243_s5 + $0xe60] sm:$0xff] %v1103_v12  ;;  %1106 = vst [vmem:[%s9243_s5 + $0xe68] sm:$0xff] %v1105_v13  ;;  %v1109_v15 = vld [vmem:[%s9238_s4 + $0x1cb8] sm:$0xff]  ;;  %v1111_v16 = vld [vmem:[%s9238_s4 + $0x1cc0] sm:$0xff] }
 0x101   : > { %1108 = vst [vmem:[%s9243_s5 + $0xe70] sm:$0xff] %v1107_v14  ;;  %1110 = vst [vmem:[%s9243_s5 + $0xe78] sm:$0xff] %v1109_v15  ;;  %v1113_v17 = vld [vmem:[%s9238_s4 + $0x1cc8] sm:$0xff]  ;;  %v1115_v18 = vld [vmem:[%s9238_s4 + $0x1cd0] sm:$0xff] }
 0x102   : > { %1112 = vst [vmem:[%s9243_s5 + $0xe80] sm:$0xff] %v1111_v16  ;;  %v1117_v19 = vld [vmem:[%s9238_s4 + $0x1cd8] sm:$0xff]  ;;  %1114 = vst [vmem:[%s9243_s5 + $0xe88] sm:$0xff] %v1113_v17  ;;  %v1119_v20 = vld [vmem:[%s9238_s4 + $0x1ce0] sm:$0xff] }
 0x103   : > { %1116 = vst [vmem:[%s9243_s5 + $0xe90] sm:$0xff] %v1115_v18  ;;  %1118 = vst [vmem:[%s9243_s5 + $0xe98] sm:$0xff] %v1117_v19  ;;  %v1121_v21 = vld [vmem:[%s9238_s4 + $0x1ce8] sm:$0xff]  ;;  %v1123_v22 = vld [vmem:[%s9238_s4 + $0x1cf0] sm:$0xff] }
 0x104   : > { %1120 = vst [vmem:[%s9243_s5 + $0xea0] sm:$0xff] %v1119_v20  ;;  %1122 = vst [vmem:[%s9243_s5 + $0xea8] sm:$0xff] %v1121_v21  ;;  %v1125_v23 = vld [vmem:[%s9238_s4 + $0x1cf8] sm:$0xff]  ;;  %v1127_v24 = vld [vmem:[%s9238_s4 + $0x1d00] sm:$0xff] }
 0x105   : > { %1124 = vst [vmem:[%s9243_s5 + $0xeb0] sm:$0xff] %v1123_v22  ;;  %v1129_v25 = vld [vmem:[%s9238_s4 + $0x1d08] sm:$0xff]  ;;  %1126 = vst [vmem:[%s9243_s5 + $0xeb8] sm:$0xff] %v1125_v23  ;;  %v1131_v26 = vld [vmem:[%s9238_s4 + $0x1d10] sm:$0xff] }
 0x106   : > { %1128 = vst [vmem:[%s9243_s5 + $0xec0] sm:$0xff] %v1127_v24  ;;  %1130 = vst [vmem:[%s9243_s5 + $0xec8] sm:$0xff] %v1129_v25  ;;  %v1133_v27 = vld [vmem:[%s9238_s4 + $0x1d18] sm:$0xff]  ;;  %v1135_v28 = vld [vmem:[%s9238_s4 + $0x1d20] sm:$0xff] }
 0x107   : > { %1132 = vst [vmem:[%s9243_s5 + $0xed0] sm:$0xff] %v1131_v26  ;;  %1134 = vst [vmem:[%s9243_s5 + $0xed8] sm:$0xff] %v1133_v27  ;;  %v1137_v29 = vld [vmem:[%s9238_s4 + $0x1d28] sm:$0xff]  ;;  %v1139_v30 = vld [vmem:[%s9238_s4 + $0x1d30] sm:$0xff] }
 0x108   : > { %1136 = vst [vmem:[%s9243_s5 + $0xee0] sm:$0xff] %v1135_v28  ;;  %v1141_v31 = vld [vmem:[%s9238_s4 + $0x1d38] sm:$0xff]  ;;  %1138 = vst [vmem:[%s9243_s5 + $0xee8] sm:$0xff] %v1137_v29  ;;  %v1143_v32 = vld [vmem:[%s9238_s4 + $0x1e00] sm:$0xff] }
 0x109   : > { %1140 = vst [vmem:[%s9243_s5 + $0xef0] sm:$0xff] %v1139_v30  ;;  %1142 = vst [vmem:[%s9243_s5 + $0xef8] sm:$0xff] %v1141_v31  ;;  %v1145_v33 = vld [vmem:[%s9238_s4 + $0x1e08] sm:$0xff]  ;;  %v1147_v34 = vld [vmem:[%s9238_s4 + $0x1e10] sm:$0xff] }
 0x10a   : > { %1144 = vst [vmem:[%s9243_s5 + $0xf00] sm:$0xff] %v1143_v32  ;;  %1146 = vst [vmem:[%s9243_s5 + $0xf08] sm:$0xff] %v1145_v33  ;;  %v1149_v35 = vld [vmem:[%s9238_s4 + $0x1e18] sm:$0xff]  ;;  %v1151_v36 = vld [vmem:[%s9238_s4 + $0x1e20] sm:$0xff] }
 0x10b   : > { %1148 = vst [vmem:[%s9243_s5 + $0xf10] sm:$0xff] %v1147_v34  ;;  %v1153_v37 = vld [vmem:[%s9238_s4 + $0x1e28] sm:$0xff]  ;;  %1150 = vst [vmem:[%s9243_s5 + $0xf18] sm:$0xff] %v1149_v35  ;;  %v1155_v38 = vld [vmem:[%s9238_s4 + $0x1e30] sm:$0xff] }
 0x10c   : > { %1152 = vst [vmem:[%s9243_s5 + $0xf20] sm:$0xff] %v1151_v36  ;;  %1154 = vst [vmem:[%s9243_s5 + $0xf28] sm:$0xff] %v1153_v37  ;;  %v1157_v39 = vld [vmem:[%s9238_s4 + $0x1e38] sm:$0xff]  ;;  %v1159_v40 = vld [vmem:[%s9238_s4 + $0x1e40] sm:$0xff] }
 0x10d   : > { %1156 = vst [vmem:[%s9243_s5 + $0xf30] sm:$0xff] %v1155_v38  ;;  %1158 = vst [vmem:[%s9243_s5 + $0xf38] sm:$0xff] %v1157_v39  ;;  %v1161_v41 = vld [vmem:[%s9238_s4 + $0x1e48] sm:$0xff]  ;;  %v1163_v42 = vld [vmem:[%s9238_s4 + $0x1e50] sm:$0xff] }
 0x10e   : > { %1160 = vst [vmem:[%s9243_s5 + $0xf40] sm:$0xff] %v1159_v40  ;;  %v1165_v43 = vld [vmem:[%s9238_s4 + $0x1e58] sm:$0xff]  ;;  %1162 = vst [vmem:[%s9243_s5 + $0xf48] sm:$0xff] %v1161_v41  ;;  %v1167_v44 = vld [vmem:[%s9238_s4 + $0x1e60] sm:$0xff] }
 0x10f   : > { %1164 = vst [vmem:[%s9243_s5 + $0xf50] sm:$0xff] %v1163_v42  ;;  %1166 = vst [vmem:[%s9243_s5 + $0xf58] sm:$0xff] %v1165_v43  ;;  %v1169_v45 = vld [vmem:[%s9238_s4 + $0x1e68] sm:$0xff]  ;;  %v1171_v46 = vld [vmem:[%s9238_s4 + $0x1e70] sm:$0xff] }
 0x110   : > { %1168 = vst [vmem:[%s9243_s5 + $0xf60] sm:$0xff] %v1167_v44  ;;  %1170 = vst [vmem:[%s9243_s5 + $0xf68] sm:$0xff] %v1169_v45  ;;  %v1173_v47 = vld [vmem:[%s9238_s4 + $0x1e78] sm:$0xff]  ;;  %v1175_v48 = vld [vmem:[%s9238_s4 + $0x1e80] sm:$0xff] }
 0x111   : > { %1172 = vst [vmem:[%s9243_s5 + $0xf70] sm:$0xff] %v1171_v46  ;;  %v1177_v49 = vld [vmem:[%s9238_s4 + $0x1e88] sm:$0xff]  ;;  %1174 = vst [vmem:[%s9243_s5 + $0xf78] sm:$0xff] %v1173_v47  ;;  %v1179_v50 = vld [vmem:[%s9238_s4 + $0x1e90] sm:$0xff] }
 0x112   : > { %1176 = vst [vmem:[%s9243_s5 + $0xf80] sm:$0xff] %v1175_v48  ;;  %1178 = vst [vmem:[%s9243_s5 + $0xf88] sm:$0xff] %v1177_v49  ;;  %v1181_v51 = vld [vmem:[%s9238_s4 + $0x1e98] sm:$0xff]  ;;  %v1183_v52 = vld [vmem:[%s9238_s4 + $0x1ea0] sm:$0xff] }
 0x113   : > { %1180 = vst [vmem:[%s9243_s5 + $0xf90] sm:$0xff] %v1179_v50  ;;  %1182 = vst [vmem:[%s9243_s5 + $0xf98] sm:$0xff] %v1181_v51  ;;  %v1185_v53 = vld [vmem:[%s9238_s4 + $0x1ea8] sm:$0xff]  ;;  %v1187_v54 = vld [vmem:[%s9238_s4 + $0x1eb0] sm:$0xff] }
 0x114   : > { %1184 = vst [vmem:[%s9243_s5 + $0xfa0] sm:$0xff] %v1183_v52  ;;  %v1189_v55 = vld [vmem:[%s9238_s4 + $0x1eb8] sm:$0xff]  ;;  %1186 = vst [vmem:[%s9243_s5 + $0xfa8] sm:$0xff] %v1185_v53  ;;  %v1191_v56 = vld [vmem:[%s9238_s4 + $0x1f80] sm:$0xff] }
 0x115   : > { %1188 = vst [vmem:[%s9243_s5 + $0xfb0] sm:$0xff] %v1187_v54  ;;  %1190 = vst [vmem:[%s9243_s5 + $0xfb8] sm:$0xff] %v1189_v55  ;;  %v1193_v57 = vld [vmem:[%s9238_s4 + $0x1f88] sm:$0xff]  ;;  %v1195_v58 = vld [vmem:[%s9238_s4 + $0x1f90] sm:$0xff] }
 0x116   : > { %1192 = vst [vmem:[%s9243_s5 + $0xfc0] sm:$0xff] %v1191_v56  ;;  %1194 = vst [vmem:[%s9243_s5 + $0xfc8] sm:$0xff] %v1193_v57  ;;  %v1197_v59 = vld [vmem:[%s9238_s4 + $0x1f98] sm:$0xff]  ;;  %v1199_v60 = vld [vmem:[%s9238_s4 + $0x1fa0] sm:$0xff] }
 0x117   : > { %1196 = vst [vmem:[%s9243_s5 + $0xfd0] sm:$0xff] %v1195_v58  ;;  %v1201_v61 = vld [vmem:[%s9238_s4 + $0x1fa8] sm:$0xff]  ;;  %1198 = vst [vmem:[%s9243_s5 + $0xfd8] sm:$0xff] %v1197_v59  ;;  %v1203_v62 = vld [vmem:[%s9238_s4 + $0x1fb0] sm:$0xff] }
 0x118   : > { %1200 = vst [vmem:[%s9243_s5 + $0xfe0] sm:$0xff] %v1199_v60  ;;  %1202 = vst [vmem:[%s9243_s5 + $0xfe8] sm:$0xff] %v1201_v61  ;;  %v1205_v63 = vld [vmem:[%s9238_s4 + $0x1fb8] sm:$0xff]  ;;  %v1207_v0 = vld [vmem:[%s9238_s4 + $0x1fc0] sm:$0xff] }
 0x119   : > { %1204 = vst [vmem:[%s9243_s5 + $0xff0] sm:$0xff] %v1203_v62  ;;  %1206 = vst [vmem:[%s9243_s5 + $0xff8] sm:$0xff] %v1205_v63  ;;  %v1209_v1 = vld [vmem:[%s9238_s4 + $0x1fc8] sm:$0xff]  ;;  %v1211_v2 = vld [vmem:[%s9238_s4 + $0x1fd0] sm:$0xff] }
 0x11a   : > { %1208 = vst [vmem:[%s9243_s5 + $0x1000] sm:$0xff] %v1207_v0  ;;  %v1213_v3 = vld [vmem:[%s9238_s4 + $0x1fd8] sm:$0xff]  ;;  %1210 = vst [vmem:[%s9243_s5 + $0x1008] sm:$0xff] %v1209_v1  ;;  %v1215_v4 = vld [vmem:[%s9238_s4 + $0x1fe0] sm:$0xff] }
 0x11b   : > { %1212 = vst [vmem:[%s9243_s5 + $0x1010] sm:$0xff] %v1211_v2  ;;  %1214 = vst [vmem:[%s9243_s5 + $0x1018] sm:$0xff] %v1213_v3  ;;  %v1217_v5 = vld [vmem:[%s9238_s4 + $0x1fe8] sm:$0xff]  ;;  %v1219_v6 = vld [vmem:[%s9238_s4 + $0x1ff0] sm:$0xff] }
 0x11c   : > { %1216 = vst [vmem:[%s9243_s5 + $0x1020] sm:$0xff] %v1215_v4  ;;  %1218 = vst [vmem:[%s9243_s5 + $0x1028] sm:$0xff] %v1217_v5  ;;  %v1221_v7 = vld [vmem:[%s9238_s4 + $0x1ff8] sm:$0xff]  ;;  %v1223_v8 = vld [vmem:[%s9238_s4 + $0x2000] sm:$0xff] }
 0x11d   : > { %1220 = vst [vmem:[%s9243_s5 + $0x1030] sm:$0xff] %v1219_v6  ;;  %v1225_v9 = vld [vmem:[%s9238_s4 + $0x2008] sm:$0xff]  ;;  %1222 = vst [vmem:[%s9243_s5 + $0x1038] sm:$0xff] %v1221_v7  ;;  %v1227_v10 = vld [vmem:[%s9238_s4 + $0x2010] sm:$0xff] }
 0x11e   : > { %1224 = vst [vmem:[%s9243_s5 + $0x1040] sm:$0xff] %v1223_v8  ;;  %1226 = vst [vmem:[%s9243_s5 + $0x1048] sm:$0xff] %v1225_v9  ;;  %v1229_v11 = vld [vmem:[%s9238_s4 + $0x2018] sm:$0xff]  ;;  %v1231_v12 = vld [vmem:[%s9238_s4 + $0x2020] sm:$0xff] }
 0x11f   : > { %1228 = vst [vmem:[%s9243_s5 + $0x1050] sm:$0xff] %v1227_v10  ;;  %1230 = vst [vmem:[%s9243_s5 + $0x1058] sm:$0xff] %v1229_v11  ;;  %v1233_v13 = vld [vmem:[%s9238_s4 + $0x2028] sm:$0xff]  ;;  %v1235_v14 = vld [vmem:[%s9238_s4 + $0x2030] sm:$0xff] }
 0x120   : > { %1232 = vst [vmem:[%s9243_s5 + $0x1060] sm:$0xff] %v1231_v12  ;;  %v1237_v15 = vld [vmem:[%s9238_s4 + $0x2038] sm:$0xff]  ;;  %1234 = vst [vmem:[%s9243_s5 + $0x1068] sm:$0xff] %v1233_v13  ;;  %v1239_v16 = vld [vmem:[%s9238_s4 + $0x2100] sm:$0xff] }
 0x121   : > { %1236 = vst [vmem:[%s9243_s5 + $0x1070] sm:$0xff] %v1235_v14  ;;  %1238 = vst [vmem:[%s9243_s5 + $0x1078] sm:$0xff] %v1237_v15  ;;  %v1241_v17 = vld [vmem:[%s9238_s4 + $0x2108] sm:$0xff]  ;;  %v1243_v18 = vld [vmem:[%s9238_s4 + $0x2110] sm:$0xff] }
 0x122   : > { %1240 = vst [vmem:[%s9243_s5 + $0x1080] sm:$0xff] %v1239_v16  ;;  %1242 = vst [vmem:[%s9243_s5 + $0x1088] sm:$0xff] %v1241_v17  ;;  %v1245_v19 = vld [vmem:[%s9238_s4 + $0x2118] sm:$0xff]  ;;  %v1247_v20 = vld [vmem:[%s9238_s4 + $0x2120] sm:$0xff] }
 0x123   : > { %1244 = vst [vmem:[%s9243_s5 + $0x1090] sm:$0xff] %v1243_v18  ;;  %v1249_v21 = vld [vmem:[%s9238_s4 + $0x2128] sm:$0xff]  ;;  %1246 = vst [vmem:[%s9243_s5 + $0x1098] sm:$0xff] %v1245_v19  ;;  %v1251_v22 = vld [vmem:[%s9238_s4 + $0x2130] sm:$0xff] }
 0x124   : > { %1248 = vst [vmem:[%s9243_s5 + $0x10a0] sm:$0xff] %v1247_v20  ;;  %1250 = vst [vmem:[%s9243_s5 + $0x10a8] sm:$0xff] %v1249_v21  ;;  %v1253_v23 = vld [vmem:[%s9238_s4 + $0x2138] sm:$0xff]  ;;  %v1255_v24 = vld [vmem:[%s9238_s4 + $0x2140] sm:$0xff] }
 0x125   : > { %1252 = vst [vmem:[%s9243_s5 + $0x10b0] sm:$0xff] %v1251_v22  ;;  %1254 = vst [vmem:[%s9243_s5 + $0x10b8] sm:$0xff] %v1253_v23  ;;  %v1257_v25 = vld [vmem:[%s9238_s4 + $0x2148] sm:$0xff]  ;;  %v1259_v26 = vld [vmem:[%s9238_s4 + $0x2150] sm:$0xff] }
 0x126   : > { %1256 = vst [vmem:[%s9243_s5 + $0x10c0] sm:$0xff] %v1255_v24  ;;  %v1261_v27 = vld [vmem:[%s9238_s4 + $0x2158] sm:$0xff]  ;;  %1258 = vst [vmem:[%s9243_s5 + $0x10c8] sm:$0xff] %v1257_v25  ;;  %v1263_v28 = vld [vmem:[%s9238_s4 + $0x2160] sm:$0xff] }
 0x127   : > { %1260 = vst [vmem:[%s9243_s5 + $0x10d0] sm:$0xff] %v1259_v26  ;;  %1262 = vst [vmem:[%s9243_s5 + $0x10d8] sm:$0xff] %v1261_v27  ;;  %v1265_v29 = vld [vmem:[%s9238_s4 + $0x2168] sm:$0xff]  ;;  %v1267_v30 = vld [vmem:[%s9238_s4 + $0x2170] sm:$0xff] }
 0x128   : > { %1264 = vst [vmem:[%s9243_s5 + $0x10e0] sm:$0xff] %v1263_v28  ;;  %1266 = vst [vmem:[%s9243_s5 + $0x10e8] sm:$0xff] %v1265_v29  ;;  %v1269_v31 = vld [vmem:[%s9238_s4 + $0x2178] sm:$0xff]  ;;  %v1271_v32 = vld [vmem:[%s9238_s4 + $0x2180] sm:$0xff] }
 0x129   : > { %1268 = vst [vmem:[%s9243_s5 + $0x10f0] sm:$0xff] %v1267_v30  ;;  %v1273_v33 = vld [vmem:[%s9238_s4 + $0x2188] sm:$0xff]  ;;  %1270 = vst [vmem:[%s9243_s5 + $0x10f8] sm:$0xff] %v1269_v31  ;;  %v1275_v34 = vld [vmem:[%s9238_s4 + $0x2190] sm:$0xff] }
 0x12a   : > { %1272 = vst [vmem:[%s9243_s5 + $0x1100] sm:$0xff] %v1271_v32  ;;  %1274 = vst [vmem:[%s9243_s5 + $0x1108] sm:$0xff] %v1273_v33  ;;  %v1277_v35 = vld [vmem:[%s9238_s4 + $0x2198] sm:$0xff]  ;;  %v1279_v36 = vld [vmem:[%s9238_s4 + $0x21a0] sm:$0xff] }
 0x12b   : > { %1276 = vst [vmem:[%s9243_s5 + $0x1110] sm:$0xff] %v1275_v34  ;;  %1278 = vst [vmem:[%s9243_s5 + $0x1118] sm:$0xff] %v1277_v35  ;;  %v1281_v37 = vld [vmem:[%s9238_s4 + $0x21a8] sm:$0xff]  ;;  %v1283_v38 = vld [vmem:[%s9238_s4 + $0x21b0] sm:$0xff] }
 0x12c   : > { %1280 = vst [vmem:[%s9243_s5 + $0x1120] sm:$0xff] %v1279_v36  ;;  %v1285_v39 = vld [vmem:[%s9238_s4 + $0x21b8] sm:$0xff]  ;;  %1282 = vst [vmem:[%s9243_s5 + $0x1128] sm:$0xff] %v1281_v37  ;;  %v1287_v40 = vld [vmem:[%s9238_s4 + $0x2280] sm:$0xff] }
 0x12d   : > { %1284 = vst [vmem:[%s9243_s5 + $0x1130] sm:$0xff] %v1283_v38  ;;  %1286 = vst [vmem:[%s9243_s5 + $0x1138] sm:$0xff] %v1285_v39  ;;  %v1289_v41 = vld [vmem:[%s9238_s4 + $0x2288] sm:$0xff]  ;;  %v1291_v42 = vld [vmem:[%s9238_s4 + $0x2290] sm:$0xff] }
 0x12e   : > { %1288 = vst [vmem:[%s9243_s5 + $0x1140] sm:$0xff] %v1287_v40  ;;  %1290 = vst [vmem:[%s9243_s5 + $0x1148] sm:$0xff] %v1289_v41  ;;  %v1293_v43 = vld [vmem:[%s9238_s4 + $0x2298] sm:$0xff]  ;;  %v1295_v44 = vld [vmem:[%s9238_s4 + $0x22a0] sm:$0xff] }
 0x12f   : > { %1292 = vst [vmem:[%s9243_s5 + $0x1150] sm:$0xff] %v1291_v42  ;;  %v1297_v45 = vld [vmem:[%s9238_s4 + $0x22a8] sm:$0xff]  ;;  %1294 = vst [vmem:[%s9243_s5 + $0x1158] sm:$0xff] %v1293_v43  ;;  %v1299_v46 = vld [vmem:[%s9238_s4 + $0x22b0] sm:$0xff] }
 0x130   : > { %1296 = vst [vmem:[%s9243_s5 + $0x1160] sm:$0xff] %v1295_v44  ;;  %1298 = vst [vmem:[%s9243_s5 + $0x1168] sm:$0xff] %v1297_v45  ;;  %v1301_v47 = vld [vmem:[%s9238_s4 + $0x22b8] sm:$0xff]  ;;  %v1303_v48 = vld [vmem:[%s9238_s4 + $0x22c0] sm:$0xff] }
 0x131   : > { %1300 = vst [vmem:[%s9243_s5 + $0x1170] sm:$0xff] %v1299_v46  ;;  %1302 = vst [vmem:[%s9243_s5 + $0x1178] sm:$0xff] %v1301_v47  ;;  %v1305_v49 = vld [vmem:[%s9238_s4 + $0x22c8] sm:$0xff]  ;;  %v1307_v50 = vld [vmem:[%s9238_s4 + $0x22d0] sm:$0xff] }
 0x132   : > { %1304 = vst [vmem:[%s9243_s5 + $0x1180] sm:$0xff] %v1303_v48  ;;  %v1309_v51 = vld [vmem:[%s9238_s4 + $0x22d8] sm:$0xff]  ;;  %1306 = vst [vmem:[%s9243_s5 + $0x1188] sm:$0xff] %v1305_v49  ;;  %v1311_v52 = vld [vmem:[%s9238_s4 + $0x22e0] sm:$0xff] }
 0x133   : > { %1308 = vst [vmem:[%s9243_s5 + $0x1190] sm:$0xff] %v1307_v50  ;;  %1310 = vst [vmem:[%s9243_s5 + $0x1198] sm:$0xff] %v1309_v51  ;;  %v1313_v53 = vld [vmem:[%s9238_s4 + $0x22e8] sm:$0xff]  ;;  %v1315_v54 = vld [vmem:[%s9238_s4 + $0x22f0] sm:$0xff] }
 0x134   : > { %1312 = vst [vmem:[%s9243_s5 + $0x11a0] sm:$0xff] %v1311_v52  ;;  %1314 = vst [vmem:[%s9243_s5 + $0x11a8] sm:$0xff] %v1313_v53  ;;  %v1317_v55 = vld [vmem:[%s9238_s4 + $0x22f8] sm:$0xff]  ;;  %v1319_v56 = vld [vmem:[%s9238_s4 + $0x2300] sm:$0xff] }
 0x135   : > { %1316 = vst [vmem:[%s9243_s5 + $0x11b0] sm:$0xff] %v1315_v54  ;;  %v1321_v57 = vld [vmem:[%s9238_s4 + $0x2308] sm:$0xff]  ;;  %1318 = vst [vmem:[%s9243_s5 + $0x11b8] sm:$0xff] %v1317_v55  ;;  %v1323_v58 = vld [vmem:[%s9238_s4 + $0x2310] sm:$0xff] }
 0x136   : > { %1320 = vst [vmem:[%s9243_s5 + $0x11c0] sm:$0xff] %v1319_v56  ;;  %1322 = vst [vmem:[%s9243_s5 + $0x11c8] sm:$0xff] %v1321_v57  ;;  %v1325_v59 = vld [vmem:[%s9238_s4 + $0x2318] sm:$0xff]  ;;  %v1327_v60 = vld [vmem:[%s9238_s4 + $0x2320] sm:$0xff] }
 0x137   : > { %1324 = vst [vmem:[%s9243_s5 + $0x11d0] sm:$0xff] %v1323_v58  ;;  %1326 = vst [vmem:[%s9243_s5 + $0x11d8] sm:$0xff] %v1325_v59  ;;  %v1329_v61 = vld [vmem:[%s9238_s4 + $0x2328] sm:$0xff]  ;;  %v1331_v62 = vld [vmem:[%s9238_s4 + $0x2330] sm:$0xff] }
 0x138   : > { %1328 = vst [vmem:[%s9243_s5 + $0x11e0] sm:$0xff] %v1327_v60  ;;  %v1333_v63 = vld [vmem:[%s9238_s4 + $0x2338] sm:$0xff]  ;;  %1330 = vst [vmem:[%s9243_s5 + $0x11e8] sm:$0xff] %v1329_v61  ;;  %v1335_v0 = vld [vmem:[%s9238_s4 + $0x2400] sm:$0xff] }
 0x139   : > { %1332 = vst [vmem:[%s9243_s5 + $0x11f0] sm:$0xff] %v1331_v62  ;;  %1334 = vst [vmem:[%s9243_s5 + $0x11f8] sm:$0xff] %v1333_v63  ;;  %v1337_v1 = vld [vmem:[%s9238_s4 + $0x2408] sm:$0xff]  ;;  %v1339_v2 = vld [vmem:[%s9238_s4 + $0x2410] sm:$0xff] }
 0x13a   : > { %1336 = vst [vmem:[%s9243_s5 + $0x1200] sm:$0xff] %v1335_v0  ;;  %1338 = vst [vmem:[%s9243_s5 + $0x1208] sm:$0xff] %v1337_v1  ;;  %v1341_v3 = vld [vmem:[%s9238_s4 + $0x2418] sm:$0xff]  ;;  %v1343_v4 = vld [vmem:[%s9238_s4 + $0x2420] sm:$0xff] }
 0x13b   : > { %1340 = vst [vmem:[%s9243_s5 + $0x1210] sm:$0xff] %v1339_v2  ;;  %v1345_v5 = vld [vmem:[%s9238_s4 + $0x2428] sm:$0xff]  ;;  %1342 = vst [vmem:[%s9243_s5 + $0x1218] sm:$0xff] %v1341_v3  ;;  %v1347_v6 = vld [vmem:[%s9238_s4 + $0x2430] sm:$0xff] }
 0x13c   : > { %1344 = vst [vmem:[%s9243_s5 + $0x1220] sm:$0xff] %v1343_v4  ;;  %1346 = vst [vmem:[%s9243_s5 + $0x1228] sm:$0xff] %v1345_v5  ;;  %v1349_v7 = vld [vmem:[%s9238_s4 + $0x2438] sm:$0xff]  ;;  %v1351_v8 = vld [vmem:[%s9238_s4 + $0x2440] sm:$0xff] }
 0x13d   : > { %1348 = vst [vmem:[%s9243_s5 + $0x1230] sm:$0xff] %v1347_v6  ;;  %1350 = vst [vmem:[%s9243_s5 + $0x1238] sm:$0xff] %v1349_v7  ;;  %v1353_v9 = vld [vmem:[%s9238_s4 + $0x2448] sm:$0xff]  ;;  %v1355_v10 = vld [vmem:[%s9238_s4 + $0x2450] sm:$0xff] }
 0x13e   : > { %1352 = vst [vmem:[%s9243_s5 + $0x1240] sm:$0xff] %v1351_v8  ;;  %v1357_v11 = vld [vmem:[%s9238_s4 + $0x2458] sm:$0xff]  ;;  %1354 = vst [vmem:[%s9243_s5 + $0x1248] sm:$0xff] %v1353_v9  ;;  %v1359_v12 = vld [vmem:[%s9238_s4 + $0x2460] sm:$0xff] }
 0x13f   : > { %1356 = vst [vmem:[%s9243_s5 + $0x1250] sm:$0xff] %v1355_v10  ;;  %1358 = vst [vmem:[%s9243_s5 + $0x1258] sm:$0xff] %v1357_v11  ;;  %v1361_v13 = vld [vmem:[%s9238_s4 + $0x2468] sm:$0xff]  ;;  %v1363_v14 = vld [vmem:[%s9238_s4 + $0x2470] sm:$0xff] }
 0x140   : > { %1360 = vst [vmem:[%s9243_s5 + $0x1260] sm:$0xff] %v1359_v12  ;;  %1362 = vst [vmem:[%s9243_s5 + $0x1268] sm:$0xff] %v1361_v13  ;;  %v1365_v15 = vld [vmem:[%s9238_s4 + $0x2478] sm:$0xff]  ;;  %v1367_v16 = vld [vmem:[%s9238_s4 + $0x2480] sm:$0xff] }
 0x141   : > { %1364 = vst [vmem:[%s9243_s5 + $0x1270] sm:$0xff] %v1363_v14  ;;  %v1369_v17 = vld [vmem:[%s9238_s4 + $0x2488] sm:$0xff]  ;;  %1366 = vst [vmem:[%s9243_s5 + $0x1278] sm:$0xff] %v1365_v15  ;;  %v1371_v18 = vld [vmem:[%s9238_s4 + $0x2490] sm:$0xff] }
 0x142   : > { %1368 = vst [vmem:[%s9243_s5 + $0x1280] sm:$0xff] %v1367_v16  ;;  %1370 = vst [vmem:[%s9243_s5 + $0x1288] sm:$0xff] %v1369_v17  ;;  %v1373_v19 = vld [vmem:[%s9238_s4 + $0x2498] sm:$0xff]  ;;  %v1375_v20 = vld [vmem:[%s9238_s4 + $0x24a0] sm:$0xff] }
 0x143   : > { %1372 = vst [vmem:[%s9243_s5 + $0x1290] sm:$0xff] %v1371_v18  ;;  %1374 = vst [vmem:[%s9243_s5 + $0x1298] sm:$0xff] %v1373_v19  ;;  %v1377_v21 = vld [vmem:[%s9238_s4 + $0x24a8] sm:$0xff]  ;;  %v1379_v22 = vld [vmem:[%s9238_s4 + $0x24b0] sm:$0xff] }
 0x144   : > { %1376 = vst [vmem:[%s9243_s5 + $0x12a0] sm:$0xff] %v1375_v20  ;;  %v1381_v23 = vld [vmem:[%s9238_s4 + $0x24b8] sm:$0xff]  ;;  %1378 = vst [vmem:[%s9243_s5 + $0x12a8] sm:$0xff] %v1377_v21  ;;  %v1383_v24 = vld [vmem:[%s9238_s4 + $0x2580] sm:$0xff] }
 0x145   : > { %1380 = vst [vmem:[%s9243_s5 + $0x12b0] sm:$0xff] %v1379_v22  ;;  %1382 = vst [vmem:[%s9243_s5 + $0x12b8] sm:$0xff] %v1381_v23  ;;  %v1385_v25 = vld [vmem:[%s9238_s4 + $0x2588] sm:$0xff]  ;;  %v1387_v26 = vld [vmem:[%s9238_s4 + $0x2590] sm:$0xff] }
 0x146   : > { %1384 = vst [vmem:[%s9243_s5 + $0x12c0] sm:$0xff] %v1383_v24  ;;  %1386 = vst [vmem:[%s9243_s5 + $0x12c8] sm:$0xff] %v1385_v25  ;;  %v1389_v27 = vld [vmem:[%s9238_s4 + $0x2598] sm:$0xff]  ;;  %v1391_v28 = vld [vmem:[%s9238_s4 + $0x25a0] sm:$0xff] }
 0x147   : > { %1388 = vst [vmem:[%s9243_s5 + $0x12d0] sm:$0xff] %v1387_v26  ;;  %v1393_v29 = vld [vmem:[%s9238_s4 + $0x25a8] sm:$0xff]  ;;  %1390 = vst [vmem:[%s9243_s5 + $0x12d8] sm:$0xff] %v1389_v27  ;;  %v1395_v30 = vld [vmem:[%s9238_s4 + $0x25b0] sm:$0xff] }
 0x148   : > { %1392 = vst [vmem:[%s9243_s5 + $0x12e0] sm:$0xff] %v1391_v28  ;;  %1394 = vst [vmem:[%s9243_s5 + $0x12e8] sm:$0xff] %v1393_v29  ;;  %v1397_v31 = vld [vmem:[%s9238_s4 + $0x25b8] sm:$0xff]  ;;  %v1399_v32 = vld [vmem:[%s9238_s4 + $0x25c0] sm:$0xff] }
 0x149   : > { %1396 = vst [vmem:[%s9243_s5 + $0x12f0] sm:$0xff] %v1395_v30  ;;  %1398 = vst [vmem:[%s9243_s5 + $0x12f8] sm:$0xff] %v1397_v31  ;;  %v1401_v33 = vld [vmem:[%s9238_s4 + $0x25c8] sm:$0xff]  ;;  %v1403_v34 = vld [vmem:[%s9238_s4 + $0x25d0] sm:$0xff] }
 0x14a   : > { %1400 = vst [vmem:[%s9243_s5 + $0x1300] sm:$0xff] %v1399_v32  ;;  %v1405_v35 = vld [vmem:[%s9238_s4 + $0x25d8] sm:$0xff]  ;;  %1402 = vst [vmem:[%s9243_s5 + $0x1308] sm:$0xff] %v1401_v33  ;;  %v1407_v36 = vld [vmem:[%s9238_s4 + $0x25e0] sm:$0xff] }
 0x14b   : > { %1404 = vst [vmem:[%s9243_s5 + $0x1310] sm:$0xff] %v1403_v34  ;;  %1406 = vst [vmem:[%s9243_s5 + $0x1318] sm:$0xff] %v1405_v35  ;;  %v1409_v37 = vld [vmem:[%s9238_s4 + $0x25e8] sm:$0xff]  ;;  %v1411_v38 = vld [vmem:[%s9238_s4 + $0x25f0] sm:$0xff] }
 0x14c   : > { %1408 = vst [vmem:[%s9243_s5 + $0x1320] sm:$0xff] %v1407_v36  ;;  %1410 = vst [vmem:[%s9243_s5 + $0x1328] sm:$0xff] %v1409_v37  ;;  %v1413_v39 = vld [vmem:[%s9238_s4 + $0x25f8] sm:$0xff]  ;;  %v1415_v40 = vld [vmem:[%s9238_s4 + $0x2600] sm:$0xff] }
 0x14d   : > { %1412 = vst [vmem:[%s9243_s5 + $0x1330] sm:$0xff] %v1411_v38  ;;  %v1417_v41 = vld [vmem:[%s9238_s4 + $0x2608] sm:$0xff]  ;;  %1414 = vst [vmem:[%s9243_s5 + $0x1338] sm:$0xff] %v1413_v39  ;;  %v1419_v42 = vld [vmem:[%s9238_s4 + $0x2610] sm:$0xff] }
 0x14e   : > { %1416 = vst [vmem:[%s9243_s5 + $0x1340] sm:$0xff] %v1415_v40  ;;  %1418 = vst [vmem:[%s9243_s5 + $0x1348] sm:$0xff] %v1417_v41  ;;  %v1421_v43 = vld [vmem:[%s9238_s4 + $0x2618] sm:$0xff]  ;;  %v1423_v44 = vld [vmem:[%s9238_s4 + $0x2620] sm:$0xff] }
 0x14f   : > { %1420 = vst [vmem:[%s9243_s5 + $0x1350] sm:$0xff] %v1419_v42  ;;  %1422 = vst [vmem:[%s9243_s5 + $0x1358] sm:$0xff] %v1421_v43  ;;  %v1425_v45 = vld [vmem:[%s9238_s4 + $0x2628] sm:$0xff]  ;;  %v1427_v46 = vld [vmem:[%s9238_s4 + $0x2630] sm:$0xff] }
 0x150   : > { %1424 = vst [vmem:[%s9243_s5 + $0x1360] sm:$0xff] %v1423_v44  ;;  %v1429_v47 = vld [vmem:[%s9238_s4 + $0x2638] sm:$0xff]  ;;  %1426 = vst [vmem:[%s9243_s5 + $0x1368] sm:$0xff] %v1425_v45  ;;  %v1431_v48 = vld [vmem:[%s9238_s4 + $0x2700] sm:$0xff] }
 0x151   : > { %1428 = vst [vmem:[%s9243_s5 + $0x1370] sm:$0xff] %v1427_v46  ;;  %1430 = vst [vmem:[%s9243_s5 + $0x1378] sm:$0xff] %v1429_v47  ;;  %v1433_v49 = vld [vmem:[%s9238_s4 + $0x2708] sm:$0xff]  ;;  %v1435_v50 = vld [vmem:[%s9238_s4 + $0x2710] sm:$0xff] }
 0x152   : > { %1432 = vst [vmem:[%s9243_s5 + $0x1380] sm:$0xff] %v1431_v48  ;;  %1434 = vst [vmem:[%s9243_s5 + $0x1388] sm:$0xff] %v1433_v49  ;;  %v1437_v51 = vld [vmem:[%s9238_s4 + $0x2718] sm:$0xff]  ;;  %v1439_v52 = vld [vmem:[%s9238_s4 + $0x2720] sm:$0xff] }
 0x153   : > { %1436 = vst [vmem:[%s9243_s5 + $0x1390] sm:$0xff] %v1435_v50  ;;  %v1441_v53 = vld [vmem:[%s9238_s4 + $0x2728] sm:$0xff]  ;;  %1438 = vst [vmem:[%s9243_s5 + $0x1398] sm:$0xff] %v1437_v51  ;;  %v1443_v54 = vld [vmem:[%s9238_s4 + $0x2730] sm:$0xff] }
 0x154   : > { %1440 = vst [vmem:[%s9243_s5 + $0x13a0] sm:$0xff] %v1439_v52  ;;  %1442 = vst [vmem:[%s9243_s5 + $0x13a8] sm:$0xff] %v1441_v53  ;;  %v1445_v55 = vld [vmem:[%s9238_s4 + $0x2738] sm:$0xff]  ;;  %v1447_v56 = vld [vmem:[%s9238_s4 + $0x2740] sm:$0xff] }
 0x155   : > { %1444 = vst [vmem:[%s9243_s5 + $0x13b0] sm:$0xff] %v1443_v54  ;;  %1446 = vst [vmem:[%s9243_s5 + $0x13b8] sm:$0xff] %v1445_v55  ;;  %v1449_v57 = vld [vmem:[%s9238_s4 + $0x2748] sm:$0xff]  ;;  %v1451_v58 = vld [vmem:[%s9238_s4 + $0x2750] sm:$0xff] }
 0x156   : > { %1448 = vst [vmem:[%s9243_s5 + $0x13c0] sm:$0xff] %v1447_v56  ;;  %v1453_v59 = vld [vmem:[%s9238_s4 + $0x2758] sm:$0xff]  ;;  %1450 = vst [vmem:[%s9243_s5 + $0x13c8] sm:$0xff] %v1449_v57  ;;  %v1455_v60 = vld [vmem:[%s9238_s4 + $0x2760] sm:$0xff] }
 0x157   : > { %1452 = vst [vmem:[%s9243_s5 + $0x13d0] sm:$0xff] %v1451_v58  ;;  %1454 = vst [vmem:[%s9243_s5 + $0x13d8] sm:$0xff] %v1453_v59  ;;  %v1457_v61 = vld [vmem:[%s9238_s4 + $0x2768] sm:$0xff]  ;;  %v1459_v62 = vld [vmem:[%s9238_s4 + $0x2770] sm:$0xff] }
 0x158   : > { %1456 = vst [vmem:[%s9243_s5 + $0x13e0] sm:$0xff] %v1455_v60  ;;  %1458 = vst [vmem:[%s9243_s5 + $0x13e8] sm:$0xff] %v1457_v61  ;;  %v1461_v63 = vld [vmem:[%s9238_s4 + $0x2778] sm:$0xff]  ;;  %v1463_v0 = vld [vmem:[%s9238_s4 + $0x2780] sm:$0xff] }
 0x159   : > { %1460 = vst [vmem:[%s9243_s5 + $0x13f0] sm:$0xff] %v1459_v62  ;;  %v1465_v1 = vld [vmem:[%s9238_s4 + $0x2788] sm:$0xff]  ;;  %1462 = vst [vmem:[%s9243_s5 + $0x13f8] sm:$0xff] %v1461_v63  ;;  %v1467_v2 = vld [vmem:[%s9238_s4 + $0x2790] sm:$0xff] }
 0x15a   : > { %1464 = vst [vmem:[%s9243_s5 + $0x1400] sm:$0xff] %v1463_v0  ;;  %1466 = vst [vmem:[%s9243_s5 + $0x1408] sm:$0xff] %v1465_v1  ;;  %v1469_v3 = vld [vmem:[%s9238_s4 + $0x2798] sm:$0xff]  ;;  %v1471_v4 = vld [vmem:[%s9238_s4 + $0x27a0] sm:$0xff] }
 0x15b   : > { %1468 = vst [vmem:[%s9243_s5 + $0x1410] sm:$0xff] %v1467_v2  ;;  %1470 = vst [vmem:[%s9243_s5 + $0x1418] sm:$0xff] %v1469_v3  ;;  %v1473_v5 = vld [vmem:[%s9238_s4 + $0x27a8] sm:$0xff]  ;;  %v1475_v6 = vld [vmem:[%s9238_s4 + $0x27b0] sm:$0xff] }
 0x15c   : > { %1472 = vst [vmem:[%s9243_s5 + $0x1420] sm:$0xff] %v1471_v4  ;;  %v1477_v7 = vld [vmem:[%s9238_s4 + $0x27b8] sm:$0xff]  ;;  %1474 = vst [vmem:[%s9243_s5 + $0x1428] sm:$0xff] %v1473_v5  ;;  %v1479_v8 = vld [vmem:[%s9238_s4 + $0x2880] sm:$0xff] }
 0x15d   : > { %1476 = vst [vmem:[%s9243_s5 + $0x1430] sm:$0xff] %v1475_v6  ;;  %1478 = vst [vmem:[%s9243_s5 + $0x1438] sm:$0xff] %v1477_v7  ;;  %v1481_v9 = vld [vmem:[%s9238_s4 + $0x2888] sm:$0xff]  ;;  %v1483_v10 = vld [vmem:[%s9238_s4 + $0x2890] sm:$0xff] }
 0x15e   : > { %1480 = vst [vmem:[%s9243_s5 + $0x1440] sm:$0xff] %v1479_v8  ;;  %1482 = vst [vmem:[%s9243_s5 + $0x1448] sm:$0xff] %v1481_v9  ;;  %v1485_v11 = vld [vmem:[%s9238_s4 + $0x2898] sm:$0xff]  ;;  %v1487_v12 = vld [vmem:[%s9238_s4 + $0x28a0] sm:$0xff] }
 0x15f   : > { %1484 = vst [vmem:[%s9243_s5 + $0x1450] sm:$0xff] %v1483_v10  ;;  %v1489_v13 = vld [vmem:[%s9238_s4 + $0x28a8] sm:$0xff]  ;;  %1486 = vst [vmem:[%s9243_s5 + $0x1458] sm:$0xff] %v1485_v11  ;;  %v1491_v14 = vld [vmem:[%s9238_s4 + $0x28b0] sm:$0xff] }
 0x160   : > { %1488 = vst [vmem:[%s9243_s5 + $0x1460] sm:$0xff] %v1487_v12  ;;  %1490 = vst [vmem:[%s9243_s5 + $0x1468] sm:$0xff] %v1489_v13  ;;  %v1493_v15 = vld [vmem:[%s9238_s4 + $0x28b8] sm:$0xff]  ;;  %v1495_v16 = vld [vmem:[%s9238_s4 + $0x28c0] sm:$0xff] }
 0x161   : > { %1492 = vst [vmem:[%s9243_s5 + $0x1470] sm:$0xff] %v1491_v14  ;;  %1494 = vst [vmem:[%s9243_s5 + $0x1478] sm:$0xff] %v1493_v15  ;;  %v1497_v17 = vld [vmem:[%s9238_s4 + $0x28c8] sm:$0xff]  ;;  %v1499_v18 = vld [vmem:[%s9238_s4 + $0x28d0] sm:$0xff] }
 0x162   : > { %1496 = vst [vmem:[%s9243_s5 + $0x1480] sm:$0xff] %v1495_v16  ;;  %v1501_v19 = vld [vmem:[%s9238_s4 + $0x28d8] sm:$0xff]  ;;  %1498 = vst [vmem:[%s9243_s5 + $0x1488] sm:$0xff] %v1497_v17  ;;  %v1503_v20 = vld [vmem:[%s9238_s4 + $0x28e0] sm:$0xff] }
 0x163   : > { %1500 = vst [vmem:[%s9243_s5 + $0x1490] sm:$0xff] %v1499_v18  ;;  %1502 = vst [vmem:[%s9243_s5 + $0x1498] sm:$0xff] %v1501_v19  ;;  %v1505_v21 = vld [vmem:[%s9238_s4 + $0x28e8] sm:$0xff]  ;;  %v1507_v22 = vld [vmem:[%s9238_s4 + $0x28f0] sm:$0xff] }
 0x164   : > { %1504 = vst [vmem:[%s9243_s5 + $0x14a0] sm:$0xff] %v1503_v20  ;;  %1506 = vst [vmem:[%s9243_s5 + $0x14a8] sm:$0xff] %v1505_v21  ;;  %v1509_v23 = vld [vmem:[%s9238_s4 + $0x28f8] sm:$0xff]  ;;  %v1511_v24 = vld [vmem:[%s9238_s4 + $0x2900] sm:$0xff] }
 0x165   : > { %1508 = vst [vmem:[%s9243_s5 + $0x14b0] sm:$0xff] %v1507_v22  ;;  %v1513_v25 = vld [vmem:[%s9238_s4 + $0x2908] sm:$0xff]  ;;  %1510 = vst [vmem:[%s9243_s5 + $0x14b8] sm:$0xff] %v1509_v23  ;;  %v1515_v26 = vld [vmem:[%s9238_s4 + $0x2910] sm:$0xff] }
 0x166   : > { %1512 = vst [vmem:[%s9243_s5 + $0x14c0] sm:$0xff] %v1511_v24  ;;  %1514 = vst [vmem:[%s9243_s5 + $0x14c8] sm:$0xff] %v1513_v25  ;;  %v1517_v27 = vld [vmem:[%s9238_s4 + $0x2918] sm:$0xff]  ;;  %v1519_v28 = vld [vmem:[%s9238_s4 + $0x2920] sm:$0xff] }
 0x167   : > { %1516 = vst [vmem:[%s9243_s5 + $0x14d0] sm:$0xff] %v1515_v26  ;;  %1518 = vst [vmem:[%s9243_s5 + $0x14d8] sm:$0xff] %v1517_v27  ;;  %v1521_v29 = vld [vmem:[%s9238_s4 + $0x2928] sm:$0xff]  ;;  %v1523_v30 = vld [vmem:[%s9238_s4 + $0x2930] sm:$0xff] }
 0x168   : > { %1520 = vst [vmem:[%s9243_s5 + $0x14e0] sm:$0xff] %v1519_v28  ;;  %v1525_v31 = vld [vmem:[%s9238_s4 + $0x2938] sm:$0xff]  ;;  %1522 = vst [vmem:[%s9243_s5 + $0x14e8] sm:$0xff] %v1521_v29  ;;  %v1527_v32 = vld [vmem:[%s9238_s4 + $0x2a00] sm:$0xff] }
 0x169   : > { %1524 = vst [vmem:[%s9243_s5 + $0x14f0] sm:$0xff] %v1523_v30  ;;  %1526 = vst [vmem:[%s9243_s5 + $0x14f8] sm:$0xff] %v1525_v31  ;;  %v1529_v33 = vld [vmem:[%s9238_s4 + $0x2a08] sm:$0xff]  ;;  %v1531_v34 = vld [vmem:[%s9238_s4 + $0x2a10] sm:$0xff] }
 0x16a   : > { %1528 = vst [vmem:[%s9243_s5 + $0x1500] sm:$0xff] %v1527_v32  ;;  %1530 = vst [vmem:[%s9243_s5 + $0x1508] sm:$0xff] %v1529_v33  ;;  %v1533_v35 = vld [vmem:[%s9238_s4 + $0x2a18] sm:$0xff]  ;;  %v1535_v36 = vld [vmem:[%s9238_s4 + $0x2a20] sm:$0xff] }
 0x16b   : > { %1532 = vst [vmem:[%s9243_s5 + $0x1510] sm:$0xff] %v1531_v34  ;;  %v1537_v37 = vld [vmem:[%s9238_s4 + $0x2a28] sm:$0xff]  ;;  %1534 = vst [vmem:[%s9243_s5 + $0x1518] sm:$0xff] %v1533_v35  ;;  %v1539_v38 = vld [vmem:[%s9238_s4 + $0x2a30] sm:$0xff] }
 0x16c   : > { %1536 = vst [vmem:[%s9243_s5 + $0x1520] sm:$0xff] %v1535_v36  ;;  %1538 = vst [vmem:[%s9243_s5 + $0x1528] sm:$0xff] %v1537_v37  ;;  %v1541_v39 = vld [vmem:[%s9238_s4 + $0x2a38] sm:$0xff]  ;;  %v1543_v40 = vld [vmem:[%s9238_s4 + $0x2a40] sm:$0xff] }
 0x16d   : > { %1540 = vst [vmem:[%s9243_s5 + $0x1530] sm:$0xff] %v1539_v38  ;;  %1542 = vst [vmem:[%s9243_s5 + $0x1538] sm:$0xff] %v1541_v39  ;;  %v1545_v41 = vld [vmem:[%s9238_s4 + $0x2a48] sm:$0xff]  ;;  %v1547_v42 = vld [vmem:[%s9238_s4 + $0x2a50] sm:$0xff] }
 0x16e   : > { %1544 = vst [vmem:[%s9243_s5 + $0x1540] sm:$0xff] %v1543_v40  ;;  %v1549_v43 = vld [vmem:[%s9238_s4 + $0x2a58] sm:$0xff]  ;;  %1546 = vst [vmem:[%s9243_s5 + $0x1548] sm:$0xff] %v1545_v41  ;;  %v1551_v44 = vld [vmem:[%s9238_s4 + $0x2a60] sm:$0xff] }
 0x16f   : > { %1548 = vst [vmem:[%s9243_s5 + $0x1550] sm:$0xff] %v1547_v42  ;;  %1550 = vst [vmem:[%s9243_s5 + $0x1558] sm:$0xff] %v1549_v43  ;;  %v1553_v45 = vld [vmem:[%s9238_s4 + $0x2a68] sm:$0xff]  ;;  %v1555_v46 = vld [vmem:[%s9238_s4 + $0x2a70] sm:$0xff] }
 0x170   : > { %1552 = vst [vmem:[%s9243_s5 + $0x1560] sm:$0xff] %v1551_v44  ;;  %1554 = vst [vmem:[%s9243_s5 + $0x1568] sm:$0xff] %v1553_v45  ;;  %v1557_v47 = vld [vmem:[%s9238_s4 + $0x2a78] sm:$0xff]  ;;  %v1559_v48 = vld [vmem:[%s9238_s4 + $0x2a80] sm:$0xff] }
 0x171   : > { %1556 = vst [vmem:[%s9243_s5 + $0x1570] sm:$0xff] %v1555_v46  ;;  %v1561_v49 = vld [vmem:[%s9238_s4 + $0x2a88] sm:$0xff]  ;;  %1558 = vst [vmem:[%s9243_s5 + $0x1578] sm:$0xff] %v1557_v47  ;;  %v1563_v50 = vld [vmem:[%s9238_s4 + $0x2a90] sm:$0xff] }
 0x172   : > { %1560 = vst [vmem:[%s9243_s5 + $0x1580] sm:$0xff] %v1559_v48  ;;  %1562 = vst [vmem:[%s9243_s5 + $0x1588] sm:$0xff] %v1561_v49  ;;  %v1565_v51 = vld [vmem:[%s9238_s4 + $0x2a98] sm:$0xff]  ;;  %v1567_v52 = vld [vmem:[%s9238_s4 + $0x2aa0] sm:$0xff] }
 0x173   : > { %1564 = vst [vmem:[%s9243_s5 + $0x1590] sm:$0xff] %v1563_v50  ;;  %1566 = vst [vmem:[%s9243_s5 + $0x1598] sm:$0xff] %v1565_v51  ;;  %v1569_v53 = vld [vmem:[%s9238_s4 + $0x2aa8] sm:$0xff]  ;;  %v1571_v54 = vld [vmem:[%s9238_s4 + $0x2ab0] sm:$0xff] }
 0x174   : > { %1568 = vst [vmem:[%s9243_s5 + $0x15a0] sm:$0xff] %v1567_v52  ;;  %v1573_v55 = vld [vmem:[%s9238_s4 + $0x2ab8] sm:$0xff]  ;;  %1570 = vst [vmem:[%s9243_s5 + $0x15a8] sm:$0xff] %v1569_v53  ;;  %v1575_v56 = vld [vmem:[%s9238_s4 + $0x2b80] sm:$0xff] }
 0x175   : > { %1572 = vst [vmem:[%s9243_s5 + $0x15b0] sm:$0xff] %v1571_v54  ;;  %1574 = vst [vmem:[%s9243_s5 + $0x15b8] sm:$0xff] %v1573_v55  ;;  %v1577_v57 = vld [vmem:[%s9238_s4 + $0x2b88] sm:$0xff]  ;;  %v1579_v58 = vld [vmem:[%s9238_s4 + $0x2b90] sm:$0xff] }
 0x176   : > { %1576 = vst [vmem:[%s9243_s5 + $0x15c0] sm:$0xff] %v1575_v56  ;;  %1578 = vst [vmem:[%s9243_s5 + $0x15c8] sm:$0xff] %v1577_v57  ;;  %v1581_v59 = vld [vmem:[%s9238_s4 + $0x2b98] sm:$0xff]  ;;  %v1583_v60 = vld [vmem:[%s9238_s4 + $0x2ba0] sm:$0xff] }
 0x177   : > { %1580 = vst [vmem:[%s9243_s5 + $0x15d0] sm:$0xff] %v1579_v58  ;;  %v1585_v61 = vld [vmem:[%s9238_s4 + $0x2ba8] sm:$0xff]  ;;  %1582 = vst [vmem:[%s9243_s5 + $0x15d8] sm:$0xff] %v1581_v59  ;;  %v1587_v62 = vld [vmem:[%s9238_s4 + $0x2bb0] sm:$0xff] }
 0x178   : > { %1584 = vst [vmem:[%s9243_s5 + $0x15e0] sm:$0xff] %v1583_v60  ;;  %1586 = vst [vmem:[%s9243_s5 + $0x15e8] sm:$0xff] %v1585_v61  ;;  %v1589_v63 = vld [vmem:[%s9238_s4 + $0x2bb8] sm:$0xff]  ;;  %v1591_v0 = vld [vmem:[%s9238_s4 + $0x2bc0] sm:$0xff] }
 0x179   : > { %1588 = vst [vmem:[%s9243_s5 + $0x15f0] sm:$0xff] %v1587_v62  ;;  %1590 = vst [vmem:[%s9243_s5 + $0x15f8] sm:$0xff] %v1589_v63  ;;  %v1593_v1 = vld [vmem:[%s9238_s4 + $0x2bc8] sm:$0xff]  ;;  %v1595_v2 = vld [vmem:[%s9238_s4 + $0x2bd0] sm:$0xff] }
 0x17a   : > { %1592 = vst [vmem:[%s9243_s5 + $0x1600] sm:$0xff] %v1591_v0  ;;  %v1597_v3 = vld [vmem:[%s9238_s4 + $0x2bd8] sm:$0xff]  ;;  %1594 = vst [vmem:[%s9243_s5 + $0x1608] sm:$0xff] %v1593_v1  ;;  %v1599_v4 = vld [vmem:[%s9238_s4 + $0x2be0] sm:$0xff] }
 0x17b   : > { %1596 = vst [vmem:[%s9243_s5 + $0x1610] sm:$0xff] %v1595_v2  ;;  %1598 = vst [vmem:[%s9243_s5 + $0x1618] sm:$0xff] %v1597_v3  ;;  %v1601_v5 = vld [vmem:[%s9238_s4 + $0x2be8] sm:$0xff]  ;;  %v1603_v6 = vld [vmem:[%s9238_s4 + $0x2bf0] sm:$0xff] }
 0x17c   : > { %1600 = vst [vmem:[%s9243_s5 + $0x1620] sm:$0xff] %v1599_v4  ;;  %1602 = vst [vmem:[%s9243_s5 + $0x1628] sm:$0xff] %v1601_v5  ;;  %v1605_v7 = vld [vmem:[%s9238_s4 + $0x2bf8] sm:$0xff]  ;;  %v1607_v8 = vld [vmem:[%s9238_s4 + $0x2c00] sm:$0xff] }
 0x17d   : > { %1604 = vst [vmem:[%s9243_s5 + $0x1630] sm:$0xff] %v1603_v6  ;;  %v1609_v9 = vld [vmem:[%s9238_s4 + $0x2c08] sm:$0xff]  ;;  %1606 = vst [vmem:[%s9243_s5 + $0x1638] sm:$0xff] %v1605_v7  ;;  %v1611_v10 = vld [vmem:[%s9238_s4 + $0x2c10] sm:$0xff] }
 0x17e   : > { %1608 = vst [vmem:[%s9243_s5 + $0x1640] sm:$0xff] %v1607_v8  ;;  %1610 = vst [vmem:[%s9243_s5 + $0x1648] sm:$0xff] %v1609_v9  ;;  %v1613_v11 = vld [vmem:[%s9238_s4 + $0x2c18] sm:$0xff]  ;;  %v1615_v12 = vld [vmem:[%s9238_s4 + $0x2c20] sm:$0xff] }
 0x17f   : > { %1612 = vst [vmem:[%s9243_s5 + $0x1650] sm:$0xff] %v1611_v10  ;;  %1614 = vst [vmem:[%s9243_s5 + $0x1658] sm:$0xff] %v1613_v11  ;;  %v1617_v13 = vld [vmem:[%s9238_s4 + $0x2c28] sm:$0xff]  ;;  %v1619_v14 = vld [vmem:[%s9238_s4 + $0x2c30] sm:$0xff] }
 0x180   : > { %1616 = vst [vmem:[%s9243_s5 + $0x1660] sm:$0xff] %v1615_v12  ;;  %v1621_v15 = vld [vmem:[%s9238_s4 + $0x2c38] sm:$0xff]  ;;  %1618 = vst [vmem:[%s9243_s5 + $0x1668] sm:$0xff] %v1617_v13  ;;  %v1623_v16 = vld [vmem:[%s9238_s4 + $0x2d00] sm:$0xff] }
 0x181   : > { %1620 = vst [vmem:[%s9243_s5 + $0x1670] sm:$0xff] %v1619_v14  ;;  %1622 = vst [vmem:[%s9243_s5 + $0x1678] sm:$0xff] %v1621_v15  ;;  %v1625_v17 = vld [vmem:[%s9238_s4 + $0x2d08] sm:$0xff]  ;;  %v1627_v18 = vld [vmem:[%s9238_s4 + $0x2d10] sm:$0xff] }
 0x182   : > { %1624 = vst [vmem:[%s9243_s5 + $0x1680] sm:$0xff] %v1623_v16  ;;  %1626 = vst [vmem:[%s9243_s5 + $0x1688] sm:$0xff] %v1625_v17  ;;  %v1629_v19 = vld [vmem:[%s9238_s4 + $0x2d18] sm:$0xff]  ;;  %v1631_v20 = vld [vmem:[%s9238_s4 + $0x2d20] sm:$0xff] }
 0x183   : > { %1628 = vst [vmem:[%s9243_s5 + $0x1690] sm:$0xff] %v1627_v18  ;;  %v1633_v21 = vld [vmem:[%s9238_s4 + $0x2d28] sm:$0xff]  ;;  %1630 = vst [vmem:[%s9243_s5 + $0x1698] sm:$0xff] %v1629_v19  ;;  %v1635_v22 = vld [vmem:[%s9238_s4 + $0x2d30] sm:$0xff] }
 0x184   : > { %1632 = vst [vmem:[%s9243_s5 + $0x16a0] sm:$0xff] %v1631_v20  ;;  %1634 = vst [vmem:[%s9243_s5 + $0x16a8] sm:$0xff] %v1633_v21  ;;  %v1637_v23 = vld [vmem:[%s9238_s4 + $0x2d38] sm:$0xff]  ;;  %v1639_v24 = vld [vmem:[%s9238_s4 + $0x2d40] sm:$0xff] }
 0x185   : > { %1636 = vst [vmem:[%s9243_s5 + $0x16b0] sm:$0xff] %v1635_v22  ;;  %1638 = vst [vmem:[%s9243_s5 + $0x16b8] sm:$0xff] %v1637_v23  ;;  %v1641_v25 = vld [vmem:[%s9238_s4 + $0x2d48] sm:$0xff]  ;;  %v1643_v26 = vld [vmem:[%s9238_s4 + $0x2d50] sm:$0xff] }
 0x186   : > { %1640 = vst [vmem:[%s9243_s5 + $0x16c0] sm:$0xff] %v1639_v24  ;;  %v1645_v27 = vld [vmem:[%s9238_s4 + $0x2d58] sm:$0xff]  ;;  %1642 = vst [vmem:[%s9243_s5 + $0x16c8] sm:$0xff] %v1641_v25  ;;  %v1647_v28 = vld [vmem:[%s9238_s4 + $0x2d60] sm:$0xff] }
 0x187   : > { %1644 = vst [vmem:[%s9243_s5 + $0x16d0] sm:$0xff] %v1643_v26  ;;  %1646 = vst [vmem:[%s9243_s5 + $0x16d8] sm:$0xff] %v1645_v27  ;;  %v1649_v29 = vld [vmem:[%s9238_s4 + $0x2d68] sm:$0xff]  ;;  %v1651_v30 = vld [vmem:[%s9238_s4 + $0x2d70] sm:$0xff] }
 0x188   : > { %1648 = vst [vmem:[%s9243_s5 + $0x16e0] sm:$0xff] %v1647_v28  ;;  %1650 = vst [vmem:[%s9243_s5 + $0x16e8] sm:$0xff] %v1649_v29  ;;  %v1653_v31 = vld [vmem:[%s9238_s4 + $0x2d78] sm:$0xff]  ;;  %v1655_v32 = vld [vmem:[%s9238_s4 + $0x2d80] sm:$0xff] }
 0x189   : > { %1652 = vst [vmem:[%s9243_s5 + $0x16f0] sm:$0xff] %v1651_v30  ;;  %v1657_v33 = vld [vmem:[%s9238_s4 + $0x2d88] sm:$0xff]  ;;  %1654 = vst [vmem:[%s9243_s5 + $0x16f8] sm:$0xff] %v1653_v31  ;;  %v1659_v34 = vld [vmem:[%s9238_s4 + $0x2d90] sm:$0xff] }
 0x18a   : > { %1656 = vst [vmem:[%s9243_s5 + $0x1700] sm:$0xff] %v1655_v32  ;;  %1658 = vst [vmem:[%s9243_s5 + $0x1708] sm:$0xff] %v1657_v33  ;;  %v1661_v35 = vld [vmem:[%s9238_s4 + $0x2d98] sm:$0xff]  ;;  %v1663_v36 = vld [vmem:[%s9238_s4 + $0x2da0] sm:$0xff] }
 0x18b   : > { %1660 = vst [vmem:[%s9243_s5 + $0x1710] sm:$0xff] %v1659_v34  ;;  %1662 = vst [vmem:[%s9243_s5 + $0x1718] sm:$0xff] %v1661_v35  ;;  %v1665_v37 = vld [vmem:[%s9238_s4 + $0x2da8] sm:$0xff]  ;;  %v1667_v38 = vld [vmem:[%s9238_s4 + $0x2db0] sm:$0xff] }
 0x18c   : > { %1664 = vst [vmem:[%s9243_s5 + $0x1720] sm:$0xff] %v1663_v36  ;;  %v1669_v39 = vld [vmem:[%s9238_s4 + $0x2db8] sm:$0xff]  ;;  %1666 = vst [vmem:[%s9243_s5 + $0x1728] sm:$0xff] %v1665_v37  ;;  %v1671_v40 = vld [vmem:[%s9238_s4 + $0x2e80] sm:$0xff] }
 0x18d   : > { %1668 = vst [vmem:[%s9243_s5 + $0x1730] sm:$0xff] %v1667_v38  ;;  %1670 = vst [vmem:[%s9243_s5 + $0x1738] sm:$0xff] %v1669_v39  ;;  %v1673_v41 = vld [vmem:[%s9238_s4 + $0x2e88] sm:$0xff]  ;;  %v1675_v42 = vld [vmem:[%s9238_s4 + $0x2e90] sm:$0xff] }
 0x18e   : > { %1672 = vst [vmem:[%s9243_s5 + $0x1740] sm:$0xff] %v1671_v40  ;;  %1674 = vst [vmem:[%s9243_s5 + $0x1748] sm:$0xff] %v1673_v41  ;;  %v1677_v43 = vld [vmem:[%s9238_s4 + $0x2e98] sm:$0xff]  ;;  %v1679_v44 = vld [vmem:[%s9238_s4 + $0x2ea0] sm:$0xff] }
 0x18f   : > { %1676 = vst [vmem:[%s9243_s5 + $0x1750] sm:$0xff] %v1675_v42  ;;  %v1681_v45 = vld [vmem:[%s9238_s4 + $0x2ea8] sm:$0xff]  ;;  %1678 = vst [vmem:[%s9243_s5 + $0x1758] sm:$0xff] %v1677_v43  ;;  %v1683_v46 = vld [vmem:[%s9238_s4 + $0x2eb0] sm:$0xff] }
 0x190   : > { %1680 = vst [vmem:[%s9243_s5 + $0x1760] sm:$0xff] %v1679_v44  ;;  %1682 = vst [vmem:[%s9243_s5 + $0x1768] sm:$0xff] %v1681_v45  ;;  %v1685_v47 = vld [vmem:[%s9238_s4 + $0x2eb8] sm:$0xff]  ;;  %v1687_v48 = vld [vmem:[%s9238_s4 + $0x2ec0] sm:$0xff] }
 0x191   : > { %1684 = vst [vmem:[%s9243_s5 + $0x1770] sm:$0xff] %v1683_v46  ;;  %1686 = vst [vmem:[%s9243_s5 + $0x1778] sm:$0xff] %v1685_v47  ;;  %v1689_v49 = vld [vmem:[%s9238_s4 + $0x2ec8] sm:$0xff]  ;;  %v1691_v50 = vld [vmem:[%s9238_s4 + $0x2ed0] sm:$0xff] }
 0x192   : > { %1688 = vst [vmem:[%s9243_s5 + $0x1780] sm:$0xff] %v1687_v48  ;;  %v1693_v51 = vld [vmem:[%s9238_s4 + $0x2ed8] sm:$0xff]  ;;  %1690 = vst [vmem:[%s9243_s5 + $0x1788] sm:$0xff] %v1689_v49  ;;  %v1695_v52 = vld [vmem:[%s9238_s4 + $0x2ee0] sm:$0xff] }
 0x193   : > { %1692 = vst [vmem:[%s9243_s5 + $0x1790] sm:$0xff] %v1691_v50  ;;  %1694 = vst [vmem:[%s9243_s5 + $0x1798] sm:$0xff] %v1693_v51  ;;  %v1697_v53 = vld [vmem:[%s9238_s4 + $0x2ee8] sm:$0xff]  ;;  %v1699_v54 = vld [vmem:[%s9238_s4 + $0x2ef0] sm:$0xff] }
 0x194   : > { %1696 = vst [vmem:[%s9243_s5 + $0x17a0] sm:$0xff] %v1695_v52  ;;  %1698 = vst [vmem:[%s9243_s5 + $0x17a8] sm:$0xff] %v1697_v53  ;;  %v1701_v55 = vld [vmem:[%s9238_s4 + $0x2ef8] sm:$0xff]  ;;  %v1703_v56 = vld [vmem:[%s9238_s4 + $0x2f00] sm:$0xff] }
 0x195   : > { %1700 = vst [vmem:[%s9243_s5 + $0x17b0] sm:$0xff] %v1699_v54  ;;  %v1705_v57 = vld [vmem:[%s9238_s4 + $0x2f08] sm:$0xff]  ;;  %1702 = vst [vmem:[%s9243_s5 + $0x17b8] sm:$0xff] %v1701_v55  ;;  %v1707_v58 = vld [vmem:[%s9238_s4 + $0x2f10] sm:$0xff] }
 0x196   : > { %1704 = vst [vmem:[%s9243_s5 + $0x17c0] sm:$0xff] %v1703_v56  ;;  %1706 = vst [vmem:[%s9243_s5 + $0x17c8] sm:$0xff] %v1705_v57  ;;  %v1709_v59 = vld [vmem:[%s9238_s4 + $0x2f18] sm:$0xff]  ;;  %v1711_v60 = vld [vmem:[%s9238_s4 + $0x2f20] sm:$0xff] }
 0x197   : > { %1708 = vst [vmem:[%s9243_s5 + $0x17d0] sm:$0xff] %v1707_v58  ;;  %1710 = vst [vmem:[%s9243_s5 + $0x17d8] sm:$0xff] %v1709_v59  ;;  %v1713_v61 = vld [vmem:[%s9238_s4 + $0x2f28] sm:$0xff]  ;;  %v1715_v62 = vld [vmem:[%s9238_s4 + $0x2f30] sm:$0xff] }
 0x198   : > { %1712 = vst [vmem:[%s9243_s5 + $0x17e0] sm:$0xff] %v1711_v60  ;;  %v1717_v63 = vld [vmem:[%s9238_s4 + $0x2f38] sm:$0xff]  ;;  %1714 = vst [vmem:[%s9243_s5 + $0x17e8] sm:$0xff] %v1713_v61 }
 0x199   : > { %1716 = vst [vmem:[%s9243_s5 + $0x17f0] sm:$0xff] %v1715_v62  ;;  %1718 = vst [vmem:[%s9243_s5 + $0x17f8] sm:$0xff] %v1717_v63 }
 0x19a PF: > { %p6700_p11 = scmp.ge.s32.totalorder %s9152_s17, 1  ;;  %p1731_p12 = scmp.lt.s32.totalorder %s9152_s17, 3 }
 0x19c   : > { %p1732_p13 = pnand %p6700_p11, %p1731_p12 }
 0x19d   : > { %s10781_s6 = sand.u32 (!%p1732_p13), 1, %s9136_s13   ;;  %v10786_v0 = vld.sshfl [vmem:[%s11879_s0] sm:$0x33 pattern:$0x76325410] (!%p1732_p13)  ;;  %s1778_s19 = smul.u32 (!%p1732_p13), 48, %s9144_s15 }
 0x19e   : > { %1735 = sbr.rel (%p1732_p13) target bundleno = 1425 (0x591), region = 51  ;;  %v10791_v1 = vcombine.high (!%p1732_p13), %v10786_v0, %v10786_v0  ;;  %s6580_s23 = scalar_lea.sflag (!%p1732_p13), [#allocation5], %s10781_s6 }
 0x19f   : > { %s9012_s9 = smul.u32 (!%p1732_p13), 6144, %s10781_s6  ;;  %p11079_p0 = scmp.lt.s32.totalorder (!%p1732_p13), %s1778_s19, 95 }
 0x1a0   : > { %4192 = vmatprep.mubr.f32.mxu0 (!%p1732_p13), %v10791_v1  ;;  %4263 = vmatprep.mubr.f32.mxu1 (!%p1732_p13), %v10791_v1  ;;  %s9013_s28 = smul.u32 (!%p1732_p13), 96, %s10781_s6 }
 0x1a1   : > { %s10795_s10 = scalar_lea.vmem (!%p1732_p13), [#allocation3], %s9012_s9 }
 0x1a2   : > { %v1813_v2 = vld [vmem:[%s10795_s10] sm:$0xff] (!%p1732_p13)  ;;  %v1814_v4 = vld [vmem:[%s10795_s10 + $0x8] sm:$0xff] (!%p1732_p13)  ;;  %s11159_s29 = scalar_lea.vmem (!%p1732_p13), [#allocation4], %s9013_s28 }
 0x1a3   : > { %v1837_v3 = vld [vmem:[%s10795_s10 + $0xc0] sm:$0xff] (!%p1732_p13)  ;;  %v1838_v6 = vld [vmem:[%s10795_s10 + $0xc8] sm:$0xff] (!%p1732_p13)  ;;  %s6594_s11 = sshll.u32 (!%p1732_p13), %s11159_s29, 4  ;;  %s11831_s11 = int_to_ptr.vmem [resolvable:$true] %s6594_s11 }
 0x1a4   : > { %v8243_v5 = vcombine.high (!%p1732_p13), %v1813_v2, %v1837_v3  ;;  %v8244_v7 = vcombine.low (!%p1732_p13), %v1813_v2, %v1837_v3  ;;  %v1861_v8 = vld [vmem:[%s10795_s10 + $0x180] sm:$0xff] (!%p1732_p13)  ;;  %v8275_v10 = vcombine.high (!%p1732_p13), %v1814_v4, %v1838_v6  ;;  %v8276_v11 = vcombine.low (!%p1732_p13), %v1814_v4, %v1838_v6  ;;  %v1862_v13 = vld [vmem:[%s10795_s10 + $0x188] sm:$0xff] (!%p1732_p13)  ;;  %s9074_s26 = scalar_lea.vmem (!%p1732_p13), %s11831_s11, 1536 }
 0x1a5   : > { %v1885_v9 = vld [vmem:[%s10795_s10 + $0x240] sm:$0xff]  ;;  %v1886_v14 = vld [vmem:[%s10795_s10 + $0x248] sm:$0xff]  ;;  %s11894_s19 = smov (!%p11079_p0, %s1778_s19), 95  ;;  %p9075_p1 = scmp.ne.s32.totalorder %s11831_s11, %s9074_s26 }
 0x1a6   : > { %v8245_v12 = vcombine.high %v1861_v8, %v1885_v9  ;;  %v1909_v15 = vld [vmem:[%s10795_s10 + $0x300] sm:$0xff]  ;;  %6708 = vmatprep.subr.bf16.mxu0 %v8243_v5  ;;  %v8277_v16 = vcombine.high %v1862_v13, %v1886_v14  ;;  %v1910_v18 = vld [vmem:[%s10795_s10 + $0x308] sm:$0xff]  ;;  %6772 = vmatprep.subr.bf16.mxu1 %v8275_v10  ;;  %v8246_v20 = vcombine.low %v1861_v8, %v1885_v9  ;;  %s11102_s27 = scalar_lea.vmem %s11881_s2, %s11894_s19 }
 0x1a7   : > { %v1933_v17 = vld [vmem:[%s10795_s10 + $0x3c0] sm:$0xff]  ;;  %v1934_v19 = vld [vmem:[%s10795_s10 + $0x3c8] sm:$0xff]  ;;  %6710 = vmatpush1.bf16.msra.mxu0 %v8244_v7  ;;  %6774 = vmatpush1.bf16.msra.mxu1 %v8276_v11  ;;  %v8278_v21 = vcombine.low %v1862_v13, %v1886_v14  ;;  %p9076_p2 = pnand %p9075_p1, %p9215_p5 }
 0x1a8   : > { %6712 = vmatprep.subr.bf16.mxu0 %v8245_v12  ;;  %v8247_v22 = vcombine.high %v1909_v15, %v1933_v17  ;;  %6776 = vmatprep.subr.bf16.mxu1 %v8277_v16  ;;  %v8279_v23 = vcombine.high %v1910_v18, %v1934_v19  ;;  %v1957_v24 = vld [vmem:[%s10795_s10 + $0x480] sm:$0xff]  ;;  %v1958_v26 = vld [vmem:[%s10795_s10 + $0x488] sm:$0xff]  ;;  %v8248_v28 = vcombine.low %v1909_v15, %v1933_v17 }
 0x1a9   : > { %v1981_v25 = vld [vmem:[%s10795_s10 + $0x540] sm:$0xff]  ;;  %v1982_v27 = vld [vmem:[%s10795_s10 + $0x548] sm:$0xff]  ;;  %v8280_v29 = vcombine.low %v1910_v18, %v1934_v19  ;;  %p9077_p3 = pneg %p9076_p2 }
 0x1aa   : > { %v8249_v30 = vcombine.high %v1957_v24, %v1981_v25  ;;  %v8281_v31 = vcombine.high %v1958_v26, %v1982_v27  ;;  %v2005_v32 = vld [vmem:[%s10795_s10 + $0x600] sm:$0xff]  ;;  %v2006_v34 = vld [vmem:[%s10795_s10 + $0x608] sm:$0xff]  ;;  %v8250_v36 = vcombine.low %v1957_v24, %v1981_v25  ;;  %v8282_v37 = vcombine.low %v1958_v26, %v1982_v27 }
 0x1ab   : > { %6714 = vmatpush1.bf16.msra.mxu0 %v8246_v20  ;;  %6778 = vmatpush1.bf16.msra.mxu1 %v8278_v21  ;;  %v2029_v33 = vld [vmem:[%s10795_s10 + $0x6c0] sm:$0xff]  ;;  %v2030_v35 = vld [vmem:[%s10795_s10 + $0x6c8] sm:$0xff] }
 0x1ac   : > { %6716 = vmatprep.subr.bf16.mxu0 %v8247_v22  ;;  %6780 = vmatprep.subr.bf16.mxu1 %v8279_v23  ;;  %v8251_v38 = vcombine.high %v2005_v32, %v2029_v33  ;;  %v8283_v39 = vcombine.high %v2006_v34, %v2030_v35  ;;  %v2053_v40 = vld [vmem:[%s10795_s10 + $0x780] sm:$0xff]  ;;  %v2054_v42 = vld [vmem:[%s10795_s10 + $0x788] sm:$0xff]  ;;  %v8252_v44 = vcombine.low %v2005_v32, %v2029_v33 }
 0x1ad   : > { %v2077_v41 = vld [vmem:[%s10795_s10 + $0x840] sm:$0xff]  ;;  %v2078_v43 = vld [vmem:[%s10795_s10 + $0x848] sm:$0xff]  ;;  %v8284_v45 = vcombine.low %v2006_v34, %v2030_v35 }
 0x1ae   : > { %v8253_v46 = vcombine.high %v2053_v40, %v2077_v41  ;;  %v8285_v47 = vcombine.high %v2054_v42, %v2078_v43  ;;  %v2101_v48 = vld [vmem:[%s10795_s10 + $0x900] sm:$0xff]  ;;  %v2102_v50 = vld [vmem:[%s10795_s10 + $0x908] sm:$0xff]  ;;  %v8254_v52 = vcombine.low %v2053_v40, %v2077_v41  ;;  %v8286_v53 = vcombine.low %v2054_v42, %v2078_v43 }
 0x1af   : > { %6718 = vmatpush1.bf16.msra.mxu0 %v8248_v28  ;;  %6782 = vmatpush1.bf16.msra.mxu1 %v8280_v29  ;;  %v2125_v49 = vld [vmem:[%s10795_s10 + $0x9c0] sm:$0xff]  ;;  %v2126_v51 = vld [vmem:[%s10795_s10 + $0x9c8] sm:$0xff] }
 0x1b0   : > { %6720 = vmatprep.subr.bf16.mxu0 %v8249_v30  ;;  %6784 = vmatprep.subr.bf16.mxu1 %v8281_v31  ;;  %v8255_v54 = vcombine.high %v2101_v48, %v2125_v49  ;;  %v8287_v55 = vcombine.high %v2102_v50, %v2126_v51  ;;  %v2149_v56 = vld [vmem:[%s10795_s10 + $0xa80] sm:$0xff]  ;;  %v2150_v58 = vld [vmem:[%s10795_s10 + $0xa88] sm:$0xff]  ;;  %v8256_v60 = vcombine.low %v2101_v48, %v2125_v49 }
 0x1b1   : > { %v2173_v57 = vld [vmem:[%s10795_s10 + $0xb40] sm:$0xff]  ;;  %v2174_v59 = vld [vmem:[%s10795_s10 + $0xb48] sm:$0xff]  ;;  %v8288_v61 = vcombine.low %v2102_v50, %v2126_v51 }
 0x1b2   : > { %v8257_v62 = vcombine.high %v2149_v56, %v2173_v57  ;;  %v8289_v63 = vcombine.high %v2150_v58, %v2174_v59  ;;  %v2197_v2 = vld [vmem:[%s10795_s10 + $0xc00] sm:$0xff]  ;;  %v2198_v4 = vld [vmem:[%s10795_s10 + $0xc08] sm:$0xff]  ;;  %v8258_v6 = vcombine.low %v2149_v56, %v2173_v57  ;;  %v8290_v7 = vcombine.low %v2150_v58, %v2174_v59 }
 0x1b3   : > { %6722 = vmatpush1.bf16.msra.mxu0 %v8250_v36  ;;  %6786 = vmatpush1.bf16.msra.mxu1 %v8282_v37  ;;  %v2221_v3 = vld [vmem:[%s10795_s10 + $0xcc0] sm:$0xff]  ;;  %v2222_v5 = vld [vmem:[%s10795_s10 + $0xcc8] sm:$0xff] }
 0x1b4   : > { %6724 = vmatprep.subr.bf16.mxu0 %v8251_v38  ;;  %6788 = vmatprep.subr.bf16.mxu1 %v8283_v39  ;;  %v8259_v8 = vcombine.high %v2197_v2, %v2221_v3  ;;  %v8291_v9 = vcombine.high %v2198_v4, %v2222_v5  ;;  %v2245_v10 = vld [vmem:[%s10795_s10 + $0xd80] sm:$0xff]  ;;  %v2246_v12 = vld [vmem:[%s10795_s10 + $0xd88] sm:$0xff]  ;;  %v8260_v14 = vcombine.low %v2197_v2, %v2221_v3 }
 0x1b5   : > { %v2269_v11 = vld [vmem:[%s10795_s10 + $0xe40] sm:$0xff]  ;;  %v2270_v13 = vld [vmem:[%s10795_s10 + $0xe48] sm:$0xff]  ;;  %v8292_v15 = vcombine.low %v2198_v4, %v2222_v5  ;;  %v1815_v4 = vld [vmem:[%s10795_s10 + $0x10] sm:$0xff] }
 0x1b6   : > { %v8261_v16 = vcombine.high %v2245_v10, %v2269_v11  ;;  %v8293_v17 = vcombine.high %v2246_v12, %v2270_v13  ;;  %v2293_v18 = vld [vmem:[%s10795_s10 + $0xf00] sm:$0xff]  ;;  %v2294_v20 = vld [vmem:[%s10795_s10 + $0xf08] sm:$0xff]  ;;  %v8262_v22 = vcombine.low %v2245_v10, %v2269_v11  ;;  %v8294_v23 = vcombine.low %v2246_v12, %v2270_v13  ;;  %v1839_v5 = vld [vmem:[%s10795_s10 + $0xd0] sm:$0xff] }
 0x1b7   : > { %6726 = vmatpush1.bf16.msra.mxu0 %v8252_v44  ;;  %6790 = vmatpush1.bf16.msra.mxu1 %v8284_v45  ;;  %v2317_v19 = vld [vmem:[%s10795_s10 + $0xfc0] sm:$0xff]  ;;  %v2318_v21 = vld [vmem:[%s10795_s10 + $0xfc8] sm:$0xff]  ;;  %v8307_v10 = vcombine.high %v1815_v4, %v1839_v5  ;;  %v1863_v12 = vld [vmem:[%s10795_s10 + $0x190] sm:$0xff] }
 0x1b8   : > { %6728 = vmatprep.subr.bf16.mxu0 %v8253_v46  ;;  %6792 = vmatprep.subr.bf16.mxu1 %v8285_v47  ;;  %v8263_v24 = vcombine.high %v2293_v18, %v2317_v19  ;;  %v8295_v25 = vcombine.high %v2294_v20, %v2318_v21  ;;  %v2341_v26 = vld [vmem:[%s10795_s10 + $0x1080] sm:$0xff]  ;;  %v2342_v28 = vld [vmem:[%s10795_s10 + $0x1088] sm:$0xff]  ;;  %v8264_v30 = vcombine.low %v2293_v18, %v2317_v19  ;;  %v1887_v13 = vld [vmem:[%s10795_s10 + $0x250] sm:$0xff] }
 0x1b9   : > { %v2365_v27 = vld [vmem:[%s10795_s10 + $0x1140] sm:$0xff]  ;;  %v2366_v29 = vld [vmem:[%s10795_s10 + $0x1148] sm:$0xff]  ;;  %v8296_v31 = vcombine.low %v2294_v20, %v2318_v21  ;;  %v8309_v18 = vcombine.high %v1863_v12, %v1887_v13  ;;  %v1911_v20 = vld [vmem:[%s10795_s10 + $0x310] sm:$0xff] }
 0x1ba   : > { %v8265_v32 = vcombine.high %v2341_v26, %v2365_v27  ;;  %v8297_v33 = vcombine.high %v2342_v28, %v2366_v29  ;;  %v2389_v34 = vld [vmem:[%s10795_s10 + $0x1200] sm:$0xff]  ;;  %v2390_v36 = vld [vmem:[%s10795_s10 + $0x1208] sm:$0xff]  ;;  %v8266_v38 = vcombine.low %v2341_v26, %v2365_v27  ;;  %v8298_v39 = vcombine.low %v2342_v28, %v2366_v29  ;;  %v1935_v21 = vld [vmem:[%s10795_s10 + $0x3d0] sm:$0xff] }
 0x1bb   : > { %6730 = vmatpush1.bf16.msra.mxu0 %v8254_v52  ;;  %6794 = vmatpush1.bf16.msra.mxu1 %v8286_v53  ;;  %v2413_v35 = vld [vmem:[%s10795_s10 + $0x12c0] sm:$0xff]  ;;  %v2414_v37 = vld [vmem:[%s10795_s10 + $0x12c8] sm:$0xff]  ;;  %v8311_v26 = vcombine.high %v1911_v20, %v1935_v21  ;;  %v1959_v28 = vld [vmem:[%s10795_s10 + $0x490] sm:$0xff] }
 0x1bc   : > { %6732 = vmatprep.subr.bf16.mxu0 %v8255_v54  ;;  %6796 = vmatprep.subr.bf16.mxu1 %v8287_v55  ;;  %v8267_v40 = vcombine.high %v2389_v34, %v2413_v35  ;;  %v8299_v41 = vcombine.high %v2390_v36, %v2414_v37  ;;  %v2437_v42 = vld [vmem:[%s10795_s10 + $0x1380] sm:$0xff]  ;;  %v2438_v44 = vld [vmem:[%s10795_s10 + $0x1388] sm:$0xff]  ;;  %v8268_v46 = vcombine.low %v2389_v34, %v2413_v35  ;;  %v1983_v29 = vld [vmem:[%s10795_s10 + $0x550] sm:$0xff] }
 0x1bd   : > { %v2461_v43 = vld [vmem:[%s10795_s10 + $0x1440] sm:$0xff]  ;;  %v2462_v45 = vld [vmem:[%s10795_s10 + $0x1448] sm:$0xff]  ;;  %v8300_v47 = vcombine.low %v2390_v36, %v2414_v37  ;;  %v8313_v34 = vcombine.high %v1959_v28, %v1983_v29  ;;  %v2007_v36 = vld [vmem:[%s10795_s10 + $0x610] sm:$0xff] }
 0x1be   : > { %v8269_v48 = vcombine.high %v2437_v42, %v2461_v43  ;;  %v8301_v49 = vcombine.high %v2438_v44, %v2462_v45  ;;  %v2485_v50 = vld [vmem:[%s10795_s10 + $0x1500] sm:$0xff]  ;;  %v2486_v52 = vld [vmem:[%s10795_s10 + $0x1508] sm:$0xff]  ;;  %v8270_v54 = vcombine.low %v2437_v42, %v2461_v43  ;;  %v8302_v55 = vcombine.low %v2438_v44, %v2462_v45  ;;  %v2031_v37 = vld [vmem:[%s10795_s10 + $0x6d0] sm:$0xff] }
 0x1bf   : > { %6734 = vmatpush1.bf16.msra.mxu0 %v8256_v60  ;;  %6798 = vmatpush1.bf16.msra.mxu1 %v8288_v61  ;;  %v2509_v51 = vld [vmem:[%s10795_s10 + $0x15c0] sm:$0xff]  ;;  %v2510_v53 = vld [vmem:[%s10795_s10 + $0x15c8] sm:$0xff]  ;;  %v8315_v42 = vcombine.high %v2007_v36, %v2031_v37  ;;  %v2055_v44 = vld [vmem:[%s10795_s10 + $0x790] sm:$0xff] }
 0x1c0   : > { %6736 = vmatprep.subr.bf16.mxu0 %v8257_v62  ;;  %6800 = vmatprep.subr.bf16.mxu1 %v8289_v63  ;;  %v8271_v56 = vcombine.high %v2485_v50, %v2509_v51  ;;  %v8303_v57 = vcombine.high %v2486_v52, %v2510_v53  ;;  %v2533_v58 = vld [vmem:[%s10795_s10 + $0x1680] sm:$0xff]  ;;  %v2534_v60 = vld [vmem:[%s10795_s10 + $0x1688] sm:$0xff]  ;;  %v8272_v62 = vcombine.low %v2485_v50, %v2509_v51  ;;  %v2079_v45 = vld [vmem:[%s10795_s10 + $0x850] sm:$0xff] }
 0x1c1   : > { %v2557_v59 = vld [vmem:[%s10795_s10 + $0x1740] sm:$0xff]  ;;  %v2558_v61 = vld [vmem:[%s10795_s10 + $0x1748] sm:$0xff]  ;;  %v8304_v63 = vcombine.low %v2486_v52, %v2510_v53  ;;  %v8317_v50 = vcombine.high %v2055_v44, %v2079_v45  ;;  %v2103_v52 = vld [vmem:[%s10795_s10 + $0x910] sm:$0xff] }
 0x1c2   : > { %v8273_v2 = vcombine.high %v2533_v58, %v2557_v59  ;;  %v8305_v3 = vcombine.high %v2534_v60, %v2558_v61  ;;  %v2127_v53 = vld [vmem:[%s10795_s10 + $0x9d0] sm:$0xff] }
 0x1c3   : > { %6738 = vmatpush1.bf16.msra.mxu0 %v8258_v6  ;;  %6802 = vmatpush1.bf16.msra.mxu1 %v8290_v7  ;;  %v1816_v6 = vld [vmem:[%s10795_s10 + $0x18] sm:$0xff] }
 0x1c4   : > { %6740 = vmatprep.subr.bf16.mxu0 %v8259_v8  ;;  %6804 = vmatprep.subr.bf16.mxu1 %v8291_v9  ;;  %v1840_v7 = vld [vmem:[%s10795_s10 + $0xd8] sm:$0xff]  ;;  %v8274_v8 = vcombine.low %v2533_v58, %v2557_v59  ;;  %v8306_v9 = vcombine.low %v2534_v60, %v2558_v61  ;;  %v8319_v58 = vcombine.high %v2103_v52, %v2127_v53  ;;  %v2151_v60 = vld [vmem:[%s10795_s10 + $0xa90] sm:$0xff] }
 0x1c5   : > { %v8339_v11 = vcombine.high %v1816_v6, %v1840_v7  ;;  %v2175_v61 = vld [vmem:[%s10795_s10 + $0xb50] sm:$0xff] }
 0x1c7   : > { %6742 = vmatpush1.bf16.msra.mxu0 %v8260_v14  ;;  %6806 = vmatpush1.bf16.msra.mxu1 %v8292_v15  ;;  %v1864_v14 = vld [vmem:[%s10795_s10 + $0x198] sm:$0xff] }
 0x1c8   : > { %6744 = vmatprep.subr.bf16.mxu0 %v8261_v16  ;;  %6808 = vmatprep.subr.bf16.mxu1 %v8293_v17  ;;  %v1888_v15 = vld [vmem:[%s10795_s10 + $0x258] sm:$0xff]  ;;  %v8308_v16 = vcombine.low %v1815_v4, %v1839_v5  ;;  %v8340_v17 = vcombine.low %v1816_v6, %v1840_v7  ;;  %v8321_v4 = vcombine.high %v2151_v60, %v2175_v61  ;;  %v2199_v6 = vld [vmem:[%s10795_s10 + $0xc10] sm:$0xff] }
 0x1c9   : > { %v8341_v19 = vcombine.high %v1864_v14, %v1888_v15  ;;  %v2223_v7 = vld [vmem:[%s10795_s10 + $0xcd0] sm:$0xff] }
 0x1cb   : > { %6746 = vmatpush1.bf16.msra.mxu0 %v8262_v22  ;;  %6810 = vmatpush1.bf16.msra.mxu1 %v8294_v23  ;;  %v1912_v22 = vld [vmem:[%s10795_s10 + $0x318] sm:$0xff] }
 0x1cc   : > { %6748 = vmatprep.subr.bf16.mxu0 %v8263_v24  ;;  %6812 = vmatprep.subr.bf16.mxu1 %v8295_v25  ;;  %v1936_v23 = vld [vmem:[%s10795_s10 + $0x3d8] sm:$0xff]  ;;  %v8310_v24 = vcombine.low %v1863_v12, %v1887_v13  ;;  %v8342_v25 = vcombine.low %v1864_v14, %v1888_v15  ;;  %v8323_v12 = vcombine.high %v2199_v6, %v2223_v7  ;;  %v2247_v14 = vld [vmem:[%s10795_s10 + $0xd90] sm:$0xff] }
 0x1cd   : > { %v8343_v27 = vcombine.high %v1912_v22, %v1936_v23  ;;  %v2271_v15 = vld [vmem:[%s10795_s10 + $0xe50] sm:$0xff] }
 0x1cf   : > { %6750 = vmatpush1.bf16.msra.mxu0 %v8264_v30  ;;  %6814 = vmatpush1.bf16.msra.mxu1 %v8296_v31  ;;  %v1960_v30 = vld [vmem:[%s10795_s10 + $0x498] sm:$0xff] }
 0x1d0   : > { %6752 = vmatprep.subr.bf16.mxu0 %v8265_v32  ;;  %6816 = vmatprep.subr.bf16.mxu1 %v8297_v33  ;;  %v1984_v31 = vld [vmem:[%s10795_s10 + $0x558] sm:$0xff]  ;;  %v8312_v32 = vcombine.low %v1911_v20, %v1935_v21  ;;  %v8344_v33 = vcombine.low %v1912_v22, %v1936_v23  ;;  %v8325_v20 = vcombine.high %v2247_v14, %v2271_v15  ;;  %v2295_v22 = vld [vmem:[%s10795_s10 + $0xf10] sm:$0xff] }
 0x1d1   : > { %v8345_v35 = vcombine.high %v1960_v30, %v1984_v31  ;;  %v2319_v23 = vld [vmem:[%s10795_s10 + $0xfd0] sm:$0xff] }
 0x1d3   : > { %6754 = vmatpush1.bf16.msra.mxu0 %v8266_v38  ;;  %6818 = vmatpush1.bf16.msra.mxu1 %v8298_v39  ;;  %v2008_v38 = vld [vmem:[%s10795_s10 + $0x618] sm:$0xff] }
 0x1d4   : > { %6756 = vmatprep.subr.bf16.mxu0 %v8267_v40  ;;  %6820 = vmatprep.subr.bf16.mxu1 %v8299_v41  ;;  %v2032_v39 = vld [vmem:[%s10795_s10 + $0x6d8] sm:$0xff]  ;;  %v8314_v40 = vcombine.low %v1959_v28, %v1983_v29  ;;  %v8346_v41 = vcombine.low %v1960_v30, %v1984_v31  ;;  %v8327_v28 = vcombine.high %v2295_v22, %v2319_v23  ;;  %v2343_v30 = vld [vmem:[%s10795_s10 + $0x1090] sm:$0xff] }
 0x1d5   : > { %v8347_v43 = vcombine.high %v2008_v38, %v2032_v39  ;;  %v2367_v31 = vld [vmem:[%s10795_s10 + $0x1150] sm:$0xff] }
 0x1d7   : > { %6758 = vmatpush1.bf16.msra.mxu0 %v8268_v46  ;;  %6822 = vmatpush1.bf16.msra.mxu1 %v8300_v47  ;;  %v2056_v46 = vld [vmem:[%s10795_s10 + $0x798] sm:$0xff] }
 0x1d8   : > { %6760 = vmatprep.subr.bf16.mxu0 %v8269_v48  ;;  %6824 = vmatprep.subr.bf16.mxu1 %v8301_v49  ;;  %v2080_v47 = vld [vmem:[%s10795_s10 + $0x858] sm:$0xff]  ;;  %v8316_v48 = vcombine.low %v2007_v36, %v2031_v37  ;;  %v8348_v49 = vcombine.low %v2008_v38, %v2032_v39  ;;  %v8329_v36 = vcombine.high %v2343_v30, %v2367_v31  ;;  %v2391_v38 = vld [vmem:[%s10795_s10 + $0x1210] sm:$0xff] }
 0x1d9   : > { %v8349_v51 = vcombine.high %v2056_v46, %v2080_v47  ;;  %v2415_v39 = vld [vmem:[%s10795_s10 + $0x12d0] sm:$0xff] }
 0x1db   : > { %6762 = vmatpush1.bf16.msra.mxu0 %v8270_v54  ;;  %6826 = vmatpush1.bf16.msra.mxu1 %v8302_v55  ;;  %v2104_v54 = vld [vmem:[%s10795_s10 + $0x918] sm:$0xff] }
 0x1dc   : > { %6764 = vmatprep.subr.bf16.mxu0 %v8271_v56  ;;  %6828 = vmatprep.subr.bf16.mxu1 %v8303_v57  ;;  %v2128_v55 = vld [vmem:[%s10795_s10 + $0x9d8] sm:$0xff]  ;;  %v8318_v56 = vcombine.low %v2055_v44, %v2079_v45  ;;  %v8350_v57 = vcombine.low %v2056_v46, %v2080_v47  ;;  %v8331_v44 = vcombine.high %v2391_v38, %v2415_v39  ;;  %v2439_v46 = vld [vmem:[%s10795_s10 + $0x1390] sm:$0xff] }
 0x1dd   : > { %v8351_v59 = vcombine.high %v2104_v54, %v2128_v55  ;;  %v2463_v47 = vld [vmem:[%s10795_s10 + $0x1450] sm:$0xff] }
 0x1df   : > { %6766 = vmatpush1.bf16.msra.mxu0 %v8272_v62  ;;  %6830 = vmatpush1.bf16.msra.mxu1 %v8304_v63  ;;  %v2152_v62 = vld [vmem:[%s10795_s10 + $0xa98] sm:$0xff] }
 0x1e0   : > { %6768 = vmatprep.subr.bf16.mxu0 %v8273_v2  ;;  %6832 = vmatprep.subr.bf16.mxu1 %v8305_v3  ;;  %v2176_v63 = vld [vmem:[%s10795_s10 + $0xb58] sm:$0xff]  ;;  %v8320_v2 = vcombine.low %v2103_v52, %v2127_v53  ;;  %v8352_v3 = vcombine.low %v2104_v54, %v2128_v55  ;;  %v8333_v52 = vcombine.high %v2439_v46, %v2463_v47  ;;  %v2487_v54 = vld [vmem:[%s10795_s10 + $0x1510] sm:$0xff] }
 0x1e1   : > { %v8353_v5 = vcombine.high %v2152_v62, %v2176_v63  ;;  %v2511_v55 = vld [vmem:[%s10795_s10 + $0x15d0] sm:$0xff] }
 0x1e3   : > { %6770 = vmatpush1.bf16.msra.mxu0 %v8274_v8  ;;  %6834 = vmatpush1.bf16.msra.mxu1 %v8306_v9  ;;  %v2200_v8 = vld [vmem:[%s10795_s10 + $0xc18] sm:$0xff] }
 0x1e4   : > { %6836 = vmatprep.subr.bf16.mxu0 %v8307_v10  ;;  %6900 = vmatprep.subr.bf16.mxu1 %v8339_v11  ;;  %v2224_v9 = vld [vmem:[%s10795_s10 + $0xcd8] sm:$0xff]  ;;  %v8322_v10 = vcombine.low %v2151_v60, %v2175_v61  ;;  %v8354_v11 = vcombine.low %v2152_v62, %v2176_v63  ;;  %v8335_v60 = vcombine.high %v2487_v54, %v2511_v55  ;;  %v2535_v62 = vld [vmem:[%s10795_s10 + $0x1690] sm:$0xff] }
 0x1e5   : > { %v8355_v13 = vcombine.high %v2200_v8, %v2224_v9  ;;  %v2559_v63 = vld [vmem:[%s10795_s10 + $0x1750] sm:$0xff] }
 0x1e6   : > { %4193 = vmatmul.mubr.f32.vlgmr.msra.gmra.mrb[0].mxu0 %v10786_v0  ;;  %4264 = vmatmul.mubr.f32.vlgmr.msra.gmra.mrb[0].mxu1 %v10786_v0 }
 0x1e7   : > { %6838 = vmatpush1.bf16.msra.mxu0 %v8308_v16  ;;  %6902 = vmatpush1.bf16.msra.mxu1 %v8340_v17  ;;  %v2248_v16 = vld [vmem:[%s10795_s10 + $0xd98] sm:$0xff] }
 0x1e8   : > { %6840 = vmatprep.subr.bf16.mxu0 %v8309_v18  ;;  %6904 = vmatprep.subr.bf16.mxu1 %v8341_v19  ;;  %v2272_v17 = vld [vmem:[%s10795_s10 + $0xe58] sm:$0xff]  ;;  %v8324_v18 = vcombine.low %v2199_v6, %v2223_v7  ;;  %v8356_v19 = vcombine.low %v2200_v8, %v2224_v9  ;;  %v8337_v6 = vcombine.high %v2535_v62, %v2559_v63  ;;  %v1817_v8 = vld [vmem:[%s10795_s10 + $0x20] sm:$0xff] }
 0x1e9   : > { %4334 = vmatprep.mubr.f32.mxu0 %v10791_v1  ;;  %4405 = vmatprep.mubr.f32.mxu1 %v10791_v1  ;;  %v8357_v21 = vcombine.high %v2248_v16, %v2272_v17  ;;  %v1841_v9 = vld [vmem:[%s10795_s10 + $0xe0] sm:$0xff] }
 0x1eb   : > { %6842 = vmatpush1.bf16.msra.mxu0 %v8310_v24  ;;  %6906 = vmatpush1.bf16.msra.mxu1 %v8342_v25  ;;  %v2296_v24 = vld [vmem:[%s10795_s10 + $0xf18] sm:$0xff] }
 0x1ec   : > { %6844 = vmatprep.subr.bf16.mxu0 %v8311_v26  ;;  %6908 = vmatprep.subr.bf16.mxu1 %v8343_v27  ;;  %v2320_v25 = vld [vmem:[%s10795_s10 + $0xfd8] sm:$0xff]  ;;  %v8326_v26 = vcombine.low %v2247_v14, %v2271_v15  ;;  %v8358_v27 = vcombine.low %v2248_v16, %v2272_v17  ;;  %v8371_v14 = vcombine.high %v1817_v8, %v1841_v9  ;;  %v1865_v16 = vld [vmem:[%s10795_s10 + $0x1a0] sm:$0xff] }
 0x1ed   : > { %v8359_v29 = vcombine.high %v2296_v24, %v2320_v25  ;;  %v1889_v17 = vld [vmem:[%s10795_s10 + $0x260] sm:$0xff] }
 0x1ef   : > { %6846 = vmatpush1.bf16.msra.mxu0 %v8312_v32  ;;  %6910 = vmatpush1.bf16.msra.mxu1 %v8344_v33  ;;  %v2344_v32 = vld [vmem:[%s10795_s10 + $0x1098] sm:$0xff] }
 0x1f0   : > { %6848 = vmatprep.subr.bf16.mxu0 %v8313_v34  ;;  %6912 = vmatprep.subr.bf16.mxu1 %v8345_v35  ;;  %v2368_v33 = vld [vmem:[%s10795_s10 + $0x1158] sm:$0xff]  ;;  %v8328_v34 = vcombine.low %v2295_v22, %v2319_v23  ;;  %v8360_v35 = vcombine.low %v2296_v24, %v2320_v25  ;;  %v8373_v22 = vcombine.high %v1865_v16, %v1889_v17  ;;  %v1913_v24 = vld [vmem:[%s10795_s10 + $0x320] sm:$0xff] }
 0x1f1   : > { %v8361_v37 = vcombine.high %v2344_v32, %v2368_v33  ;;  %v1937_v25 = vld [vmem:[%s10795_s10 + $0x3e0] sm:$0xff] }
 0x1f3   : > { %6850 = vmatpush1.bf16.msra.mxu0 %v8314_v40  ;;  %6914 = vmatpush1.bf16.msra.mxu1 %v8346_v41  ;;  %v2392_v40 = vld [vmem:[%s10795_s10 + $0x1218] sm:$0xff] }
 0x1f4   : > { %6852 = vmatprep.subr.bf16.mxu0 %v8315_v42  ;;  %6916 = vmatprep.subr.bf16.mxu1 %v8347_v43  ;;  %v2416_v41 = vld [vmem:[%s10795_s10 + $0x12d8] sm:$0xff]  ;;  %v8330_v42 = vcombine.low %v2343_v30, %v2367_v31  ;;  %v8362_v43 = vcombine.low %v2344_v32, %v2368_v33  ;;  %v8375_v30 = vcombine.high %v1913_v24, %v1937_v25  ;;  %v1961_v32 = vld [vmem:[%s10795_s10 + $0x4a0] sm:$0xff] }
 0x1f5   : > { %v8363_v45 = vcombine.high %v2392_v40, %v2416_v41  ;;  %v1985_v33 = vld [vmem:[%s10795_s10 + $0x560] sm:$0xff] }
 0x1f7   : > { %6854 = vmatpush1.bf16.msra.mxu0 %v8316_v48  ;;  %6918 = vmatpush1.bf16.msra.mxu1 %v8348_v49  ;;  %v2440_v48 = vld [vmem:[%s10795_s10 + $0x1398] sm:$0xff] }
 0x1f8   : > { %6856 = vmatprep.subr.bf16.mxu0 %v8317_v50  ;;  %6920 = vmatprep.subr.bf16.mxu1 %v8349_v51  ;;  %v2464_v49 = vld [vmem:[%s10795_s10 + $0x1458] sm:$0xff]  ;;  %v8332_v50 = vcombine.low %v2391_v38, %v2415_v39  ;;  %v8364_v51 = vcombine.low %v2392_v40, %v2416_v41  ;;  %v2009_v39 = vld [vmem:[%s10795_s10 + $0x620] sm:$0xff]  ;;  %v2010_v41 = vld [vmem:[%s10795_s10 + $0x628] sm:$0xff] }
 0x1f9   : > { %v8365_v53 = vcombine.high %v2440_v48, %v2464_v49  ;;  %v2033_v40 = vld [vmem:[%s10795_s10 + $0x6e0] sm:$0xff] }
 0x1fb   : > { %6858 = vmatpush1.bf16.msra.mxu0 %v8318_v56  ;;  %6922 = vmatpush1.bf16.msra.mxu1 %v8350_v57  ;;  %v2488_v56 = vld [vmem:[%s10795_s10 + $0x1518] sm:$0xff] }
 0x1fc   : > { %6860 = vmatprep.subr.bf16.mxu0 %v8319_v58  ;;  %6924 = vmatprep.subr.bf16.mxu1 %v8351_v59  ;;  %v2512_v57 = vld [vmem:[%s10795_s10 + $0x15d8] sm:$0xff]  ;;  %v8334_v58 = vcombine.low %v2439_v46, %v2463_v47  ;;  %v8366_v59 = vcombine.low %v2440_v48, %v2464_v49  ;;  %v2057_v47 = vld [vmem:[%s10795_s10 + $0x7a0] sm:$0xff]  ;;  %v2058_v49 = vld [vmem:[%s10795_s10 + $0x7a8] sm:$0xff] }
 0x1fd   : > { %v8367_v61 = vcombine.high %v2488_v56, %v2512_v57  ;;  %v2081_v48 = vld [vmem:[%s10795_s10 + $0x860] sm:$0xff] }
 0x1ff   : > { %6862 = vmatpush1.bf16.msra.mxu0 %v8320_v2  ;;  %6926 = vmatpush1.bf16.msra.mxu1 %v8352_v3  ;;  %v2536_v2 = vld [vmem:[%s10795_s10 + $0x1698] sm:$0xff] }
 0x200   : > { %6864 = vmatprep.subr.bf16.mxu0 %v8321_v4  ;;  %6928 = vmatprep.subr.bf16.mxu1 %v8353_v5  ;;  %v2560_v3 = vld [vmem:[%s10795_s10 + $0x1758] sm:$0xff]  ;;  %v8336_v4 = vcombine.low %v2487_v54, %v2511_v55  ;;  %v8368_v5 = vcombine.low %v2488_v56, %v2512_v57  ;;  %v2105_v55 = vld [vmem:[%s10795_s10 + $0x920] sm:$0xff]  ;;  %v2106_v57 = vld [vmem:[%s10795_s10 + $0x928] sm:$0xff] }
 0x201   : > { %v8369_v7 = vcombine.high %v2536_v2, %v2560_v3  ;;  %v2129_v56 = vld [vmem:[%s10795_s10 + $0x9e0] sm:$0xff] }
 0x203   : > { %6866 = vmatpush1.bf16.msra.mxu0 %v8322_v10  ;;  %6930 = vmatpush1.bf16.msra.mxu1 %v8354_v11  ;;  %v1818_v10 = vld [vmem:[%s10795_s10 + $0x28] sm:$0xff] }
 0x204   : > { %6868 = vmatprep.subr.bf16.mxu0 %v8323_v12  ;;  %6932 = vmatprep.subr.bf16.mxu1 %v8355_v13  ;;  %v1842_v11 = vld [vmem:[%s10795_s10 + $0xe8] sm:$0xff]  ;;  %v8338_v12 = vcombine.low %v2535_v62, %v2559_v63  ;;  %v8370_v13 = vcombine.low %v2536_v2, %v2560_v3  ;;  %v2153_v63 = vld [vmem:[%s10795_s10 + $0xaa0] sm:$0xff] }
 0x205   : > { %v8403_v15 = vcombine.high %v1818_v10, %v1842_v11  ;;  %v2177_v2 = vld [vmem:[%s10795_s10 + $0xb60] sm:$0xff]  ;;  %v2154_v3 = vld [vmem:[%s10795_s10 + $0xaa8] sm:$0xff] }
 0x207   : > { %6870 = vmatpush1.bf16.msra.mxu0 %v8324_v18  ;;  %6934 = vmatpush1.bf16.msra.mxu1 %v8356_v19  ;;  %v1866_v18 = vld [vmem:[%s10795_s10 + $0x1a8] sm:$0xff] }
 0x208   : > { %6872 = vmatprep.subr.bf16.mxu0 %v8325_v20  ;;  %6936 = vmatprep.subr.bf16.mxu1 %v8357_v21  ;;  %v1890_v19 = vld [vmem:[%s10795_s10 + $0x268] sm:$0xff]  ;;  %v8372_v20 = vcombine.low %v1817_v8, %v1841_v9  ;;  %v8404_v21 = vcombine.low %v1818_v10, %v1842_v11  ;;  %v2201_v9 = vld [vmem:[%s10795_s10 + $0xc20] sm:$0xff] }
 0x209   : > { %v8405_v23 = vcombine.high %v1866_v18, %v1890_v19  ;;  %v2225_v10 = vld [vmem:[%s10795_s10 + $0xce0] sm:$0xff]  ;;  %v2202_v11 = vld [vmem:[%s10795_s10 + $0xc28] sm:$0xff] }
 0x20b   : > { %6874 = vmatpush1.bf16.msra.mxu0 %v8326_v26  ;;  %6938 = vmatpush1.bf16.msra.mxu1 %v8358_v27  ;;  %v1914_v26 = vld [vmem:[%s10795_s10 + $0x328] sm:$0xff] }
 0x20c   : > { %6876 = vmatprep.subr.bf16.mxu0 %v8327_v28  ;;  %6940 = vmatprep.subr.bf16.mxu1 %v8359_v29  ;;  %v1938_v27 = vld [vmem:[%s10795_s10 + $0x3e8] sm:$0xff]  ;;  %v8374_v28 = vcombine.low %v1865_v16, %v1889_v17  ;;  %v8406_v29 = vcombine.low %v1866_v18, %v1890_v19  ;;  %v2249_v17 = vld [vmem:[%s10795_s10 + $0xda0] sm:$0xff] }
 0x20d   : > { %v8407_v31 = vcombine.high %v1914_v26, %v1938_v27  ;;  %v2273_v18 = vld [vmem:[%s10795_s10 + $0xe60] sm:$0xff]  ;;  %v2250_v19 = vld [vmem:[%s10795_s10 + $0xda8] sm:$0xff] }
 0x20f   : > { %6878 = vmatpush1.bf16.msra.mxu0 %v8328_v34  ;;  %6942 = vmatpush1.bf16.msra.mxu1 %v8360_v35  ;;  %v1962_v34 = vld [vmem:[%s10795_s10 + $0x4a8] sm:$0xff] }
 0x210   : > { %6880 = vmatprep.subr.bf16.mxu0 %v8329_v36  ;;  %6944 = vmatprep.subr.bf16.mxu1 %v8361_v37  ;;  %v1986_v35 = vld [vmem:[%s10795_s10 + $0x568] sm:$0xff]  ;;  %v8408_v36 = vcombine.low %v1914_v26, %v1938_v27  ;;  %v8377_v37 = vcombine.high %v1961_v32, %v1985_v33  ;;  %v2321_v26 = vld [vmem:[%s10795_s10 + $0xfe0] sm:$0xff] }
 0x211   : > { %v8409_v38 = vcombine.high %v1962_v34, %v1986_v35  ;;  %v2298_v27 = vld [vmem:[%s10795_s10 + $0xf28] sm:$0xff] }
 0x213   : > { %6882 = vmatpush1.bf16.msra.mxu0 %v8330_v42  ;;  %6946 = vmatpush1.bf16.msra.mxu1 %v8362_v43  ;;  %v2034_v42 = vld [vmem:[%s10795_s10 + $0x6e8] sm:$0xff]  ;;  %v8378_v43 = vcombine.low %v1961_v32, %v1985_v33  ;;  %v2345_v33 = vld [vmem:[%s10795_s10 + $0x10a0] sm:$0xff] }
 0x214   : > { %6884 = vmatprep.subr.bf16.mxu0 %v8331_v44  ;;  %6948 = vmatprep.subr.bf16.mxu1 %v8363_v45  ;;  %v8410_v44 = vcombine.low %v1962_v34, %v1986_v35  ;;  %v8379_v45 = vcombine.high %v2009_v39, %v2033_v40  ;;  %v8411_v46 = vcombine.high %v2010_v41, %v2034_v42  ;;  %v2369_v34 = vld [vmem:[%s10795_s10 + $0x1160] sm:$0xff]  ;;  %v2346_v35 = vld [vmem:[%s10795_s10 + $0x10a8] sm:$0xff] }
 0x217   : > { %6886 = vmatpush1.bf16.msra.mxu0 %v8332_v50  ;;  %6950 = vmatpush1.bf16.msra.mxu1 %v8364_v51  ;;  %v2082_v50 = vld [vmem:[%s10795_s10 + $0x868] sm:$0xff]  ;;  %v8380_v51 = vcombine.low %v2009_v39, %v2033_v40  ;;  %v2393_v40 = vld [vmem:[%s10795_s10 + $0x1220] sm:$0xff] }
 0x218   : > { %6888 = vmatprep.subr.bf16.mxu0 %v8333_v52  ;;  %6952 = vmatprep.subr.bf16.mxu1 %v8365_v53  ;;  %v8412_v52 = vcombine.low %v2010_v41, %v2034_v42  ;;  %v8381_v53 = vcombine.high %v2057_v47, %v2081_v48  ;;  %v8413_v54 = vcombine.high %v2058_v49, %v2082_v50  ;;  %v2417_v41 = vld [vmem:[%s10795_s10 + $0x12e0] sm:$0xff]  ;;  %v2394_v42 = vld [vmem:[%s10795_s10 + $0x1228] sm:$0xff] }
 0x21b   : > { %6890 = vmatpush1.bf16.msra.mxu0 %v8334_v58  ;;  %6954 = vmatpush1.bf16.msra.mxu1 %v8366_v59  ;;  %v2130_v58 = vld [vmem:[%s10795_s10 + $0x9e8] sm:$0xff]  ;;  %v8382_v59 = vcombine.low %v2057_v47, %v2081_v48  ;;  %v2441_v48 = vld [vmem:[%s10795_s10 + $0x13a0] sm:$0xff] }
 0x21c   : > { %6892 = vmatprep.subr.bf16.mxu0 %v8335_v60  ;;  %6956 = vmatprep.subr.bf16.mxu1 %v8367_v61  ;;  %v8414_v60 = vcombine.low %v2058_v49, %v2082_v50  ;;  %v8383_v61 = vcombine.high %v2105_v55, %v2129_v56  ;;  %v8415_v62 = vcombine.high %v2106_v57, %v2130_v58  ;;  %v2465_v49 = vld [vmem:[%s10795_s10 + $0x1460] sm:$0xff]  ;;  %v2442_v50 = vld [vmem:[%s10795_s10 + $0x13a8] sm:$0xff] }
 0x21f   : > { %6894 = vmatpush1.bf16.msra.mxu0 %v8336_v4  ;;  %6958 = vmatpush1.bf16.msra.mxu1 %v8368_v5  ;;  %v2178_v4 = vld [vmem:[%s10795_s10 + $0xb68] sm:$0xff]  ;;  %v8384_v5 = vcombine.low %v2105_v55, %v2129_v56  ;;  %v2489_v56 = vld [vmem:[%s10795_s10 + $0x1520] sm:$0xff] }
 0x220   : > { %6896 = vmatprep.subr.bf16.mxu0 %v8337_v6  ;;  %6960 = vmatprep.subr.bf16.mxu1 %v8369_v7  ;;  %v8416_v6 = vcombine.low %v2106_v57, %v2130_v58  ;;  %v8385_v7 = vcombine.high %v2153_v63, %v2177_v2  ;;  %v8417_v8 = vcombine.high %v2154_v3, %v2178_v4  ;;  %v2513_v57 = vld [vmem:[%s10795_s10 + $0x15e0] sm:$0xff]  ;;  %v2490_v58 = vld [vmem:[%s10795_s10 + $0x1528] sm:$0xff] }
 0x223   : > { %6898 = vmatpush1.bf16.msra.mxu0 %v8338_v12  ;;  %6962 = vmatpush1.bf16.msra.mxu1 %v8370_v13  ;;  %v2226_v12 = vld [vmem:[%s10795_s10 + $0xce8] sm:$0xff]  ;;  %v8386_v13 = vcombine.low %v2153_v63, %v2177_v2  ;;  %v2537_v2 = vld [vmem:[%s10795_s10 + $0x16a0] sm:$0xff] }
 0x224   : > { %6964 = vmatprep.subr.bf16.mxu0 %v8371_v14  ;;  %7028 = vmatprep.subr.bf16.mxu1 %v8403_v15  ;;  %v8418_v14 = vcombine.low %v2154_v3, %v2178_v4  ;;  %v8387_v15 = vcombine.high %v2201_v9, %v2225_v10  ;;  %v8419_v16 = vcombine.high %v2202_v11, %v2226_v12  ;;  %v2561_v3 = vld [vmem:[%s10795_s10 + $0x1760] sm:$0xff]  ;;  %v2538_v4 = vld [vmem:[%s10795_s10 + $0x16a8] sm:$0xff] }
 0x226   : > { %4335 = vmatmul.mubr.f32.vlgmr.msra.gmra.mrb[2].mxu0 %v10786_v0  ;;  %4406 = vmatmul.mubr.f32.vlgmr.msra.gmra.mrb[2].mxu1 %v10786_v0  ;;  %v8376_v0 = vcombine.low %v1913_v24, %v1937_v25  ;;  %v2297_v25 = vld [vmem:[%s10795_s10 + $0xf20] sm:$0xff] }
 0x227   : > { %6966 = vmatpush1.bf16.msra.mxu0 %v8372_v20  ;;  %7030 = vmatpush1.bf16.msra.mxu1 %v8404_v21  ;;  %v2274_v20 = vld [vmem:[%s10795_s10 + $0xe68] sm:$0xff]  ;;  %v8388_v21 = vcombine.low %v2201_v9, %v2225_v10  ;;  %v1819_v10 = vld [vmem:[%s10795_s10 + $0x30] sm:$0xff] }
 0x228   : > { %6968 = vmatprep.subr.bf16.mxu0 %v8373_v22  ;;  %7032 = vmatprep.subr.bf16.mxu1 %v8405_v23  ;;  %v8420_v22 = vcombine.low %v2202_v11, %v2226_v12  ;;  %v8389_v23 = vcombine.high %v2249_v17, %v2273_v18  ;;  %v8421_v24 = vcombine.high %v2250_v19, %v2274_v20  ;;  %v1843_v11 = vld [vmem:[%s10795_s10 + $0xf0] sm:$0xff]  ;;  %v1820_v12 = vld [vmem:[%s10795_s10 + $0x38] sm:$0xff] }
 0x229   : > { %4476 = vmatprep.mubr.f32.mxu0 %v10791_v1  ;;  %4547 = vmatprep.mubr.f32.mxu1 %v10791_v1 }
 0x22b   : > { %6970 = vmatpush1.bf16.msra.mxu0 %v8374_v28  ;;  %7034 = vmatpush1.bf16.msra.mxu1 %v8406_v29  ;;  %v2322_v28 = vld [vmem:[%s10795_s10 + $0xfe8] sm:$0xff]  ;;  %v8390_v29 = vcombine.low %v2249_v17, %v2273_v18  ;;  %v1867_v18 = vld [vmem:[%s10795_s10 + $0x1b0] sm:$0xff] }
 0x22c   : > { %6972 = vmatprep.subr.bf16.mxu0 %v8375_v30  ;;  %7036 = vmatprep.subr.bf16.mxu1 %v8407_v31  ;;  %v8422_v30 = vcombine.low %v2250_v19, %v2274_v20  ;;  %v8391_v31 = vcombine.high %v2297_v25, %v2321_v26  ;;  %v8423_v32 = vcombine.high %v2298_v27, %v2322_v28  ;;  %v1891_v19 = vld [vmem:[%s10795_s10 + $0x270] sm:$0xff]  ;;  %v1868_v20 = vld [vmem:[%s10795_s10 + $0x1b8] sm:$0xff] }
 0x22f   : > { %6974 = vmatpush1.bf16.msra.mxu0 %v8376_v0  ;;  %7038 = vmatpush1.bf16.msra.mxu1 %v8408_v36  ;;  %v2370_v0 = vld [vmem:[%s10795_s10 + $0x1168] sm:$0xff]  ;;  %v8392_v36 = vcombine.low %v2297_v25, %v2321_v26  ;;  %v1915_v26 = vld [vmem:[%s10795_s10 + $0x330] sm:$0xff] }
 0x230   : > { %6976 = vmatprep.subr.bf16.mxu0 %v8377_v37  ;;  %7040 = vmatprep.subr.bf16.mxu1 %v8409_v38  ;;  %v8424_v37 = vcombine.low %v2298_v27, %v2322_v28  ;;  %v8393_v38 = vcombine.high %v2345_v33, %v2369_v34  ;;  %v8425_v39 = vcombine.high %v2346_v35, %v2370_v0  ;;  %v1939_v27 = vld [vmem:[%s10795_s10 + $0x3f0] sm:$0xff]  ;;  %v11010_v28 = vld.sshfl [vmem:[%s11879_s0] sm:$0x33 pattern:$0x76325410] }
 0x233   : > { %6978 = vmatpush1.bf16.msra.mxu0 %v8378_v43  ;;  %7042 = vmatpush1.bf16.msra.mxu1 %v8410_v44  ;;  %v2418_v43 = vld [vmem:[%s10795_s10 + $0x12e8] sm:$0xff]  ;;  %v8394_v44 = vcombine.low %v2345_v33, %v2369_v34  ;;  %v8439_v33 = vcombine.high %v1915_v26, %v1939_v27 }
 0x234   : > { %6980 = vmatprep.subr.bf16.mxu0 %v8379_v45  ;;  %7044 = vmatprep.subr.bf16.mxu1 %v8411_v46  ;;  %v8426_v45 = vcombine.low %v2346_v35, %v2370_v0  ;;  %v8395_v46 = vcombine.high %v2393_v40, %v2417_v41  ;;  %v8427_v47 = vcombine.high %v2394_v42, %v2418_v43  ;;  %v1963_v35 = vld [vmem:[%s10795_s10 + $0x4b0] sm:$0xff] }
 0x235   : > { %v1987_v0 = vld [vmem:[%s10795_s10 + $0x570] sm:$0xff] }
 0x237   : > { %6982 = vmatpush1.bf16.msra.mxu0 %v8380_v51  ;;  %7046 = vmatpush1.bf16.msra.mxu1 %v8412_v52  ;;  %v2466_v51 = vld [vmem:[%s10795_s10 + $0x1468] sm:$0xff]  ;;  %v8396_v52 = vcombine.low %v2393_v40, %v2417_v41  ;;  %v8441_v40 = vcombine.high %v1963_v35, %v1987_v0 }
 0x238   : > { %6984 = vmatprep.subr.bf16.mxu0 %v8381_v53  ;;  %7048 = vmatprep.subr.bf16.mxu1 %v8413_v54  ;;  %v8428_v53 = vcombine.low %v2394_v42, %v2418_v43  ;;  %v8397_v54 = vcombine.high %v2441_v48, %v2465_v49  ;;  %v8429_v55 = vcombine.high %v2442_v50, %v2466_v51  ;;  %v2011_v42 = vld [vmem:[%s10795_s10 + $0x630] sm:$0xff] }
 0x239   : > { %v2035_v43 = vld [vmem:[%s10795_s10 + $0x6f0] sm:$0xff] }
 0x23b   : > { %6986 = vmatpush1.bf16.msra.mxu0 %v8382_v59  ;;  %7050 = vmatpush1.bf16.msra.mxu1 %v8414_v60  ;;  %v2514_v59 = vld [vmem:[%s10795_s10 + $0x15e8] sm:$0xff]  ;;  %v8398_v60 = vcombine.low %v2441_v48, %v2465_v49  ;;  %v8443_v48 = vcombine.high %v2011_v42, %v2035_v43 }
 0x23c   : > { %6988 = vmatprep.subr.bf16.mxu0 %v8383_v61  ;;  %7052 = vmatprep.subr.bf16.mxu1 %v8415_v62  ;;  %v8430_v61 = vcombine.low %v2442_v50, %v2466_v51  ;;  %v8399_v62 = vcombine.high %v2489_v56, %v2513_v57  ;;  %v8431_v63 = vcombine.high %v2490_v58, %v2514_v59  ;;  %v2059_v50 = vld [vmem:[%s10795_s10 + $0x7b0] sm:$0xff] }
 0x23d   : > { %v2083_v51 = vld [vmem:[%s10795_s10 + $0x870] sm:$0xff] }
 0x23f   : > { %6990 = vmatpush1.bf16.msra.mxu0 %v8384_v5  ;;  %7054 = vmatpush1.bf16.msra.mxu1 %v8416_v6  ;;  %v2562_v5 = vld [vmem:[%s10795_s10 + $0x1768] sm:$0xff]  ;;  %v8400_v6 = vcombine.low %v2489_v56, %v2513_v57  ;;  %v8445_v56 = vcombine.high %v2059_v50, %v2083_v51 }
 0x240   : > { %6992 = vmatprep.subr.bf16.mxu0 %v8385_v7  ;;  %7056 = vmatprep.subr.bf16.mxu1 %v8417_v8  ;;  %v8432_v7 = vcombine.low %v2490_v58, %v2514_v59  ;;  %v8401_v8 = vcombine.high %v2537_v2, %v2561_v3  ;;  %v8433_v9 = vcombine.high %v2538_v4, %v2562_v5  ;;  %v2107_v58 = vld [vmem:[%s10795_s10 + $0x930] sm:$0xff] }
 0x241   : > { %v2131_v59 = vld [vmem:[%s10795_s10 + $0x9f0] sm:$0xff] }
 0x243   : > { %6994 = vmatpush1.bf16.msra.mxu0 %v8386_v13  ;;  %7058 = vmatpush1.bf16.msra.mxu1 %v8418_v14  ;;  %v1844_v13 = vld [vmem:[%s10795_s10 + $0xf8] sm:$0xff]  ;;  %v8402_v14 = vcombine.low %v2537_v2, %v2561_v3  ;;  %v8447_v2 = vcombine.high %v2107_v58, %v2131_v59 }
 0x244   : > { %6996 = vmatprep.subr.bf16.mxu0 %v8387_v15  ;;  %7060 = vmatprep.subr.bf16.mxu1 %v8419_v16  ;;  %v8434_v15 = vcombine.low %v2538_v4, %v2562_v5  ;;  %v8435_v16 = vcombine.high %v1819_v10, %v1843_v11  ;;  %v8467_v17 = vcombine.high %v1820_v12, %v1844_v13  ;;  %v2155_v4 = vld [vmem:[%s10795_s10 + $0xab0] sm:$0xff] }
 0x245   : > { %v2179_v5 = vld [vmem:[%s10795_s10 + $0xb70] sm:$0xff] }
 0x247   : > { %6998 = vmatpush1.bf16.msra.mxu0 %v8388_v21  ;;  %7062 = vmatpush1.bf16.msra.mxu1 %v8420_v22  ;;  %v1892_v21 = vld [vmem:[%s10795_s10 + $0x278] sm:$0xff]  ;;  %v8436_v22 = vcombine.low %v1819_v10, %v1843_v11  ;;  %v8449_v10 = vcombine.high %v2155_v4, %v2179_v5 }
 0x248   : > { %7000 = vmatprep.subr.bf16.mxu0 %v8389_v23  ;;  %7064 = vmatprep.subr.bf16.mxu1 %v8421_v24  ;;  %v8468_v23 = vcombine.low %v1820_v12, %v1844_v13  ;;  %v8437_v24 = vcombine.high %v1867_v18, %v1891_v19  ;;  %v8469_v25 = vcombine.high %v1868_v20, %v1892_v21  ;;  %v2203_v12 = vld [vmem:[%s10795_s10 + $0xc30] sm:$0xff] }
 0x249   : > { %v2227_v13 = vld [vmem:[%s10795_s10 + $0xcf0] sm:$0xff] }
 0x24b   : > { %7002 = vmatpush1.bf16.msra.mxu0 %v8390_v29  ;;  %7066 = vmatpush1.bf16.msra.mxu1 %v8422_v30  ;;  %v1916_v29 = vld [vmem:[%s10795_s10 + $0x338] sm:$0xff] }
 0x24c   : > { %7004 = vmatprep.subr.bf16.mxu0 %v8391_v31  ;;  %7068 = vmatprep.subr.bf16.mxu1 %v8423_v32  ;;  %v1940_v30 = vld [vmem:[%s10795_s10 + $0x3f8] sm:$0xff]  ;;  %v8438_v31 = vcombine.low %v1867_v18, %v1891_v19  ;;  %v8470_v32 = vcombine.low %v1868_v20, %v1892_v21  ;;  %v8451_v18 = vcombine.high %v2203_v12, %v2227_v13  ;;  %v2251_v20 = vld [vmem:[%s10795_s10 + $0xdb0] sm:$0xff] }
 0x24d   : > { %v8471_v34 = vcombine.high %v1916_v29, %v1940_v30  ;;  %v2275_v21 = vld [vmem:[%s10795_s10 + $0xe70] sm:$0xff] }
 0x24f   : > { %7006 = vmatpush1.bf16.msra.mxu0 %v8392_v36  ;;  %7070 = vmatpush1.bf16.msra.mxu1 %v8424_v37  ;;  %v1964_v36 = vld [vmem:[%s10795_s10 + $0x4b8] sm:$0xff] }
 0x250   : > { %7008 = vmatprep.subr.bf16.mxu0 %v8393_v38  ;;  %7072 = vmatprep.subr.bf16.mxu1 %v8425_v39  ;;  %v1988_v37 = vld [vmem:[%s10795_s10 + $0x578] sm:$0xff]  ;;  %v8440_v38 = vcombine.low %v1915_v26, %v1939_v27  ;;  %v8472_v39 = vcombine.low %v1916_v29, %v1940_v30  ;;  %v8453_v26 = vcombine.high %v2251_v20, %v2275_v21  ;;  %v2299_v29 = vld [vmem:[%s10795_s10 + $0xf30] sm:$0xff] }
 0x251   : > { %v8473_v41 = vcombine.high %v1964_v36, %v1988_v37  ;;  %v2323_v30 = vld [vmem:[%s10795_s10 + $0xff0] sm:$0xff] }
 0x253   : > { %7010 = vmatpush1.bf16.msra.mxu0 %v8394_v44  ;;  %7074 = vmatpush1.bf16.msra.mxu1 %v8426_v45  ;;  %v2012_v44 = vld [vmem:[%s10795_s10 + $0x638] sm:$0xff] }
 0x254   : > { %7012 = vmatprep.subr.bf16.mxu0 %v8395_v46  ;;  %7076 = vmatprep.subr.bf16.mxu1 %v8427_v47  ;;  %v2036_v45 = vld [vmem:[%s10795_s10 + $0x6f8] sm:$0xff]  ;;  %v8442_v46 = vcombine.low %v1963_v35, %v1987_v0  ;;  %v8474_v47 = vcombine.low %v1964_v36, %v1988_v37  ;;  %v8455_v35 = vcombine.high %v2299_v29, %v2323_v30  ;;  %v2347_v36 = vld [vmem:[%s10795_s10 + $0x10b0] sm:$0xff] }
 0x255   : > { %v8475_v49 = vcombine.high %v2012_v44, %v2036_v45  ;;  %v2371_v37 = vld [vmem:[%s10795_s10 + $0x1170] sm:$0xff] }
 0x257   : > { %7014 = vmatpush1.bf16.msra.mxu0 %v8396_v52  ;;  %7078 = vmatpush1.bf16.msra.mxu1 %v8428_v53  ;;  %v2060_v52 = vld [vmem:[%s10795_s10 + $0x7b8] sm:$0xff] }
 0x258   : > { %7016 = vmatprep.subr.bf16.mxu0 %v8397_v54  ;;  %7080 = vmatprep.subr.bf16.mxu1 %v8429_v55  ;;  %v2084_v53 = vld [vmem:[%s10795_s10 + $0x878] sm:$0xff]  ;;  %v8444_v54 = vcombine.low %v2011_v42, %v2035_v43  ;;  %v8476_v55 = vcombine.low %v2012_v44, %v2036_v45  ;;  %v8457_v42 = vcombine.high %v2347_v36, %v2371_v37  ;;  %v2395_v44 = vld [vmem:[%s10795_s10 + $0x1230] sm:$0xff] }
 0x259   : > { %v8477_v57 = vcombine.high %v2060_v52, %v2084_v53  ;;  %v2419_v45 = vld [vmem:[%s10795_s10 + $0x12f0] sm:$0xff] }
 0x25b   : > { %7018 = vmatpush1.bf16.msra.mxu0 %v8398_v60  ;;  %7082 = vmatpush1.bf16.msra.mxu1 %v8430_v61  ;;  %v2108_v60 = vld [vmem:[%s10795_s10 + $0x938] sm:$0xff] }
 0x25c   : > { %7020 = vmatprep.subr.bf16.mxu0 %v8399_v62  ;;  %7084 = vmatprep.subr.bf16.mxu1 %v8431_v63  ;;  %v2132_v61 = vld [vmem:[%s10795_s10 + $0x9f8] sm:$0xff]  ;;  %v8446_v62 = vcombine.low %v2059_v50, %v2083_v51  ;;  %v8478_v63 = vcombine.low %v2060_v52, %v2084_v53  ;;  %v8459_v50 = vcombine.high %v2395_v44, %v2419_v45  ;;  %v2443_v52 = vld [vmem:[%s10795_s10 + $0x13b0] sm:$0xff] }
 0x25d   : > { %v8479_v3 = vcombine.high %v2108_v60, %v2132_v61  ;;  %v2467_v53 = vld [vmem:[%s10795_s10 + $0x1470] sm:$0xff] }
 0x25f   : > { %7022 = vmatpush1.bf16.msra.mxu0 %v8400_v6  ;;  %7086 = vmatpush1.bf16.msra.mxu1 %v8432_v7  ;;  %v2156_v6 = vld [vmem:[%s10795_s10 + $0xab8] sm:$0xff] }
 0x260   : > { %7024 = vmatprep.subr.bf16.mxu0 %v8401_v8  ;;  %7088 = vmatprep.subr.bf16.mxu1 %v8433_v9  ;;  %v2180_v7 = vld [vmem:[%s10795_s10 + $0xb78] sm:$0xff]  ;;  %v8448_v8 = vcombine.low %v2107_v58, %v2131_v59  ;;  %v8480_v9 = vcombine.low %v2108_v60, %v2132_v61  ;;  %v8461_v58 = vcombine.high %v2443_v52, %v2467_v53  ;;  %v2491_v60 = vld [vmem:[%s10795_s10 + $0x1530] sm:$0xff] }
 0x261   : > { %v8481_v11 = vcombine.high %v2156_v6, %v2180_v7  ;;  %v2515_v61 = vld [vmem:[%s10795_s10 + $0x15f0] sm:$0xff] }
 0x263   : > { %7026 = vmatpush1.bf16.msra.mxu0 %v8402_v14  ;;  %7090 = vmatpush1.bf16.msra.mxu1 %v8434_v15  ;;  %v2204_v14 = vld [vmem:[%s10795_s10 + $0xc38] sm:$0xff] }
 0x264   : > { %7092 = vmatprep.subr.bf16.mxu0 %v8435_v16  ;;  %7156 = vmatprep.subr.bf16.mxu1 %v8467_v17  ;;  %v2228_v15 = vld [vmem:[%s10795_s10 + $0xcf8] sm:$0xff]  ;;  %v8450_v16 = vcombine.low %v2155_v4, %v2179_v5  ;;  %v8482_v17 = vcombine.low %v2156_v6, %v2180_v7  ;;  %v8463_v4 = vcombine.high %v2491_v60, %v2515_v61  ;;  %v2539_v6 = vld [vmem:[%s10795_s10 + $0x16b0] sm:$0xff] }
 0x265   : > { %v8483_v19 = vcombine.high %v2204_v14, %v2228_v15  ;;  %v2563_v7 = vld [vmem:[%s10795_s10 + $0x1770] sm:$0xff] }
 0x266   : > { %4477 = vmatmul.mubr.f32.vlgmr.msra.gmra.mrb[4].mxu0 %v11010_v28  ;;  %4548 = vmatmul.mubr.f32.vlgmr.msra.gmra.mrb[4].mxu1 %v11010_v28 }
 0x267   : > { %7094 = vmatpush1.bf16.msra.mxu0 %v8436_v22  ;;  %7158 = vmatpush1.bf16.msra.mxu1 %v8468_v23  ;;  %v2252_v22 = vld [vmem:[%s10795_s10 + $0xdb8] sm:$0xff] }
 0x268   : > { %7096 = vmatprep.subr.bf16.mxu0 %v8437_v24  ;;  %7160 = vmatprep.subr.bf16.mxu1 %v8469_v25  ;;  %v2276_v23 = vld [vmem:[%s10795_s10 + $0xe78] sm:$0xff]  ;;  %v8452_v24 = vcombine.low %v2203_v12, %v2227_v13  ;;  %v8484_v25 = vcombine.low %v2204_v14, %v2228_v15  ;;  %v8465_v12 = vcombine.high %v2539_v6, %v2563_v7  ;;  %v1821_v14 = vld [vmem:[%s10795_s10 + $0x40] sm:$0xff] }
 0x269   : > { %4618 = vmatprep.mubr.f32.mxu0 %v10791_v1  ;;  %4689 = vmatprep.mubr.f32.mxu1 %v10791_v1  ;;  %v8485_v27 = vcombine.high %v2252_v22, %v2276_v23  ;;  %v1845_v15 = vld [vmem:[%s10795_s10 + $0x100] sm:$0xff] }
 0x26b   : > { %7098 = vmatpush1.bf16.msra.mxu0 %v8438_v31  ;;  %7162 = vmatpush1.bf16.msra.mxu1 %v8470_v32  ;;  %v2300_v31 = vld [vmem:[%s10795_s10 + $0xf38] sm:$0xff] }
 0x26c   : > { %7100 = vmatprep.subr.bf16.mxu0 %v8439_v33  ;;  %7164 = vmatprep.subr.bf16.mxu1 %v8471_v34  ;;  %v2324_v32 = vld [vmem:[%s10795_s10 + $0xff8] sm:$0xff]  ;;  %v8454_v33 = vcombine.low %v2251_v20, %v2275_v21  ;;  %v8486_v34 = vcombine.low %v2252_v22, %v2276_v23  ;;  %v8499_v20 = vcombine.high %v1821_v14, %v1845_v15  ;;  %v1869_v22 = vld [vmem:[%s10795_s10 + $0x1c0] sm:$0xff] }
 0x26d   : > { %v8487_v0 = vcombine.high %v2300_v31, %v2324_v32  ;;  %v1893_v23 = vld [vmem:[%s10795_s10 + $0x280] sm:$0xff] }
 0x26f   : > { %7102 = vmatpush1.bf16.msra.mxu0 %v8440_v38  ;;  %7166 = vmatpush1.bf16.msra.mxu1 %v8472_v39  ;;  %v2348_v38 = vld [vmem:[%s10795_s10 + $0x10b8] sm:$0xff] }
 0x270   : > { %7104 = vmatprep.subr.bf16.mxu0 %v8441_v40  ;;  %7168 = vmatprep.subr.bf16.mxu1 %v8473_v41  ;;  %v2372_v39 = vld [vmem:[%s10795_s10 + $0x1178] sm:$0xff]  ;;  %v8456_v40 = vcombine.low %v2299_v29, %v2323_v30  ;;  %v8488_v41 = vcombine.low %v2300_v31, %v2324_v32  ;;  %v8501_v29 = vcombine.high %v1869_v22, %v1893_v23  ;;  %v1917_v31 = vld [vmem:[%s10795_s10 + $0x340] sm:$0xff] }
 0x271   : > { %v8489_v43 = vcombine.high %v2348_v38, %v2372_v39  ;;  %v1941_v32 = vld [vmem:[%s10795_s10 + $0x400] sm:$0xff] }
 0x273   : > { %7106 = vmatpush1.bf16.msra.mxu0 %v8442_v46  ;;  %7170 = vmatpush1.bf16.msra.mxu1 %v8474_v47  ;;  %v2396_v46 = vld [vmem:[%s10795_s10 + $0x1238] sm:$0xff] }
 0x274   : > { %7108 = vmatprep.subr.bf16.mxu0 %v8443_v48  ;;  %7172 = vmatprep.subr.bf16.mxu1 %v8475_v49  ;;  %v2420_v47 = vld [vmem:[%s10795_s10 + $0x12f8] sm:$0xff]  ;;  %v8458_v48 = vcombine.low %v2347_v36, %v2371_v37  ;;  %v8490_v49 = vcombine.low %v2348_v38, %v2372_v39  ;;  %v8503_v37 = vcombine.high %v1917_v31, %v1941_v32  ;;  %v1965_v39 = vld [vmem:[%s10795_s10 + $0x4c0] sm:$0xff] }
 0x275   : > { %v8491_v51 = vcombine.high %v2396_v46, %v2420_v47 }
 0x277   : > { %7110 = vmatpush1.bf16.msra.mxu0 %v8444_v54  ;;  %7174 = vmatpush1.bf16.msra.mxu1 %v8476_v55  ;;  %v2444_v54 = vld [vmem:[%s10795_s10 + $0x13b8] sm:$0xff] }
 0x278   : > { %7112 = vmatprep.subr.bf16.mxu0 %v8445_v56  ;;  %7176 = vmatprep.subr.bf16.mxu1 %v8477_v57  ;;  %v2468_v55 = vld [vmem:[%s10795_s10 + $0x1478] sm:$0xff]  ;;  %v8460_v56 = vcombine.low %v2395_v44, %v2419_v45  ;;  %v8492_v57 = vcombine.low %v2396_v46, %v2420_v47  ;;  %v8504_v44 = vcombine.low %v1917_v31, %v1941_v32 }
 0x279   : > { %v8493_v59 = vcombine.high %v2444_v54, %v2468_v55 }
 0x27b   : > { %7114 = vmatpush1.bf16.msra.mxu0 %v8446_v62  ;;  %7178 = vmatpush1.bf16.msra.mxu1 %v8478_v63  ;;  %v2492_v62 = vld [vmem:[%s10795_s10 + $0x1538] sm:$0xff] }
 0x27c   : > { %7116 = vmatprep.subr.bf16.mxu0 %v8447_v2  ;;  %7180 = vmatprep.subr.bf16.mxu1 %v8479_v3  ;;  %v2516_v63 = vld [vmem:[%s10795_s10 + $0x15f8] sm:$0xff]  ;;  %v8462_v2 = vcombine.low %v2443_v52, %v2467_v53  ;;  %v8494_v3 = vcombine.low %v2444_v54, %v2468_v55  ;;  %v2014_v52 = vld [vmem:[%s10795_s10 + $0x648] sm:$0xff] }
 0x27d   : > { %v8495_v5 = vcombine.high %v2492_v62, %v2516_v63  ;;  %v2038_v53 = vld [vmem:[%s10795_s10 + $0x708] sm:$0xff] }
 0x27f   : > { %7118 = vmatpush1.bf16.msra.mxu0 %v8448_v8  ;;  %7182 = vmatpush1.bf16.msra.mxu1 %v8480_v9  ;;  %v2540_v8 = vld [vmem:[%s10795_s10 + $0x16b8] sm:$0xff] }
 0x280   : > { %7120 = vmatprep.subr.bf16.mxu0 %v8449_v10  ;;  %7184 = vmatprep.subr.bf16.mxu1 %v8481_v11  ;;  %v2564_v9 = vld [vmem:[%s10795_s10 + $0x1778] sm:$0xff]  ;;  %v8464_v10 = vcombine.low %v2491_v60, %v2515_v61  ;;  %v8496_v11 = vcombine.low %v2492_v62, %v2516_v63  ;;  %v8539_v62 = vcombine.high %v2014_v52, %v2038_v53 }
 0x281   : > { %v8497_v13 = vcombine.high %v2540_v8, %v2564_v9 }
 0x283   : > { %7122 = vmatpush1.bf16.msra.mxu0 %v8450_v16  ;;  %7186 = vmatpush1.bf16.msra.mxu1 %v8482_v17  ;;  %v1822_v16 = vld [vmem:[%s10795_s10 + $0x48] sm:$0xff] }
 0x284   : > { %7124 = vmatprep.subr.bf16.mxu0 %v8451_v18  ;;  %7188 = vmatprep.subr.bf16.mxu1 %v8483_v19  ;;  %v1846_v17 = vld [vmem:[%s10795_s10 + $0x108] sm:$0xff]  ;;  %v8466_v18 = vcombine.low %v2539_v6, %v2563_v7  ;;  %v8498_v19 = vcombine.low %v2540_v8, %v2564_v9 }
 0x285   : > { %v8531_v21 = vcombine.high %v1822_v16, %v1846_v17  ;;  %v2062_v8 = vld [vmem:[%s10795_s10 + $0x7c8] sm:$0xff] }
 0x286   : > { %v2086_v9 = vld [vmem:[%s10795_s10 + $0x888] sm:$0xff] }
 0x287   : > { %7126 = vmatpush1.bf16.msra.mxu0 %v8452_v24  ;;  %7190 = vmatpush1.bf16.msra.mxu1 %v8484_v25  ;;  %v1870_v24 = vld [vmem:[%s10795_s10 + $0x1c8] sm:$0xff] }
 0x288   : > { %7128 = vmatprep.subr.bf16.mxu0 %v8453_v26  ;;  %7192 = vmatprep.subr.bf16.mxu1 %v8485_v27  ;;  %v1894_v25 = vld [vmem:[%s10795_s10 + $0x288] sm:$0xff]  ;;  %v8500_v26 = vcombine.low %v1821_v14, %v1845_v15  ;;  %v8532_v27 = vcombine.low %v1822_v16, %v1846_v17  ;;  %v2109_v14 = vld [vmem:[%s10795_s10 + $0x940] sm:$0xff] }
 0x289   : > { %v8533_v30 = vcombine.high %v1870_v24, %v1894_v25  ;;  %v8534_v36 = vcombine.low %v1870_v24, %v1894_v25  ;;  %v2133_v15 = vld [vmem:[%s10795_s10 + $0xa00] sm:$0xff] }
 0x28b   : > { %7130 = vmatpush1.bf16.msra.mxu0 %v8454_v33  ;;  %7194 = vmatpush1.bf16.msra.mxu1 %v8486_v34  ;;  %v1918_v33 = vld [vmem:[%s10795_s10 + $0x348] sm:$0xff] }
 0x28c   : > { %7132 = vmatprep.subr.bf16.mxu0 %v8455_v35  ;;  %7196 = vmatprep.subr.bf16.mxu1 %v8487_v0  ;;  %v1942_v34 = vld [vmem:[%s10795_s10 + $0x408] sm:$0xff]  ;;  %v5885_v35 = vlaneseq  ;;  %v8502_v0 = vcombine.low %v1869_v22, %v1893_v23  ;;  %v8542_v22 = vcombine.low %v2062_v8, %v2086_v9  ;;  %v8511_v23 = vcombine.high %v2109_v14, %v2133_v15 }
 0x28d   : > { %v8535_v38 = vcombine.high %v1918_v33, %v1942_v34  ;;  %v8536_v45 = vcombine.low %v1918_v33, %v1942_v34  ;;  %v2158_v33 = vld [vmem:[%s10795_s10 + $0xac8] sm:$0xff] }
 0x28e   : > { %v2182_v34 = vld [vmem:[%s10795_s10 + $0xb88] sm:$0xff] }
 0x28f   : > { %7134 = vmatpush1.bf16.msra.mxu0 %v8456_v40  ;;  %7198 = vmatpush1.bf16.msra.mxu1 %v8488_v41  ;;  %v1989_v40 = vld [vmem:[%s10795_s10 + $0x580] sm:$0xff]  ;;  %v1966_v41 = vld [vmem:[%s10795_s10 + $0x4c8] sm:$0xff] }
 0x290   : > { %7136 = vmatprep.subr.bf16.mxu0 %v8457_v42  ;;  %7200 = vmatprep.subr.bf16.mxu1 %v8489_v43  ;;  %v1990_v42 = vld [vmem:[%s10795_s10 + $0x588] sm:$0xff]  ;;  %v11096_v43 = vshrl.u32 %v5885_v35, 7  ;;  %v8505_v46 = vcombine.high %v1965_v39, %v1989_v40 }
 0x291   : > { %v8537_v47 = vcombine.high %v1966_v41, %v1990_v42  ;;  %v8538_v60 = vcombine.low %v1966_v41, %v1990_v42  ;;  %v8545_v41 = vcombine.high %v2158_v33, %v2182_v34  ;;  %v2205_v42 = vld [vmem:[%s10795_s10 + $0xc40] sm:$0xff] }
 0x292   : > { %v11109_v54 = vsub.s32 0, %v11096_v43  ;;  %v11112_v55 = vsub.s32 1, %v11096_v43 }
 0x293   : > { %7138 = vmatpush1.bf16.msra.mxu0 %v8458_v48  ;;  %7202 = vmatpush1.bf16.msra.mxu1 %v8490_v49  ;;  %v2013_v48 = vld [vmem:[%s10795_s10 + $0x640] sm:$0xff] }
 0x294   : > { %7140 = vmatprep.subr.bf16.mxu0 %v8459_v50  ;;  %7204 = vmatprep.subr.bf16.mxu1 %v8491_v51  ;;  %v2037_v49 = vld [vmem:[%s10795_s10 + $0x700] sm:$0xff]  ;;  %v9154_v50 = vmov 1983009808  }
 0x295   : > { %v5883_v51 = vunpack.c.l.s4 %v9154_v50  ;;  %v8507_v61 = vcombine.high %v2013_v48, %v2037_v49 }
 0x297   : > { %7142 = vmatpush1.bf16.msra.mxu0 %v8460_v56  ;;  %7206 = vmatpush1.bf16.msra.mxu1 %v8492_v57  ;;  %v11115_v56 = vsub.s32 2, %v11096_v43  ;;  %v11118_v57 = vsub.s32 3, %v11096_v43  ;;  %v5884_v63 = vunpack.c.0.s8 %v5883_v51  ;;  %v8546_v51 = vcombine.low %v2158_v33, %v2182_v34  ;;  %v2469_v33 = vld [vmem:[%s10795_s10 + $0x1480] sm:$0xff]  ;;  %v2446_v34 = vld [vmem:[%s10795_s10 + $0x13c8] sm:$0xff] }
 0x298   : > { %7144 = vmatprep.subr.bf16.mxu0 %v8461_v58  ;;  %7208 = vmatprep.subr.bf16.mxu1 %v8493_v59  ;;  %v8506_v58 = vcombine.low %v1965_v39, %v1989_v40  ;;  %v11121_v59 = vld [vmem:[%s11102_s27] sm:$0xff] }
 0x299   : > { %v6158_v6 = vrot.slane %v11121_v59, %v11115_v56  ;;  %v6162_v7 = vrot.slane %v11121_v59, %v11118_v57  ;;  %v11138_v16 = vsub.s32 %v5884_v63, %v11096_v43  ;;  %v2278_v63 = vld [vmem:[%s10795_s10 + $0xe88] sm:$0xff] }
 0x29b   : > { %7146 = vmatpush1.bf16.msra.mxu0 %v8462_v2  ;;  %7210 = vmatpush1.bf16.msra.mxu1 %v8494_v3  ;;  %v2061_v2 = vld [vmem:[%s10795_s10 + $0x7c0] sm:$0xff] }
 0x29c   : > { %7148 = vmatprep.subr.bf16.mxu0 %v8463_v4  ;;  %7212 = vmatprep.subr.bf16.mxu1 %v8495_v5  ;;  %v2085_v3 = vld [vmem:[%s10795_s10 + $0x880] sm:$0xff]  ;;  %v6150_v4 = vrot.slane %v11121_v59, %v11109_v54  ;;  %v6154_v5 = vrot.slane %v11121_v59, %v11112_v55 }
 0x29e   : > { %v6339_v17 = vcombine.low %v6150_v4, %v6154_v5 }
 0x29f   : > { %7150 = vmatpush1.bf16.msra.mxu0 %v8464_v10  ;;  %7214 = vmatpush1.bf16.msra.mxu1 %v8496_v11  ;;  %v8508_v10 = vcombine.low %v2013_v48, %v2037_v49  ;;  %v8540_v11 = vcombine.low %v2014_v52, %v2038_v53  ;;  %v2230_v48 = vld [vmem:[%s10795_s10 + $0xd08] sm:$0xff] }
 0x2a0   : > { %7152 = vmatprep.subr.bf16.mxu0 %v8465_v12  ;;  %7216 = vmatprep.subr.bf16.mxu1 %v8497_v13  ;;  %v8509_v12 = vcombine.high %v2061_v2, %v2085_v3  ;;  %v8541_v13 = vcombine.high %v2062_v8, %v2086_v9  ;;  %v6347_v31 = vrot.slane %v6339_v17, %v11138_v16  ;;  %v2302_v8 = vld [vmem:[%s10795_s10 + $0xf48] sm:$0xff] }
 0x2a1   : > { %v2326_v9 = vld [vmem:[%s10795_s10 + $0x1008] sm:$0xff] }
 0x2a2   : > { %v2350_v17 = vld [vmem:[%s10795_s10 + $0x10c8] sm:$0xff] }
 0x2a3   : > { %7154 = vmatpush1.bf16.msra.mxu0 %v8466_v18  ;;  %7218 = vmatpush1.bf16.msra.mxu1 %v8498_v19  ;;  %v6340_v18 = vcombine.low %v6158_v6, %v6162_v7  ;;  %v2110_v19 = vld [vmem:[%s10795_s10 + $0x948] sm:$0xff]  ;;  %v2301_v6 = vld [vmem:[%s10795_s10 + $0xf40] sm:$0xff] }
 0x2a4   : > { %7220 = vmatprep.subr.bf16.mxu0 %v8499_v20  ;;  %7284 = vmatprep.subr.bf16.mxu1 %v8531_v21  ;;  %v2134_v20 = vld [vmem:[%s10795_s10 + $0xa08] sm:$0xff]  ;;  %v8510_v21 = vcombine.low %v2061_v2, %v2085_v3  ;;  %v2325_v7 = vld [vmem:[%s10795_s10 + $0x1000] sm:$0xff] }
 0x2a5   : > { %v8543_v25 = vcombine.high %v2110_v19, %v2134_v20  ;;  %v6354_v32 = vrot.slane %v6340_v18, %v11138_v16  ;;  %v2374_v18 = vld [vmem:[%s10795_s10 + $0x1188] sm:$0xff] }
 0x2a6   : > { %4619 = vmatmul.mubr.f32.vlgmr.msra.gmra.mrb[6].mxu0 %v11010_v28  ;;  %4690 = vmatmul.mubr.f32.vlgmr.msra.gmra.mrb[6].mxu1 %v11010_v28 }
 0x2a7   : > { %7222 = vmatpush1.bf16.msra.mxu0 %v8500_v26  ;;  %7286 = vmatpush1.bf16.msra.mxu1 %v8532_v27  ;;  %v2157_v26 = vld [vmem:[%s10795_s10 + $0xac0] sm:$0xff] }
 0x2a8   : > { %7224 = vmatprep.subr.bf16.mxu0 %v8501_v29  ;;  %7288 = vmatprep.subr.bf16.mxu1 %v8533_v30  ;;  %v2181_v27 = vld [vmem:[%s10795_s10 + $0xb80] sm:$0xff] }
 0x2a9   : > { %4760 = vmatprep.mubr.f32.mxu0 %v10791_v1  ;;  %4831 = vmatprep.mubr.f32.mxu1 %v10791_v1  ;;  %v8513_v39 = vcombine.high %v2157_v26, %v2181_v27  ;;  %v8514_v49 = vcombine.low %v2157_v26, %v2181_v27  ;;  %v2422_v26 = vld [vmem:[%s10795_s10 + $0x1308] sm:$0xff] }
 0x2ab   : > { %7226 = vmatpush1.bf16.msra.mxu0 %v8502_v0  ;;  %7290 = vmatpush1.bf16.msra.mxu1 %v8534_v36  ;;  %v8512_v36 = vcombine.low %v2109_v14, %v2133_v15  ;;  %v2349_v14 = vld [vmem:[%s10795_s10 + $0x10c0] sm:$0xff] }
 0x2ac   : > { %7228 = vmatprep.subr.bf16.mxu0 %v8503_v37  ;;  %7292 = vmatprep.subr.bf16.mxu1 %v8535_v38  ;;  %v8544_v38 = vcombine.low %v2110_v19, %v2134_v20  ;;  %v2373_v15 = vld [vmem:[%s10795_s10 + $0x1180] sm:$0xff]  ;;  %v8520_v19 = vcombine.low %v2301_v6, %v2325_v7  ;;  %v8552_v20 = vcombine.low %v2302_v8, %v2326_v9 }
 0x2ad   : > { %v8522_v27 = vcombine.low %v2349_v14, %v2373_v15 }
 0x2af   : > { %7230 = vmatpush1.bf16.msra.mxu0 %v8504_v44  ;;  %7294 = vmatpush1.bf16.msra.mxu1 %v8536_v45  ;;  %v2229_v44 = vld [vmem:[%s10795_s10 + $0xd00] sm:$0xff] }
 0x2b0   : > { %7232 = vmatprep.subr.bf16.mxu0 %v8505_v46  ;;  %7296 = vmatprep.subr.bf16.mxu1 %v8537_v47  ;;  %v6355_v46 = vcombine.low %v6347_v31, %v6354_v32  ;;  %v2206_v47 = vld [vmem:[%s10795_s10 + $0xc48] sm:$0xff]  ;;  %v8515_v52 = vcombine.high %v2205_v42, %v2229_v44  ;;  %v8516_v2 = vcombine.low %v2205_v42, %v2229_v44  ;;  %v2445_v32 = vld [vmem:[%s10795_s10 + $0x13c0] sm:$0xff] }
 0x2b1   : > { %v8547_v53 = vcombine.high %v2206_v47, %v2230_v48  ;;  %v8548_v3 = vcombine.low %v2206_v47, %v2230_v48  ;;  %v2518_v42 = vld [vmem:[%s10795_s10 + $0x1608] sm:$0xff]  ;;  %v8526_v44 = vcombine.low %v2445_v32, %v2469_v33  ;;  %v2541_v48 = vld [vmem:[%s10795_s10 + $0x16c0] sm:$0xff] }
 0x2b3   : > { %7234 = vmatpush1.bf16.msra.mxu0 %v8506_v58  ;;  %7298 = vmatpush1.bf16.msra.mxu1 %v8538_v60  ;;  %v2253_v58 = vld [vmem:[%s10795_s10 + $0xdc0] sm:$0xff] }
 0x2b4   : > { %7236 = vmatprep.subr.bf16.mxu0 %v8507_v61  ;;  %7300 = vmatprep.subr.bf16.mxu1 %v8539_v62  ;;  %v2277_v60 = vld [vmem:[%s10795_s10 + $0xe80] sm:$0xff]  ;;  %v2254_v62 = vld [vmem:[%s10795_s10 + $0xdc8] sm:$0xff] }
 0x2b5   : > { %v8517_v4 = vcombine.high %v2253_v58, %v2277_v60  ;;  %v8549_v5 = vcombine.high %v2254_v62, %v2278_v63 }
 0x2b7   : > { %7238 = vmatpush1.bf16.msra.mxu0 %v8508_v10  ;;  %7302 = vmatpush1.bf16.msra.mxu1 %v8540_v11  ;;  %v8518_v10 = vcombine.low %v2253_v58, %v2277_v60  ;;  %v8550_v11 = vcombine.low %v2254_v62, %v2278_v63  ;;  %v1847_v62 = vld [vmem:[%s10795_s10 + $0x110] sm:$0xff]  ;;  %v1824_v63 = vld [vmem:[%s10795_s10 + $0x58] sm:$0xff] }
 0x2b8   : > { %7240 = vmatprep.subr.bf16.mxu0 %v8509_v12  ;;  %7304 = vmatprep.subr.bf16.mxu1 %v8541_v13  ;;  %v8519_v12 = vcombine.high %v2301_v6, %v2325_v7  ;;  %v8551_v13 = vcombine.high %v2302_v8, %v2326_v9  ;;  %v1871_v7 = vld [vmem:[%s10795_s10 + $0x1d0] sm:$0xff]  ;;  %v1872_v9 = vld [vmem:[%s10795_s10 + $0x1d8] sm:$0xff] }
 0x2b9   : > { %v4194_v24 = vpop.f32.mrb[0].mxu0  ;;  %v4265_v29 = vpop.f32.mrb[0].mxu1  ;;  %v1895_v8 = vld [vmem:[%s10795_s10 + $0x290] sm:$0xff] }
 0x2ba   : > { %v4196_v30 = vpop.f32.mrb[1].mxu0  ;;  %v4267_v0 = vpop.f32.mrb[1].mxu1 }
 0x2bb   : > { %v5880_v35 = vcombine.low %v4194_v24, %v4196_v30  ;;  %7242 = vmatpush1.bf16.msra.mxu0 %v8510_v21  ;;  %v5881_v37 = vcombine.low %v4265_v29, %v4267_v0  ;;  %7306 = vmatpush1.bf16.msra.mxu1 %v8542_v22  ;;  %v8521_v21 = vcombine.high %v2349_v14, %v2373_v15  ;;  %v2421_v24 = vld [vmem:[%s10795_s10 + $0x1300] sm:$0xff]  ;;  %v1919_v15 = vld [vmem:[%s10795_s10 + $0x350] sm:$0xff] }
 0x2bc   : > { %7244 = vmatprep.subr.bf16.mxu0 %v8511_v23  ;;  %7308 = vmatprep.subr.bf16.mxu1 %v8543_v25  ;;  %v8553_v22 = vcombine.high %v2350_v17, %v2374_v18  ;;  %v2397_v23 = vld [vmem:[%s10795_s10 + $0x1240] sm:$0xff]  ;;  %v2398_v25 = vld [vmem:[%s10795_s10 + $0x1248] sm:$0xff]  ;;  %v8554_v29 = vcombine.low %v2350_v17, %v2374_v18  ;;  %v1943_v17 = vld [vmem:[%s10795_s10 + $0x410] sm:$0xff] }
 0x2bd   : > { %v5888_v40 = vrot.slane %v5880_v35, %v11138_v16  ;;  %v5895_v45 = vrot.slane %v5881_v37, %v11138_v16  ;;  %v8523_v30 = vcombine.high %v2397_v23, %v2421_v24  ;;  %v8555_v31 = vcombine.high %v2398_v25, %v2422_v26  ;;  %v2470_v35 = vld [vmem:[%s10795_s10 + $0x1488] sm:$0xff]  ;;  %v1920_v18 = vld [vmem:[%s10795_s10 + $0x358] sm:$0xff] }
 0x2be   : > { %v8524_v0 = vcombine.low %v2397_v23, %v2421_v24  ;;  %v8525_v37 = vcombine.high %v2445_v32, %v2469_v33  ;;  %v1967_v24 = vld [vmem:[%s10795_s10 + $0x4d0] sm:$0xff] }
 0x2bf   : > { %7246 = vmatpush1.bf16.msra.mxu0 %v8512_v36  ;;  %v5896_v50 = vcombine.low %v5888_v40, %v5895_v45  ;;  %7310 = vmatpush1.bf16.msra.mxu1 %v8544_v38  ;;  %v8556_v36 = vcombine.low %v2398_v25, %v2422_v26  ;;  %v8557_v38 = vcombine.high %v2446_v34, %v2470_v35  ;;  %v2517_v40 = vld [vmem:[%s10795_s10 + $0x1600] sm:$0xff]  ;;  %v1991_v25 = vld [vmem:[%s10795_s10 + $0x590] sm:$0xff]  ;;  %v1968_v26 = vld [vmem:[%s10795_s10 + $0x4d8] sm:$0xff] }
 0x2c0   : > { %7248 = vmatprep.subr.bf16.mxu0 %v8513_v39  ;;  %7312 = vmatprep.subr.bf16.mxu1 %v8545_v41  ;;  %v2493_v39 = vld [vmem:[%s10795_s10 + $0x1540] sm:$0xff]  ;;  %v2494_v41 = vld [vmem:[%s10795_s10 + $0x1548] sm:$0xff]  ;;  %v8558_v45 = vcombine.low %v2446_v34, %v2470_v35  ;;  %v2015_v32 = vld [vmem:[%s10795_s10 + $0x650] sm:$0xff] }
 0x2c1   : > { %v6555_v61 = vadd.f32 %v6355_v46, %v5896_v50  ;;  %v8527_v46 = vcombine.high %v2493_v39, %v2517_v40  ;;  %v8559_v47 = vcombine.high %v2494_v41, %v2518_v42  ;;  %v2542_v50 = vld [vmem:[%s10795_s10 + $0x16c8] sm:$0xff]  ;;  %v2039_v33 = vld [vmem:[%s10795_s10 + $0x710] sm:$0xff]  ;;  %v2016_v34 = vld [vmem:[%s10795_s10 + $0x658] sm:$0xff] }
 0x2c2   : > { %v2040_v35 = vld [vmem:[%s10795_s10 + $0x718] sm:$0xff] }
 0x2c3   : > { %7250 = vmatpush1.bf16.msra.mxu0 %v8514_v49  ;;  %6567 = vst [vmem:[%s11159_s29] sm:$0xff] %v6555_v61  ;;  %7314 = vmatpush1.bf16.msra.mxu1 %v8546_v51  ;;  %v2565_v49 = vld [vmem:[%s10795_s10 + $0x1780] sm:$0xff]  ;;  %v2566_v51 = vld [vmem:[%s10795_s10 + $0x1788] sm:$0xff]  ;;  %v1823_v61 = vld [vmem:[%s10795_s10 + $0x50] sm:$0xff] }
 0x2c4   : > { %7252 = vmatprep.subr.bf16.mxu0 %v8515_v52  ;;  %7316 = vmatprep.subr.bf16.mxu1 %v8547_v53  ;;  %v8528_v52 = vcombine.low %v2493_v39, %v2517_v40  ;;  %v8560_v53 = vcombine.low %v2494_v41, %v2518_v42  ;;  %v8529_v58 = vcombine.high %v2541_v48, %v2565_v49 }
 0x2c5   : > { %v8561_v60 = vcombine.high %v2542_v50, %v2566_v51  ;;  %v8570_v39 = vcombine.low %v1967_v24, %v1991_v25  ;;  %v8571_v41 = vcombine.high %v2015_v32, %v2039_v33  ;;  %v8603_v42 = vcombine.high %v2016_v34, %v2040_v35 }
 0x2c7   : > { %7254 = vmatpush1.bf16.msra.mxu0 %v8516_v2  ;;  %7318 = vmatpush1.bf16.msra.mxu1 %v8548_v3  ;;  %v1848_v2 = vld [vmem:[%s10795_s10 + $0x118] sm:$0xff]  ;;  %v8530_v3 = vcombine.low %v2541_v48, %v2565_v49 }
 0x2c8   : > { %7256 = vmatprep.subr.bf16.mxu0 %v8517_v4  ;;  %7320 = vmatprep.subr.bf16.mxu1 %v8549_v5  ;;  %v8562_v4 = vcombine.low %v2542_v50, %v2566_v51  ;;  %v8563_v5 = vcombine.high %v1823_v61, %v1847_v62  ;;  %v8595_v6 = vcombine.high %v1824_v63, %v1848_v2  ;;  %v2064_v49 = vld [vmem:[%s10795_s10 + $0x7d8] sm:$0xff] }
 0x2c9   : > { %v2088_v50 = vld [vmem:[%s10795_s10 + $0x898] sm:$0xff]  ;;  %v8572_v51 = vcombine.low %v2015_v32, %v2039_v33 }
 0x2cb   : > { %7258 = vmatpush1.bf16.msra.mxu0 %v8518_v10  ;;  %7322 = vmatpush1.bf16.msra.mxu1 %v8550_v11  ;;  %v1896_v10 = vld [vmem:[%s10795_s10 + $0x298] sm:$0xff]  ;;  %v8564_v11 = vcombine.low %v1823_v61, %v1847_v62  ;;  %v2135_v61 = vld [vmem:[%s10795_s10 + $0xa10] sm:$0xff] }
 0x2cc   : > { %7260 = vmatprep.subr.bf16.mxu0 %v8519_v12  ;;  %7324 = vmatprep.subr.bf16.mxu1 %v8551_v13  ;;  %v8596_v12 = vcombine.low %v1824_v63, %v1848_v2  ;;  %v8565_v13 = vcombine.high %v1871_v7, %v1895_v8  ;;  %v8597_v14 = vcombine.high %v1872_v9, %v1896_v10  ;;  %v2112_v2 = vld [vmem:[%s10795_s10 + $0x958] sm:$0xff] }
 0x2cf   : > { %7262 = vmatpush1.bf16.msra.mxu0 %v8520_v19  ;;  %7326 = vmatpush1.bf16.msra.mxu1 %v8552_v20  ;;  %v1944_v19 = vld [vmem:[%s10795_s10 + $0x418] sm:$0xff]  ;;  %v8566_v20 = vcombine.low %v1871_v7, %v1895_v8  ;;  %v2159_v8 = vld [vmem:[%s10795_s10 + $0xad0] sm:$0xff] }
 0x2d0   : > { %7264 = vmatprep.subr.bf16.mxu0 %v8521_v21  ;;  %7328 = vmatprep.subr.bf16.mxu1 %v8553_v22  ;;  %v8598_v21 = vcombine.low %v1872_v9, %v1896_v10  ;;  %v8567_v22 = vcombine.high %v1919_v15, %v1943_v17  ;;  %v8599_v23 = vcombine.high %v1920_v18, %v1944_v19  ;;  %v2183_v9 = vld [vmem:[%s10795_s10 + $0xb90] sm:$0xff] }
 0x2d3   : > { %7266 = vmatpush1.bf16.msra.mxu0 %v8522_v27  ;;  %7330 = vmatpush1.bf16.msra.mxu1 %v8554_v29  ;;  %v1992_v27 = vld [vmem:[%s10795_s10 + $0x598] sm:$0xff]  ;;  %v8600_v29 = vcombine.low %v1920_v18, %v1944_v19 }
 0x2d4   : > { %7268 = vmatprep.subr.bf16.mxu0 %v8523_v30  ;;  %7332 = vmatprep.subr.bf16.mxu1 %v8555_v31  ;;  %v8569_v30 = vcombine.high %v1967_v24, %v1991_v25  ;;  %v8601_v31 = vcombine.high %v1968_v26, %v1992_v27  ;;  %v8602_v40 = vcombine.low %v1968_v26, %v1992_v27  ;;  %v2207_v25 = vld [vmem:[%s10795_s10 + $0xc50] sm:$0xff] }
 0x2d5   : > { %v2231_v26 = vld [vmem:[%s10795_s10 + $0xd10] sm:$0xff] }
 0x2d7   : > { %7270 = vmatpush1.bf16.msra.mxu0 %v8524_v0  ;;  %7334 = vmatpush1.bf16.msra.mxu1 %v8556_v36  ;;  %v11211_v0 = vsub.s32 4, %v11096_v43  ;;  %v11214_v36 = vsub.s32 5, %v11096_v43 }
 0x2d8   : > { %7272 = vmatprep.subr.bf16.mxu0 %v8525_v37  ;;  %7336 = vmatprep.subr.bf16.mxu1 %v8557_v38  ;;  %v11217_v37 = vsub.s32 6, %v11096_v43  ;;  %v11220_v38 = vsub.s32 7, %v11096_v43 }
 0x2d9   : > { %v6170_v43 = vrot.slane %v11121_v59, %v11214_v36 }
 0x2da   : > { %v6178_v48 = vrot.slane %v11121_v59, %v11220_v38 }
 0x2db   : > { %7274 = vmatpush1.bf16.msra.mxu0 %v8526_v44  ;;  %7338 = vmatpush1.bf16.msra.mxu1 %v8558_v45  ;;  %v2063_v44 = vld [vmem:[%s10795_s10 + $0x7d0] sm:$0xff] }
 0x2dc   : > { %7276 = vmatprep.subr.bf16.mxu0 %v8527_v46  ;;  %7340 = vmatprep.subr.bf16.mxu1 %v8559_v47  ;;  %v2087_v45 = vld [vmem:[%s10795_s10 + $0x890] sm:$0xff]  ;;  %v6166_v46 = vrot.slane %v11121_v59, %v11211_v0  ;;  %v6174_v47 = vrot.slane %v11121_v59, %v11217_v37 }
 0x2dd   : > { %v8574_v59 = vcombine.low %v2063_v44, %v2087_v45 }
 0x2de   : > { %v6356_v62 = vcombine.low %v6166_v46, %v6170_v43  ;;  %v6357_v63 = vcombine.low %v6174_v47, %v6178_v48  ;;  %v2303_v48 = vld [vmem:[%s10795_s10 + $0xf50] sm:$0xff] }
 0x2df   : > { %7278 = vmatpush1.bf16.msra.mxu0 %v8528_v52  ;;  %7342 = vmatpush1.bf16.msra.mxu1 %v8560_v53  ;;  %v8604_v52 = vcombine.low %v2016_v34, %v2040_v35  ;;  %v8573_v53 = vcombine.high %v2063_v44, %v2087_v45  ;;  %v8579_v34 = vcombine.high %v2207_v25, %v2231_v26  ;;  %v2280_v44 = vld [vmem:[%s10795_s10 + $0xe98] sm:$0xff] }
 0x2e0   : > { %7280 = vmatprep.subr.bf16.mxu0 %v8529_v58  ;;  %7344 = vmatprep.subr.bf16.mxu1 %v8561_v60  ;;  %v8605_v58 = vcombine.high %v2064_v49, %v2088_v50  ;;  %v2111_v60 = vld [vmem:[%s10795_s10 + $0x950] sm:$0xff]  ;;  %v8580_v45 = vcombine.low %v2207_v25, %v2231_v26  ;;  %v2496_v25 = vld [vmem:[%s10795_s10 + $0x1558] sm:$0xff] }
 0x2e1   : > { %v8576_v19 = vcombine.low %v2111_v60, %v2135_v61  ;;  %v2520_v26 = vld [vmem:[%s10795_s10 + $0x1618] sm:$0xff] }
 0x2e3   : > { %7282 = vmatpush1.bf16.msra.mxu0 %v8530_v3  ;;  %7346 = vmatpush1.bf16.msra.mxu1 %v8562_v4  ;;  %v2136_v3 = vld [vmem:[%s10795_s10 + $0xa18] sm:$0xff]  ;;  %v8606_v4 = vcombine.low %v2064_v49, %v2088_v50  ;;  %v2327_v49 = vld [vmem:[%s10795_s10 + $0x1010] sm:$0xff] }
 0x2e4   : > { %7348 = vmatprep.subr.bf16.mxu0 %v8563_v5  ;;  %7412 = vmatprep.subr.bf16.mxu1 %v8595_v6  ;;  %v8575_v5 = vcombine.high %v2111_v60, %v2135_v61  ;;  %v8607_v7 = vcombine.high %v2112_v2, %v2136_v3  ;;  %v2304_v50 = vld [vmem:[%s10795_s10 + $0xf58] sm:$0xff]  ;;  %v2351_v61 = vld [vmem:[%s10795_s10 + $0x10d0] sm:$0xff] }
 0x2e6   : > { %4761 = vmatmul.mubr.f32.vlgmr.msra.gmra.mrb[8].mxu0 %v11010_v28  ;;  %4832 = vmatmul.mubr.f32.vlgmr.msra.gmra.mrb[8].mxu1 %v11010_v28  ;;  %v8568_v28 = vcombine.low %v1919_v15, %v1943_v17  ;;  %v2184_v15 = vld [vmem:[%s10795_s10 + $0xb98] sm:$0xff] }
 0x2e7   : > { %7350 = vmatpush1.bf16.msra.mxu0 %v8564_v11  ;;  %7414 = vmatpush1.bf16.msra.mxu1 %v8596_v12  ;;  %v6364_v12 = vrot.slane %v6356_v62, %v11138_v16  ;;  %v2375_v62 = vld [vmem:[%s10795_s10 + $0x1190] sm:$0xff] }
 0x2e8   : > { %7352 = vmatprep.subr.bf16.mxu0 %v8565_v13  ;;  %7416 = vmatprep.subr.bf16.mxu1 %v8597_v14  ;;  %v6371_v13 = vrot.slane %v6357_v63, %v11138_v16  ;;  %v2160_v14 = vld [vmem:[%s10795_s10 + $0xad8] sm:$0xff] }
 0x2e9   : > { %4902 = vmatprep.mubr.f32.mxu0 %v10791_v1  ;;  %4973 = vmatprep.mubr.f32.mxu1 %v10791_v1  ;;  %v8609_v24 = vcombine.high %v2160_v14, %v2184_v15  ;;  %v8610_v33 = vcombine.low %v2160_v14, %v2184_v15  ;;  %v2352_v63 = vld [vmem:[%s10795_s10 + $0x10d8] sm:$0xff]  ;;  %v2447_v14 = vld [vmem:[%s10795_s10 + $0x13d0] sm:$0xff] }
 0x2ea   : > { %v2471_v15 = vld [vmem:[%s10795_s10 + $0x1490] sm:$0xff] }
 0x2eb   : > { %7354 = vmatpush1.bf16.msra.mxu0 %v8566_v20  ;;  %7418 = vmatpush1.bf16.msra.mxu1 %v8598_v21  ;;  %v8608_v21 = vcombine.low %v2112_v2, %v2136_v3  ;;  %v2376_v2 = vld [vmem:[%s10795_s10 + $0x1198] sm:$0xff]  ;;  %v8584_v3 = vcombine.low %v2303_v48, %v2327_v49 }
 0x2ec   : > { %7356 = vmatprep.subr.bf16.mxu0 %v8567_v22  ;;  %7420 = vmatprep.subr.bf16.mxu1 %v8599_v23  ;;  %v8577_v22 = vcombine.high %v2159_v8, %v2183_v9 }
 0x2ef   : > { %7358 = vmatpush1.bf16.msra.mxu0 %v8568_v28  ;;  %7422 = vmatpush1.bf16.msra.mxu1 %v8600_v29  ;;  %v6372_v28 = vcombine.low %v6364_v12, %v6371_v13  ;;  %v2208_v29 = vld [vmem:[%s10795_s10 + $0xc58] sm:$0xff] }
 0x2f0   : > { %7360 = vmatprep.subr.bf16.mxu0 %v8569_v30  ;;  %7424 = vmatprep.subr.bf16.mxu1 %v8601_v31  ;;  %v2232_v30 = vld [vmem:[%s10795_s10 + $0xd18] sm:$0xff]  ;;  %v8578_v31 = vcombine.low %v2159_v8, %v2183_v9 }
 0x2f1   : > { %v8611_v35 = vcombine.high %v2208_v29, %v2232_v30  ;;  %v8612_v46 = vcombine.low %v2208_v29, %v2232_v30  ;;  %v2400_v8 = vld [vmem:[%s10795_s10 + $0x1258] sm:$0xff]  ;;  %v8623_v30 = vcombine.high %v2496_v25, %v2520_v26 }
 0x2f2   : > { %v2424_v9 = vld [vmem:[%s10795_s10 + $0x1318] sm:$0xff] }
 0x2f3   : > { %7362 = vmatpush1.bf16.msra.mxu0 %v8570_v39  ;;  %7426 = vmatpush1.bf16.msra.mxu1 %v8602_v40  ;;  %v2255_v39 = vld [vmem:[%s10795_s10 + $0xdd0] sm:$0xff]  ;;  %v8619_v13 = vcombine.high %v2400_v8, %v2424_v9 }
 0x2f4   : > { %7364 = vmatprep.subr.bf16.mxu0 %v8571_v41  ;;  %7428 = vmatprep.subr.bf16.mxu1 %v8603_v42  ;;  %v2279_v40 = vld [vmem:[%s10795_s10 + $0xe90] sm:$0xff]  ;;  %v2256_v42 = vld [vmem:[%s10795_s10 + $0xdd8] sm:$0xff] }
 0x2f5   : > { %v8581_v43 = vcombine.high %v2255_v39, %v2279_v40  ;;  %v8613_v47 = vcombine.high %v2256_v42, %v2280_v44 }
 0x2f7   : > { %7366 = vmatpush1.bf16.msra.mxu0 %v8572_v51  ;;  %7430 = vmatpush1.bf16.msra.mxu1 %v8604_v52  ;;  %v2328_v51 = vld [vmem:[%s10795_s10 + $0x1018] sm:$0xff]  ;;  %v8582_v52 = vcombine.low %v2255_v39, %v2279_v40  ;;  %v8624_v39 = vcombine.low %v2496_v25, %v2520_v26 }
 0x2f8   : > { %7368 = vmatprep.subr.bf16.mxu0 %v8573_v53  ;;  %7432 = vmatprep.subr.bf16.mxu1 %v8605_v58  ;;  %v8614_v53 = vcombine.low %v2256_v42, %v2280_v44  ;;  %v8583_v58 = vcombine.high %v2303_v48, %v2327_v49  ;;  %v8615_v60 = vcombine.high %v2304_v50, %v2328_v51  ;;  %v1825_v42 = vld [vmem:[%s10795_s10 + $0x60] sm:$0xff] }
 0x2f9   : > { %v4336_v6 = vpop.f32.mrb[2].mxu0  ;;  %v4407_v10 = vpop.f32.mrb[2].mxu1  ;;  %v1849_v44 = vld [vmem:[%s10795_s10 + $0x120] sm:$0xff] }
 0x2fa   : > { %v4338_v11 = vpop.f32.mrb[3].mxu0  ;;  %v4409_v18 = vpop.f32.mrb[3].mxu1  ;;  %v8627_v48 = vcombine.high %v1825_v42, %v1849_v44 }
 0x2fb   : > { %v5897_v17 = vcombine.low %v4336_v6, %v4338_v11  ;;  %7370 = vmatpush1.bf16.msra.mxu0 %v8574_v59  ;;  %v5898_v20 = vcombine.low %v4407_v10, %v4409_v18  ;;  %7434 = vmatpush1.bf16.msra.mxu1 %v8606_v4  ;;  %v8616_v59 = vcombine.low %v2304_v50, %v2328_v51  ;;  %v2399_v6 = vld [vmem:[%s10795_s10 + $0x1250] sm:$0xff]  ;;  %v2472_v18 = vld [vmem:[%s10795_s10 + $0x1498] sm:$0xff]  ;;  %v1873_v50 = vld [vmem:[%s10795_s10 + $0x1e0] sm:$0xff] }
 0x2fc   : > { %7372 = vmatprep.subr.bf16.mxu0 %v8575_v5  ;;  %7436 = vmatprep.subr.bf16.mxu1 %v8607_v7  ;;  %v8585_v4 = vcombine.high %v2351_v61, %v2375_v62  ;;  %v8617_v5 = vcombine.high %v2352_v63, %v2376_v2  ;;  %v2423_v7 = vld [vmem:[%s10795_s10 + $0x1310] sm:$0xff]  ;;  %v8586_v10 = vcombine.low %v2351_v61, %v2375_v62  ;;  %v1897_v51 = vld [vmem:[%s10795_s10 + $0x2a0] sm:$0xff] }
 0x2fd   : > { %v5905_v23 = vrot.slane %v5897_v17, %v11138_v16  ;;  %v5912_v27 = vrot.slane %v5898_v20, %v11138_v16  ;;  %v8618_v11 = vcombine.low %v2352_v63, %v2376_v2  ;;  %v8587_v12 = vcombine.high %v2399_v6, %v2423_v7  ;;  %v2448_v17 = vld [vmem:[%s10795_s10 + $0x13d8] sm:$0xff]  ;;  %v1921_v63 = vld [vmem:[%s10795_s10 + $0x360] sm:$0xff] }
 0x2fe   : > { %v8620_v20 = vcombine.low %v2400_v8, %v2424_v9  ;;  %v8629_v61 = vcombine.high %v1873_v50, %v1897_v51  ;;  %v1945_v2 = vld [vmem:[%s10795_s10 + $0x420] sm:$0xff] }
 0x2ff   : > { %7374 = vmatpush1.bf16.msra.mxu0 %v8576_v19  ;;  %v5913_v32 = vcombine.low %v5905_v23, %v5912_v27  ;;  %7438 = vmatpush1.bf16.msra.mxu1 %v8608_v21  ;;  %v8588_v19 = vcombine.low %v2399_v6, %v2423_v7  ;;  %v8589_v21 = vcombine.high %v2447_v14, %v2471_v15  ;;  %v2495_v23 = vld [vmem:[%s10795_s10 + $0x1550] sm:$0xff]  ;;  %v1969_v9 = vld [vmem:[%s10795_s10 + $0x4e0] sm:$0xff] }
 0x300   : > { %7376 = vmatprep.subr.bf16.mxu0 %v8577_v22  ;;  %7440 = vmatprep.subr.bf16.mxu1 %v8609_v24  ;;  %v8621_v22 = vcombine.high %v2448_v17, %v2472_v18  ;;  %v2519_v24 = vld [vmem:[%s10795_s10 + $0x1610] sm:$0xff]  ;;  %v8590_v27 = vcombine.low %v2447_v14, %v2471_v15  ;;  %v8631_v7 = vcombine.high %v1921_v63, %v1945_v2 }
 0x301   : > { %v6556_v41 = vadd.f32 %v6372_v28, %v5913_v32  ;;  %v8622_v28 = vcombine.low %v2448_v17, %v2472_v18  ;;  %v8591_v29 = vcombine.high %v2495_v23, %v2519_v24  ;;  %v2567_v32 = vld [vmem:[%s10795_s10 + $0x1790] sm:$0xff]  ;;  %v2017_v18 = vld [vmem:[%s10795_s10 + $0x660] sm:$0xff] }
 0x303   : > { %7378 = vmatpush1.bf16.msra.mxu0 %v8578_v31  ;;  %6568 = vst [vmem:[%s11159_s29 + $0x8] sm:$0xff] %v6556_v41  ;;  %7442 = vmatpush1.bf16.msra.mxu1 %v8610_v33  ;;  %v2543_v31 = vld [vmem:[%s10795_s10 + $0x16d0] sm:$0xff]  ;;  %v2544_v33 = vld [vmem:[%s10795_s10 + $0x16d8] sm:$0xff] }
 0x304   : > { %7380 = vmatprep.subr.bf16.mxu0 %v8579_v34  ;;  %7444 = vmatprep.subr.bf16.mxu1 %v8611_v35  ;;  %v2568_v34 = vld [vmem:[%s10795_s10 + $0x1798] sm:$0xff]  ;;  %v8592_v35 = vcombine.low %v2495_v23, %v2519_v24  ;;  %v8593_v40 = vcombine.high %v2543_v31, %v2567_v32  ;;  %v11309_v23 = vld [vmem:[%s11102_s27 + $0x8] sm:$0xff] }
 0x305   : > { %v8625_v41 = vcombine.high %v2544_v33, %v2568_v34 }
 0x307   : > { %7382 = vmatpush1.bf16.msra.mxu0 %v8580_v45  ;;  %7446 = vmatpush1.bf16.msra.mxu1 %v8612_v46  ;;  %v1826_v45 = vld [vmem:[%s10795_s10 + $0x68] sm:$0xff] }
 0x308   : > { %7384 = vmatprep.subr.bf16.mxu0 %v8581_v43  ;;  %7448 = vmatprep.subr.bf16.mxu1 %v8613_v47  ;;  %v1850_v46 = vld [vmem:[%s10795_s10 + $0x128] sm:$0xff]  ;;  %v8594_v43 = vcombine.low %v2543_v31, %v2567_v32  ;;  %v8626_v47 = vcombine.low %v2544_v33, %v2568_v34  ;;  %v6190_v31 = vrot.slane %v11309_v23, %v11115_v56 }
 0x309   : > { %v8659_v49 = vcombine.high %v1826_v45, %v1850_v46  ;;  %v6194_v32 = vrot.slane %v11309_v23, %v11118_v57  ;;  %v2066_v33 = vld [vmem:[%s10795_s10 + $0x7e8] sm:$0xff] }
 0x30a   : > { %v2090_v34 = vld [vmem:[%s10795_s10 + $0x8a8] sm:$0xff] }
 0x30b   : > { %7386 = vmatpush1.bf16.msra.mxu0 %v8582_v52  ;;  %7450 = vmatpush1.bf16.msra.mxu1 %v8614_v53  ;;  %v1874_v52 = vld [vmem:[%s10795_s10 + $0x1e8] sm:$0xff] }
 0x30c   : > { %7388 = vmatprep.subr.bf16.mxu0 %v8583_v58  ;;  %7452 = vmatprep.subr.bf16.mxu1 %v8615_v60  ;;  %v1898_v53 = vld [vmem:[%s10795_s10 + $0x2a8] sm:$0xff]  ;;  %v8628_v58 = vcombine.low %v1825_v42, %v1849_v44  ;;  %v8660_v60 = vcombine.low %v1826_v45, %v1850_v46  ;;  %v2113_v42 = vld [vmem:[%s10795_s10 + $0x960] sm:$0xff]  ;;  %v6374_v46 = vcombine.low %v6190_v31, %v6194_v32 }
 0x30d   : > { %v8661_v62 = vcombine.high %v1874_v52, %v1898_v53  ;;  %v8662_v6 = vcombine.low %v1874_v52, %v1898_v53  ;;  %v2137_v44 = vld [vmem:[%s10795_s10 + $0xa20] sm:$0xff] }
 0x30e   : > { %v2161_v53 = vld [vmem:[%s10795_s10 + $0xae0] sm:$0xff] }
 0x30f   : > { %7390 = vmatpush1.bf16.msra.mxu0 %v8584_v3  ;;  %7454 = vmatpush1.bf16.msra.mxu1 %v8616_v59  ;;  %v11292_v3 = vld.sshfl [vmem:[%s11879_s0] sm:$0x33 pattern:$0x76325410]  ;;  %v1922_v59 = vld [vmem:[%s10795_s10 + $0x368] sm:$0xff] }
 0x310   : > { %7392 = vmatprep.subr.bf16.mxu0 %v8585_v4  ;;  %7456 = vmatprep.subr.bf16.mxu1 %v8617_v5  ;;  %v1946_v4 = vld [vmem:[%s10795_s10 + $0x428] sm:$0xff]  ;;  %v8630_v5 = vcombine.low %v1873_v50, %v1897_v51  ;;  %v8639_v50 = vcombine.high %v2113_v42, %v2137_v44 }
 0x311   : > { %v8663_v8 = vcombine.high %v1922_v59, %v1946_v4  ;;  %v8664_v14 = vcombine.low %v1922_v59, %v1946_v4  ;;  %v2186_v59 = vld [vmem:[%s10795_s10 + $0xba8] sm:$0xff] }
 0x313   : > { %7394 = vmatpush1.bf16.msra.mxu0 %v8586_v10  ;;  %7458 = vmatpush1.bf16.msra.mxu1 %v8618_v11  ;;  %v1993_v10 = vld [vmem:[%s10795_s10 + $0x5a0] sm:$0xff]  ;;  %v1970_v11 = vld [vmem:[%s10795_s10 + $0x4e8] sm:$0xff] }
 0x314   : > { %7396 = vmatprep.subr.bf16.mxu0 %v8587_v12  ;;  %7460 = vmatprep.subr.bf16.mxu1 %v8619_v13  ;;  %v1994_v12 = vld [vmem:[%s10795_s10 + $0x5a8] sm:$0xff]  ;;  %v8632_v13 = vcombine.low %v1921_v63, %v1945_v2  ;;  %v8633_v15 = vcombine.high %v1969_v9, %v1993_v10  ;;  %v6388_v63 = vrot.slane %v6374_v46, %v11138_v16  ;;  %v2353_v46 = vld [vmem:[%s10795_s10 + $0x10e0] sm:$0xff] }
 0x315   : > { %v8665_v17 = vcombine.high %v1970_v11, %v1994_v12  ;;  %v8666_v24 = vcombine.low %v1970_v11, %v1994_v12  ;;  %v2162_v2 = vld [vmem:[%s10795_s10 + $0xae8] sm:$0xff]  ;;  %v2209_v12 = vld [vmem:[%s10795_s10 + $0xc60] sm:$0xff] }
 0x316   : > { %v8673_v11 = vcombine.high %v2162_v2, %v2186_v59 }
 0x317   : > { %7398 = vmatpush1.bf16.msra.mxu0 %v8588_v19  ;;  %7462 = vmatpush1.bf16.msra.mxu1 %v8620_v20  ;;  %v2041_v19 = vld [vmem:[%s10795_s10 + $0x720] sm:$0xff]  ;;  %v2018_v20 = vld [vmem:[%s10795_s10 + $0x668] sm:$0xff] }
 0x318   : > { %7400 = vmatprep.subr.bf16.mxu0 %v8589_v21  ;;  %7464 = vmatprep.subr.bf16.mxu1 %v8621_v22  ;;  %v2042_v21 = vld [vmem:[%s10795_s10 + $0x728] sm:$0xff]  ;;  %v8634_v22 = vcombine.low %v1969_v9, %v1993_v10  ;;  %v8635_v25 = vcombine.high %v2017_v18, %v2041_v19 }
 0x319   : > { %v8667_v26 = vcombine.high %v2018_v20, %v2042_v21 }
 0x31b   : > { %7402 = vmatpush1.bf16.msra.mxu0 %v8590_v27  ;;  %7466 = vmatpush1.bf16.msra.mxu1 %v8622_v28  ;;  %v2065_v27 = vld [vmem:[%s10795_s10 + $0x7e0] sm:$0xff] }
 0x31c   : > { %7404 = vmatprep.subr.bf16.mxu0 %v8591_v29  ;;  %7468 = vmatprep.subr.bf16.mxu1 %v8623_v30  ;;  %v2089_v28 = vld [vmem:[%s10795_s10 + $0x8a0] sm:$0xff]  ;;  %v6182_v29 = vrot.slane %v11309_v23, %v11109_v54  ;;  %v6186_v30 = vrot.slane %v11309_v23, %v11112_v55 }
 0x31e   : > { %v6373_v45 = vcombine.low %v6182_v29, %v6186_v30  ;;  %v2282_v29 = vld [vmem:[%s10795_s10 + $0xea8] sm:$0xff] }
 0x31f   : > { %7406 = vmatpush1.bf16.msra.mxu0 %v8592_v35  ;;  %7470 = vmatpush1.bf16.msra.mxu1 %v8624_v39  ;;  %v8636_v35 = vcombine.low %v2017_v18, %v2041_v19  ;;  %v8668_v39 = vcombine.low %v2018_v20, %v2042_v21  ;;  %v2234_v18 = vld [vmem:[%s10795_s10 + $0xd28] sm:$0xff]  ;;  %v8674_v21 = vcombine.low %v2162_v2, %v2186_v59 }
 0x320   : > { %7408 = vmatprep.subr.bf16.mxu0 %v8593_v40  ;;  %7472 = vmatprep.subr.bf16.mxu1 %v8625_v41  ;;  %v8637_v40 = vcombine.high %v2065_v27, %v2089_v28  ;;  %v8669_v41 = vcombine.high %v2066_v33, %v2090_v34 }
 0x323   : > { %7410 = vmatpush1.bf16.msra.mxu0 %v8594_v43  ;;  %7474 = vmatpush1.bf16.msra.mxu1 %v8626_v47  ;;  %v2114_v43 = vld [vmem:[%s10795_s10 + $0x968] sm:$0xff] }
 0x324   : > { %7476 = vmatprep.subr.bf16.mxu0 %v8627_v48  ;;  %7540 = vmatprep.subr.bf16.mxu1 %v8659_v49  ;;  %v2138_v47 = vld [vmem:[%s10795_s10 + $0xa28] sm:$0xff]  ;;  %v8638_v48 = vcombine.low %v2065_v27, %v2089_v28  ;;  %v8670_v49 = vcombine.low %v2066_v33, %v2090_v34  ;;  %v2305_v34 = vld [vmem:[%s10795_s10 + $0xf60] sm:$0xff] }
 0x325   : > { %v8671_v52 = vcombine.high %v2114_v43, %v2138_v47  ;;  %v2258_v28 = vld [vmem:[%s10795_s10 + $0xde8] sm:$0xff] }
 0x326   : > { %4903 = vmatmul.mubr.f32.vlgmr.msra.gmra.mrb[10].mxu0 %v11292_v3  ;;  %4974 = vmatmul.mubr.f32.vlgmr.msra.gmra.mrb[10].mxu1 %v11292_v3  ;;  %v8677_v33 = vcombine.high %v2258_v28, %v2282_v29 }
 0x327   : > { %7478 = vmatpush1.bf16.msra.mxu0 %v8628_v58  ;;  %7542 = vmatpush1.bf16.msra.mxu1 %v8660_v60  ;;  %v2185_v58 = vld [vmem:[%s10795_s10 + $0xba0] sm:$0xff] }
 0x328   : > { %7480 = vmatprep.subr.bf16.mxu0 %v8629_v61  ;;  %7544 = vmatprep.subr.bf16.mxu1 %v8661_v62  ;;  %v6381_v62 = vrot.slane %v6373_v45, %v11138_v16  ;;  %v8641_v9 = vcombine.high %v2161_v53, %v2185_v58  ;;  %v8642_v19 = vcombine.low %v2161_v53, %v2185_v58  ;;  %v2401_v53 = vld [vmem:[%s10795_s10 + $0x1260] sm:$0xff] }
 0x329   : > { %5044 = vmatprep.mubr.f32.mxu0 %v10791_v1  ;;  %5115 = vmatprep.mubr.f32.mxu1 %v10791_v1  ;;  %v2425_v58 = vld [vmem:[%s10795_s10 + $0x1320] sm:$0xff] }
 0x32a   : > { %v8651_v2 = vcombine.high %v2401_v53, %v2425_v58 }
 0x32b   : > { %7482 = vmatpush1.bf16.msra.mxu0 %v8630_v5  ;;  %7546 = vmatpush1.bf16.msra.mxu1 %v8662_v6  ;;  %v8640_v6 = vcombine.low %v2113_v42, %v2137_v44  ;;  %v8678_v42 = vcombine.low %v2258_v28, %v2282_v29 }
 0x32c   : > { %7484 = vmatprep.subr.bf16.mxu0 %v8631_v7  ;;  %7548 = vmatprep.subr.bf16.mxu1 %v8663_v8  ;;  %v8672_v8 = vcombine.low %v2114_v43, %v2138_v47  ;;  %v2377_v43 = vld [vmem:[%s10795_s10 + $0x11a0] sm:$0xff]  ;;  %v2354_v47 = vld [vmem:[%s10795_s10 + $0x10e8] sm:$0xff] }
 0x32f   : > { %7486 = vmatpush1.bf16.msra.mxu0 %v8632_v13  ;;  %7550 = vmatpush1.bf16.msra.mxu1 %v8664_v14  ;;  %v2233_v13 = vld [vmem:[%s10795_s10 + $0xd20] sm:$0xff] }
 0x330   : > { %7488 = vmatprep.subr.bf16.mxu0 %v8633_v15  ;;  %7552 = vmatprep.subr.bf16.mxu1 %v8665_v17  ;;  %v6389_v15 = vcombine.low %v6381_v62, %v6388_v63  ;;  %v2210_v17 = vld [vmem:[%s10795_s10 + $0xc68] sm:$0xff]  ;;  %v8644_v30 = vcombine.low %v2209_v12, %v2233_v13  ;;  %v8650_v62 = vcombine.low %v2353_v46, %v2377_v43 }
 0x331   : > { %v8676_v31 = vcombine.low %v2210_v17, %v2234_v18 }
 0x333   : > { %7490 = vmatpush1.bf16.msra.mxu0 %v8634_v22  ;;  %7554 = vmatpush1.bf16.msra.mxu1 %v8666_v24  ;;  %v8643_v22 = vcombine.high %v2209_v12, %v2233_v13  ;;  %v8675_v24 = vcombine.high %v2210_v17, %v2234_v18  ;;  %v2497_v12 = vld [vmem:[%s10795_s10 + $0x1560] sm:$0xff] }
 0x334   : > { %7492 = vmatprep.subr.bf16.mxu0 %v8635_v25  ;;  %7556 = vmatprep.subr.bf16.mxu1 %v8667_v26  ;;  %v2257_v25 = vld [vmem:[%s10795_s10 + $0xde0] sm:$0xff] }
 0x335   : > { %v2281_v26 = vld [vmem:[%s10795_s10 + $0xea0] sm:$0xff] }
 0x336   : > { %v8645_v32 = vcombine.high %v2257_v25, %v2281_v26  ;;  %v2521_v13 = vld [vmem:[%s10795_s10 + $0x1620] sm:$0xff] }
 0x337   : > { %7494 = vmatpush1.bf16.msra.mxu0 %v8636_v35  ;;  %7558 = vmatpush1.bf16.msra.mxu1 %v8668_v39  ;;  %v2329_v35 = vld [vmem:[%s10795_s10 + $0x1020] sm:$0xff]  ;;  %v2306_v39 = vld [vmem:[%s10795_s10 + $0xf68] sm:$0xff] }
 0x338   : > { %7496 = vmatprep.subr.bf16.mxu0 %v8637_v40  ;;  %7560 = vmatprep.subr.bf16.mxu1 %v8669_v41  ;;  %v2330_v40 = vld [vmem:[%s10795_s10 + $0x1028] sm:$0xff]  ;;  %v8646_v41 = vcombine.low %v2257_v25, %v2281_v26  ;;  %v8647_v44 = vcombine.high %v2305_v34, %v2329_v35  ;;  %v8656_v26 = vcombine.low %v2497_v12, %v2521_v13 }
 0x339   : > { %v4478_v51 = vpop.f32.mrb[4].mxu0  ;;  %v4549_v60 = vpop.f32.mrb[4].mxu1  ;;  %v8679_v45 = vcombine.high %v2306_v39, %v2330_v40  ;;  %v2570_v25 = vld [vmem:[%s10795_s10 + $0x17a8] sm:$0xff] }
 0x33a   : > { %v4480_v61 = vpop.f32.mrb[5].mxu0  ;;  %v4551_v5 = vpop.f32.mrb[5].mxu1 }
 0x33b   : > { %v5914_v4 = vcombine.low %v4478_v51, %v4480_v61  ;;  %7498 = vmatpush1.bf16.msra.mxu0 %v8638_v48  ;;  %v5915_v7 = vcombine.low %v4549_v60, %v4551_v5  ;;  %7562 = vmatpush1.bf16.msra.mxu1 %v8670_v49  ;;  %v2378_v48 = vld [vmem:[%s10795_s10 + $0x11a8] sm:$0xff]  ;;  %v8648_v49 = vcombine.low %v2305_v34, %v2329_v35  ;;  %v2473_v5 = vld [vmem:[%s10795_s10 + $0x14a0] sm:$0xff] }
 0x33c   : > { %7500 = vmatprep.subr.bf16.mxu0 %v8639_v50  ;;  %7564 = vmatprep.subr.bf16.mxu1 %v8671_v52  ;;  %v8680_v50 = vcombine.low %v2306_v39, %v2330_v40  ;;  %v8649_v51 = vcombine.high %v2353_v46, %v2377_v43  ;;  %v8681_v52 = vcombine.high %v2354_v47, %v2378_v48  ;;  %v2402_v60 = vld [vmem:[%s10795_s10 + $0x1268] sm:$0xff] }
 0x33d   : > { %v5922_v10 = vrot.slane %v5914_v4, %v11138_v16  ;;  %v5929_v14 = vrot.slane %v5915_v7, %v11138_v16  ;;  %v2426_v61 = vld [vmem:[%s10795_s10 + $0x1328] sm:$0xff]  ;;  %v8682_v63 = vcombine.low %v2354_v47, %v2378_v48  ;;  %v2449_v4 = vld [vmem:[%s10795_s10 + $0x13e0] sm:$0xff] }
 0x33e   : > { %v8683_v59 = vcombine.high %v2402_v60, %v2426_v61  ;;  %v2474_v7 = vld [vmem:[%s10795_s10 + $0x14a8] sm:$0xff]  ;;  %v8654_v17 = vcombine.low %v2449_v4, %v2473_v5 }
 0x33f   : > { %7502 = vmatpush1.bf16.msra.mxu0 %v8640_v6  ;;  %v5930_v20 = vcombine.low %v5922_v10, %v5929_v14  ;;  %7566 = vmatpush1.bf16.msra.mxu1 %v8672_v8  ;;  %v2450_v6 = vld [vmem:[%s10795_s10 + $0x13e8] sm:$0xff]  ;;  %v8652_v8 = vcombine.low %v2401_v53, %v2425_v58  ;;  %v8653_v10 = vcombine.high %v2449_v4, %v2473_v5 }
 0x340   : > { %7504 = vmatprep.subr.bf16.mxu0 %v8641_v9  ;;  %7568 = vmatprep.subr.bf16.mxu1 %v8673_v11  ;;  %v8684_v9 = vcombine.low %v2402_v60, %v2426_v61  ;;  %v8685_v11 = vcombine.high %v2450_v6, %v2474_v7  ;;  %v2498_v14 = vld [vmem:[%s10795_s10 + $0x1568] sm:$0xff]  ;;  %v8686_v18 = vcombine.low %v2450_v6, %v2474_v7 }
 0x341   : > { %v6557_v27 = vadd.f32 %v6389_v15, %v5930_v20  ;;  %v2522_v15 = vld [vmem:[%s10795_s10 + $0x1628] sm:$0xff] }
 0x342   : > { %v8687_v20 = vcombine.high %v2498_v14, %v2522_v15 }
 0x343   : > { %7506 = vmatpush1.bf16.msra.mxu0 %v8642_v19  ;;  %6569 = vst [vmem:[%s11159_s29 + $0x10] sm:$0xff] %v6557_v27  ;;  %7570 = vmatpush1.bf16.msra.mxu1 %v8674_v21  ;;  %v8655_v19 = vcombine.high %v2497_v12, %v2521_v13  ;;  %v2545_v21 = vld [vmem:[%s10795_s10 + $0x16e0] sm:$0xff]  ;;  %v8688_v27 = vcombine.low %v2498_v14, %v2522_v15 }
 0x344   : > { %7508 = vmatprep.subr.bf16.mxu0 %v8643_v22  ;;  %7572 = vmatprep.subr.bf16.mxu1 %v8675_v24  ;;  %v2569_v22 = vld [vmem:[%s10795_s10 + $0x17a0] sm:$0xff]  ;;  %v2546_v24 = vld [vmem:[%s10795_s10 + $0x16e8] sm:$0xff] }
 0x345   : > { %v8657_v28 = vcombine.high %v2545_v21, %v2569_v22  ;;  %v8689_v29 = vcombine.high %v2546_v24, %v2570_v25  ;;  %v8658_v34 = vcombine.low %v2545_v21, %v2569_v22  ;;  %v8690_v35 = vcombine.low %v2546_v24, %v2570_v25  ;;  %v2068_v24 = vld [vmem:[%s10795_s10 + $0x7f8] sm:$0xff] }
 0x346   : > { %v6206_v21 = vrot.slane %v11309_v23, %v11217_v37  ;;  %v6210_v22 = vrot.slane %v11309_v23, %v11220_v38  ;;  %v2092_v25 = vld [vmem:[%s10795_s10 + $0x8b8] sm:$0xff] }
 0x347   : > { %7510 = vmatpush1.bf16.msra.mxu0 %v8644_v30  ;;  %7574 = vmatpush1.bf16.msra.mxu1 %v8676_v31  ;;  %v1827_v30 = vld [vmem:[%s10795_s10 + $0x70] sm:$0xff] }
 0x348   : > { %7512 = vmatprep.subr.bf16.mxu0 %v8645_v32  ;;  %7576 = vmatprep.subr.bf16.mxu1 %v8677_v33  ;;  %v1851_v31 = vld [vmem:[%s10795_s10 + $0x130] sm:$0xff]  ;;  %v1828_v32 = vld [vmem:[%s10795_s10 + $0x78] sm:$0xff] }
 0x349   : > { %v1852_v33 = vld [vmem:[%s10795_s10 + $0x138] sm:$0xff]  ;;  %v8691_v39 = vcombine.high %v1827_v30, %v1851_v31  ;;  %v8692_v46 = vcombine.low %v1827_v30, %v1851_v31  ;;  %v2115_v30 = vld [vmem:[%s10795_s10 + $0x970] sm:$0xff] }
 0x34a   : > { %v8723_v40 = vcombine.high %v1828_v32, %v1852_v33  ;;  %v8724_v43 = vcombine.low %v1828_v32, %v1852_v33  ;;  %v2139_v31 = vld [vmem:[%s10795_s10 + $0xa30] sm:$0xff]  ;;  %v6391_v33 = vcombine.low %v6206_v21, %v6210_v22 }
 0x34b   : > { %7514 = vmatpush1.bf16.msra.mxu0 %v8646_v41  ;;  %7578 = vmatpush1.bf16.msra.mxu1 %v8678_v42  ;;  %v1875_v41 = vld [vmem:[%s10795_s10 + $0x1f0] sm:$0xff] }
 0x34c   : > { %7516 = vmatprep.subr.bf16.mxu0 %v8647_v44  ;;  %7580 = vmatprep.subr.bf16.mxu1 %v8679_v45  ;;  %v1899_v42 = vld [vmem:[%s10795_s10 + $0x2b0] sm:$0xff]  ;;  %v1876_v44 = vld [vmem:[%s10795_s10 + $0x1f8] sm:$0xff] }
 0x34d   : > { %v1900_v45 = vld [vmem:[%s10795_s10 + $0x2b8] sm:$0xff]  ;;  %v8693_v47 = vcombine.high %v1875_v41, %v1899_v42  ;;  %v8694_v53 = vcombine.low %v1875_v41, %v1899_v42 }
 0x34e   : > { %v8725_v48 = vcombine.high %v1876_v44, %v1900_v45  ;;  %v8726_v58 = vcombine.low %v1876_v44, %v1900_v45  ;;  %v2163_v44 = vld [vmem:[%s10795_s10 + $0xaf0] sm:$0xff] }
 0x34f   : > { %7518 = vmatpush1.bf16.msra.mxu0 %v8648_v49  ;;  %7582 = vmatpush1.bf16.msra.mxu1 %v8680_v50  ;;  %v1923_v49 = vld [vmem:[%s10795_s10 + $0x370] sm:$0xff] }
 0x350   : > { %7520 = vmatprep.subr.bf16.mxu0 %v8649_v51  ;;  %7584 = vmatprep.subr.bf16.mxu1 %v8681_v52  ;;  %v1947_v50 = vld [vmem:[%s10795_s10 + $0x430] sm:$0xff]  ;;  %v1924_v51 = vld [vmem:[%s10795_s10 + $0x378] sm:$0xff] }
 0x351   : > { %v1948_v52 = vld [vmem:[%s10795_s10 + $0x438] sm:$0xff]  ;;  %v8695_v60 = vcombine.high %v1923_v49, %v1947_v50  ;;  %v8696_v4 = vcombine.low %v1923_v49, %v1947_v50  ;;  %v2187_v45 = vld [vmem:[%s10795_s10 + $0xbb0] sm:$0xff] }
 0x352   : > { %v8727_v61 = vcombine.high %v1924_v51, %v1948_v52  ;;  %v8728_v5 = vcombine.low %v1924_v51, %v1948_v52  ;;  %v2164_v49 = vld [vmem:[%s10795_s10 + $0xaf8] sm:$0xff] }
 0x353   : > { %7522 = vmatpush1.bf16.msra.mxu0 %v8650_v62  ;;  %7586 = vmatpush1.bf16.msra.mxu1 %v8682_v63  ;;  %v1971_v62 = vld [vmem:[%s10795_s10 + $0x4f0] sm:$0xff]  ;;  %v2188_v50 = vld [vmem:[%s10795_s10 + $0xbb8] sm:$0xff] }
 0x354   : > { %7524 = vmatprep.subr.bf16.mxu0 %v8651_v2  ;;  %7588 = vmatprep.subr.bf16.mxu1 %v8683_v59  ;;  %v1995_v63 = vld [vmem:[%s10795_s10 + $0x5b0] sm:$0xff]  ;;  %v1972_v2 = vld [vmem:[%s10795_s10 + $0x4f8] sm:$0xff] }
 0x355   : > { %v1996_v59 = vld [vmem:[%s10795_s10 + $0x5b8] sm:$0xff]  ;;  %v8697_v6 = vcombine.high %v1971_v62, %v1995_v63  ;;  %v8698_v12 = vcombine.low %v1971_v62, %v1995_v63  ;;  %v8737_v63 = vcombine.high %v2164_v49, %v2188_v50 }
 0x356   : > { %v8729_v7 = vcombine.high %v1972_v2, %v1996_v59  ;;  %v8730_v13 = vcombine.low %v1972_v2, %v1996_v59  ;;  %v2211_v2 = vld [vmem:[%s10795_s10 + $0xc70] sm:$0xff] }
 0x357   : > { %7526 = vmatpush1.bf16.msra.mxu0 %v8652_v8  ;;  %7590 = vmatpush1.bf16.msra.mxu1 %v8684_v9  ;;  %v2019_v8 = vld [vmem:[%s10795_s10 + $0x670] sm:$0xff] }
 0x358   : > { %7528 = vmatprep.subr.bf16.mxu0 %v8653_v10  ;;  %7592 = vmatprep.subr.bf16.mxu1 %v8685_v11  ;;  %v2043_v9 = vld [vmem:[%s10795_s10 + $0x730] sm:$0xff]  ;;  %v2020_v10 = vld [vmem:[%s10795_s10 + $0x678] sm:$0xff] }
 0x359   : > { %v2044_v11 = vld [vmem:[%s10795_s10 + $0x738] sm:$0xff]  ;;  %v8699_v14 = vcombine.high %v2019_v8, %v2043_v9  ;;  %v2235_v59 = vld [vmem:[%s10795_s10 + $0xd30] sm:$0xff] }
 0x35a   : > { %v8731_v15 = vcombine.high %v2020_v10, %v2044_v11 }
 0x35b   : > { %7530 = vmatpush1.bf16.msra.mxu0 %v8654_v17  ;;  %7594 = vmatpush1.bf16.msra.mxu1 %v8686_v18  ;;  %v2067_v17 = vld [vmem:[%s10795_s10 + $0x7f0] sm:$0xff] }
 0x35c   : > { %7532 = vmatprep.subr.bf16.mxu0 %v8655_v19  ;;  %7596 = vmatprep.subr.bf16.mxu1 %v8687_v20  ;;  %v2091_v18 = vld [vmem:[%s10795_s10 + $0x8b0] sm:$0xff]  ;;  %v6198_v19 = vrot.slane %v11309_v23, %v11211_v0  ;;  %v6202_v20 = vrot.slane %v11309_v23, %v11214_v36 }
 0x35d   : > { %v8702_v23 = vcombine.low %v2067_v17, %v2091_v18 }
 0x35e   : > { %v6390_v32 = vcombine.low %v6198_v19, %v6202_v20  ;;  %v8708_v19 = vcombine.low %v2211_v2, %v2235_v59 }
 0x35f   : > { %7534 = vmatpush1.bf16.msra.mxu0 %v8656_v26  ;;  %7598 = vmatpush1.bf16.msra.mxu1 %v8688_v27  ;;  %v8700_v26 = vcombine.low %v2019_v8, %v2043_v9  ;;  %v8732_v27 = vcombine.low %v2020_v10, %v2044_v11  ;;  %v8706_v8 = vcombine.low %v2163_v44, %v2187_v45 }
 0x360   : > { %7536 = vmatprep.subr.bf16.mxu0 %v8657_v28  ;;  %7600 = vmatprep.subr.bf16.mxu1 %v8689_v29  ;;  %v8701_v28 = vcombine.high %v2067_v17, %v2091_v18  ;;  %v8733_v29 = vcombine.high %v2068_v24, %v2092_v25  ;;  %v8738_v10 = vcombine.low %v2164_v49, %v2188_v50  ;;  %v2260_v17 = vld [vmem:[%s10795_s10 + $0xdf8] sm:$0xff]  ;;  %v2451_v50 = vld [vmem:[%s10795_s10 + $0x13f0] sm:$0xff] }
 0x361   : > { %v8707_v11 = vcombine.high %v2211_v2, %v2235_v59  ;;  %v2284_v18 = vld [vmem:[%s10795_s10 + $0xeb8] sm:$0xff]  ;;  %v2523_v2 = vld [vmem:[%s10795_s10 + $0x1630] sm:$0xff] }
 0x362   : > { %v8741_v22 = vcombine.high %v2260_v17, %v2284_v18  ;;  %v2500_v59 = vld [vmem:[%s10795_s10 + $0x1578] sm:$0xff] }
 0x363   : > { %7538 = vmatpush1.bf16.msra.mxu0 %v8658_v34  ;;  %7602 = vmatpush1.bf16.msra.mxu1 %v8690_v35  ;;  %v2116_v34 = vld [vmem:[%s10795_s10 + $0x978] sm:$0xff] }
 0x364   : > { %7604 = vmatprep.subr.bf16.mxu0 %v8691_v39  ;;  %7668 = vmatprep.subr.bf16.mxu1 %v8723_v40  ;;  %v2140_v35 = vld [vmem:[%s10795_s10 + $0xa38] sm:$0xff]  ;;  %v8734_v39 = vcombine.low %v2068_v24, %v2092_v25  ;;  %v8703_v40 = vcombine.high %v2115_v30, %v2139_v31  ;;  %v2307_v24 = vld [vmem:[%s10795_s10 + $0xf70] sm:$0xff] }
 0x365   : > { %v8735_v42 = vcombine.high %v2116_v34, %v2140_v35  ;;  %v2331_v25 = vld [vmem:[%s10795_s10 + $0x1030] sm:$0xff] }
 0x366   : > { %5045 = vmatmul.mubr.f32.vlgmr.msra.gmra.mrb[12].mxu0 %v11292_v3  ;;  %5116 = vmatmul.mubr.f32.vlgmr.msra.gmra.mrb[12].mxu1 %v11292_v3 }
 0x367   : > { %7606 = vmatpush1.bf16.msra.mxu0 %v8692_v46  ;;  %7670 = vmatpush1.bf16.msra.mxu1 %v8724_v43 }
 0x368   : > { %7608 = vmatprep.subr.bf16.mxu0 %v8693_v47  ;;  %7672 = vmatprep.subr.bf16.mxu1 %v8725_v48  ;;  %v6398_v47 = vrot.slane %v6390_v32, %v11138_v16  ;;  %v6405_v48 = vrot.slane %v6391_v33, %v11138_v16  ;;  %v2355_v32 = vld [vmem:[%s10795_s10 + $0x10f0] sm:$0xff] }
 0x369   : > { %5186 = vmatprep.mubr.f32.mxu0 %v10791_v1  ;;  %5257 = vmatprep.mubr.f32.mxu1 %v10791_v1  ;;  %v2379_v33 = vld [vmem:[%s10795_s10 + $0x11b0] sm:$0xff] }
 0x36b   : > { %7610 = vmatpush1.bf16.msra.mxu0 %v8694_v53  ;;  %7674 = vmatpush1.bf16.msra.mxu1 %v8726_v58  ;;  %v8704_v53 = vcombine.low %v2115_v30, %v2139_v31  ;;  %v8711_v30 = vcombine.high %v2307_v24, %v2331_v25 }
 0x36c   : > { %7612 = vmatprep.subr.bf16.mxu0 %v8695_v60  ;;  %7676 = vmatprep.subr.bf16.mxu1 %v8727_v61  ;;  %v8736_v60 = vcombine.low %v2116_v34, %v2140_v35  ;;  %v8705_v61 = vcombine.high %v2163_v44, %v2187_v45  ;;  %v2356_v34 = vld [vmem:[%s10795_s10 + $0x10f8] sm:$0xff]  ;;  %v2427_v44 = vld [vmem:[%s10795_s10 + $0x1330] sm:$0xff] }
 0x36d   : > { %v2380_v35 = vld [vmem:[%s10795_s10 + $0x11b8] sm:$0xff] }
 0x36e   : > { %v2404_v45 = vld [vmem:[%s10795_s10 + $0x1278] sm:$0xff] }
 0x36f   : > { %7614 = vmatpush1.bf16.msra.mxu0 %v8696_v4  ;;  %7678 = vmatpush1.bf16.msra.mxu1 %v8728_v5  ;;  %v6406_v5 = vcombine.low %v6398_v47, %v6405_v48  ;;  %v8746_v47 = vcombine.low %v2356_v34, %v2380_v35 }
 0x370   : > { %7616 = vmatprep.subr.bf16.mxu0 %v8697_v6  ;;  %7680 = vmatprep.subr.bf16.mxu1 %v8729_v7  ;;  %v2212_v6 = vld [vmem:[%s10795_s10 + $0xc78] sm:$0xff] }
 0x371   : > { %v2236_v7 = vld [vmem:[%s10795_s10 + $0xd38] sm:$0xff] }
 0x372   : > { %v8740_v20 = vcombine.low %v2212_v6, %v2236_v7 }
 0x373   : > { %7618 = vmatpush1.bf16.msra.mxu0 %v8698_v12  ;;  %7682 = vmatpush1.bf16.msra.mxu1 %v8730_v13  ;;  %v8739_v12 = vcombine.high %v2212_v6, %v2236_v7  ;;  %v2259_v13 = vld [vmem:[%s10795_s10 + $0xdf0] sm:$0xff] }
 0x374   : > { %7620 = vmatprep.subr.bf16.mxu0 %v8699_v14  ;;  %7684 = vmatprep.subr.bf16.mxu1 %v8731_v15  ;;  %v2283_v14 = vld [vmem:[%s10795_s10 + $0xeb0] sm:$0xff] }
 0x375   : > { %v8709_v21 = vcombine.high %v2259_v13, %v2283_v14 }
 0x377   : > { %7622 = vmatpush1.bf16.msra.mxu0 %v8700_v26  ;;  %7686 = vmatpush1.bf16.msra.mxu1 %v8732_v27  ;;  %v2308_v26 = vld [vmem:[%s10795_s10 + $0xf78] sm:$0xff] }
 0x378   : > { %7624 = vmatprep.subr.bf16.mxu0 %v8701_v28  ;;  %7688 = vmatprep.subr.bf16.mxu1 %v8733_v29  ;;  %v2332_v27 = vld [vmem:[%s10795_s10 + $0x1038] sm:$0xff]  ;;  %v8710_v28 = vcombine.low %v2259_v13, %v2283_v14  ;;  %v8742_v29 = vcombine.low %v2260_v17, %v2284_v18  ;;  %v1829_v18 = vld [vmem:[%s10795_s10 + $0x80] sm:$0xff] }
 0x379   : > { %v4620_v41 = vpop.f32.mrb[6].mxu0  ;;  %v4691_v46 = vpop.f32.mrb[6].mxu1  ;;  %v8743_v31 = vcombine.high %v2308_v26, %v2332_v27 }
 0x37a   : > { %v4622_v43 = vpop.f32.mrb[7].mxu0  ;;  %v4693_v52 = vpop.f32.mrb[7].mxu1 }
 0x37b   : > { %v5931_v51 = vcombine.low %v4620_v41, %v4622_v43  ;;  %7626 = vmatpush1.bf16.msra.mxu0 %v8702_v23  ;;  %v5932_v58 = vcombine.low %v4691_v46, %v4693_v52  ;;  %7690 = vmatpush1.bf16.msra.mxu1 %v8734_v39  ;;  %v8712_v23 = vcombine.low %v2307_v24, %v2331_v25  ;;  %v2428_v46 = vld [vmem:[%s10795_s10 + $0x1338] sm:$0xff] }
 0x37c   : > { %7628 = vmatprep.subr.bf16.mxu0 %v8703_v40  ;;  %7692 = vmatprep.subr.bf16.mxu1 %v8735_v42  ;;  %v8744_v39 = vcombine.low %v2308_v26, %v2332_v27  ;;  %v8713_v40 = vcombine.high %v2355_v32, %v2379_v33  ;;  %v8745_v41 = vcombine.high %v2356_v34, %v2380_v35  ;;  %v2403_v42 = vld [vmem:[%s10795_s10 + $0x1270] sm:$0xff]  ;;  %v2452_v52 = vld [vmem:[%s10795_s10 + $0x13f8] sm:$0xff]  ;;  %v1877_v27 = vld [vmem:[%s10795_s10 + $0x200] sm:$0xff] }
 0x37d   : > { %v5939_v62 = vrot.slane %v5931_v51, %v11138_v16  ;;  %v5946_v4 = vrot.slane %v5932_v58, %v11138_v16  ;;  %v8714_v43 = vcombine.low %v2355_v32, %v2379_v33  ;;  %v8715_v48 = vcombine.high %v2403_v42, %v2427_v44  ;;  %v2475_v51 = vld [vmem:[%s10795_s10 + $0x14b0] sm:$0xff]  ;;  %v1925_v35 = vld [vmem:[%s10795_s10 + $0x380] sm:$0xff] }
 0x37e   : > { %v8747_v49 = vcombine.high %v2404_v45, %v2428_v46  ;;  %v8716_v58 = vcombine.low %v2403_v42, %v2427_v44 }
 0x37f   : > { %7630 = vmatpush1.bf16.msra.mxu0 %v8704_v53  ;;  %v5947_v9 = vcombine.low %v5939_v62, %v5946_v4  ;;  %7694 = vmatpush1.bf16.msra.mxu1 %v8736_v60  ;;  %v2476_v53 = vld [vmem:[%s10795_s10 + $0x14b8] sm:$0xff]  ;;  %v8748_v60 = vcombine.low %v2404_v45, %v2428_v46  ;;  %v1973_v46 = vld [vmem:[%s10795_s10 + $0x500] sm:$0xff] }
 0x380   : > { %7632 = vmatprep.subr.bf16.mxu0 %v8705_v61  ;;  %7696 = vmatprep.subr.bf16.mxu1 %v8737_v63  ;;  %v8717_v61 = vcombine.high %v2451_v50, %v2475_v51  ;;  %v8749_v62 = vcombine.high %v2452_v52, %v2476_v53  ;;  %v2499_v63 = vld [vmem:[%s10795_s10 + $0x1570] sm:$0xff]  ;;  %v2524_v4 = vld [vmem:[%s10795_s10 + $0x1638] sm:$0xff]  ;;  %v8750_v6 = vcombine.low %v2452_v52, %v2476_v53  ;;  %v2021_v52 = vld [vmem:[%s10795_s10 + $0x680] sm:$0xff] }
 0x381   : > { %v6558_v15 = vadd.f32 %v6406_v5, %v5947_v9  ;;  %v8718_v5 = vcombine.low %v2451_v50, %v2475_v51  ;;  %v8719_v7 = vcombine.high %v2499_v63, %v2523_v2  ;;  %v2547_v9 = vld [vmem:[%s10795_s10 + $0x16f0] sm:$0xff]  ;;  %v8720_v13 = vcombine.low %v2499_v63, %v2523_v2  ;;  %v2045_v53 = vld [vmem:[%s10795_s10 + $0x740] sm:$0xff] }
 0x382   : > { %v8752_v14 = vcombine.low %v2500_v59, %v2524_v4  ;;  %v8763_v2 = vcombine.high %v2021_v52, %v2045_v53 }
 0x383   : > { %7634 = vmatpush1.bf16.msra.mxu0 %v8706_v8  ;;  %6570 = vst [vmem:[%s11159_s29 + $0x18] sm:$0xff] %v6558_v15  ;;  %7698 = vmatpush1.bf16.msra.mxu1 %v8738_v10  ;;  %v8751_v8 = vcombine.high %v2500_v59, %v2524_v4  ;;  %v2571_v10 = vld [vmem:[%s10795_s10 + $0x17b0] sm:$0xff]  ;;  %v2069_v4 = vld [vmem:[%s10795_s10 + $0x800] sm:$0xff] }
 0x384   : > { %7636 = vmatprep.subr.bf16.mxu0 %v8707_v11  ;;  %7700 = vmatprep.subr.bf16.mxu1 %v8739_v12  ;;  %v2548_v11 = vld [vmem:[%s10795_s10 + $0x16f8] sm:$0xff]  ;;  %v8721_v15 = vcombine.high %v2547_v9, %v2571_v10 }
 0x385   : > { %v2572_v12 = vld [vmem:[%s10795_s10 + $0x17b8] sm:$0xff] }
 0x386   : > { %v8753_v17 = vcombine.high %v2548_v11, %v2572_v12  ;;  %v8754_v24 = vcombine.low %v2548_v11, %v2572_v12  ;;  %v2094_v11 = vld [vmem:[%s10795_s10 + $0x8c8] sm:$0xff]  ;;  %v8764_v12 = vcombine.low %v2021_v52, %v2045_v53 }
 0x387   : > { %7638 = vmatpush1.bf16.msra.mxu0 %v8708_v19  ;;  %7702 = vmatpush1.bf16.msra.mxu1 %v8740_v20  ;;  %v1853_v19 = vld [vmem:[%s10795_s10 + $0x140] sm:$0xff]  ;;  %v1830_v20 = vld [vmem:[%s10795_s10 + $0x88] sm:$0xff] }
 0x388   : > { %7640 = vmatprep.subr.bf16.mxu0 %v8709_v21  ;;  %7704 = vmatprep.subr.bf16.mxu1 %v8741_v22  ;;  %v1854_v21 = vld [vmem:[%s10795_s10 + $0x148] sm:$0xff]  ;;  %v8722_v22 = vcombine.low %v2547_v9, %v2571_v10  ;;  %v8755_v25 = vcombine.high %v1829_v18, %v1853_v19 }
 0x389   : > { %v8787_v26 = vcombine.high %v1830_v20, %v1854_v21  ;;  %v8788_v32 = vcombine.low %v1830_v20, %v1854_v21  ;;  %v2070_v10 = vld [vmem:[%s10795_s10 + $0x808] sm:$0xff] }
 0x38a   : > { %v2118_v21 = vld [vmem:[%s10795_s10 + $0x988] sm:$0xff] }
 0x38b   : > { %7642 = vmatpush1.bf16.msra.mxu0 %v8710_v28  ;;  %7706 = vmatpush1.bf16.msra.mxu1 %v8742_v29  ;;  %v1901_v28 = vld [vmem:[%s10795_s10 + $0x2c0] sm:$0xff]  ;;  %v1878_v29 = vld [vmem:[%s10795_s10 + $0x208] sm:$0xff] }
 0x38c   : > { %7644 = vmatprep.subr.bf16.mxu0 %v8711_v30  ;;  %7708 = vmatprep.subr.bf16.mxu1 %v8743_v31  ;;  %v1902_v30 = vld [vmem:[%s10795_s10 + $0x2c8] sm:$0xff]  ;;  %v8756_v31 = vcombine.low %v1829_v18, %v1853_v19  ;;  %v8757_v33 = vcombine.high %v1877_v27, %v1901_v28  ;;  %v2141_v18 = vld [vmem:[%s10795_s10 + $0xa40] sm:$0xff] }
 0x38d   : > { %v8789_v34 = vcombine.high %v1878_v29, %v1902_v30  ;;  %v8790_v42 = vcombine.low %v1878_v29, %v1902_v30  ;;  %v2165_v29 = vld [vmem:[%s10795_s10 + $0xb00] sm:$0xff] }
 0x38e   : > { %v2189_v30 = vld [vmem:[%s10795_s10 + $0xbc0] sm:$0xff] }
 0x38f   : > { %7646 = vmatpush1.bf16.msra.mxu0 %v8712_v23  ;;  %7710 = vmatpush1.bf16.msra.mxu1 %v8744_v39  ;;  %v1949_v23 = vld [vmem:[%s10795_s10 + $0x440] sm:$0xff]  ;;  %v1926_v39 = vld [vmem:[%s10795_s10 + $0x388] sm:$0xff]  ;;  %v8770_v52 = vcombine.low %v2165_v29, %v2189_v30 }
 0x390   : > { %7648 = vmatprep.subr.bf16.mxu0 %v8713_v40  ;;  %7712 = vmatprep.subr.bf16.mxu1 %v8745_v41  ;;  %v1950_v40 = vld [vmem:[%s10795_s10 + $0x448] sm:$0xff]  ;;  %v8758_v41 = vcombine.low %v1877_v27, %v1901_v28  ;;  %v8759_v44 = vcombine.high %v1925_v35, %v1949_v23 }
 0x391   : > { %v8791_v45 = vcombine.high %v1926_v39, %v1950_v40 }
 0x393   : > { %7650 = vmatpush1.bf16.msra.mxu0 %v8714_v43  ;;  %7714 = vmatpush1.bf16.msra.mxu1 %v8746_v47  ;;  %v1997_v43 = vld [vmem:[%s10795_s10 + $0x5c0] sm:$0xff]  ;;  %v1974_v47 = vld [vmem:[%s10795_s10 + $0x508] sm:$0xff] }
 0x394   : > { %7652 = vmatprep.subr.bf16.mxu0 %v8715_v48  ;;  %7716 = vmatprep.subr.bf16.mxu1 %v8747_v49  ;;  %v1998_v48 = vld [vmem:[%s10795_s10 + $0x5c8] sm:$0xff]  ;;  %v8792_v49 = vcombine.low %v1926_v39, %v1950_v40  ;;  %v8761_v50 = vcombine.high %v1973_v46, %v1997_v43 }
 0x395   : > { %v8793_v51 = vcombine.high %v1974_v47, %v1998_v48  ;;  %v8794_v63 = vcombine.low %v1974_v47, %v1998_v48  ;;  %v2213_v47 = vld [vmem:[%s10795_s10 + $0xc80] sm:$0xff] }
 0x396   : > { %v2237_v48 = vld [vmem:[%s10795_s10 + $0xd40] sm:$0xff] }
 0x397   : > { %7654 = vmatpush1.bf16.msra.mxu0 %v8716_v58  ;;  %7718 = vmatpush1.bf16.msra.mxu1 %v8748_v60  ;;  %v2022_v58 = vld [vmem:[%s10795_s10 + $0x688] sm:$0xff] }
 0x398   : > { %7656 = vmatprep.subr.bf16.mxu0 %v8717_v61  ;;  %7720 = vmatprep.subr.bf16.mxu1 %v8749_v62  ;;  %v2046_v60 = vld [vmem:[%s10795_s10 + $0x748] sm:$0xff]  ;;  %v8762_v61 = vcombine.low %v1973_v46, %v1997_v43  ;;  %v11474_v62 = vld [vmem:[%s11102_s27 + $0x10] sm:$0xff] }
 0x399   : > { %v8795_v59 = vcombine.high %v2022_v58, %v2046_v60  ;;  %v6226_v9 = vrot.slane %v11474_v62, %v11118_v57 }
 0x39b   : > { %7658 = vmatpush1.bf16.msra.mxu0 %v8718_v5  ;;  %7722 = vmatpush1.bf16.msra.mxu1 %v8750_v6  ;;  %v2093_v5 = vld [vmem:[%s10795_s10 + $0x8c0] sm:$0xff]  ;;  %v6214_v6 = vrot.slane %v11474_v62, %v11109_v54 }
 0x39c   : > { %7660 = vmatprep.subr.bf16.mxu0 %v8719_v7  ;;  %7724 = vmatprep.subr.bf16.mxu1 %v8751_v8  ;;  %v6218_v7 = vrot.slane %v11474_v62, %v11112_v55  ;;  %v6222_v8 = vrot.slane %v11474_v62, %v11115_v56 }
 0x39e   : > { %v6407_v19 = vcombine.low %v6214_v6, %v6218_v7  ;;  %v6408_v20 = vcombine.low %v6222_v8, %v6226_v9  ;;  %v8772_v6 = vcombine.low %v2213_v47, %v2237_v48 }
 0x39f   : > { %7662 = vmatpush1.bf16.msra.mxu0 %v8720_v13  ;;  %7726 = vmatpush1.bf16.msra.mxu1 %v8752_v14  ;;  %v8796_v13 = vcombine.low %v2022_v58, %v2046_v60  ;;  %v8765_v14 = vcombine.high %v2069_v4, %v2093_v5  ;;  %v8771_v60 = vcombine.high %v2213_v47, %v2237_v48  ;;  %v2525_v47 = vld [vmem:[%s10795_s10 + $0x1640] sm:$0xff]  ;;  %v2502_v48 = vld [vmem:[%s10795_s10 + $0x1588] sm:$0xff] }
 0x3a0   : > { %7664 = vmatprep.subr.bf16.mxu0 %v8721_v15  ;;  %7728 = vmatprep.subr.bf16.mxu1 %v8753_v17  ;;  %v8797_v15 = vcombine.high %v2070_v10, %v2094_v11  ;;  %v2117_v17 = vld [vmem:[%s10795_s10 + $0x980] sm:$0xff] }
 0x3a3   : > { %7666 = vmatpush1.bf16.msra.mxu0 %v8722_v22  ;;  %7730 = vmatpush1.bf16.msra.mxu1 %v8754_v24  ;;  %v2142_v22 = vld [vmem:[%s10795_s10 + $0xa48] sm:$0xff]  ;;  %v8766_v24 = vcombine.low %v2069_v4, %v2093_v5 }
 0x3a4   : > { %7732 = vmatprep.subr.bf16.mxu0 %v8755_v25  ;;  %7796 = vmatprep.subr.bf16.mxu1 %v8787_v26  ;;  %v8798_v25 = vcombine.low %v2070_v10, %v2094_v11  ;;  %v8767_v26 = vcombine.high %v2117_v17, %v2141_v18  ;;  %v8799_v28 = vcombine.high %v2118_v21, %v2142_v22  ;;  %v2262_v4 = vld [vmem:[%s10795_s10 + $0xe08] sm:$0xff]  ;;  %v2309_v10 = vld [vmem:[%s10795_s10 + $0xf80] sm:$0xff] }
 0x3a5   : > { %v2286_v5 = vld [vmem:[%s10795_s10 + $0xec8] sm:$0xff]  ;;  %v2333_v11 = vld [vmem:[%s10795_s10 + $0x1040] sm:$0xff] }
 0x3a6   : > { %5187 = vmatmul.mubr.f32.vlgmr.msra.gmra.mrb[14].mxu0 %v11292_v3  ;;  %5258 = vmatmul.mubr.f32.vlgmr.msra.gmra.mrb[14].mxu1 %v11292_v3  ;;  %v8760_v3 = vcombine.low %v1925_v35, %v1949_v23  ;;  %v2166_v35 = vld [vmem:[%s10795_s10 + $0xb08] sm:$0xff]  ;;  %v8805_v9 = vcombine.high %v2262_v4, %v2286_v5 }
 0x3a7   : > { %7734 = vmatpush1.bf16.msra.mxu0 %v8756_v31  ;;  %7798 = vmatpush1.bf16.msra.mxu1 %v8788_v32  ;;  %v2190_v23 = vld [vmem:[%s10795_s10 + $0xbc8] sm:$0xff] }
 0x3a8   : > { %7736 = vmatprep.subr.bf16.mxu0 %v8757_v33  ;;  %7800 = vmatprep.subr.bf16.mxu1 %v8789_v34  ;;  %v6415_v33 = vrot.slane %v6407_v19, %v11138_v16  ;;  %v6422_v34 = vrot.slane %v6408_v20, %v11138_v16  ;;  %v8801_v43 = vcombine.high %v2166_v35, %v2190_v23  ;;  %v2357_v19 = vld [vmem:[%s10795_s10 + $0x1100] sm:$0xff] }
 0x3a9   : > { %5328 = vmatprep.mubr.f32.mxu0 %v10791_v1  ;;  %5399 = vmatprep.mubr.f32.mxu1 %v10791_v1  ;;  %v8802_v58 = vcombine.low %v2166_v35, %v2190_v23  ;;  %v2381_v20 = vld [vmem:[%s10795_s10 + $0x11c0] sm:$0xff] }
 0x3aa   : > { %v2453_v23 = vld [vmem:[%s10795_s10 + $0x1400] sm:$0xff] }
 0x3ab   : > { %7738 = vmatpush1.bf16.msra.mxu0 %v8758_v41  ;;  %7802 = vmatpush1.bf16.msra.mxu1 %v8790_v42  ;;  %v8768_v41 = vcombine.low %v2117_v17, %v2141_v18  ;;  %v8775_v17 = vcombine.high %v2309_v10, %v2333_v11 }
 0x3ac   : > { %7740 = vmatprep.subr.bf16.mxu0 %v8759_v44  ;;  %7804 = vmatprep.subr.bf16.mxu1 %v8791_v45  ;;  %v8800_v44 = vcombine.low %v2118_v21, %v2142_v22  ;;  %v8769_v45 = vcombine.high %v2165_v29, %v2189_v30  ;;  %v2358_v21 = vld [vmem:[%s10795_s10 + $0x1108] sm:$0xff]  ;;  %v2429_v29 = vld [vmem:[%s10795_s10 + $0x1340] sm:$0xff] }
 0x3ad   : > { %v2382_v22 = vld [vmem:[%s10795_s10 + $0x11c8] sm:$0xff] }
 0x3ae   : > { %v2406_v30 = vld [vmem:[%s10795_s10 + $0x1288] sm:$0xff] }
 0x3af   : > { %7742 = vmatpush1.bf16.msra.mxu0 %v8760_v3  ;;  %7806 = vmatpush1.bf16.msra.mxu1 %v8792_v49  ;;  %v6423_v49 = vcombine.low %v6415_v33, %v6422_v34  ;;  %v8810_v33 = vcombine.low %v2358_v21, %v2382_v22 }
 0x3b0   : > { %7744 = vmatprep.subr.bf16.mxu0 %v8761_v50  ;;  %7808 = vmatprep.subr.bf16.mxu1 %v8793_v51  ;;  %v2214_v50 = vld [vmem:[%s10795_s10 + $0xc88] sm:$0xff] }
 0x3b1   : > { %v2238_v51 = vld [vmem:[%s10795_s10 + $0xd48] sm:$0xff] }
 0x3b2   : > { %v8804_v7 = vcombine.low %v2214_v50, %v2238_v51 }
 0x3b3   : > { %7746 = vmatpush1.bf16.msra.mxu0 %v8762_v61  ;;  %7810 = vmatpush1.bf16.msra.mxu1 %v8794_v63  ;;  %v8803_v61 = vcombine.high %v2214_v50, %v2238_v51  ;;  %v2261_v63 = vld [vmem:[%s10795_s10 + $0xe00] sm:$0xff] }
 0x3b4   : > { %7748 = vmatprep.subr.bf16.mxu0 %v8763_v2  ;;  %7812 = vmatprep.subr.bf16.mxu1 %v8795_v59  ;;  %v2285_v2 = vld [vmem:[%s10795_s10 + $0xec0] sm:$0xff] }
 0x3b5   : > { %v8773_v8 = vcombine.high %v2261_v63, %v2285_v2 }
 0x3b7   : > { %7750 = vmatpush1.bf16.msra.mxu0 %v8764_v12  ;;  %7814 = vmatpush1.bf16.msra.mxu1 %v8796_v13  ;;  %v2310_v12 = vld [vmem:[%s10795_s10 + $0xf88] sm:$0xff] }
 0x3b8   : > { %7752 = vmatprep.subr.bf16.mxu0 %v8765_v14  ;;  %7816 = vmatprep.subr.bf16.mxu1 %v8797_v15  ;;  %v2334_v13 = vld [vmem:[%s10795_s10 + $0x1048] sm:$0xff]  ;;  %v8774_v14 = vcombine.low %v2261_v63, %v2285_v2  ;;  %v8806_v15 = vcombine.low %v2262_v4, %v2286_v5  ;;  %v1831_v5 = vld [vmem:[%s10795_s10 + $0x90] sm:$0xff] }
 0x3b9   : > { %v4762_v27 = vpop.f32.mrb[8].mxu0  ;;  %v4833_v31 = vpop.f32.mrb[8].mxu1  ;;  %v8807_v18 = vcombine.high %v2310_v12, %v2334_v13 }
 0x3ba   : > { %v4764_v32 = vpop.f32.mrb[9].mxu0  ;;  %v4835_v40 = vpop.f32.mrb[9].mxu1 }
 0x3bb   : > { %v5948_v39 = vcombine.low %v4762_v27, %v4764_v32  ;;  %7754 = vmatpush1.bf16.msra.mxu0 %v8766_v24  ;;  %v5949_v42 = vcombine.low %v4833_v31, %v4835_v40  ;;  %7818 = vmatpush1.bf16.msra.mxu1 %v8798_v25  ;;  %v8776_v24 = vcombine.low %v2309_v10, %v2333_v11  ;;  %v2430_v31 = vld [vmem:[%s10795_s10 + $0x1348] sm:$0xff] }
 0x3bc   : > { %7756 = vmatprep.subr.bf16.mxu0 %v8767_v26  ;;  %7820 = vmatprep.subr.bf16.mxu1 %v8799_v28  ;;  %v8808_v25 = vcombine.low %v2310_v12, %v2334_v13  ;;  %v8777_v26 = vcombine.high %v2357_v19, %v2381_v20  ;;  %v8809_v27 = vcombine.high %v2358_v21, %v2382_v22  ;;  %v2405_v28 = vld [vmem:[%s10795_s10 + $0x1280] sm:$0xff]  ;;  %v2454_v40 = vld [vmem:[%s10795_s10 + $0x1408] sm:$0xff]  ;;  %v1879_v13 = vld [vmem:[%s10795_s10 + $0x210] sm:$0xff] }
 0x3bd   : > { %v5956_v46 = vrot.slane %v5948_v39, %v11138_v16  ;;  %v5963_v3 = vrot.slane %v5949_v42, %v11138_v16  ;;  %v8778_v32 = vcombine.low %v2357_v19, %v2381_v20  ;;  %v8779_v34 = vcombine.high %v2405_v28, %v2429_v29  ;;  %v2477_v39 = vld [vmem:[%s10795_s10 + $0x14c0] sm:$0xff]  ;;  %v1927_v22 = vld [vmem:[%s10795_s10 + $0x390] sm:$0xff] }
 0x3be   : > { %v8811_v35 = vcombine.high %v2406_v30, %v2430_v31  ;;  %v8780_v42 = vcombine.low %v2405_v28, %v2429_v29 }
 0x3bf   : > { %7758 = vmatpush1.bf16.msra.mxu0 %v8768_v41  ;;  %v5964_v53 = vcombine.low %v5956_v46, %v5963_v3  ;;  %7822 = vmatpush1.bf16.msra.mxu1 %v8800_v44  ;;  %v2478_v41 = vld [vmem:[%s10795_s10 + $0x14c8] sm:$0xff]  ;;  %v8812_v44 = vcombine.low %v2406_v30, %v2430_v31 }
 0x3c0   : > { %7760 = vmatprep.subr.bf16.mxu0 %v8769_v45  ;;  %7824 = vmatprep.subr.bf16.mxu1 %v8801_v43  ;;  %v8781_v45 = vcombine.high %v2453_v23, %v2477_v39  ;;  %v8813_v46 = vcombine.high %v2454_v40, %v2478_v41  ;;  %v2501_v43 = vld [vmem:[%s10795_s10 + $0x1580] sm:$0xff]  ;;  %v2526_v3 = vld [vmem:[%s10795_s10 + $0x1648] sm:$0xff]  ;;  %v8814_v50 = vcombine.low %v2454_v40, %v2478_v41 }
 0x3c1   : > { %v6559_v59 = vadd.f32 %v6423_v49, %v5964_v53  ;;  %v8782_v49 = vcombine.low %v2453_v23, %v2477_v39  ;;  %v8783_v51 = vcombine.high %v2501_v43, %v2525_v47  ;;  %v2549_v53 = vld [vmem:[%s10795_s10 + $0x1700] sm:$0xff]  ;;  %v8784_v63 = vcombine.low %v2501_v43, %v2525_v47 }
 0x3c2   : > { %v8816_v2 = vcombine.low %v2502_v48, %v2526_v3 }
 0x3c3   : > { %7762 = vmatpush1.bf16.msra.mxu0 %v8770_v52  ;;  %6571 = vst [vmem:[%s11159_s29 + $0x20] sm:$0xff] %v6559_v59  ;;  %7826 = vmatpush1.bf16.msra.mxu1 %v8802_v58  ;;  %v8815_v52 = vcombine.high %v2502_v48, %v2526_v3  ;;  %v2573_v58 = vld [vmem:[%s10795_s10 + $0x17c0] sm:$0xff] }
 0x3c4   : > { %7764 = vmatprep.subr.bf16.mxu0 %v8771_v60  ;;  %7828 = vmatprep.subr.bf16.mxu1 %v8803_v61  ;;  %v2550_v60 = vld [vmem:[%s10795_s10 + $0x1708] sm:$0xff]  ;;  %v8785_v59 = vcombine.high %v2549_v53, %v2573_v58 }
 0x3c5   : > { %v2574_v61 = vld [vmem:[%s10795_s10 + $0x17c8] sm:$0xff] }
 0x3c6   : > { %v8817_v4 = vcombine.high %v2550_v60, %v2574_v61  ;;  %v8818_v10 = vcombine.low %v2550_v60, %v2574_v61  ;;  %v2072_v60 = vld [vmem:[%s10795_s10 + $0x818] sm:$0xff] }
 0x3c7   : > { %7766 = vmatpush1.bf16.msra.mxu0 %v8772_v6  ;;  %7830 = vmatpush1.bf16.msra.mxu1 %v8804_v7  ;;  %v1855_v6 = vld [vmem:[%s10795_s10 + $0x150] sm:$0xff]  ;;  %v1832_v7 = vld [vmem:[%s10795_s10 + $0x98] sm:$0xff] }
 0x3c8   : > { %7768 = vmatprep.subr.bf16.mxu0 %v8773_v8  ;;  %7832 = vmatprep.subr.bf16.mxu1 %v8805_v9  ;;  %v1856_v8 = vld [vmem:[%s10795_s10 + $0x158] sm:$0xff]  ;;  %v8786_v9 = vcombine.low %v2549_v53, %v2573_v58  ;;  %v8819_v11 = vcombine.high %v1831_v5, %v1855_v6  ;;  %v6238_v53 = vrot.slane %v11474_v62, %v11217_v37 }
 0x3c9   : > { %v8851_v12 = vcombine.high %v1832_v7, %v1856_v8  ;;  %v8852_v19 = vcombine.low %v1832_v7, %v1856_v8  ;;  %v6242_v58 = vrot.slane %v11474_v62, %v11220_v38  ;;  %v2096_v61 = vld [vmem:[%s10795_s10 + $0x8d8] sm:$0xff] }
 0x3cb   : > { %7770 = vmatpush1.bf16.msra.mxu0 %v8774_v14  ;;  %7834 = vmatpush1.bf16.msra.mxu1 %v8806_v15  ;;  %v1903_v14 = vld [vmem:[%s10795_s10 + $0x2d0] sm:$0xff]  ;;  %v1880_v15 = vld [vmem:[%s10795_s10 + $0x218] sm:$0xff]  ;;  %v6425_v8 = vcombine.low %v6238_v53, %v6242_v58 }
 0x3cc   : > { %7772 = vmatprep.subr.bf16.mxu0 %v8775_v17  ;;  %7836 = vmatprep.subr.bf16.mxu1 %v8807_v18  ;;  %v1904_v17 = vld [vmem:[%s10795_s10 + $0x2d8] sm:$0xff]  ;;  %v8820_v18 = vcombine.low %v1831_v5, %v1855_v6  ;;  %v8821_v20 = vcombine.high %v1879_v13, %v1903_v14  ;;  %v8822_v28 = vcombine.low %v1879_v13, %v1903_v14  ;;  %v2119_v5 = vld [vmem:[%s10795_s10 + $0x990] sm:$0xff] }
 0x3cd   : > { %v8853_v21 = vcombine.high %v1880_v15, %v1904_v17  ;;  %v8854_v29 = vcombine.low %v1880_v15, %v1904_v17  ;;  %v2143_v6 = vld [vmem:[%s10795_s10 + $0xa50] sm:$0xff] }
 0x3ce   : > { %v2167_v15 = vld [vmem:[%s10795_s10 + $0xb10] sm:$0xff] }
 0x3cf   : > { %7774 = vmatpush1.bf16.msra.mxu0 %v8776_v24  ;;  %7838 = vmatpush1.bf16.msra.mxu1 %v8808_v25  ;;  %v1951_v24 = vld [vmem:[%s10795_s10 + $0x450] sm:$0xff]  ;;  %v11546_v25 = vld.sshfl [vmem:[%s11879_s0] sm:$0x33 pattern:$0x76325410] }
 0x3d0   : > { %7776 = vmatprep.subr.bf16.mxu0 %v8777_v26  ;;  %7840 = vmatprep.subr.bf16.mxu1 %v8809_v27  ;;  %v1928_v26 = vld [vmem:[%s10795_s10 + $0x398] sm:$0xff]  ;;  %v8823_v30 = vcombine.high %v1927_v22, %v1951_v24  ;;  %v8824_v23 = vcombine.low %v1927_v22, %v1951_v24  ;;  %v2191_v17 = vld [vmem:[%s10795_s10 + $0xbd0] sm:$0xff] }
 0x3d1   : > { %v1952_v27 = vld [vmem:[%s10795_s10 + $0x458] sm:$0xff] }
 0x3d2   : > { %v8855_v31 = vcombine.high %v1928_v26, %v1952_v27  ;;  %v8856_v39 = vcombine.low %v1928_v26, %v1952_v27  ;;  %v2168_v22 = vld [vmem:[%s10795_s10 + $0xb18] sm:$0xff] }
 0x3d3   : > { %7778 = vmatpush1.bf16.msra.mxu0 %v8778_v32  ;;  %7842 = vmatpush1.bf16.msra.mxu1 %v8810_v33  ;;  %v1975_v32 = vld [vmem:[%s10795_s10 + $0x510] sm:$0xff]  ;;  %v2192_v24 = vld [vmem:[%s10795_s10 + $0xbd8] sm:$0xff] }
 0x3d4   : > { %7780 = vmatprep.subr.bf16.mxu0 %v8779_v34  ;;  %7844 = vmatprep.subr.bf16.mxu1 %v8811_v35  ;;  %v1999_v33 = vld [vmem:[%s10795_s10 + $0x5d0] sm:$0xff]  ;;  %v1976_v34 = vld [vmem:[%s10795_s10 + $0x518] sm:$0xff] }
 0x3d5   : > { %v2000_v35 = vld [vmem:[%s10795_s10 + $0x5d8] sm:$0xff]  ;;  %v8825_v40 = vcombine.high %v1975_v32, %v1999_v33  ;;  %v8826_v43 = vcombine.low %v1975_v32, %v1999_v33  ;;  %v8865_v33 = vcombine.high %v2168_v22, %v2192_v24 }
 0x3d6   : > { %v8857_v41 = vcombine.high %v1976_v34, %v2000_v35  ;;  %v8858_v47 = vcombine.low %v1976_v34, %v2000_v35  ;;  %v2215_v34 = vld [vmem:[%s10795_s10 + $0xc90] sm:$0xff] }
 0x3d7   : > { %7782 = vmatpush1.bf16.msra.mxu0 %v8780_v42  ;;  %7846 = vmatpush1.bf16.msra.mxu1 %v8812_v44  ;;  %v2023_v42 = vld [vmem:[%s10795_s10 + $0x690] sm:$0xff] }
 0x3d8   : > { %7784 = vmatprep.subr.bf16.mxu0 %v8781_v45  ;;  %7848 = vmatprep.subr.bf16.mxu1 %v8813_v46  ;;  %v2047_v44 = vld [vmem:[%s10795_s10 + $0x750] sm:$0xff]  ;;  %v2024_v45 = vld [vmem:[%s10795_s10 + $0x698] sm:$0xff] }
 0x3d9   : > { %v2048_v46 = vld [vmem:[%s10795_s10 + $0x758] sm:$0xff]  ;;  %v8827_v48 = vcombine.high %v2023_v42, %v2047_v44  ;;  %v2239_v35 = vld [vmem:[%s10795_s10 + $0xd50] sm:$0xff] }
 0x3da   : > { %v8859_v3 = vcombine.high %v2024_v45, %v2048_v46 }
 0x3db   : > { %7786 = vmatpush1.bf16.msra.mxu0 %v8782_v49  ;;  %7850 = vmatpush1.bf16.msra.mxu1 %v8814_v50  ;;  %v2071_v49 = vld [vmem:[%s10795_s10 + $0x810] sm:$0xff] }
 0x3dc   : > { %7788 = vmatprep.subr.bf16.mxu0 %v8783_v51  ;;  %7852 = vmatprep.subr.bf16.mxu1 %v8815_v52  ;;  %v2095_v50 = vld [vmem:[%s10795_s10 + $0x8d0] sm:$0xff]  ;;  %v6230_v51 = vrot.slane %v11474_v62, %v11211_v0  ;;  %v6234_v52 = vrot.slane %v11474_v62, %v11214_v36 }
 0x3dd   : > { %v8830_v62 = vcombine.low %v2071_v49, %v2095_v50 }
 0x3de   : > { %v6424_v7 = vcombine.low %v6230_v51, %v6234_v52  ;;  %v8836_v51 = vcombine.low %v2215_v34, %v2239_v35 }
 0x3df   : > { %7790 = vmatpush1.bf16.msra.mxu0 %v8784_v63  ;;  %7854 = vmatpush1.bf16.msra.mxu1 %v8816_v2  ;;  %v8828_v63 = vcombine.low %v2023_v42, %v2047_v44  ;;  %v8860_v2 = vcombine.low %v2024_v45, %v2048_v46  ;;  %v8834_v42 = vcombine.low %v2167_v15, %v2191_v17 }
 0x3e0   : > { %7792 = vmatprep.subr.bf16.mxu0 %v8785_v59  ;;  %7856 = vmatprep.subr.bf16.mxu1 %v8817_v4  ;;  %v8829_v59 = vcombine.high %v2071_v49, %v2095_v50  ;;  %v8861_v4 = vcombine.high %v2072_v60, %v2096_v61  ;;  %v8866_v45 = vcombine.low %v2168_v22, %v2192_v24  ;;  %v2264_v49 = vld [vmem:[%s10795_s10 + $0xe18] sm:$0xff]  ;;  %v2455_v24 = vld [vmem:[%s10795_s10 + $0x1410] sm:$0xff] }
 0x3e1   : > { %v8835_v46 = vcombine.high %v2215_v34, %v2239_v35  ;;  %v2288_v50 = vld [vmem:[%s10795_s10 + $0xed8] sm:$0xff]  ;;  %v2527_v34 = vld [vmem:[%s10795_s10 + $0x1650] sm:$0xff] }
 0x3e2   : > { %v8869_v58 = vcombine.high %v2264_v49, %v2288_v50  ;;  %v2504_v35 = vld [vmem:[%s10795_s10 + $0x1598] sm:$0xff] }
 0x3e3   : > { %7794 = vmatpush1.bf16.msra.mxu0 %v8786_v9  ;;  %7858 = vmatpush1.bf16.msra.mxu1 %v8818_v10  ;;  %v2120_v9 = vld [vmem:[%s10795_s10 + $0x998] sm:$0xff] }
 0x3e4   : > { %7860 = vmatprep.subr.bf16.mxu0 %v8819_v11  ;;  %7924 = vmatprep.subr.bf16.mxu1 %v8851_v12  ;;  %v2144_v10 = vld [vmem:[%s10795_s10 + $0xa58] sm:$0xff]  ;;  %v8862_v11 = vcombine.low %v2072_v60, %v2096_v61  ;;  %v8831_v12 = vcombine.high %v2119_v5, %v2143_v6  ;;  %v2311_v60 = vld [vmem:[%s10795_s10 + $0xf90] sm:$0xff] }
 0x3e5   : > { %v8863_v14 = vcombine.high %v2120_v9, %v2144_v10  ;;  %v2335_v61 = vld [vmem:[%s10795_s10 + $0x1050] sm:$0xff] }
 0x3e6   : > { %5329 = vmatmul.mubr.f32.vlgmr.msra.gmra.mrb[16].mxu0 %v11546_v25  ;;  %5400 = vmatmul.mubr.f32.vlgmr.msra.gmra.mrb[16].mxu1 %v11546_v25 }
 0x3e7   : > { %7862 = vmatpush1.bf16.msra.mxu0 %v8820_v18  ;;  %7926 = vmatpush1.bf16.msra.mxu1 %v8852_v19 }
 0x3e8   : > { %7864 = vmatprep.subr.bf16.mxu0 %v8821_v20  ;;  %7928 = vmatprep.subr.bf16.mxu1 %v8853_v21  ;;  %v6432_v20 = vrot.slane %v6424_v7, %v11138_v16  ;;  %v6439_v21 = vrot.slane %v6425_v8, %v11138_v16  ;;  %v2359_v7 = vld [vmem:[%s10795_s10 + $0x1110] sm:$0xff] }
 0x3e9   : > { %5470 = vmatprep.mubr.f32.mxu0 %v10791_v1  ;;  %5541 = vmatprep.mubr.f32.mxu1 %v10791_v1  ;;  %v2383_v8 = vld [vmem:[%s10795_s10 + $0x11d0] sm:$0xff] }
 0x3eb   : > { %7866 = vmatpush1.bf16.msra.mxu0 %v8822_v28  ;;  %7930 = vmatpush1.bf16.msra.mxu1 %v8854_v29  ;;  %v8832_v28 = vcombine.low %v2119_v5, %v2143_v6  ;;  %v8839_v5 = vcombine.high %v2311_v60, %v2335_v61 }
 0x3ec   : > { %7868 = vmatprep.subr.bf16.mxu0 %v8823_v30  ;;  %7932 = vmatprep.subr.bf16.mxu1 %v8855_v31  ;;  %v8864_v30 = vcombine.low %v2120_v9, %v2144_v10  ;;  %v8833_v31 = vcombine.high %v2167_v15, %v2191_v17  ;;  %v2360_v9 = vld [vmem:[%s10795_s10 + $0x1118] sm:$0xff]  ;;  %v2431_v15 = vld [vmem:[%s10795_s10 + $0x1350] sm:$0xff] }
 0x3ed   : > { %v2384_v10 = vld [vmem:[%s10795_s10 + $0x11d8] sm:$0xff] }
 0x3ee   : > { %v2408_v17 = vld [vmem:[%s10795_s10 + $0x1298] sm:$0xff] }
 0x3ef   : > { %7870 = vmatpush1.bf16.msra.mxu0 %v8824_v23  ;;  %7934 = vmatpush1.bf16.msra.mxu1 %v8856_v39  ;;  %v6440_v39 = vcombine.low %v6432_v20, %v6439_v21  ;;  %v8874_v20 = vcombine.low %v2360_v9, %v2384_v10 }
 0x3f0   : > { %7872 = vmatprep.subr.bf16.mxu0 %v8825_v40  ;;  %7936 = vmatprep.subr.bf16.mxu1 %v8857_v41  ;;  %v2216_v40 = vld [vmem:[%s10795_s10 + $0xc98] sm:$0xff] }
 0x3f1   : > { %v2240_v41 = vld [vmem:[%s10795_s10 + $0xd58] sm:$0xff] }
 0x3f2   : > { %v8868_v52 = vcombine.low %v2216_v40, %v2240_v41 }
 0x3f3   : > { %7874 = vmatpush1.bf16.msra.mxu0 %v8826_v43  ;;  %7938 = vmatpush1.bf16.msra.mxu1 %v8858_v47  ;;  %v8867_v43 = vcombine.high %v2216_v40, %v2240_v41  ;;  %v2263_v47 = vld [vmem:[%s10795_s10 + $0xe10] sm:$0xff] }
 0x3f4   : > { %7876 = vmatprep.subr.bf16.mxu0 %v8827_v48  ;;  %7940 = vmatprep.subr.bf16.mxu1 %v8859_v3  ;;  %v2287_v48 = vld [vmem:[%s10795_s10 + $0xed0] sm:$0xff] }
 0x3f5   : > { %v8837_v53 = vcombine.high %v2263_v47, %v2287_v48 }
 0x3f7   : > { %7878 = vmatpush1.bf16.msra.mxu0 %v8828_v63  ;;  %7942 = vmatpush1.bf16.msra.mxu1 %v8860_v2  ;;  %v2312_v63 = vld [vmem:[%s10795_s10 + $0xf98] sm:$0xff] }
 0x3f8   : > { %7880 = vmatprep.subr.bf16.mxu0 %v8829_v59  ;;  %7944 = vmatprep.subr.bf16.mxu1 %v8861_v4  ;;  %v2336_v2 = vld [vmem:[%s10795_s10 + $0x1058] sm:$0xff]  ;;  %v8838_v59 = vcombine.low %v2263_v47, %v2287_v48  ;;  %v8870_v4 = vcombine.low %v2264_v49, %v2288_v50  ;;  %v1833_v50 = vld [vmem:[%s10795_s10 + $0xa0] sm:$0xff] }
 0x3f9   : > { %v4904_v13 = vpop.f32.mrb[10].mxu0  ;;  %v4975_v18 = vpop.f32.mrb[10].mxu1  ;;  %v8871_v6 = vcombine.high %v2312_v63, %v2336_v2 }
 0x3fa   : > { %v4906_v19 = vpop.f32.mrb[11].mxu0  ;;  %v4977_v27 = vpop.f32.mrb[11].mxu1 }
 0x3fb   : > { %v5965_v26 = vcombine.low %v4904_v13, %v4906_v19  ;;  %7882 = vmatpush1.bf16.msra.mxu0 %v8830_v62  ;;  %v5966_v29 = vcombine.low %v4975_v18, %v4977_v27  ;;  %7946 = vmatpush1.bf16.msra.mxu1 %v8862_v11  ;;  %v8840_v62 = vcombine.low %v2311_v60, %v2335_v61  ;;  %v2432_v18 = vld [vmem:[%s10795_s10 + $0x1358] sm:$0xff] }
 0x3fc   : > { %7884 = vmatprep.subr.bf16.mxu0 %v8831_v12  ;;  %7948 = vmatprep.subr.bf16.mxu1 %v8863_v14  ;;  %v8872_v11 = vcombine.low %v2312_v63, %v2336_v2  ;;  %v8841_v12 = vcombine.high %v2359_v7, %v2383_v8  ;;  %v8873_v13 = vcombine.high %v2360_v9, %v2384_v10  ;;  %v2407_v14 = vld [vmem:[%s10795_s10 + $0x1290] sm:$0xff]  ;;  %v2456_v27 = vld [vmem:[%s10795_s10 + $0x1418] sm:$0xff]  ;;  %v1881_v2 = vld [vmem:[%s10795_s10 + $0x220] sm:$0xff] }
 0x3fd   : > { %v5973_v32 = vrot.slane %v5965_v26, %v11138_v16  ;;  %v5980_v23 = vrot.slane %v5966_v29, %v11138_v16  ;;  %v8842_v19 = vcombine.low %v2359_v7, %v2383_v8  ;;  %v8843_v21 = vcombine.high %v2407_v14, %v2431_v15  ;;  %v2479_v26 = vld [vmem:[%s10795_s10 + $0x14d0] sm:$0xff]  ;;  %v1929_v10 = vld [vmem:[%s10795_s10 + $0x3a0] sm:$0xff] }
 0x3fe   : > { %v8875_v22 = vcombine.high %v2408_v17, %v2432_v18  ;;  %v8844_v29 = vcombine.low %v2407_v14, %v2431_v15 }
 0x3ff   : > { %7886 = vmatpush1.bf16.msra.mxu0 %v8832_v28  ;;  %v5981_v44 = vcombine.low %v5973_v32, %v5980_v23  ;;  %7950 = vmatpush1.bf16.msra.mxu1 %v8864_v30  ;;  %v2480_v28 = vld [vmem:[%s10795_s10 + $0x14d8] sm:$0xff]  ;;  %v8876_v30 = vcombine.low %v2408_v17, %v2432_v18  ;;  %v1977_v18 = vld [vmem:[%s10795_s10 + $0x520] sm:$0xff] }
 0x400   : > { %7888 = vmatprep.subr.bf16.mxu0 %v8833_v31  ;;  %7952 = vmatprep.subr.bf16.mxu1 %v8865_v33  ;;  %v8845_v31 = vcombine.high %v2455_v24, %v2479_v26  ;;  %v8877_v32 = vcombine.high %v2456_v27, %v2480_v28  ;;  %v2503_v33 = vld [vmem:[%s10795_s10 + $0x1590] sm:$0xff]  ;;  %v2528_v23 = vld [vmem:[%s10795_s10 + $0x1658] sm:$0xff]  ;;  %v8878_v40 = vcombine.low %v2456_v27, %v2480_v28  ;;  %v2025_v28 = vld [vmem:[%s10795_s10 + $0x6a0] sm:$0xff] }
 0x401   : > { %v6560_v3 = vadd.f32 %v6440_v39, %v5981_v44  ;;  %v8846_v39 = vcombine.low %v2455_v24, %v2479_v26  ;;  %v8847_v41 = vcombine.high %v2503_v33, %v2527_v34  ;;  %v2551_v44 = vld [vmem:[%s10795_s10 + $0x1710] sm:$0xff]  ;;  %v8848_v47 = vcombine.low %v2503_v33, %v2527_v34  ;;  %v11644_v33 = vld [vmem:[%s11102_s27 + $0x18] sm:$0xff] }
 0x402   : > { %v8880_v48 = vcombine.low %v2504_v35, %v2528_v23 }
 0x403   : > { %7890 = vmatpush1.bf16.msra.mxu0 %v8834_v42  ;;  %6572 = vst [vmem:[%s11159_s29 + $0x28] sm:$0xff] %v6560_v3  ;;  %7954 = vmatpush1.bf16.msra.mxu1 %v8866_v45  ;;  %v8879_v42 = vcombine.high %v2504_v35, %v2528_v23  ;;  %v2575_v45 = vld [vmem:[%s10795_s10 + $0x17d0] sm:$0xff] }
 0x404   : > { %7892 = vmatprep.subr.bf16.mxu0 %v8835_v46  ;;  %7956 = vmatprep.subr.bf16.mxu1 %v8867_v43  ;;  %v2552_v46 = vld [vmem:[%s10795_s10 + $0x1718] sm:$0xff]  ;;  %v8849_v3 = vcombine.high %v2551_v44, %v2575_v45 }
 0x405   : > { %v2576_v43 = vld [vmem:[%s10795_s10 + $0x17d8] sm:$0xff] }
 0x406   : > { %v8881_v49 = vcombine.high %v2552_v46, %v2576_v43  ;;  %v8882_v60 = vcombine.low %v2552_v46, %v2576_v43  ;;  %v2074_v46 = vld [vmem:[%s10795_s10 + $0x828] sm:$0xff] }
 0x407   : > { %7894 = vmatpush1.bf16.msra.mxu0 %v8836_v51  ;;  %7958 = vmatpush1.bf16.msra.mxu1 %v8868_v52  ;;  %v1857_v51 = vld [vmem:[%s10795_s10 + $0x160] sm:$0xff]  ;;  %v1834_v52 = vld [vmem:[%s10795_s10 + $0xa8] sm:$0xff] }
 0x408   : > { %7896 = vmatprep.subr.bf16.mxu0 %v8837_v53  ;;  %7960 = vmatprep.subr.bf16.mxu1 %v8869_v58  ;;  %v1858_v53 = vld [vmem:[%s10795_s10 + $0x168] sm:$0xff]  ;;  %v8850_v58 = vcombine.low %v2551_v44, %v2575_v45  ;;  %v8883_v61 = vcombine.high %v1833_v50, %v1857_v51  ;;  %v6254_v44 = vrot.slane %v11644_v33, %v11115_v56 }
 0x409   : > { %v8915_v63 = vcombine.high %v1834_v52, %v1858_v53  ;;  %v8916_v7 = vcombine.low %v1834_v52, %v1858_v53  ;;  %v6258_v45 = vrot.slane %v11644_v33, %v11118_v57  ;;  %v2098_v43 = vld [vmem:[%s10795_s10 + $0x8e8] sm:$0xff] }
 0x40b   : > { %7898 = vmatpush1.bf16.msra.mxu0 %v8838_v59  ;;  %7962 = vmatpush1.bf16.msra.mxu1 %v8870_v4  ;;  %v1905_v59 = vld [vmem:[%s10795_s10 + $0x2e0] sm:$0xff]  ;;  %v1882_v4 = vld [vmem:[%s10795_s10 + $0x228] sm:$0xff]  ;;  %v6442_v53 = vcombine.low %v6254_v44, %v6258_v45 }
 0x40c   : > { %7900 = vmatprep.subr.bf16.mxu0 %v8839_v5  ;;  %7964 = vmatprep.subr.bf16.mxu1 %v8871_v6  ;;  %v1906_v5 = vld [vmem:[%s10795_s10 + $0x2e8] sm:$0xff]  ;;  %v8884_v6 = vcombine.low %v1833_v50, %v1857_v51  ;;  %v8885_v8 = vcombine.high %v1881_v2, %v1905_v59  ;;  %v2121_v50 = vld [vmem:[%s10795_s10 + $0x9a0] sm:$0xff] }
 0x40d   : > { %v8917_v9 = vcombine.high %v1882_v4, %v1906_v5  ;;  %v8918_v14 = vcombine.low %v1882_v4, %v1906_v5  ;;  %v2145_v51 = vld [vmem:[%s10795_s10 + $0xa60] sm:$0xff] }
 0x40e   : > { %v2169_v5 = vld [vmem:[%s10795_s10 + $0xb20] sm:$0xff] }
 0x40f   : > { %7902 = vmatpush1.bf16.msra.mxu0 %v8840_v62  ;;  %7966 = vmatpush1.bf16.msra.mxu1 %v8872_v11  ;;  %v1953_v62 = vld [vmem:[%s10795_s10 + $0x460] sm:$0xff]  ;;  %v1930_v11 = vld [vmem:[%s10795_s10 + $0x3a8] sm:$0xff] }
 0x410   : > { %7904 = vmatprep.subr.bf16.mxu0 %v8841_v12  ;;  %7968 = vmatprep.subr.bf16.mxu1 %v8873_v13  ;;  %v1954_v12 = vld [vmem:[%s10795_s10 + $0x468] sm:$0xff]  ;;  %v8886_v13 = vcombine.low %v1881_v2, %v1905_v59  ;;  %v8887_v15 = vcombine.high %v1929_v10, %v1953_v62  ;;  %v8895_v2 = vcombine.high %v2121_v50, %v2145_v51 }
 0x411   : > { %v8919_v17 = vcombine.high %v1930_v11, %v1954_v12  ;;  %v8920_v24 = vcombine.low %v1930_v11, %v1954_v12  ;;  %v2194_v11 = vld [vmem:[%s10795_s10 + $0xbe8] sm:$0xff] }
 0x413   : > { %7906 = vmatpush1.bf16.msra.mxu0 %v8842_v19  ;;  %7970 = vmatpush1.bf16.msra.mxu1 %v8874_v20  ;;  %v2001_v19 = vld [vmem:[%s10795_s10 + $0x5e0] sm:$0xff]  ;;  %v1978_v20 = vld [vmem:[%s10795_s10 + $0x528] sm:$0xff] }
 0x414   : > { %7908 = vmatprep.subr.bf16.mxu0 %v8843_v21  ;;  %7972 = vmatprep.subr.bf16.mxu1 %v8875_v22  ;;  %v2002_v21 = vld [vmem:[%s10795_s10 + $0x5e8] sm:$0xff]  ;;  %v8888_v22 = vcombine.low %v1929_v10, %v1953_v62  ;;  %v8889_v26 = vcombine.high %v1977_v18, %v2001_v19  ;;  %v6456_v10 = vrot.slane %v6442_v53, %v11138_v16  ;;  %v2361_v53 = vld [vmem:[%s10795_s10 + $0x1120] sm:$0xff] }
 0x415   : > { %v8921_v27 = vcombine.high %v1978_v20, %v2002_v21  ;;  %v8922_v34 = vcombine.low %v1978_v20, %v2002_v21  ;;  %v2170_v62 = vld [vmem:[%s10795_s10 + $0xb28] sm:$0xff]  ;;  %v2217_v21 = vld [vmem:[%s10795_s10 + $0xca0] sm:$0xff] }
 0x416   : > { %v8929_v20 = vcombine.high %v2170_v62, %v2194_v11 }
 0x417   : > { %7910 = vmatpush1.bf16.msra.mxu0 %v8844_v29  ;;  %7974 = vmatpush1.bf16.msra.mxu1 %v8876_v30  ;;  %v2049_v29 = vld [vmem:[%s10795_s10 + $0x760] sm:$0xff]  ;;  %v2026_v30 = vld [vmem:[%s10795_s10 + $0x6a8] sm:$0xff] }
 0x418   : > { %7912 = vmatprep.subr.bf16.mxu0 %v8845_v31  ;;  %7976 = vmatprep.subr.bf16.mxu1 %v8877_v32  ;;  %v2050_v31 = vld [vmem:[%s10795_s10 + $0x768] sm:$0xff]  ;;  %v8890_v32 = vcombine.low %v1977_v18, %v2001_v19  ;;  %v8891_v35 = vcombine.high %v2025_v28, %v2049_v29 }
 0x419   : > { %v8923_v23 = vcombine.high %v2026_v30, %v2050_v31 }
 0x41b   : > { %7914 = vmatpush1.bf16.msra.mxu0 %v8846_v39  ;;  %7978 = vmatpush1.bf16.msra.mxu1 %v8878_v40  ;;  %v2073_v39 = vld [vmem:[%s10795_s10 + $0x820] sm:$0xff] }
 0x41c   : > { %7916 = vmatprep.subr.bf16.mxu0 %v8847_v41  ;;  %7980 = vmatprep.subr.bf16.mxu1 %v8879_v42  ;;  %v2097_v40 = vld [vmem:[%s10795_s10 + $0x8e0] sm:$0xff]  ;;  %v6246_v41 = vrot.slane %v11644_v33, %v11109_v54  ;;  %v6250_v42 = vrot.slane %v11644_v33, %v11112_v55 }
 0x41e   : > { %v6441_v52 = vcombine.low %v6246_v41, %v6250_v42  ;;  %v2290_v41 = vld [vmem:[%s10795_s10 + $0xee8] sm:$0xff] }
 0x41f   : > { %7918 = vmatpush1.bf16.msra.mxu0 %v8848_v47  ;;  %7982 = vmatpush1.bf16.msra.mxu1 %v8880_v48  ;;  %v8892_v47 = vcombine.low %v2025_v28, %v2049_v29  ;;  %v8924_v48 = vcombine.low %v2026_v30, %v2050_v31  ;;  %v2242_v28 = vld [vmem:[%s10795_s10 + $0xd68] sm:$0xff]  ;;  %v8930_v31 = vcombine.low %v2170_v62, %v2194_v11 }
 0x420   : > { %7920 = vmatprep.subr.bf16.mxu0 %v8849_v3  ;;  %7984 = vmatprep.subr.bf16.mxu1 %v8881_v49  ;;  %v8893_v3 = vcombine.high %v2073_v39, %v2097_v40  ;;  %v8925_v49 = vcombine.high %v2074_v46, %v2098_v43 }
 0x423   : > { %7922 = vmatpush1.bf16.msra.mxu0 %v8850_v58  ;;  %7986 = vmatpush1.bf16.msra.mxu1 %v8882_v60  ;;  %v2122_v58 = vld [vmem:[%s10795_s10 + $0x9a8] sm:$0xff] }
 0x424   : > { %7988 = vmatprep.subr.bf16.mxu0 %v8883_v61  ;;  %8052 = vmatprep.subr.bf16.mxu1 %v8915_v63  ;;  %v2146_v60 = vld [vmem:[%s10795_s10 + $0xa68] sm:$0xff]  ;;  %v8894_v61 = vcombine.low %v2073_v39, %v2097_v40  ;;  %v8926_v63 = vcombine.low %v2074_v46, %v2098_v43  ;;  %v2313_v43 = vld [vmem:[%s10795_s10 + $0xfa0] sm:$0xff] }
 0x425   : > { %v8927_v4 = vcombine.high %v2122_v58, %v2146_v60  ;;  %v2266_v40 = vld [vmem:[%s10795_s10 + $0xe28] sm:$0xff] }
 0x426   : > { %5471 = vmatmul.mubr.f32.vlgmr.msra.gmra.mrb[18].mxu0 %v11546_v25  ;;  %5542 = vmatmul.mubr.f32.vlgmr.msra.gmra.mrb[18].mxu1 %v11546_v25  ;;  %v8933_v46 = vcombine.high %v2266_v40, %v2290_v41 }
 0x427   : > { %7990 = vmatpush1.bf16.msra.mxu0 %v8884_v6  ;;  %8054 = vmatpush1.bf16.msra.mxu1 %v8916_v7  ;;  %v2193_v6 = vld [vmem:[%s10795_s10 + $0xbe0] sm:$0xff] }
 0x428   : > { %7992 = vmatprep.subr.bf16.mxu0 %v8885_v8  ;;  %8056 = vmatprep.subr.bf16.mxu1 %v8917_v9  ;;  %v6449_v9 = vrot.slane %v6441_v52, %v11138_v16  ;;  %v8897_v18 = vcombine.high %v2169_v5, %v2193_v6  ;;  %v8898_v29 = vcombine.low %v2169_v5, %v2193_v6  ;;  %v2409_v5 = vld [vmem:[%s10795_s10 + $0x12a0] sm:$0xff] }
 0x429   : > { %5612 = vmatprep.mubr.f32.mxu0 %v10791_v1  ;;  %5683 = vmatprep.mubr.f32.mxu1 %v10791_v1  ;;  %v2433_v6 = vld [vmem:[%s10795_s10 + $0x1360] sm:$0xff] }
 0x42a   : > { %v8907_v62 = vcombine.high %v2409_v5, %v2433_v6 }
 0x42b   : > { %7994 = vmatpush1.bf16.msra.mxu0 %v8886_v13  ;;  %8058 = vmatpush1.bf16.msra.mxu1 %v8918_v14  ;;  %v8896_v14 = vcombine.low %v2121_v50, %v2145_v51  ;;  %v8934_v50 = vcombine.low %v2266_v40, %v2290_v41 }
 0x42c   : > { %7996 = vmatprep.subr.bf16.mxu0 %v8887_v15  ;;  %8060 = vmatprep.subr.bf16.mxu1 %v8919_v17  ;;  %v8928_v17 = vcombine.low %v2122_v58, %v2146_v60  ;;  %v2385_v58 = vld [vmem:[%s10795_s10 + $0x11e0] sm:$0xff]  ;;  %v2362_v60 = vld [vmem:[%s10795_s10 + $0x1128] sm:$0xff] }
 0x42f   : > { %7998 = vmatpush1.bf16.msra.mxu0 %v8888_v22  ;;  %8062 = vmatpush1.bf16.msra.mxu1 %v8920_v24  ;;  %v2241_v22 = vld [vmem:[%s10795_s10 + $0xd60] sm:$0xff] }
 0x430   : > { %8000 = vmatprep.subr.bf16.mxu0 %v8889_v26  ;;  %8064 = vmatprep.subr.bf16.mxu1 %v8921_v27  ;;  %v6457_v26 = vcombine.low %v6449_v9, %v6456_v10  ;;  %v2218_v27 = vld [vmem:[%s10795_s10 + $0xca8] sm:$0xff]  ;;  %v8900_v42 = vcombine.low %v2217_v21, %v2241_v22  ;;  %v8906_v9 = vcombine.low %v2361_v53, %v2385_v58 }
 0x431   : > { %v8932_v44 = vcombine.low %v2218_v27, %v2242_v28 }
 0x433   : > { %8002 = vmatpush1.bf16.msra.mxu0 %v8890_v32  ;;  %8066 = vmatpush1.bf16.msra.mxu1 %v8922_v34  ;;  %v8899_v32 = vcombine.high %v2217_v21, %v2241_v22  ;;  %v8931_v34 = vcombine.high %v2218_v27, %v2242_v28  ;;  %v2505_v21 = vld [vmem:[%s10795_s10 + $0x15a0] sm:$0xff] }
 0x434   : > { %8004 = vmatprep.subr.bf16.mxu0 %v8891_v35  ;;  %8068 = vmatprep.subr.bf16.mxu1 %v8923_v23  ;;  %v2265_v35 = vld [vmem:[%s10795_s10 + $0xe20] sm:$0xff] }
 0x435   : > { %v2289_v23 = vld [vmem:[%s10795_s10 + $0xee0] sm:$0xff] }
 0x436   : > { %v8901_v45 = vcombine.high %v2265_v35, %v2289_v23  ;;  %v2529_v22 = vld [vmem:[%s10795_s10 + $0x1660] sm:$0xff] }
 0x437   : > { %8006 = vmatpush1.bf16.msra.mxu0 %v8892_v47  ;;  %8070 = vmatpush1.bf16.msra.mxu1 %v8924_v48  ;;  %v2337_v47 = vld [vmem:[%s10795_s10 + $0x1060] sm:$0xff]  ;;  %v2314_v48 = vld [vmem:[%s10795_s10 + $0xfa8] sm:$0xff] }
 0x438   : > { %8008 = vmatprep.subr.bf16.mxu0 %v8893_v3  ;;  %8072 = vmatprep.subr.bf16.mxu1 %v8925_v49  ;;  %v2338_v3 = vld [vmem:[%s10795_s10 + $0x1068] sm:$0xff]  ;;  %v8902_v49 = vcombine.low %v2265_v35, %v2289_v23  ;;  %v8903_v51 = vcombine.high %v2313_v43, %v2337_v47  ;;  %v8912_v23 = vcombine.low %v2505_v21, %v2529_v22 }
 0x439   : > { %v5046_v59 = vpop.f32.mrb[12].mxu0  ;;  %v5117_v7 = vpop.f32.mrb[12].mxu1  ;;  %v8935_v52 = vcombine.high %v2314_v48, %v2338_v3  ;;  %v2578_v35 = vld [vmem:[%s10795_s10 + $0x17e8] sm:$0xff] }
 0x43a   : > { %v5048_v8 = vpop.f32.mrb[13].mxu0  ;;  %v5119_v13 = vpop.f32.mrb[13].mxu1 }
 0x43b   : > { %v5982_v12 = vcombine.low %v5046_v59, %v5048_v8  ;;  %8010 = vmatpush1.bf16.msra.mxu0 %v8894_v61  ;;  %v5983_v15 = vcombine.low %v5117_v7, %v5119_v13  ;;  %8074 = vmatpush1.bf16.msra.mxu1 %v8926_v63  ;;  %v2386_v61 = vld [vmem:[%s10795_s10 + $0x11e8] sm:$0xff]  ;;  %v8904_v63 = vcombine.low %v2313_v43, %v2337_v47  ;;  %v2481_v13 = vld [vmem:[%s10795_s10 + $0x14e0] sm:$0xff] }
 0x43c   : > { %8012 = vmatprep.subr.bf16.mxu0 %v8895_v2  ;;  %8076 = vmatprep.subr.bf16.mxu1 %v8927_v4  ;;  %v8936_v2 = vcombine.low %v2314_v48, %v2338_v3  ;;  %v8905_v59 = vcombine.high %v2361_v53, %v2385_v58  ;;  %v8937_v4 = vcombine.high %v2362_v60, %v2386_v61  ;;  %v2410_v7 = vld [vmem:[%s10795_s10 + $0x12a8] sm:$0xff] }
 0x43d   : > { %v5990_v19 = vrot.slane %v5982_v12, %v11138_v16  ;;  %v5997_v24 = vrot.slane %v5983_v15, %v11138_v16  ;;  %v2434_v8 = vld [vmem:[%s10795_s10 + $0x1368] sm:$0xff]  ;;  %v8938_v10 = vcombine.low %v2362_v60, %v2386_v61  ;;  %v2457_v12 = vld [vmem:[%s10795_s10 + $0x1420] sm:$0xff] }
 0x43e   : > { %v8939_v11 = vcombine.high %v2410_v7, %v2434_v8  ;;  %v2482_v15 = vld [vmem:[%s10795_s10 + $0x14e8] sm:$0xff]  ;;  %v8910_v27 = vcombine.low %v2457_v12, %v2481_v13 }
 0x43f   : > { %8014 = vmatpush1.bf16.msra.mxu0 %v8896_v14  ;;  %v5998_v30 = vcombine.low %v5990_v19, %v5997_v24  ;;  %8078 = vmatpush1.bf16.msra.mxu1 %v8928_v17  ;;  %v2458_v14 = vld [vmem:[%s10795_s10 + $0x1428] sm:$0xff]  ;;  %v8908_v17 = vcombine.low %v2409_v5, %v2433_v6  ;;  %v8909_v19 = vcombine.high %v2457_v12, %v2481_v13 }
 0x440   : > { %8016 = vmatprep.subr.bf16.mxu0 %v8897_v18  ;;  %8080 = vmatprep.subr.bf16.mxu1 %v8929_v20  ;;  %v8940_v18 = vcombine.low %v2410_v7, %v2434_v8  ;;  %v8941_v20 = vcombine.high %v2458_v14, %v2482_v15  ;;  %v2506_v24 = vld [vmem:[%s10795_s10 + $0x15a8] sm:$0xff]  ;;  %v8942_v28 = vcombine.low %v2458_v14, %v2482_v15  ;;  %v2027_v15 = vld [vmem:[%s10795_s10 + $0x6b0] sm:$0xff] }
 0x441   : > { %v6561_v39 = vadd.f32 %v6457_v26, %v5998_v30  ;;  %v2530_v26 = vld [vmem:[%s10795_s10 + $0x1668] sm:$0xff] }
 0x442   : > { %v8943_v30 = vcombine.high %v2506_v24, %v2530_v26 }
 0x443   : > { %8018 = vmatpush1.bf16.msra.mxu0 %v8898_v29  ;;  %6573 = vst [vmem:[%s11159_s29 + $0x30] sm:$0xff] %v6561_v39  ;;  %8082 = vmatpush1.bf16.msra.mxu1 %v8930_v31  ;;  %v8911_v29 = vcombine.high %v2505_v21, %v2529_v22  ;;  %v2553_v31 = vld [vmem:[%s10795_s10 + $0x1720] sm:$0xff]  ;;  %v8944_v39 = vcombine.low %v2506_v24, %v2530_v26  ;;  %v2075_v24 = vld [vmem:[%s10795_s10 + $0x830] sm:$0xff] }
 0x444   : > { %8020 = vmatprep.subr.bf16.mxu0 %v8899_v32  ;;  %8084 = vmatprep.subr.bf16.mxu1 %v8931_v34  ;;  %v2577_v32 = vld [vmem:[%s10795_s10 + $0x17e0] sm:$0xff]  ;;  %v2554_v34 = vld [vmem:[%s10795_s10 + $0x1728] sm:$0xff]  ;;  %v2099_v26 = vld [vmem:[%s10795_s10 + $0x8f0] sm:$0xff] }
 0x445   : > { %v8913_v40 = vcombine.high %v2553_v31, %v2577_v32  ;;  %v8945_v41 = vcombine.high %v2554_v34, %v2578_v35  ;;  %v8914_v43 = vcombine.low %v2553_v31, %v2577_v32  ;;  %v8946_v47 = vcombine.low %v2554_v34, %v2578_v35  ;;  %v2076_v31 = vld [vmem:[%s10795_s10 + $0x838] sm:$0xff] }
 0x446   : > { %v2100_v32 = vld [vmem:[%s10795_s10 + $0x8f8] sm:$0xff] }
 0x447   : > { %8022 = vmatpush1.bf16.msra.mxu0 %v8900_v42  ;;  %8086 = vmatpush1.bf16.msra.mxu1 %v8932_v44  ;;  %v1835_v42 = vld [vmem:[%s10795_s10 + $0xb0] sm:$0xff] }
 0x448   : > { %8024 = vmatprep.subr.bf16.mxu0 %v8901_v45  ;;  %8088 = vmatprep.subr.bf16.mxu1 %v8933_v46  ;;  %v1859_v44 = vld [vmem:[%s10795_s10 + $0x170] sm:$0xff]  ;;  %v1836_v45 = vld [vmem:[%s10795_s10 + $0xb8] sm:$0xff] }
 0x449   : > { %v1860_v46 = vld [vmem:[%s10795_s10 + $0x178] sm:$0xff]  ;;  %v8947_v48 = vcombine.high %v1835_v42, %v1859_v44  ;;  %v8948_v53 = vcombine.low %v1835_v42, %v1859_v44 }
 0x44a   : > { %v8979_v3 = vcombine.high %v1836_v45, %v1860_v46  ;;  %v8980_v58 = vcombine.low %v1836_v45, %v1860_v46  ;;  %v2124_v45 = vld [vmem:[%s10795_s10 + $0x9b8] sm:$0xff] }
 0x44b   : > { %8026 = vmatpush1.bf16.msra.mxu0 %v8902_v49  ;;  %8090 = vmatpush1.bf16.msra.mxu1 %v8934_v50  ;;  %v1883_v49 = vld [vmem:[%s10795_s10 + $0x230] sm:$0xff]  ;;  %v2148_v46 = vld [vmem:[%s10795_s10 + $0xa78] sm:$0xff] }
 0x44c   : > { %8028 = vmatprep.subr.bf16.mxu0 %v8903_v51  ;;  %8092 = vmatprep.subr.bf16.mxu1 %v8935_v52  ;;  %v1907_v50 = vld [vmem:[%s10795_s10 + $0x2f0] sm:$0xff]  ;;  %v1884_v51 = vld [vmem:[%s10795_s10 + $0x238] sm:$0xff] }
 0x44d   : > { %v1908_v52 = vld [vmem:[%s10795_s10 + $0x2f8] sm:$0xff]  ;;  %v8949_v60 = vcombine.high %v1883_v49, %v1907_v50  ;;  %v8950_v5 = vcombine.low %v1883_v49, %v1907_v50  ;;  %v2171_v49 = vld [vmem:[%s10795_s10 + $0xb30] sm:$0xff] }
 0x44e   : > { %v8981_v61 = vcombine.high %v1884_v51, %v1908_v52  ;;  %v8982_v6 = vcombine.low %v1884_v51, %v1908_v52  ;;  %v2195_v50 = vld [vmem:[%s10795_s10 + $0xbf0] sm:$0xff] }
 0x44f   : > { %8030 = vmatpush1.bf16.msra.mxu0 %v8904_v63  ;;  %8094 = vmatpush1.bf16.msra.mxu1 %v8936_v2  ;;  %v1931_v63 = vld [vmem:[%s10795_s10 + $0x3b0] sm:$0xff] }
 0x450   : > { %8032 = vmatprep.subr.bf16.mxu0 %v8905_v59  ;;  %8096 = vmatprep.subr.bf16.mxu1 %v8937_v4  ;;  %v1955_v2 = vld [vmem:[%s10795_s10 + $0x470] sm:$0xff]  ;;  %v1932_v59 = vld [vmem:[%s10795_s10 + $0x3b8] sm:$0xff] }
 0x451   : > { %v1956_v4 = vld [vmem:[%s10795_s10 + $0x478] sm:$0xff]  ;;  %v8951_v7 = vcombine.high %v1931_v63, %v1955_v2 }
 0x452   : > { %v8983_v8 = vcombine.high %v1932_v59, %v1956_v4  ;;  %v8984_v12 = vcombine.low %v1932_v59, %v1956_v4 }
 0x453   : > { %8034 = vmatpush1.bf16.msra.mxu0 %v8906_v9  ;;  %8098 = vmatpush1.bf16.msra.mxu1 %v8938_v10  ;;  %v1979_v9 = vld [vmem:[%s10795_s10 + $0x530] sm:$0xff] }
 0x454   : > { %8036 = vmatprep.subr.bf16.mxu0 %v8907_v62  ;;  %8100 = vmatprep.subr.bf16.mxu1 %v8939_v11  ;;  %v2003_v10 = vld [vmem:[%s10795_s10 + $0x5f0] sm:$0xff]  ;;  %v1980_v62 = vld [vmem:[%s10795_s10 + $0x538] sm:$0xff] }
 0x455   : > { %v2004_v11 = vld [vmem:[%s10795_s10 + $0x5f8] sm:$0xff]  ;;  %v8953_v13 = vcombine.high %v1979_v9, %v2003_v10 }
 0x456   : > { %v8985_v14 = vcombine.high %v1980_v62, %v2004_v11 }
 0x457   : > { %8038 = vmatpush1.bf16.msra.mxu0 %v8908_v17  ;;  %8102 = vmatpush1.bf16.msra.mxu1 %v8940_v18  ;;  %v2051_v17 = vld [vmem:[%s10795_s10 + $0x770] sm:$0xff]  ;;  %v2028_v18 = vld [vmem:[%s10795_s10 + $0x6b8] sm:$0xff] }
 0x458   : > { %8040 = vmatprep.subr.bf16.mxu0 %v8909_v19  ;;  %8104 = vmatprep.subr.bf16.mxu1 %v8941_v20  ;;  %v2052_v19 = vld [vmem:[%s10795_s10 + $0x778] sm:$0xff]  ;;  %v8954_v20 = vcombine.low %v1979_v9, %v2003_v10  ;;  %v8955_v21 = vcombine.high %v2027_v15, %v2051_v17  ;;  %v8956_v34 = vcombine.low %v2027_v15, %v2051_v17  ;;  %v2219_v9 = vld [vmem:[%s10795_s10 + $0xcb0] sm:$0xff] }
 0x459   : > { %v8987_v22 = vcombine.high %v2028_v18, %v2052_v19  ;;  %v8988_v35 = vcombine.low %v2028_v18, %v2052_v19  ;;  %v2243_v10 = vld [vmem:[%s10795_s10 + $0xd70] sm:$0xff] }
 0x45a   : > { %v8963_v17 = vcombine.high %v2219_v9, %v2243_v10  ;;  %v2267_v19 = vld [vmem:[%s10795_s10 + $0xe30] sm:$0xff] }
 0x45b   : > { %8042 = vmatpush1.bf16.msra.mxu0 %v8910_v27  ;;  %8106 = vmatpush1.bf16.msra.mxu1 %v8942_v28  ;;  %v6262_v27 = vrot.slane %v11644_v33, %v11211_v0  ;;  %v6266_v28 = vrot.slane %v11644_v33, %v11214_v36 }
 0x45c   : > { %8044 = vmatprep.subr.bf16.mxu0 %v8911_v29  ;;  %8108 = vmatprep.subr.bf16.mxu1 %v8943_v30  ;;  %v6270_v29 = vrot.slane %v11644_v33, %v11217_v37  ;;  %v6274_v30 = vrot.slane %v11644_v33, %v11220_v38  ;;  %v8958_v33 = vcombine.low %v2075_v24, %v2099_v26 }
 0x45d   : > { %v6458_v42 = vcombine.low %v6262_v27, %v6266_v28 }
 0x45e   : > { %v6459_v44 = vcombine.low %v6270_v29, %v6274_v30  ;;  %v2315_v29 = vld [vmem:[%s10795_s10 + $0xfb0] sm:$0xff] }
 0x45f   : > { %8046 = vmatpush1.bf16.msra.mxu0 %v8912_v23  ;;  %8110 = vmatpush1.bf16.msra.mxu1 %v8944_v39  ;;  %v8957_v23 = vcombine.high %v2075_v24, %v2099_v26  ;;  %v8989_v39 = vcombine.high %v2076_v31, %v2100_v32  ;;  %v8964_v24 = vcombine.low %v2219_v9, %v2243_v10  ;;  %v2339_v30 = vld [vmem:[%s10795_s10 + $0x1070] sm:$0xff]  ;;  %v2532_v9 = vld [vmem:[%s10795_s10 + $0x1678] sm:$0xff] }
 0x460   : > { %8048 = vmatprep.subr.bf16.mxu0 %v8913_v40  ;;  %8112 = vmatprep.subr.bf16.mxu1 %v8945_v41  ;;  %v2123_v40 = vld [vmem:[%s10795_s10 + $0x9b0] sm:$0xff] }
 0x461   : > { %v2147_v41 = vld [vmem:[%s10795_s10 + $0xa70] sm:$0xff] }
 0x462   : > { %v8960_v59 = vcombine.low %v2123_v40, %v2147_v41 }
 0x463   : > { %8050 = vmatpush1.bf16.msra.mxu0 %v8914_v43  ;;  %8114 = vmatpush1.bf16.msra.mxu1 %v8946_v47  ;;  %v8990_v43 = vcombine.low %v2076_v31, %v2100_v32  ;;  %v8959_v47 = vcombine.high %v2123_v40, %v2147_v41  ;;  %v2316_v31 = vld [vmem:[%s10795_s10 + $0xfb8] sm:$0xff]  ;;  %v2363_v40 = vld [vmem:[%s10795_s10 + $0x1130] sm:$0xff] }
 0x464   : > { %8116 = vmatprep.subr.bf16.mxu0 %v8947_v48  ;;  %8180 = vmatprep.subr.bf16.mxu1 %v8979_v3  ;;  %v8991_v3 = vcombine.high %v2124_v45, %v2148_v46  ;;  %v2340_v32 = vld [vmem:[%s10795_s10 + $0x1078] sm:$0xff]  ;;  %v2387_v41 = vld [vmem:[%s10795_s10 + $0x11f0] sm:$0xff] }
 0x466   : > { %5613 = vmatmul.mubr.f32.vlgmr.msra.gmra.mrb[20].mxu0 %v11546_v25  ;;  %5684 = vmatmul.mubr.f32.vlgmr.msra.gmra.mrb[20].mxu1 %v11546_v25  ;;  %v8952_v25 = vcombine.low %v1931_v63, %v1955_v2 }
 0x467   : > { %8118 = vmatpush1.bf16.msra.mxu0 %v8948_v53  ;;  %8182 = vmatpush1.bf16.msra.mxu1 %v8980_v58  ;;  %v6466_v53 = vrot.slane %v6458_v42, %v11138_v16  ;;  %v6473_v58 = vrot.slane %v6459_v44, %v11138_v16  ;;  %v2364_v42 = vld [vmem:[%s10795_s10 + $0x1138] sm:$0xff] }
 0x468   : > { %8120 = vmatprep.subr.bf16.mxu0 %v8949_v60  ;;  %8184 = vmatprep.subr.bf16.mxu1 %v8981_v61  ;;  %v2172_v60 = vld [vmem:[%s10795_s10 + $0xb38] sm:$0xff] }
 0x469   : > { %5754 = vmatprep.mubr.f32.mxu0 %v10791_v1  ;;  %5825 = vmatprep.mubr.f32.mxu1 %v10791_v1  ;;  %v8986_v1 = vcombine.low %v1980_v62, %v2004_v11  ;;  %v2196_v61 = vld [vmem:[%s10795_s10 + $0xbf8] sm:$0xff]  ;;  %v6474_v11 = vcombine.low %v6466_v53, %v6473_v58  ;;  %v2459_v58 = vld [vmem:[%s10795_s10 + $0x1430] sm:$0xff] }
 0x46a   : > { %v8994_v15 = vcombine.low %v2172_v60, %v2196_v61  ;;  %v2388_v44 = vld [vmem:[%s10795_s10 + $0x11f8] sm:$0xff] }
 0x46b   : > { %8122 = vmatpush1.bf16.msra.mxu0 %v8950_v5  ;;  %8186 = vmatpush1.bf16.msra.mxu1 %v8982_v6  ;;  %v8992_v5 = vcombine.low %v2124_v45, %v2148_v46  ;;  %v8961_v6 = vcombine.high %v2171_v49, %v2195_v50  ;;  %v8968_v45 = vcombine.low %v2315_v29, %v2339_v30 }
 0x46c   : > { %8124 = vmatprep.subr.bf16.mxu0 %v8951_v7  ;;  %8188 = vmatprep.subr.bf16.mxu1 %v8983_v8  ;;  %v8993_v8 = vcombine.high %v2172_v60, %v2196_v61  ;;  %v9000_v46 = vcombine.low %v2316_v31, %v2340_v32  ;;  %v2483_v60 = vld [vmem:[%s10795_s10 + $0x14f0] sm:$0xff]  ;;  %v2460_v61 = vld [vmem:[%s10795_s10 + $0x1438] sm:$0xff] }
 0x46d   : > { %v8974_v10 = vcombine.low %v2459_v58, %v2483_v60 }
 0x46f   : > { %8126 = vmatpush1.bf16.msra.mxu0 %v8952_v25  ;;  %8190 = vmatpush1.bf16.msra.mxu1 %v8984_v12  ;;  %v2220_v25 = vld [vmem:[%s10795_s10 + $0xcb8] sm:$0xff] }
 0x470   : > { %8128 = vmatprep.subr.bf16.mxu0 %v8953_v13  ;;  %8192 = vmatprep.subr.bf16.mxu1 %v8985_v14  ;;  %v2244_v12 = vld [vmem:[%s10795_s10 + $0xd78] sm:$0xff]  ;;  %v8962_v13 = vcombine.low %v2171_v49, %v2195_v50  ;;  %v8970_v50 = vcombine.low %v2363_v40, %v2387_v41 }
 0x471   : > { %v8995_v18 = vcombine.high %v2220_v25, %v2244_v12  ;;  %v8996_v26 = vcombine.low %v2220_v25, %v2244_v12  ;;  %v2436_v49 = vld [vmem:[%s10795_s10 + $0x1378] sm:$0xff]  ;;  %v2555_v12 = vld [vmem:[%s10795_s10 + $0x1730] sm:$0xff] }
 0x473   : > { %8130 = vmatpush1.bf16.msra.mxu0 %v8954_v20  ;;  %8194 = vmatpush1.bf16.msra.mxu1 %v8986_v1  ;;  %v2291_v20 = vld [vmem:[%s10795_s10 + $0xef0] sm:$0xff] }
 0x474   : > { %8132 = vmatprep.subr.bf16.mxu0 %v8955_v21  ;;  %8196 = vmatprep.subr.bf16.mxu1 %v8987_v22  ;;  %v2268_v21 = vld [vmem:[%s10795_s10 + $0xe38] sm:$0xff]  ;;  %v8965_v27 = vcombine.high %v2267_v19, %v2291_v20 }
 0x475   : > { %v2292_v22 = vld [vmem:[%s10795_s10 + $0xef8] sm:$0xff] }
 0x476   : > { %v8997_v28 = vcombine.high %v2268_v21, %v2292_v22 }
 0x477   : > { %8134 = vmatpush1.bf16.msra.mxu0 %v8956_v34  ;;  %8198 = vmatpush1.bf16.msra.mxu1 %v8988_v35  ;;  %v8966_v34 = vcombine.low %v2267_v19, %v2291_v20  ;;  %v8998_v35 = vcombine.low %v2268_v21, %v2292_v22  ;;  %v9073_v22 = vld.sshfl [vmem:[%s11879_s0] sm:$0x33 pattern:$0x76325410] }
 0x478   : > { %8136 = vmatprep.subr.bf16.mxu0 %v8957_v23  ;;  %8200 = vmatprep.subr.bf16.mxu1 %v8989_v39  ;;  %v8967_v23 = vcombine.high %v2315_v29, %v2339_v30  ;;  %v8999_v39 = vcombine.high %v2316_v31, %v2340_v32 }
 0x479   : > { %v5188_v48 = vpop.f32.mrb[14].mxu0  ;;  %v5259_v51 = vpop.f32.mrb[14].mxu1 }
 0x47a   : > { %v5190_v52 = vpop.f32.mrb[15].mxu0  ;;  %v5261_v2 = vpop.f32.mrb[15].mxu1 }
 0x47b   : > { %v5999_v63 = vcombine.low %v5188_v48, %v5190_v52  ;;  %8138 = vmatpush1.bf16.msra.mxu0 %v8958_v33  ;;  %v6000_v4 = vcombine.low %v5259_v51, %v5261_v2  ;;  %8202 = vmatpush1.bf16.msra.mxu1 %v8990_v43  ;;  %v8969_v33 = vcombine.high %v2363_v40, %v2387_v41  ;;  %v2435_v48 = vld [vmem:[%s10795_s10 + $0x1370] sm:$0xff] }
 0x47c   : > { %8140 = vmatprep.subr.bf16.mxu0 %v8959_v47  ;;  %8204 = vmatprep.subr.bf16.mxu1 %v8991_v3  ;;  %v9001_v43 = vcombine.high %v2364_v42, %v2388_v44  ;;  %v2411_v47 = vld [vmem:[%s10795_s10 + $0x12b0] sm:$0xff]  ;;  %v2412_v3 = vld [vmem:[%s10795_s10 + $0x12b8] sm:$0xff]  ;;  %v9002_v51 = vcombine.low %v2364_v42, %v2388_v44 }
 0x47d   : > { %v6007_v7 = vrot.slane %v5999_v63, %v11138_v16  ;;  %v6014_v62 = vrot.slane %v6000_v4, %v11138_v16  ;;  %v8971_v52 = vcombine.high %v2411_v47, %v2435_v48  ;;  %v9003_v53 = vcombine.high %v2412_v3, %v2436_v49  ;;  %v2484_v63 = vld [vmem:[%s10795_s10 + $0x14f8] sm:$0xff] }
 0x47e   : > { %v8972_v2 = vcombine.low %v2411_v47, %v2435_v48  ;;  %v8973_v4 = vcombine.high %v2459_v58, %v2483_v60 }
 0x47f   : > { %8142 = vmatpush1.bf16.msra.mxu0 %v8960_v59  ;;  %v6015_v14 = vcombine.low %v6007_v7, %v6014_v62  ;;  %8206 = vmatpush1.bf16.msra.mxu1 %v8992_v5  ;;  %v9004_v59 = vcombine.low %v2412_v3, %v2436_v49  ;;  %v9005_v5 = vcombine.high %v2460_v61, %v2484_v63  ;;  %v2531_v7 = vld [vmem:[%s10795_s10 + $0x1670] sm:$0xff] }
 0x480   : > { %8144 = vmatprep.subr.bf16.mxu0 %v8961_v6  ;;  %8208 = vmatprep.subr.bf16.mxu1 %v8993_v8  ;;  %v2507_v6 = vld [vmem:[%s10795_s10 + $0x15b0] sm:$0xff]  ;;  %v2508_v8 = vld [vmem:[%s10795_s10 + $0x15b8] sm:$0xff]  ;;  %v9006_v62 = vcombine.low %v2460_v61, %v2484_v63 }
 0x481   : > { %v6562_v1 = vadd.f32 %v6474_v11, %v6015_v14  ;;  %v8975_v11 = vcombine.high %v2507_v6, %v2531_v7  ;;  %v9007_v25 = vcombine.high %v2508_v8, %v2532_v9  ;;  %v2556_v14 = vld [vmem:[%s10795_s10 + $0x1738] sm:$0xff] }
 0x483   : > { %8146 = vmatpush1.bf16.msra.mxu0 %v8962_v13  ;;  %6574 = vst [vmem:[%s11159_s29 + $0x38] sm:$0xff] %v6562_v1  ;;  %8210 = vmatpush1.bf16.msra.mxu1 %v8994_v15  ;;  %v2579_v13 = vld [vmem:[%s10795_s10 + $0x17f0] sm:$0xff]  ;;  %v2580_v15 = vld [vmem:[%s10795_s10 + $0x17f8] sm:$0xff]  ;;  %s6706_s10 = smul.u32 1536, %s9144_s15  ;;  %s9155_s15 = smov [#allocation4]  }
 0x484   : > { %8148 = vmatprep.subr.bf16.mxu0 %v8963_v17  ;;  %8212 = vmatprep.subr.bf16.mxu1 %v8995_v18  ;;  %v8976_v17 = vcombine.low %v2507_v6, %v2531_v7  ;;  %v9008_v18 = vcombine.low %v2508_v8, %v2532_v9  ;;  %v8977_v19 = vcombine.high %v2555_v12, %v2579_v13  ;;  %v6140_v9 = vld [vmem:[%s11102_s27 + $0x28] sm:$0xff] }
 0x485   : > { %v9009_v20 = vcombine.high %v2556_v14, %v2580_v15  ;;  %v8978_v1 = vcombine.low %v2555_v12, %v2579_v13  ;;  %v9010_v21 = vcombine.low %v2556_v14, %v2580_v15  ;;  %s11829_s21 = scalar_lea.hbm %s11882_s3, %s6706_s10 }
 0x487   : > { %8150 = vmatpush1.bf16.msra.mxu0 %v8964_v24  ;;  %8214 = vmatpush1.bf16.msra.mxu1 %v8996_v26  ;;  %v6139_v24 = vld [vmem:[%s11102_s27 + $0x20] sm:$0xff]  ;;  %s9078_s27 = sshll.u32 %s9155_s15, 4  ;;  %s9079_s27 = int_to_ptr.vmem [resolvable:$false] %s9078_s27 }
 0x488   : > { %8152 = vmatprep.subr.bf16.mxu0 %v8965_v27  ;;  %8216 = vmatprep.subr.bf16.mxu1 %v8997_v28  ;;  %v6278_v26 = vrot.slane %v6139_v24, %v11109_v54  ;;  %v6282_v27 = vrot.slane %v6139_v24, %v11112_v55  ;;  %v6286_v28 = vrot.slane %v6139_v24, %v11115_v56  ;;  %s9080_s28 = scalar_lea.vmem %s9079_s27, 3072  ;;  %p9081_p4 = scmp.lt.s32.totalorder %s11831_s11, %s9079_s27 }
 0x489   : > { %v6290_v29 = vrot.slane %v6139_v24, %v11118_v57  ;;  %v6294_v47 = vrot.slane %v6139_v24, %v11211_v0  ;;  %v6298_v48 = vrot.slane %v6139_v24, %v11214_v36  ;;  %v6302_v3 = vrot.slane %v6139_v24, %v11217_v37  ;;  %p9082_p6 = scmp.lt.s32.totalorder %s9080_s28, %s9074_s26 }
 0x48a   : > { %v6475_v30 = vcombine.low %v6278_v26, %v6282_v27  ;;  %v6306_v49 = vrot.slane %v6139_v24, %v11220_v38  ;;  %v6326_v24 = vrot.slane %v6140_v9, %v11211_v0  ;;  %v6330_v26 = vrot.slane %v6140_v9, %v11214_v36 }
 0x48b   : > { %8154 = vmatpush1.bf16.msra.mxu0 %v8966_v34  ;;  %8218 = vmatpush1.bf16.msra.mxu1 %v8998_v35  ;;  %v6476_v31 = vcombine.low %v6286_v28, %v6290_v29  ;;  %v6334_v27 = vrot.slane %v6140_v9, %v11217_v37  ;;  %v6338_v28 = vrot.slane %v6140_v9, %v11220_v38  ;;  %p9083_p7 = por %p9082_p6, %p9081_p4 }
 0x48c   : > { %8156 = vmatprep.subr.bf16.mxu0 %v8967_v23  ;;  %8220 = vmatprep.subr.bf16.mxu1 %v8999_v39  ;;  %v6483_v23 = vrot.slane %v6475_v30, %v11138_v16  ;;  %v6526_v29 = vcombine.low %v6326_v24, %v6330_v26 }
 0x48d   : > { %v6490_v39 = vrot.slane %v6476_v31, %v11138_v16  ;;  %v6527_v30 = vcombine.low %v6334_v27, %v6338_v28  ;;  %p9084_p8 = pnand %p9083_p7, %p9077_p3 }
 0x48f   : > { %8158 = vmatpush1.bf16.msra.mxu0 %v8968_v45  ;;  %8222 = vmatpush1.bf16.msra.mxu1 %v9000_v46  ;;  %v6491_v46 = vcombine.low %v6483_v23, %v6490_v39  ;;  %v6541_v23 = vrot.slane %v6527_v30, %v11138_v16 }
 0x490   : > { %8160 = vmatprep.subr.bf16.mxu0 %v8969_v33  ;;  %8224 = vmatprep.subr.bf16.mxu1 %v9001_v43 }
 0x493   : > { %8162 = vmatpush1.bf16.msra.mxu0 %v8970_v50  ;;  %8226 = vmatpush1.bf16.msra.mxu1 %v9002_v51  ;;  %v6492_v50 = vcombine.low %v6294_v47, %v6298_v48  ;;  %v6493_v51 = vcombine.low %v6302_v3, %v6306_v49 }
 0x494   : > { %8164 = vmatprep.subr.bf16.mxu0 %v8971_v52  ;;  %8228 = vmatprep.subr.bf16.mxu1 %v9003_v53 }
 0x495   : > { %v6500_v60 = vrot.slane %v6492_v50, %v11138_v16  ;;  %v6507_v61 = vrot.slane %v6493_v51, %v11138_v16 }
 0x497   : > { %8166 = vmatpush1.bf16.msra.mxu0 %v8972_v2  ;;  %8230 = vmatpush1.bf16.msra.mxu1 %v9004_v59  ;;  %v6508_v6 = vcombine.low %v6500_v60, %v6507_v61 }
 0x498   : > { %8168 = vmatprep.subr.bf16.mxu0 %v8973_v4  ;;  %8232 = vmatprep.subr.bf16.mxu1 %v9005_v5 }
 0x49b   : > { %8170 = vmatpush1.bf16.msra.mxu0 %v8974_v10  ;;  %8234 = vmatpush1.bf16.msra.mxu1 %v9006_v62  ;;  %v6310_v10 = vrot.slane %v6140_v9, %v11109_v54  ;;  %v6314_v62 = vrot.slane %v6140_v9, %v11112_v55 }
 0x49c   : > { %8172 = vmatprep.subr.bf16.mxu0 %v8975_v11  ;;  %8236 = vmatprep.subr.bf16.mxu1 %v9007_v25  ;;  %v6318_v11 = vrot.slane %v6140_v9, %v11115_v56  ;;  %v6322_v25 = vrot.slane %v6140_v9, %v11118_v57 }
 0x49d   : > { %v6509_v12 = vcombine.low %v6310_v10, %v6314_v62 }
 0x49e   : > { %v6510_v13 = vcombine.low %v6318_v11, %v6322_v25 }
 0x49f   : > { %8174 = vmatpush1.bf16.msra.mxu0 %v8976_v17  ;;  %8238 = vmatpush1.bf16.msra.mxu1 %v9008_v18  ;;  %v6517_v18 = vrot.slane %v6509_v12, %v11138_v16 }
 0x4a0   : > { %8176 = vmatprep.subr.bf16.mxu0 %v8977_v19  ;;  %8240 = vmatprep.subr.bf16.mxu1 %v9009_v20  ;;  %v6524_v19 = vrot.slane %v6510_v13, %v11138_v16 }
 0x4a2   : > { %v6525_v56 = vcombine.low %v6517_v18, %v6524_v19 }
 0x4a3   : > { %8178 = vmatpush1.bf16.msra.mxu0 %v8978_v1  ;;  %8242 = vmatpush1.bf16.msra.mxu1 %v9010_v21 }
 0x4a6   : > { %5755 = vmatmul.mubr.f32.vlgmr.msra.gmra.mrb[22].mxu0 %v9073_v22  ;;  %5826 = vmatmul.mubr.f32.vlgmr.msra.gmra.mrb[22].mxu1 %v9073_v22 }
 0x4b9   : > { %v5330_v32 = vpop.f32.mrb[16].mxu0  ;;  %v5401_v34 = vpop.f32.mrb[16].mxu1 }
 0x4ba   : > { %v5332_v35 = vpop.f32.mrb[17].mxu0  ;;  %v5403_v41 = vpop.f32.mrb[17].mxu1 }
 0x4bb   : > { %v6016_v40 = vcombine.low %v5330_v32, %v5332_v35  ;;  %v6017_v42 = vcombine.low %v5401_v34, %v5403_v41  ;;  %v6534_v35 = vrot.slane %v6526_v29, %v11138_v16 }
 0x4bd   : > { %v6024_v44 = vrot.slane %v6016_v40, %v11138_v16  ;;  %v6031_v45 = vrot.slane %v6017_v42, %v11138_v16  ;;  %v6542_v38 = vcombine.low %v6534_v35, %v6541_v23 }
 0x4bf   : > { %v6032_v33 = vcombine.low %v6024_v44, %v6031_v45 }
 0x4c1   : > { %v6563_v43 = vadd.f32 %v6491_v46, %v6032_v33 }
 0x4c3   : > { %6575 = vst [vmem:[%s11159_s29 + $0x40] sm:$0xff] %v6563_v43 }
 0x4f9   : > { %v5472_v52 = vpop.f32.mrb[18].mxu0  ;;  %v5543_v53 = vpop.f32.mrb[18].mxu1 }
 0x4fa   : > { %v5474_v58 = vpop.f32.mrb[19].mxu0  ;;  %v5545_v2 = vpop.f32.mrb[19].mxu1 }
 0x4fb   : > { %v6033_v63 = vcombine.low %v5472_v52, %v5474_v58  ;;  %v6034_v59 = vcombine.low %v5543_v53, %v5545_v2 }
 0x4fd   : > { %v6041_v4 = vrot.slane %v6033_v63, %v11138_v16  ;;  %v6048_v5 = vrot.slane %v6034_v59, %v11138_v16 }
 0x4ff   : > { %v6049_v7 = vcombine.low %v6041_v4, %v6048_v5 }
 0x501   : > { %v6564_v8 = vadd.f32 %v6508_v6, %v6049_v7 }
 0x503   : > { %6576 = vst [vmem:[%s11159_s29 + $0x48] sm:$0xff] %v6564_v8 }
 0x539   : > { %v5614_v14 = vpop.f32.mrb[20].mxu0  ;;  %v5685_v15 = vpop.f32.mrb[20].mxu1 }
 0x53a   : > { %v5616_v17 = vpop.f32.mrb[21].mxu0  ;;  %v5687_v1 = vpop.f32.mrb[21].mxu1 }
 0x53b   : > { %v6050_v20 = vcombine.low %v5614_v14, %v5616_v17  ;;  %v6051_v21 = vcombine.low %v5685_v15, %v5687_v1 }
 0x53d   : > { %v6058_v54 = vrot.slane %v6050_v20, %v11138_v16  ;;  %v6065_v55 = vrot.slane %v6051_v21, %v11138_v16 }
 0x53f   : > { %v6066_v22 = vcombine.low %v6058_v54, %v6065_v55 }
 0x541   : > { %v6565_v57 = vadd.f32 %v6525_v56, %v6066_v22 }
 0x543   : > { %6577 = vst [vmem:[%s11159_s29 + $0x50] sm:$0xff] %v6565_v57 }
 0x579   : > { %v5756_v31 = vpop.f32.mrb[22].mxu0  ;;  %v5827_v32 = vpop.f32.mrb[22].mxu1 }
 0x57a   : > { %v5758_v34 = vpop.f32.mrb[23].mxu0  ;;  %v5829_v36 = vpop.f32.mrb[23].mxu1 }
 0x57b   : > { %v6067_v0 = vcombine.low %v5756_v31, %v5758_v34  ;;  %v6068_v39 = vcombine.low %v5827_v32, %v5829_v36 }
 0x57d   : > { %v6075_v37 = vrot.slane %v6067_v0, %v11138_v16  ;;  %v6082_v40 = vrot.slane %v6068_v39, %v11138_v16 }
 0x57f   : > { %v6083_v41 = vcombine.low %v6075_v37, %v6082_v40 }
 0x581   : > { %v6566_v42 = vadd.f32 %v6542_v38, %v6083_v41 }
 0x583   : > { %6578 = vst [vmem:[%s11159_s29 + $0x58] sm:$0xff] %v6566_v42 }
 0x584   : > { %9087 = shalt.err (!%p9084_p8)
}
 0x585   : > { %s9088_s6 = scalar_lea.hbm %s11829_s21, 1536  ;;  %s9092_s4 = scalar_lea.hbm %s11882_s3, 3072 }
 0x586   : > { %p9089_p11 = scmp.ne.s32.totalorder %s11829_s21, %s9088_s6  ;;  %p9093_p0 = scmp.lt.u32.totalorder %s11829_s21, %s11882_s3 }
 0x587   : > { %p9094_p1 = scmp.lt.u32.totalorder %s9092_s4, %s9088_s6  ;;  %p9096_p3 = scmp.lt.u32.totalorder %s9088_s6, %s11829_s21 }
 0x588   : > { %p9090_p12 = pnand %p9089_p11, %p9215_p5 }
 0x589   : > { %p9095_p2 = por %p9094_p1, %p9093_p0 }
 0x58a   : > { %p9091_p13 = pneg %p9090_p12 }
 0x58b   : > { %p9097_p4 = por %p9096_p3, %p9095_p2 }
 0x58d   : > { %p9098_p6 = pnand %p9097_p4, %p9091_p13 }
 0x58f   : > { %9101 = shalt.err (!%p9098_p6)
}
 0x590   : > { %9014 = dma.vmem_to_hbm [thread:$0]  (%p9215_p5), %s11831_s11, 1536, %s11829_s21, %s6580_s23  }
 0x591 PF: > { %s6606_s8 = sand.u32 1, %s9132_s12   ;;  %p9017_p7 = pnand %p6698_p10, %p9226_p9 }
 0x592   : > { %s6607_s9 = scalar_lea.sflag [#allocation5], %s6606_s8 }
 0x593   : > { %9127 = dma.done.wait (!%p9017_p7), %s6607_s9, 1536  }
 0x594   : > { %9129 = vsyncadd (!%p9017_p7), %s6607_s9, 4294965760  ;;  %s16_s17 = sadd.s32 1, %s9152_s17   ;;  %s11886_s12 = smov %s9136_s13 }
 0x595   : > { %p13_p8 = scmp.ge.s32.totalorder %s16_s17, 4   ;;  %s11887_s13 = smov %s9140_s14 }
 0x596   : > { %s11888_s14 = smov %s9224_s24  ;;  %s11889_s15 = smov %s9148_s16 }
 0x597   : > { %s11890_s16 = smov %s11892_s20  ;;  %15 = sbr.rel (!%p13_p8) target bundleno = 4 (0x4), region = 109 }
 0x59e   :  { %6612 = vsyncpa [#allocation5], 1 }
 0x59f   :  { %6614 = vsyncpa [#allocation5 + $0x1], 1 }

</bundles_post_ra>
